<compile_context>
chip_gen: v5e
topology: v5e:2x2
jax: 0.10.0
libtpu: 0.0.40
codegen_flags: <defaults>
</compile_context>

<pallas_src>
import jax
import jax.numpy as jnp
from jax import lax
from jax.experimental import pallas as pl
from jax.experimental.pallas import tpu as pltpu


def _round_up(x, m):
    return (x + m - 1) // m * m


def _make_kernel(np_, pad, taps, co):
    """Builds the fused MultiConv kernel with static geometry baked in.

    np_  : number of padded-flattened spatial positions (Hp * Wp)
    pad  : zero-extension rows added on each side of the flattened axis
    taps : 9 static flattened offsets of the 3x3 stencil
    co   : output channels
    """

    def kernel(prelu_ref, x_ref, w1_ref, w2_ref, w3_ref, sb_ref, mask_ref,
               o_ref, h1_ref, h2_ref):
        a1 = prelu_ref[0]
        a2 = prelu_ref[1]
        mask = mask_ref[...]                      # (Np, 1) f32, 1.0 on real pixels

        # Extension rows are read as the zero halo of the next conv layer, so the
        # scratch slabs must start from zero every grid step.
        h1_ref[...] = jnp.zeros_like(h1_ref)
        h2_ref[...] = jnp.zeros_like(h2_ref)

        def conv3x3(load_slice, w_ref):
            acc = jnp.zeros((np_, co), jnp.float32)
            for t, d in enumerate(taps):          # static 9-tap unroll
                lhs = load_slice(pad + d).astype(jnp.bfloat16)      # (Np, Cin) bf16
                acc = acc + jnp.dot(lhs, w_ref[t],
                                    preferred_element_type=jnp.float32)
            return acc

        # ---- layer 1: conv3x3 + folded(bias, BN) + PReLU ---------------------
        y = conv3x3(lambda s: x_ref[0, s:s + np_, :], w1_ref)
        y = y * sb_ref[0] + sb_ref[1]
        y = jnp.where(y >= 0.0, y, a1 * y)
        h1_ref[pad:pad + np_, :] = y * mask       # ring zeroed = zero padding

        # ---- layer 2: conv3x3 + folded(bias, BN) + PReLU ---------------------
        y = conv3x3(lambda s: h1_ref[s:s + np_, :], w2_ref)
        y = y * sb_ref[2] + sb_ref[3]
        y = jnp.where(y >= 0.0, y, a2 * y)
        h2_ref[pad:pad + np_, :] = y * mask

        # ---- layer 3: conv1x1 + folded(bias, BN) + Softmax over channels -----
        y = jnp.dot(h2_ref[pad:pad + np_, :].astype(jnp.bfloat16), w3_ref[...],
                    preferred_element_type=jnp.float32)
        y = y * sb_ref[4] + sb_ref[5]
        y = y - jnp.max(y, axis=-1, keepdims=True)
        p = jnp.exp(y)
        inv = pl.reciprocal(jnp.sum(p, axis=-1, keepdims=True), approx=False)
        o_ref[0] = p * inv

    return kernel


def multiconv_pallas(x, params):
    B, Ci, H, W = x.shape
    Co = params["w1"].shape[0]
    Hp, Wp = H + 2, W + 2
    Np = Hp * Wp
    Pad = _round_up(Wp + 1, 8)       # halo >= Wp + 1; 8-aligned central store
    Next = Np + 2 * Pad

    # --- layout plumbing (pure data movement, done once in XLA) ---------------
    # zero-pad spatially, go channels-last, flatten spatial, add a zero halo.
    xp = jnp.pad(x, ((0, 0), (0, 0), (1, 1), (1, 1)))
    x_ext = jnp.transpose(xp, (0, 2, 3, 1)).reshape(B, Np, Ci)
    x_ext = jnp.pad(x_ext, ((0, 0), (Pad, Pad), (0, 0))).astype(jnp.bfloat16)

    # interior mask over the padded-flattened spatial axis (1 = real pixel)
    mask = jnp.pad(jnp.ones((H, W), jnp.float32), ((1, 1), (1, 1))).reshape(Np, 1)

    # 3x3 weights -> 9 taps of shape (Cin, Cout); 1x1 weight -> (Cin, Cout)
    def taps_of(w):  # (Co, Ci, 3, 3) -> (9, Ci, Co)
        return jnp.transpose(w, (2, 3, 1, 0)).reshape(9, w.shape[1], w.shape[0])

    w1_t = taps_of(params["w1"]).astype(jnp.bfloat16)
    w2_t = taps_of(params["w2"]).astype(jnp.bfloat16)
    w3_m = jnp.transpose(params["w3"][:, :, 0, 0]).astype(jnp.bfloat16)

    # fold conv bias + inference BatchNorm into a single per-channel scale/bias
    def fold(b, g, beta, mean, var, eps=1e-5):
        s = g / jnp.sqrt(var + eps)
        t = beta + s * (b - mean)
        return s.astype(jnp.float32), t.astype(jnp.float32)

    s1, t1 = fold(params["b1"], params["g1"], params["be1"], params["m1"], params["v1"])
    s2, t2 = fold(params["b2"], params["g2"], params["be2"], params["m2"], params["v2"])
    s3, t3 = fold(params["b3"], params["g3"], params["be3"], params["m3"], params["v3"])
    sb = jnp.stack([s1, t1, s2, t2, s3, t3]).reshape(6, 1, Co)

    prelu = jnp.stack([params["a1"], params["a2"]]).astype(jnp.float32)

    d_taps = tuple((ky - 1) * Wp + (kx - 1) for ky in range(3) for kx in range(3))
    kernel = _make_kernel(Np, Pad, d_taps, Co)

    out_flat = pl.pallas_call(
        kernel,
        out_shape=jax.ShapeDtypeStruct((B, Np, Co), jnp.float32),
        grid_spec=pltpu.PrefetchScalarGridSpec(
            num_scalar_prefetch=0,
            grid=(B,),
            in_specs=[
                pl.BlockSpec(memory_space=pltpu.MemorySpace.SMEM),   # prelu (2,)
                pl.BlockSpec((1, Next, Ci), lambda b: (b, 0, 0)),    # x (halo'd)
                pl.BlockSpec((9, Ci, Co), lambda b: (0, 0, 0)),      # w1 taps
                pl.BlockSpec((9, Co, Co), lambda b: (0, 0, 0)),      # w2 taps
                pl.BlockSpec((Co, Co), lambda b: (0, 0)),            # w3
                pl.BlockSpec((6, 1, Co), lambda b: (0, 0, 0)),       # folded BN
                pl.BlockSpec((Np, 1), lambda b: (0, 0)),             # mask
            ],
            out_specs=pl.BlockSpec((1, Np, Co), lambda b: (b, 0, 0)),
            scratch_shapes=[pltpu.VMEM((Next, Co), jnp.float32),
                            pltpu.VMEM((Next, Co), jnp.float32)],
        ),
        compiler_params=pltpu.CompilerParams(
            dimension_semantics=("parallel",)),
    )(prelu, x_ext, w1_t, w2_t, w3_m, sb, mask)

    out = out_flat.reshape(B, Hp, Wp, Co)[:, 1:H + 1, 1:W + 1, :]
    return jnp.transpose(out, (0, 3, 1, 2))          # back to NCHW


def multiconv_reference(x, p):
    """Pure-JAX reference (eval-mode BN) mirroring the PyTorch forward; conv
    operands are bf16 with f32 accumulation, matching the kernel's MXU math."""

    def conv(h, w, b, pad):
        y = lax.conv_general_dilated(
            h.astype(jnp.bfloat16), w.astype(jnp.bfloat16),
            window_strides=(1, 1), padding=((pad, pad), (pad, pad)),
            dimension_numbers=("NCHW", "OIHW", "NCHW"),
            preferred_element_type=jnp.float32)
        return y + b[None, :, None, None]

    def bn(y, g, beta, mean, var, eps=1e-5):
        return (y - mean[None, :, None, None]) / jnp.sqrt(var + eps)[None, :, None, None] \
            * g[None, :, None, None] + beta[None, :, None, None]

    def prelu(y, a):
        return jnp.where(y >= 0.0, y, a * y)

    h = prelu(bn(conv(x, p["w1"], p["b1"], 1), p["g1"], p["be1"], p["m1"], p["v1"]), p["a1"])
    h = prelu(bn(conv(h, p["w2"], p["b2"], 1), p["g2"], p["be2"], p["m2"], p["v2"]), p["a2"])
    h = bn(conv(h, p["w3"], p["b3"], 0), p["g3"], p["be3"], p["m3"], p["v3"])
    return jax.nn.softmax(h, axis=1)                 # Softmax2d: over channels


if __name__ == "__main__":
    B, Ci, Co, H, W = 2, 8, 16, 16, 16

    key = jax.random.PRNGKey(0)
    ks = iter(jax.random.split(key, 24))

    def nrm(shape, scale=0.1):
        return scale * jax.random.normal(next(ks), shape, jnp.float32)

    params = dict(
        w1=nrm((Co, Ci, 3, 3)), b1=nrm((Co,)),
        g1=1.0 + nrm((Co,)), be1=nrm((Co,)), m1=nrm((Co,)),
        v1=jax.random.uniform(next(ks), (Co,), jnp.float32, 0.5, 1.5),
        a1=jnp.float32(0.25),                         # PyTorch PReLU default
        w2=nrm((Co, Co, 3, 3)), b2=nrm((Co,)),
        g2=1.0 + nrm((Co,)), be2=nrm((Co,)), m2=nrm((Co,)),
        v2=jax.random.uniform(next(ks), (Co,), jnp.float32, 0.5, 1.5),
        a2=jnp.float32(0.25),
        w3=nrm((Co, Co, 1, 1)), b3=nrm((Co,)),
        g3=1.0 + nrm((Co,)), be3=nrm((Co,)), m3=nrm((Co,)),
        v3=jax.random.uniform(next(ks), (Co,), jnp.float32, 0.5, 1.5),
    )
    x = jax.random.normal(next(ks), (B, Ci, H, W), jnp.float32)

    out = jax.block_until_ready(multiconv_pallas(x, params))
    ref = multiconv_reference(x, params)

    assert out.shape == (B, Co, H, W)
    assert bool(jnp.all(jnp.isfinite(out)))
    # Softmax2d output: channel probabilities sum to 1 at every pixel.
    assert bool(jnp.allclose(jnp.sum(out, axis=1), 1.0, atol=1e-3))
    assert bool(jnp.allclose(out, ref, rtol=1e-2, atol=1e-3)), \
        float(jnp.max(jnp.abs(out - ref)))
    print("KERNEL_OK")
</pallas_src>

<mosaic_0001>
module attributes {stable_mosaic.version = 11 : i64} {
  func.func @kernel(%arg0: i32, %arg1: memref<2xf32, #tpu.memory_space<smem>>, %arg2: memref<1x372x8xbf16, #tpu.memory_space<vmem>>, %arg3: memref<9x8x16xbf16, #tpu.memory_space<vmem>>, %arg4: memref<9x16x16xbf16, #tpu.memory_space<vmem>>, %arg5: memref<16x16xbf16, #tpu.memory_space<vmem>>, %arg6: memref<6x1x16xf32, #tpu.memory_space<vmem>>, %arg7: memref<324x1xf32, #tpu.memory_space<vmem>>, %arg8: memref<1x324x16xf32, #tpu.memory_space<vmem>>, %arg9: memref<372x16xf32, #tpu.memory_space<vmem>>, %arg10: memref<372x16xf32, #tpu.memory_space<vmem>>) attributes {dimension_semantics = [#tpu.dimension_semantics<parallel>], iteration_bounds = array<i64: 2>, scalar_prefetch = 0 : i64, scratch_operands = 2 : i64, tpu.core_type = #tpu.core_type<tc>, window_params = [{transform_indices = @transform_0, window_bounds = array<i64: 2>}, {transform_indices = @transform_1, window_bounds = array<i64: 1, 372, 8>}, {pipeline_mode = #tpu.pipeline_mode<synchronous>, transform_indices = @transform_2, window_bounds = array<i64: 9, 8, 16>}, {pipeline_mode = #tpu.pipeline_mode<synchronous>, transform_indices = @transform_3, window_bounds = array<i64: 9, 16, 16>}, {pipeline_mode = #tpu.pipeline_mode<synchronous>, transform_indices = @transform_4, window_bounds = array<i64: 16, 16>}, {pipeline_mode = #tpu.pipeline_mode<synchronous>, transform_indices = @transform_5, window_bounds = array<i64: 6, 1, 16>}, {pipeline_mode = #tpu.pipeline_mode<synchronous>, transform_indices = @transform_6, window_bounds = array<i64: 324, 1>}, {transform_indices = @transform_7, window_bounds = array<i64: 1, 324, 16>}]} {
    %c0 = arith.constant 0 : index
    %0 = memref.load %arg1[%c0] : memref<2xf32, #tpu.memory_space<smem>>
    %c1 = arith.constant 1 : index
    %1 = memref.load %arg1[%c1] : memref<2xf32, #tpu.memory_space<smem>>
    %c0_0 = arith.constant 0 : index
    %c0_1 = arith.constant 0 : index
    %2 = vector.load %arg7[%c0_0, %c0_1] : memref<324x1xf32, #tpu.memory_space<vmem>>, vector<324x1xf32>
    %cst = arith.constant 0.000000e+00 : f32
    %3 = vector.broadcast %cst : f32 to vector<372x16xf32>
    %c0_2 = arith.constant 0 : index
    %c0_3 = arith.constant 0 : index
    %4 = vector.load %arg9[%c0_2, %c0_3] : memref<372x16xf32, #tpu.memory_space<vmem>>, vector<372x16xf32>
    tpu.vector_store %arg9[%c0_2, %c0_3], %3 {strides = array<i32>} : memref<372x16xf32, #tpu.memory_space<vmem>>, vector<372x16xf32>,
    %cst_4 = arith.constant 0.000000e+00 : f32
    %5 = vector.broadcast %cst_4 : f32 to vector<372x16xf32>
    %c0_5 = arith.constant 0 : index
    %c0_6 = arith.constant 0 : index
    %6 = vector.load %arg10[%c0_5, %c0_6] : memref<372x16xf32, #tpu.memory_space<vmem>>, vector<372x16xf32>
    tpu.vector_store %arg10[%c0_5, %c0_6], %5 {strides = array<i32>} : memref<372x16xf32, #tpu.memory_space<vmem>>, vector<372x16xf32>,
    %cst_7 = arith.constant 0.000000e+00 : f32
    %7 = vector.broadcast %cst_7 : f32 to vector<324x16xf32>
    %c0_8 = arith.constant 0 : index
    %c5 = arith.constant 5 : index
    %c0_9 = arith.constant 0 : index
    %8 = vector.load %arg2[%c0_8, %c5, %c0_9] : memref<1x372x8xbf16, #tpu.memory_space<vmem>>, vector<1x324x8xbf16>
    %9 = vector.shape_cast %8 : vector<1x324x8xbf16> to vector<324x8xbf16>
    %c0_10 = arith.constant 0 : index
    %c0_11 = arith.constant 0 : index
    %c0_12 = arith.constant 0 : index
    %10 = vector.load %arg3[%c0_10, %c0_11, %c0_12] : memref<9x8x16xbf16, #tpu.memory_space<vmem>>, vector<1x8x16xbf16>
    %11 = vector.shape_cast %10 : vector<1x8x16xbf16> to vector<8x16xbf16>
    %cst_13 = arith.constant dense<0.000000e+00> : vector<324x16xf32>
    %12 = tpu.matmul %9, %11, %cst_13 {dimension_numbers = #tpu.dot_dimension_numbers<[1], [0], [0], [1], [0, 0, 1, 1], [], []>} : vector<324x8xbf16>, vector<8x16xbf16>, vector<324x16xf32> -> vector<324x16xf32>
    %13 = arith.addf %7, %12 : vector<324x16xf32>
    %c0_14 = arith.constant 0 : index
    %c6 = arith.constant 6 : index
    %c0_15 = arith.constant 0 : index
    %14 = vector.load %arg2[%c0_14, %c6, %c0_15] : memref<1x372x8xbf16, #tpu.memory_space<vmem>>, vector<1x324x8xbf16>
    %15 = vector.shape_cast %14 : vector<1x324x8xbf16> to vector<324x8xbf16>
    %c1_16 = arith.constant 1 : index
    %c0_17 = arith.constant 0 : index
    %c0_18 = arith.constant 0 : index
    %16 = vector.load %arg3[%c1_16, %c0_17, %c0_18] : memref<9x8x16xbf16, #tpu.memory_space<vmem>>, vector<1x8x16xbf16>
    %17 = vector.shape_cast %16 : vector<1x8x16xbf16> to vector<8x16xbf16>
    %cst_19 = arith.constant dense<0.000000e+00> : vector<324x16xf32>
    %18 = tpu.matmul %15, %17, %cst_19 {dimension_numbers = #tpu.dot_dimension_numbers<[1], [0], [0], [1], [0, 0, 1, 1], [], []>} : vector<324x8xbf16>, vector<8x16xbf16>, vector<324x16xf32> -> vector<324x16xf32>
    %19 = arith.addf %13, %18 : vector<324x16xf32>
    %c0_20 = arith.constant 0 : index
    %c7 = arith.constant 7 : index
    %c0_21 = arith.constant 0 : index
    %20 = vector.load %arg2[%c0_20, %c7, %c0_21] : memref<1x372x8xbf16, #tpu.memory_space<vmem>>, vector<1x324x8xbf16>
    %21 = vector.shape_cast %20 : vector<1x324x8xbf16> to vector<324x8xbf16>
    %c2 = arith.constant 2 : index
    %c0_22 = arith.constant 0 : index
    %c0_23 = arith.constant 0 : index
    %22 = vector.load %arg3[%c2, %c0_22, %c0_23] : memref<9x8x16xbf16, #tpu.memory_space<vmem>>, vector<1x8x16xbf16>
    %23 = vector.shape_cast %22 : vector<1x8x16xbf16> to vector<8x16xbf16>
    %cst_24 = arith.constant dense<0.000000e+00> : vector<324x16xf32>
    %24 = tpu.matmul %21, %23, %cst_24 {dimension_numbers = #tpu.dot_dimension_numbers<[1], [0], [0], [1], [0, 0, 1, 1], [], []>} : vector<324x8xbf16>, vector<8x16xbf16>, vector<324x16xf32> -> vector<324x16xf32>
    %25 = arith.addf %19, %24 : vector<324x16xf32>
    %c0_25 = arith.constant 0 : index
    %c23 = arith.constant 23 : index
    %c0_26 = arith.constant 0 : index
    %26 = vector.load %arg2[%c0_25, %c23, %c0_26] : memref<1x372x8xbf16, #tpu.memory_space<vmem>>, vector<1x324x8xbf16>
    %27 = vector.shape_cast %26 : vector<1x324x8xbf16> to vector<324x8xbf16>
    %c3 = arith.constant 3 : index
    %c0_27 = arith.constant 0 : index
    %c0_28 = arith.constant 0 : index
    %28 = vector.load %arg3[%c3, %c0_27, %c0_28] : memref<9x8x16xbf16, #tpu.memory_space<vmem>>, vector<1x8x16xbf16>
    %29 = vector.shape_cast %28 : vector<1x8x16xbf16> to vector<8x16xbf16>
    %cst_29 = arith.constant dense<0.000000e+00> : vector<324x16xf32>
    %30 = tpu.matmul %27, %29, %cst_29 {dimension_numbers = #tpu.dot_dimension_numbers<[1], [0], [0], [1], [0, 0, 1, 1], [], []>} : vector<324x8xbf16>, vector<8x16xbf16>, vector<324x16xf32> -> vector<324x16xf32>
    %31 = arith.addf %25, %30 : vector<324x16xf32>
    %c0_30 = arith.constant 0 : index
    %c24 = arith.constant 24 : index
    %c0_31 = arith.constant 0 : index
    %32 = vector.load %arg2[%c0_30, %c24, %c0_31] : memref<1x372x8xbf16, #tpu.memory_space<vmem>>, vector<1x324x8xbf16>
    %33 = vector.shape_cast %32 : vector<1x324x8xbf16> to vector<324x8xbf16>
    %c4 = arith.constant 4 : index
    %c0_32 = arith.constant 0 : index
    %c0_33 = arith.constant 0 : index
    %34 = vector.load %arg3[%c4, %c0_32, %c0_33] : memref<9x8x16xbf16, #tpu.memory_space<vmem>>, vector<1x8x16xbf16>
    %35 = vector.shape_cast %34 : vector<1x8x16xbf16> to vector<8x16xbf16>
    %cst_34 = arith.constant dense<0.000000e+00> : vector<324x16xf32>
    %36 = tpu.matmul %33, %35, %cst_34 {dimension_numbers = #tpu.dot_dimension_numbers<[1], [0], [0], [1], [0, 0, 1, 1], [], []>} : vector<324x8xbf16>, vector<8x16xbf16>, vector<324x16xf32> -> vector<324x16xf32>
    %37 = arith.addf %31, %36 : vector<324x16xf32>
    %c0_35 = arith.constant 0 : index
    %c25 = arith.constant 25 : index
    %c0_36 = arith.constant 0 : index
    %38 = vector.load %arg2[%c0_35, %c25, %c0_36] : memref<1x372x8xbf16, #tpu.memory_space<vmem>>, vector<1x324x8xbf16>
    %39 = vector.shape_cast %38 : vector<1x324x8xbf16> to vector<324x8xbf16>
    %c5_37 = arith.constant 5 : index
    %c0_38 = arith.constant 0 : index
    %c0_39 = arith.constant 0 : index
    %40 = vector.load %arg3[%c5_37, %c0_38, %c0_39] : memref<9x8x16xbf16, #tpu.memory_space<vmem>>, vector<1x8x16xbf16>
    %41 = vector.shape_cast %40 : vector<1x8x16xbf16> to vector<8x16xbf16>
    %cst_40 = arith.constant dense<0.000000e+00> : vector<324x16xf32>
    %42 = tpu.matmul %39, %41, %cst_40 {dimension_numbers = #tpu.dot_dimension_numbers<[1], [0], [0], [1], [0, 0, 1, 1], [], []>} : vector<324x8xbf16>, vector<8x16xbf16>, vector<324x16xf32> -> vector<324x16xf32>
    %43 = arith.addf %37, %42 : vector<324x16xf32>
    %c0_41 = arith.constant 0 : index
    %c41 = arith.constant 41 : index
    %c0_42 = arith.constant 0 : index
    %44 = vector.load %arg2[%c0_41, %c41, %c0_42] : memref<1x372x8xbf16, #tpu.memory_space<vmem>>, vector<1x324x8xbf16>
    %45 = vector.shape_cast %44 : vector<1x324x8xbf16> to vector<324x8xbf16>
    %c6_43 = arith.constant 6 : index
    %c0_44 = arith.constant 0 : index
    %c0_45 = arith.constant 0 : index
    %46 = vector.load %arg3[%c6_43, %c0_44, %c0_45] : memref<9x8x16xbf16, #tpu.memory_space<vmem>>, vector<1x8x16xbf16>
    %47 = vector.shape_cast %46 : vector<1x8x16xbf16> to vector<8x16xbf16>
    %cst_46 = arith.constant dense<0.000000e+00> : vector<324x16xf32>
    %48 = tpu.matmul %45, %47, %cst_46 {dimension_numbers = #tpu.dot_dimension_numbers<[1], [0], [0], [1], [0, 0, 1, 1], [], []>} : vector<324x8xbf16>, vector<8x16xbf16>, vector<324x16xf32> -> vector<324x16xf32>
    %49 = arith.addf %43, %48 : vector<324x16xf32>
    %c0_47 = arith.constant 0 : index
    %c42 = arith.constant 42 : index
    %c0_48 = arith.constant 0 : index
    %50 = vector.load %arg2[%c0_47, %c42, %c0_48] : memref<1x372x8xbf16, #tpu.memory_space<vmem>>, vector<1x324x8xbf16>
    %51 = vector.shape_cast %50 : vector<1x324x8xbf16> to vector<324x8xbf16>
    %c7_49 = arith.constant 7 : index
    %c0_50 = arith.constant 0 : index
    %c0_51 = arith.constant 0 : index
    %52 = vector.load %arg3[%c7_49, %c0_50, %c0_51] : memref<9x8x16xbf16, #tpu.memory_space<vmem>>, vector<1x8x16xbf16>
    %53 = vector.shape_cast %52 : vector<1x8x16xbf16> to vector<8x16xbf16>
    %cst_52 = arith.constant dense<0.000000e+00> : vector<324x16xf32>
    %54 = tpu.matmul %51, %53, %cst_52 {dimension_numbers = #tpu.dot_dimension_numbers<[1], [0], [0], [1], [0, 0, 1, 1], [], []>} : vector<324x8xbf16>, vector<8x16xbf16>, vector<324x16xf32> -> vector<324x16xf32>
    %55 = arith.addf %49, %54 : vector<324x16xf32>
    %c0_53 = arith.constant 0 : index
    %c43 = arith.constant 43 : index
    %c0_54 = arith.constant 0 : index
    %56 = vector.load %arg2[%c0_53, %c43, %c0_54] : memref<1x372x8xbf16, #tpu.memory_space<vmem>>, vector<1x324x8xbf16>
    %57 = vector.shape_cast %56 : vector<1x324x8xbf16> to vector<324x8xbf16>
    %c8 = arith.constant 8 : index
    %c0_55 = arith.constant 0 : index
    %c0_56 = arith.constant 0 : index
    %58 = vector.load %arg3[%c8, %c0_55, %c0_56] : memref<9x8x16xbf16, #tpu.memory_space<vmem>>, vector<1x8x16xbf16>
    %59 = vector.shape_cast %58 : vector<1x8x16xbf16> to vector<8x16xbf16>
    %cst_57 = arith.constant dense<0.000000e+00> : vector<324x16xf32>
    %60 = tpu.matmul %57, %59, %cst_57 {dimension_numbers = #tpu.dot_dimension_numbers<[1], [0], [0], [1], [0, 0, 1, 1], [], []>} : vector<324x8xbf16>, vector<8x16xbf16>, vector<324x16xf32> -> vector<324x16xf32>
    %61 = arith.addf %55, %60 : vector<324x16xf32>
    %c0_58 = arith.constant 0 : index
    %c0_59 = arith.constant 0 : index
    %c0_60 = arith.constant 0 : index
    %62 = vector.load %arg6[%c0_58, %c0_59, %c0_60] : memref<6x1x16xf32, #tpu.memory_space<vmem>>, vector<1x1x16xf32>
    %63 = vector.shape_cast %62 : vector<1x1x16xf32> to vector<1x16xf32>
    %64 = vector.broadcast %63 : vector<1x16xf32> to vector<324x16xf32>
    %65 = arith.mulf %61, %64 : vector<324x16xf32>
    %c1_61 = arith.constant 1 : index
    %c0_62 = arith.constant 0 : index
    %c0_63 = arith.constant 0 : index
    %66 = vector.load %arg6[%c1_61, %c0_62, %c0_63] : memref<6x1x16xf32, #tpu.memory_space<vmem>>, vector<1x1x16xf32>
    %67 = vector.shape_cast %66 : vector<1x1x16xf32> to vector<1x16xf32>
    %68 = vector.broadcast %67 : vector<1x16xf32> to vector<324x16xf32>
    %69 = arith.addf %65, %68 : vector<324x16xf32>
    %cst_64 = arith.constant 0.000000e+00 : f32
    %70 = vector.broadcast %cst_64 : f32 to vector<324x16xf32>
    %71 = arith.cmpf oge, %69, %70 : vector<324x16xf32>
    %72 = vector.broadcast %0 : f32 to vector<324x16xf32>
    %73 = arith.mulf %72, %69 : vector<324x16xf32>
    %74 = arith.select %71, %69, %73 : vector<324x16xi1>, vector<324x16xf32>
    %75 = vector.broadcast %2 : vector<324x1xf32> to vector<324x16xf32>
    %76 = arith.mulf %74, %75 : vector<324x16xf32>
    %c24_65 = arith.constant 24 : index
    %c0_66 = arith.constant 0 : index
    %77 = vector.load %arg9[%c24_65, %c0_66] : memref<372x16xf32, #tpu.memory_space<vmem>>, vector<324x16xf32>
    tpu.vector_store %arg9[%c24_65, %c0_66], %76 {strides = array<i32>} : memref<372x16xf32, #tpu.memory_space<vmem>>, vector<324x16xf32>,
    %cst_67 = arith.constant 0.000000e+00 : f32
    %78 = vector.broadcast %cst_67 : f32 to vector<324x16xf32>
    %c5_68 = arith.constant 5 : index
    %c0_69 = arith.constant 0 : index
    %79 = vector.load %arg9[%c5_68, %c0_69] : memref<372x16xf32, #tpu.memory_space<vmem>>, vector<324x16xf32>
    %80 = arith.truncf %79 : vector<324x16xf32> to vector<324x16xbf16>
    %c0_70 = arith.constant 0 : index
    %c0_71 = arith.constant 0 : index
    %c0_72 = arith.constant 0 : index
    %81 = vector.load %arg4[%c0_70, %c0_71, %c0_72] : memref<9x16x16xbf16, #tpu.memory_space<vmem>>, vector<1x16x16xbf16>
    %82 = vector.shape_cast %81 : vector<1x16x16xbf16> to vector<16x16xbf16>
    %cst_73 = arith.constant dense<0.000000e+00> : vector<324x16xf32>
    %83 = tpu.matmul %80, %82, %cst_73 {dimension_numbers = #tpu.dot_dimension_numbers<[1], [0], [0], [1], [0, 0, 1, 1], [], []>} : vector<324x16xbf16>, vector<16x16xbf16>, vector<324x16xf32> -> vector<324x16xf32>
    %84 = arith.addf %78, %83 : vector<324x16xf32>
    %c6_74 = arith.constant 6 : index
    %c0_75 = arith.constant 0 : index
    %85 = vector.load %arg9[%c6_74, %c0_75] : memref<372x16xf32, #tpu.memory_space<vmem>>, vector<324x16xf32>
    %86 = arith.truncf %85 : vector<324x16xf32> to vector<324x16xbf16>
    %c1_76 = arith.constant 1 : index
    %c0_77 = arith.constant 0 : index
    %c0_78 = arith.constant 0 : index
    %87 = vector.load %arg4[%c1_76, %c0_77, %c0_78] : memref<9x16x16xbf16, #tpu.memory_space<vmem>>, vector<1x16x16xbf16>
    %88 = vector.shape_cast %87 : vector<1x16x16xbf16> to vector<16x16xbf16>
    %cst_79 = arith.constant dense<0.000000e+00> : vector<324x16xf32>
    %89 = tpu.matmul %86, %88, %cst_79 {dimension_numbers = #tpu.dot_dimension_numbers<[1], [0], [0], [1], [0, 0, 1, 1], [], []>} : vector<324x16xbf16>, vector<16x16xbf16>, vector<324x16xf32> -> vector<324x16xf32>
    %90 = arith.addf %84, %89 : vector<324x16xf32>
    %c7_80 = arith.constant 7 : index
    %c0_81 = arith.constant 0 : index
    %91 = vector.load %arg9[%c7_80, %c0_81] : memref<372x16xf32, #tpu.memory_space<vmem>>, vector<324x16xf32>
    %92 = arith.truncf %91 : vector<324x16xf32> to vector<324x16xbf16>
    %c2_82 = arith.constant 2 : index
    %c0_83 = arith.constant 0 : index
    %c0_84 = arith.constant 0 : index
    %93 = vector.load %arg4[%c2_82, %c0_83, %c0_84] : memref<9x16x16xbf16, #tpu.memory_space<vmem>>, vector<1x16x16xbf16>
    %94 = vector.shape_cast %93 : vector<1x16x16xbf16> to vector<16x16xbf16>
    %cst_85 = arith.constant dense<0.000000e+00> : vector<324x16xf32>
    %95 = tpu.matmul %92, %94, %cst_85 {dimension_numbers = #tpu.dot_dimension_numbers<[1], [0], [0], [1], [0, 0, 1, 1], [], []>} : vector<324x16xbf16>, vector<16x16xbf16>, vector<324x16xf32> -> vector<324x16xf32>
    %96 = arith.addf %90, %95 : vector<324x16xf32>
    %c23_86 = arith.constant 23 : index
    %c0_87 = arith.constant 0 : index
    %97 = vector.load %arg9[%c23_86, %c0_87] : memref<372x16xf32, #tpu.memory_space<vmem>>, vector<324x16xf32>
    %98 = arith.truncf %97 : vector<324x16xf32> to vector<324x16xbf16>
    %c3_88 = arith.constant 3 : index
    %c0_89 = arith.constant 0 : index
    %c0_90 = arith.constant 0 : index
    %99 = vector.load %arg4[%c3_88, %c0_89, %c0_90] : memref<9x16x16xbf16, #tpu.memory_space<vmem>>, vector<1x16x16xbf16>
    %100 = vector.shape_cast %99 : vector<1x16x16xbf16> to vector<16x16xbf16>
    %cst_91 = arith.constant dense<0.000000e+00> : vector<324x16xf32>
    %101 = tpu.matmul %98, %100, %cst_91 {dimension_numbers = #tpu.dot_dimension_numbers<[1], [0], [0], [1], [0, 0, 1, 1], [], []>} : vector<324x16xbf16>, vector<16x16xbf16>, vector<324x16xf32> -> vector<324x16xf32>
    %102 = arith.addf %96, %101 : vector<324x16xf32>
    %c24_92 = arith.constant 24 : index
    %c0_93 = arith.constant 0 : index
    %103 = vector.load %arg9[%c24_92, %c0_93] : memref<372x16xf32, #tpu.memory_space<vmem>>, vector<324x16xf32>
    %104 = arith.truncf %103 : vector<324x16xf32> to vector<324x16xbf16>
    %c4_94 = arith.constant 4 : index
    %c0_95 = arith.constant 0 : index
    %c0_96 = arith.constant 0 : index
    %105 = vector.load %arg4[%c4_94, %c0_95, %c0_96] : memref<9x16x16xbf16, #tpu.memory_space<vmem>>, vector<1x16x16xbf16>
    %106 = vector.shape_cast %105 : vector<1x16x16xbf16> to vector<16x16xbf16>
    %cst_97 = arith.constant dense<0.000000e+00> : vector<324x16xf32>
    %107 = tpu.matmul %104, %106, %cst_97 {dimension_numbers = #tpu.dot_dimension_numbers<[1], [0], [0], [1], [0, 0, 1, 1], [], []>} : vector<324x16xbf16>, vector<16x16xbf16>, vector<324x16xf32> -> vector<324x16xf32>
    %108 = arith.addf %102, %107 : vector<324x16xf32>
    %c25_98 = arith.constant 25 : index
    %c0_99 = arith.constant 0 : index
    %109 = vector.load %arg9[%c25_98, %c0_99] : memref<372x16xf32, #tpu.memory_space<vmem>>, vector<324x16xf32>
    %110 = arith.truncf %109 : vector<324x16xf32> to vector<324x16xbf16>
    %c5_100 = arith.constant 5 : index
    %c0_101 = arith.constant 0 : index
    %c0_102 = arith.constant 0 : index
    %111 = vector.load %arg4[%c5_100, %c0_101, %c0_102] : memref<9x16x16xbf16, #tpu.memory_space<vmem>>, vector<1x16x16xbf16>
    %112 = vector.shape_cast %111 : vector<1x16x16xbf16> to vector<16x16xbf16>
    %cst_103 = arith.constant dense<0.000000e+00> : vector<324x16xf32>
    %113 = tpu.matmul %110, %112, %cst_103 {dimension_numbers = #tpu.dot_dimension_numbers<[1], [0], [0], [1], [0, 0, 1, 1], [], []>} : vector<324x16xbf16>, vector<16x16xbf16>, vector<324x16xf32> -> vector<324x16xf32>
    %114 = arith.addf %108, %113 : vector<324x16xf32>
    %c41_104 = arith.constant 41 : index
    %c0_105 = arith.constant 0 : index
    %115 = vector.load %arg9[%c41_104, %c0_105] : memref<372x16xf32, #tpu.memory_space<vmem>>, vector<324x16xf32>
    %116 = arith.truncf %115 : vector<324x16xf32> to vector<324x16xbf16>
    %c6_106 = arith.constant 6 : index
    %c0_107 = arith.constant 0 : index
    %c0_108 = arith.constant 0 : index
    %117 = vector.load %arg4[%c6_106, %c0_107, %c0_108] : memref<9x16x16xbf16, #tpu.memory_space<vmem>>, vector<1x16x16xbf16>
    %118 = vector.shape_cast %117 : vector<1x16x16xbf16> to vector<16x16xbf16>
    %cst_109 = arith.constant dense<0.000000e+00> : vector<324x16xf32>
    %119 = tpu.matmul %116, %118, %cst_109 {dimension_numbers = #tpu.dot_dimension_numbers<[1], [0], [0], [1], [0, 0, 1, 1], [], []>} : vector<324x16xbf16>, vector<16x16xbf16>, vector<324x16xf32> -> vector<324x16xf32>
    %120 = arith.addf %114, %119 : vector<324x16xf32>
    %c42_110 = arith.constant 42 : index
    %c0_111 = arith.constant 0 : index
    %121 = vector.load %arg9[%c42_110, %c0_111] : memref<372x16xf32, #tpu.memory_space<vmem>>, vector<324x16xf32>
    %122 = arith.truncf %121 : vector<324x16xf32> to vector<324x16xbf16>
    %c7_112 = arith.constant 7 : index
    %c0_113 = arith.constant 0 : index
    %c0_114 = arith.constant 0 : index
    %123 = vector.load %arg4[%c7_112, %c0_113, %c0_114] : memref<9x16x16xbf16, #tpu.memory_space<vmem>>, vector<1x16x16xbf16>
    %124 = vector.shape_cast %123 : vector<1x16x16xbf16> to vector<16x16xbf16>
    %cst_115 = arith.constant dense<0.000000e+00> : vector<324x16xf32>
    %125 = tpu.matmul %122, %124, %cst_115 {dimension_numbers = #tpu.dot_dimension_numbers<[1], [0], [0], [1], [0, 0, 1, 1], [], []>} : vector<324x16xbf16>, vector<16x16xbf16>, vector<324x16xf32> -> vector<324x16xf32>
    %126 = arith.addf %120, %125 : vector<324x16xf32>
    %c43_116 = arith.constant 43 : index
    %c0_117 = arith.constant 0 : index
    %127 = vector.load %arg9[%c43_116, %c0_117] : memref<372x16xf32, #tpu.memory_space<vmem>>, vector<324x16xf32>
    %128 = arith.truncf %127 : vector<324x16xf32> to vector<324x16xbf16>
    %c8_118 = arith.constant 8 : index
    %c0_119 = arith.constant 0 : index
    %c0_120 = arith.constant 0 : index
    %129 = vector.load %arg4[%c8_118, %c0_119, %c0_120] : memref<9x16x16xbf16, #tpu.memory_space<vmem>>, vector<1x16x16xbf16>
    %130 = vector.shape_cast %129 : vector<1x16x16xbf16> to vector<16x16xbf16>
    %cst_121 = arith.constant dense<0.000000e+00> : vector<324x16xf32>
    %131 = tpu.matmul %128, %130, %cst_121 {dimension_numbers = #tpu.dot_dimension_numbers<[1], [0], [0], [1], [0, 0, 1, 1], [], []>} : vector<324x16xbf16>, vector<16x16xbf16>, vector<324x16xf32> -> vector<324x16xf32>
    %132 = arith.addf %126, %131 : vector<324x16xf32>
    %c2_122 = arith.constant 2 : index
    %c0_123 = arith.constant 0 : index
    %c0_124 = arith.constant 0 : index
    %133 = vector.load %arg6[%c2_122, %c0_123, %c0_124] : memref<6x1x16xf32, #tpu.memory_space<vmem>>, vector<1x1x16xf32>
    %134 = vector.shape_cast %133 : vector<1x1x16xf32> to vector<1x16xf32>
    %135 = vector.broadcast %134 : vector<1x16xf32> to vector<324x16xf32>
    %136 = arith.mulf %132, %135 : vector<324x16xf32>
    %c3_125 = arith.constant 3 : index
    %c0_126 = arith.constant 0 : index
    %c0_127 = arith.constant 0 : index
    %137 = vector.load %arg6[%c3_125, %c0_126, %c0_127] : memref<6x1x16xf32, #tpu.memory_space<vmem>>, vector<1x1x16xf32>
    %138 = vector.shape_cast %137 : vector<1x1x16xf32> to vector<1x16xf32>
    %139 = vector.broadcast %138 : vector<1x16xf32> to vector<324x16xf32>
    %140 = arith.addf %136, %139 : vector<324x16xf32>
    %cst_128 = arith.constant 0.000000e+00 : f32
    %141 = vector.broadcast %cst_128 : f32 to vector<324x16xf32>
    %142 = arith.cmpf oge, %140, %141 : vector<324x16xf32>
    %143 = vector.broadcast %1 : f32 to vector<324x16xf32>
    %144 = arith.mulf %143, %140 : vector<324x16xf32>
    %145 = arith.select %142, %140, %144 : vector<324x16xi1>, vector<324x16xf32>
    %146 = vector.broadcast %2 : vector<324x1xf32> to vector<324x16xf32>
    %147 = arith.mulf %145, %146 : vector<324x16xf32>
    %c24_129 = arith.constant 24 : index
    %c0_130 = arith.constant 0 : index
    %148 = vector.load %arg10[%c24_129, %c0_130] : memref<372x16xf32, #tpu.memory_space<vmem>>, vector<324x16xf32>
    tpu.vector_store %arg10[%c24_129, %c0_130], %147 {strides = array<i32>} : memref<372x16xf32, #tpu.memory_space<vmem>>, vector<324x16xf32>,
    %c24_131 = arith.constant 24 : index
    %c0_132 = arith.constant 0 : index
    %149 = vector.load %arg10[%c24_131, %c0_132] : memref<372x16xf32, #tpu.memory_space<vmem>>, vector<324x16xf32>
    %150 = arith.truncf %149 : vector<324x16xf32> to vector<324x16xbf16>
    %c0_133 = arith.constant 0 : index
    %c0_134 = arith.constant 0 : index
    %151 = vector.load %arg5[%c0_133, %c0_134] : memref<16x16xbf16, #tpu.memory_space<vmem>>, vector<16x16xbf16>
    %cst_135 = arith.constant dense<0.000000e+00> : vector<324x16xf32>
    %152 = tpu.matmul %150, %151, %cst_135 {dimension_numbers = #tpu.dot_dimension_numbers<[1], [0], [0], [1], [0, 0, 1, 1], [], []>} : vector<324x16xbf16>, vector<16x16xbf16>, vector<324x16xf32> -> vector<324x16xf32>
    %c4_136 = arith.constant 4 : index
    %c0_137 = arith.constant 0 : index
    %c0_138 = arith.constant 0 : index
    %153 = vector.load %arg6[%c4_136, %c0_137, %c0_138] : memref<6x1x16xf32, #tpu.memory_space<vmem>>, vector<1x1x16xf32>
    %154 = vector.shape_cast %153 : vector<1x1x16xf32> to vector<1x16xf32>
    %155 = vector.broadcast %154 : vector<1x16xf32> to vector<324x16xf32>
    %156 = arith.mulf %152, %155 : vector<324x16xf32>
    %c5_139 = arith.constant 5 : index
    %c0_140 = arith.constant 0 : index
    %c0_141 = arith.constant 0 : index
    %157 = vector.load %arg6[%c5_139, %c0_140, %c0_141] : memref<6x1x16xf32, #tpu.memory_space<vmem>>, vector<1x1x16xf32>
    %158 = vector.shape_cast %157 : vector<1x1x16xf32> to vector<1x16xf32>
    %159 = vector.broadcast %158 : vector<1x16xf32> to vector<324x16xf32>
    %160 = arith.addf %156, %159 : vector<324x16xf32>
    %cst_142 = arith.constant dense<0xFF800000> : vector<324xf32>
    %161 = vector.multi_reduction <maximumf>, %160, %cst_142 [1] : vector<324x16xf32> to vector<324xf32>
    %162 = vector.shape_cast %161 : vector<324xf32> to vector<324x1xf32>
    %163 = vector.broadcast %162 : vector<324x1xf32> to vector<324x16xf32>
    %164 = arith.subf %160, %163 : vector<324x16xf32>
    %165 = math.exp %164 : vector<324x16xf32>
    %cst_143 = arith.constant dense<0.000000e+00> : vector<324xf32>
    %166 = vector.multi_reduction <add>, %165, %cst_143 [1] : vector<324x16xf32> to vector<324xf32>
    %167 = vector.shape_cast %166 : vector<324xf32> to vector<324x1xf32>
    %168 = tpu.reciprocal %167 : vector<324x1xf32> -> vector<324x1xf32>
    %169 = vector.broadcast %168 : vector<324x1xf32> to vector<324x16xf32>
    %170 = arith.mulf %165, %169 : vector<324x16xf32>
    %c0_144 = arith.constant 0 : index
    %c0_145 = arith.constant 0 : index
    %c0_146 = arith.constant 0 : index
    %171 = vector.load %arg8[%c0_144, %c0_145, %c0_146] : memref<1x324x16xf32, #tpu.memory_space<vmem>>, vector<1x324x16xf32>
    %172 = vector.shape_cast %171 : vector<1x324x16xf32> to vector<324x16xf32>
    %173 = vector.shape_cast %170 : vector<324x16xf32> to vector<1x324x16xf32>
    tpu.vector_store %arg8[%c0_144, %c0_145, %c0_146], %173 {strides = array<i32>} : memref<1x324x16xf32, #tpu.memory_space<vmem>>, vector<1x324x16xf32>,
    return
  }
  func.func @transform_0(%arg0: i32) -> i32 {
    %c0_i32 = arith.constant 0 : i32
    %c0_i32_0 = arith.constant 0 : i32
    return %c0_i32 : i32
  }
  func.func @transform_1(%arg0: i32) -> (i32, i32, i32) {
    %c0_i32 = arith.constant 0 : i32
    %c0_i32_0 = arith.constant 0 : i32
    %c0_i32_1 = arith.constant 0 : i32
    return %arg0, %c0_i32, %c0_i32_0 : i32, i32, i32
  }
  func.func @transform_2(%arg0: i32) -> (i32, i32, i32) {
    %c0_i32 = arith.constant 0 : i32
    %c0_i32_0 = arith.constant 0 : i32
    %c0_i32_1 = arith.constant 0 : i32
    %c0_i32_2 = arith.constant 0 : i32
    return %c0_i32, %c0_i32_0, %c0_i32_1 : i32, i32, i32
  }
  func.func @transform_3(%arg0: i32) -> (i32, i32, i32) {
    %c0_i32 = arith.constant 0 : i32
    %c0_i32_0 = arith.constant 0 : i32
    %c0_i32_1 = arith.constant 0 : i32
    %c0_i32_2 = arith.constant 0 : i32
    return %c0_i32, %c0_i32_0, %c0_i32_1 : i32, i32, i32
  }
  func.func @transform_4(%arg0: i32) -> (i32, i32) {
    %c0_i32 = arith.constant 0 : i32
    %c0_i32_0 = arith.constant 0 : i32
    %c0_i32_1 = arith.constant 0 : i32
    return %c0_i32, %c0_i32_0 : i32, i32
  }
  func.func @transform_5(%arg0: i32) -> (i32, i32, i32) {
    %c0_i32 = arith.constant 0 : i32
    %c0_i32_0 = arith.constant 0 : i32
    %c0_i32_1 = arith.constant 0 : i32
    %c0_i32_2 = arith.constant 0 : i32
    return %c0_i32, %c0_i32_0, %c0_i32_1 : i32, i32, i32
  }
  func.func @transform_6(%arg0: i32) -> (i32, i32) {
    %c0_i32 = arith.constant 0 : i32
    %c0_i32_0 = arith.constant 0 : i32
    %c0_i32_1 = arith.constant 0 : i32
    return %c0_i32, %c0_i32_0 : i32, i32
  }
  func.func @transform_7(%arg0: i32) -> (i32, i32, i32) {
    %c0_i32 = arith.constant 0 : i32
    %c0_i32_0 = arith.constant 0 : i32
    %c0_i32_1 = arith.constant 0 : i32
    return %arg0, %c0_i32, %c0_i32_0 : i32, i32, i32
  }
}

</mosaic_0001>

<bundles_post_ra>
// kernel: tpu_custom_call.1
= control target key start
LH: loop header
LB: loop body
LE: loop exit
PB: predicated region body
PF: predicated region fallthrough
CT: control target
= control target key end

     0   :  { %12 = vsyncpa [#allocation5], 0  ;;  %s9730_s24 = smov 0   ;;  %s13380_s0 = inlined_call_operand.vmem [shape: f32[2], index: 0, kind: input, shape index: {}]   ;;  %s13381_s1 = inlined_call_operand.vmem [shape: bf16[2,372,8], index: 1, kind: input, shape index: {}]   ;;  %s13382_s2 = inlined_call_operand.vmem [shape: bf16[9,8,16], index: 2, kind: input, shape index: {}]   ;;  %s13383_s3 = inlined_call_operand.vmem [shape: bf16[9,16,16], index: 3, kind: input, shape index: {}]   ;;  %s13384_s4 = inlined_call_operand.vmem [shape: bf16[16,16], index: 4, kind: input, shape index: {}]   ;;  %s13385_s5 = inlined_call_operand.vmem [shape: f32[6,1,16], index: 5, kind: input, shape index: {}]   ;;  %s13386_s6 = inlined_call_operand.vmem [shape: f32[324,1], index: 6, kind: input, shape index: {}]   ;;  %s13387_s7 = inlined_call_operand.vmem [shape: f32[2,324,16], index: 7, kind: output, shape index: {}]  }
   0x1 LB: > { %s8532_s25 = sadd.s32 4294967295, %s9685_s24   ;;  %p8534_p0 = scmp.ge.s32.totalorder %s9685_s24, 1  ;;  %s9685_s24 = sphi %s9730_s24, %s18_s24  }
   0x2   : > { %p201_p1 = scmp.lt.s32.totalorder %s9685_s24, 3  ;;  %s213_s28 = sshll.u32 %s13380_s0, 4  ;;  %s214_s28 = int_to_ptr.vmem [resolvable:$true] %s213_s28 }
   0x3   : > { %p9446_p3 = scmp.eq.s32.totalorder %s8532_s25, 0  ;;  %s9687_s29 = smov [#allocation4]  }
   0x4   : > { %p202_p2 = pnand %p8534_p0, %p201_p1 }
   0x6   : > { %p9442_p4 = pneg %p202_p2  ;;  %249 = sbr.rel (%p202_p2) target bundleno = 2343 (0x927), region = 48 }
   0x8   : > { %p9443_p5 = pnand %p9446_p3, %p9442_p4 }
   0xa   : > { %9445 = dma.vmem_to_smem (!%p9443_p5), %s214_s28, 16, %s9687_s29, [#allocation5]  }
   0xb   : > { %9680 = dma.done.wait (%p9446_p3), [#allocation5], 16  }
   0xc   : > { %9682 = vsyncadd (%p9446_p3), [#allocation5], 4294967280 }
   0xd   : > { %256 = sfence }
   0xe   : > { %v8542_v0 = vld [vmem:[%s13382_s2 + $0x4] sm:$0xf]  ;;  %vm690_vm0 = vcmask 1043456   ;;  %p283_p6 = scmp.lt.s32.totalorder %s8532_s25, 1  ;;  %v8705_v2 = vld [vmem:[%s13382_s2 + $0x10] sm:$0xf] }
   0xf   : > { %v692_v1 = vsel %vm690_vm0, %v8542_v0, 0  ;;  %v475_v3 = vld [vmem:[%s13382_s2] sm:$0xf]  ;;  %v2142_v4 = vsel %vm690_vm0, %v8705_v2, 0  ;;  %v8661_v6 = vld [vmem:[%s13382_s2 + $0x8] sm:$0xf] }
  0x10   : > { %9433 = vmatpush.bf16.msra.mxu3 %v692_v1  ;;  %701 = vmatpush.bf16.msra.mxu0 %v692_v1  ;;  %s13702_s25 = smov (!%p283_p6, %s8532_s25), 1  ;;  %v1063_v5 = vsel %vm690_vm0, %v475_v3, 0  ;;  %v1342_v7 = vsel %vm690_vm0, %v8661_v6, 0  ;;  %vm584_vm1 = vcmask 1044480   ;;  %vm626_vm2 = vcmask 64512   ;;  %s294_s14 = sld [smem:[#allocation4]] }
  0x11   : > { %1072 = vmatpush.bf16.msra.mxu1 %v1063_v5  ;;  %s9436_s15 = smul.u32 188, %s13702_s25  ;;  %1351 = vmatpush.bf16.msra.mxu2 %v1342_v7  ;;  %vm810_vm3 = vsmask.f32 5376  ;;  %vm1184_vm4 = vsmask.f32 4352  ;;  %vm3211_vm6 = vcmask 1046528  }
  0x12   : > { %vm2304_vm5 = vsmask.f32 7424  ;;  %vm3479_vm7 = vsmask.f32 6400  ;;  %vm337_vm8 = vcmask 130048   ;;  %s8541_s19 = sld [smem:[#allocation4 + $0x1]] }
  0x13   : > { %s9763_s18 = scalar_lea.vmem %s13381_s1, %s9436_s15 }
  0x14   : > { %2151 = vmatpush.bf16.msrb.mxu0 %v2142_v4  ;;  %9434 = vmatpush.bf16.msrb.mxu3 %v1063_v5  ;;  %v9766_v8 = vld [vmem:[%s9763_s18 + $0x80] sm:$0xff]  ;;  %v9769_v9 = vld [vmem:[%s9763_s18 + $0x88] sm:$0xff]  ;;  %v9784_v42 = vld [vmem:[%s9763_s18 + $0x90] sm:$0xff] }
  0x15   : > { %v434_v10 = vld [vmem:[%s9763_s18 + $0x4] sm:$0xf]  ;;  %v9164_v11 = vld [vmem:[%s9763_s18 + $0x8] sm:$0xff]  ;;  %v476_v12 = vld [vmem:[%s9763_s18] sm:$0x8]  ;;  %v616_v15 = vrot.slane %v9766_v8, 3 }
  0x16   : > { %v522_v13 = vunpack.c.l.b16 %v434_v10  ;;  %v433_v14 = vld [vmem:[%s9763_s18] sm:$0xc]  ;;  %v618_v16 = vrot.slane %v9769_v9, 3  ;;  %v521_v17 = vunpack.c.l.b16 %v476_v12  ;;  %v820_v19 = vshrl.u32 %v9164_v11, 16  ;;  %v9165_v43 = vld [vmem:[%s9763_s18 + $0x10] sm:$0xff]  ;;  %v9798_v60 = vld [vmem:[%s9763_s18 + $0x98] sm:$0xff] }
  0x17   : > { %v808_v18 = vunpack.c.l.b16 %v433_v14  ;;  %v823_v20 = vshll.u32 %v9164_v11, 16  ;;  %v586_v23 = vrot.slane %v9164_v11, 3  ;;  %v620_v47 = vrot.slane %v9784_v42, 3  ;;  %v9166_v61 = vld [vmem:[%s9763_s18 + $0x18] sm:$0xff]  ;;  %v9807_v10 = vld [vmem:[%s9763_s18 + $0xa0] sm:$0xf] }
  0x18   : > { %v619_v21 = vsel %vm584_vm1, %v616_v15, %v618_v16  ;;  %v563_v22 = vpack.c.b16 %v522_v13, %v521_v17  ;;  %v822_v25 = vrot.slane %v820_v19, 2  ;;  %v1193_v27 = vrot.slane %v820_v19, 3  ;;  %v474_v11 = vld [vmem:[%s9763_s18 + $0xa4] sm:$0x1] }
  0x19   : > { %v809_v24 = vpack.c.b16 %v522_v13, %v808_v18  ;;  %8635 = vmatmul.msk.bf16.vlgmr.msra.gmra.mxu3 %vm626_vm2, %v619_v21  ;;  %v825_v26 = vrot.slane %v823_v20, 3  ;;  %v1194_v28 = vrot.slane %v823_v20, 4  ;;  %v829_v48 = vshrl.u32 %v9165_v43, 16  ;;  %v9167_v20 = vld [vmem:[%s9763_s18 + $0x20] sm:$0xff] }
  0x1a   : > { %v585_v29 = vrot.slane %v563_v22, 3  ;;  %v1186_v32 = vshrl.u32 %v563_v22, 16  ;;  %9435 = vmatpush.bf16.msra.mxu3 %v1342_v7  ;;  %v1189_v34 = vshll.u32 %v563_v22, 16  ;;  %v832_v49 = vshll.u32 %v9165_v43, 16 }
  0x1b   : > { %v812_v30 = vshrl.u32 %v809_v24, 16  ;;  %v815_v31 = vshll.u32 %v809_v24, 16  ;;  %v826_v33 = vor.u32 %v825_v26, %v822_v25  ;;  %v1195_v40 = vor.u32 %v1194_v28, %v1193_v27 }
  0x1c   : > { %v587_v35 = vsel %vm584_vm1, %v585_v29, %v586_v23  ;;  %v1188_v38 = vrot.slane %v1186_v32, 3  ;;  %v1191_v39 = vrot.slane %v1189_v34, 4  ;;  %v621_v50 = vsel %vm584_vm1, %v618_v16, %v620_v47  ;;  %v9168_v34 = vld [vmem:[%s9763_s18 + $0x28] sm:$0xff] }
  0x1d   : > { %v814_v36 = vrot.slane %v812_v30, 2  ;;  %v817_v37 = vrot.slane %v815_v31, 3  ;;  %8619 = vmatmul.msk.bf16.vlgmr.msra.gmra.mxu0 %vm626_vm2, %v587_v35  ;;  %v588_v51 = vrot.slane %v9165_v43, 3  ;;  %v831_v52 = vrot.slane %v829_v48, 2 }
  0x1e   : > { %v1192_v44 = vor.u32 %v1191_v39, %v1188_v38  ;;  %v834_v53 = vrot.slane %v832_v49, 3  ;;  %v1197_v54 = vrot.slane %v829_v48, 3  ;;  %v1198_v55 = vrot.slane %v832_v49, 4 }
  0x1f   : > { %v818_v41 = vor.u32 %v817_v37, %v814_v36  ;;  %v589_v56 = vsel %vm584_vm1, %v586_v23, %v588_v51  ;;  %v622_v63 = vrot.slane %v9798_v60, 3  ;;  %v838_v0 = vshrl.u32 %v9166_v61, 16 }
  0x20   : > { %v1196_v46 = vsel %vm1184_vm4, %v1192_v44, %v1195_v40  ;;  %v835_v57 = vor.u32 %v834_v53, %v831_v52  ;;  %v1199_v58 = vor.u32 %v1198_v55, %v1197_v54  ;;  %v841_v1 = vshll.u32 %v9166_v61, 16 }
  0x21   : > { %v827_v45 = vsel %vm810_vm3, %v818_v41, %v826_v33  ;;  %8662 = vmatmul.msk.bf16.vlgmr.msra.gmra.mxu2 %vm626_vm2, %v1196_v46  ;;  %v623_v2 = vsel %vm584_vm1, %v620_v47, %v622_v63  ;;  %v590_v3 = vrot.slane %v9166_v61, 3  ;;  %v840_v4 = vrot.slane %v838_v0, 2 }
  0x22   : > { %8640 = vmatmul.msk.bf16.vlgmr.msra.gmra.mxu1 %vm626_vm2, %v827_v45  ;;  %v836_v59 = vsel %vm810_vm3, %v826_v33, %v835_v57  ;;  %v1200_v62 = vsel %vm1184_vm4, %v1195_v40, %v1199_v58  ;;  %v843_v5 = vrot.slane %v841_v1, 3  ;;  %v1201_v6 = vrot.slane %v838_v0, 3 }
  0x23   : > { %v1202_v7 = vrot.slane %v841_v1, 4  ;;  %v591_v12 = vsel %vm584_vm1, %v588_v51, %v590_v3  ;;  %v561_v14 = vunpack.c.l.b16 %v9807_v10  ;;  %v562_v16 = vunpack.c.l.b16 %v474_v11 }
  0x24   : > { %v844_v13 = vor.u32 %v843_v5, %v840_v4  ;;  %v847_v23 = vshrl.u32 %v9167_v20, 16  ;;  %v850_v24 = vshll.u32 %v9167_v20, 16  ;;  %v592_v26 = vrot.slane %v9167_v20, 3  ;;  %v9170_v20 = vld [vmem:[%s9763_s18 + $0x38] sm:$0xff] }
  0x25   : > { %v1203_v17 = vor.u32 %v1202_v7, %v1201_v6  ;;  %v9817_v19 = vpack.c.b16 %v562_v16, %v561_v14  ;;  %v856_v37 = vshrl.u32 %v9168_v34, 16  ;;  %v859_v38 = vshll.u32 %v9168_v34, 16 }
  0x26   : > { %v845_v18 = vsel %vm810_vm3, %v835_v57, %v844_v13  ;;  %v849_v27 = vrot.slane %v847_v23, 2  ;;  %v852_v28 = vrot.slane %v850_v24, 3  ;;  %v1205_v29 = vrot.slane %v847_v23, 3  ;;  %v9169_v57 = vld [vmem:[%s9763_s18 + $0x30] sm:$0xff] }
  0x27   : > { %v1204_v21 = vsel %vm1184_vm4, %v1199_v58, %v1203_v17  ;;  %v624_v22 = vrot.slane %v9817_v19, 3  ;;  %v1206_v30 = vrot.slane %v850_v24, 4  ;;  %v593_v31 = vsel %vm584_vm1, %v590_v3, %v592_v26 }
  0x28   : > { %v853_v32 = vor.u32 %v852_v28, %v849_v27  ;;  %v594_v39 = vrot.slane %v9168_v34, 3  ;;  %v858_v40 = vrot.slane %v856_v37, 2  ;;  %v861_v41 = vrot.slane %v859_v38, 3 }
  0x29   : > { %8636 = vmatmul.msk.bf16.gmra.mxu3 %vm626_vm2, %v621_v50  ;;  %v625_v25 = vsel %vm584_vm1, %v622_v63, %v624_v22  ;;  %v1207_v33 = vor.u32 %v1206_v30, %v1205_v29  ;;  %v1209_v43 = vrot.slane %v856_v37, 3  ;;  %v1210_v44 = vrot.slane %v859_v38, 4 }
  0x2a   : > { %v854_v35 = vsel %vm810_vm3, %v844_v13, %v853_v32  ;;  %v595_v45 = vsel %vm584_vm1, %v592_v26, %v594_v39  ;;  %v862_v46 = vor.u32 %v861_v41, %v858_v40  ;;  %v955_v47 = vshrl.u32 %v9766_v8, 16 }
  0x2b   : > { %v1208_v36 = vsel %vm1184_vm4, %v1203_v17, %v1207_v33  ;;  %v958_v48 = vshll.u32 %v9766_v8, 16  ;;  %v964_v49 = vshrl.u32 %v9769_v9, 16  ;;  %v967_v50 = vshll.u32 %v9769_v9, 16 }
  0x2c   : > { %v1211_v51 = vor.u32 %v1210_v44, %v1209_v43  ;;  %v863_v52 = vsel %vm810_vm3, %v853_v32, %v862_v46  ;;  %v957_v53 = vrot.slane %v955_v47, 2  ;;  %v868_v63 = vshll.u32 %v9169_v57, 16 }
  0x2d   : > { %8620 = vmatmul.msk.bf16.gmra.mxu0 %vm626_vm2, %v589_v56  ;;  %v960_v54 = vrot.slane %v958_v48, 3  ;;  %v966_v55 = vrot.slane %v964_v49, 2  ;;  %v969_v56 = vrot.slane %v967_v50, 3  ;;  %v596_v1 = vrot.slane %v9169_v57, 3 }
  0x2e   : > { %v1212_v58 = vsel %vm1184_vm4, %v1207_v33, %v1211_v51  ;;  %v870_v3 = vrot.slane %v868_v63, 3  ;;  %v1214_v5 = vrot.slane %v868_v63, 4  ;;  %v973_v11 = vshrl.u32 %v9784_v42, 16 }
  0x2f   : > { %v970_v61 = vor.u32 %v969_v56, %v966_v55  ;;  %v597_v6 = vsel %vm584_vm1, %v594_v39, %v596_v1  ;;  %v874_v23 = vshrl.u32 %v9170_v20, 16  ;;  %v877_v24 = vshll.u32 %v9170_v20, 16  ;;  %v9171_v39 = vld [vmem:[%s9763_s18 + $0x40] sm:$0xff]  ;;  %v8727_v55 = vld [vmem:[%s13382_s2 + $0x14] sm:$0xf] }
  0x30   : > { %v975_v17 = vrot.slane %v973_v11, 2  ;;  %v598_v26 = vrot.slane %v9170_v20, 3  ;;  %v982_v33 = vshrl.u32 %v9798_v60, 16  ;;  %v985_v34 = vshll.u32 %v9798_v60, 16 }
  0x31   : > { %8663 = vmatmul.msk.bf16.gmra.mxu2 %vm626_vm2, %v1200_v62  ;;  %v865_v62 = vshrl.u32 %v9169_v57, 16  ;;  %v876_v27 = vrot.slane %v874_v23, 2  ;;  %v879_v28 = vrot.slane %v877_v24, 3  ;;  %v1217_v29 = vrot.slane %v874_v23, 3 }
  0x32   : > { %8641 = vmatmul.msk.bf16.gmra.mxu1 %vm626_vm2, %v836_v59  ;;  %v9853_v59 = vor.u32 %v960_v54, %v957_v53  ;;  %v1218_v30 = vrot.slane %v877_v24, 4  ;;  %v984_v37 = vrot.slane %v982_v33, 2  ;;  %v987_v38 = vrot.slane %v985_v34, 3 }
  0x33   : > { %v1213_v4 = vrot.slane %v865_v62, 3  ;;  %v880_v32 = vor.u32 %v879_v28, %v876_v27  ;;  %v883_v43 = vshrl.u32 %v9171_v39, 16  ;;  %v886_v44 = vshll.u32 %v9171_v39, 16  ;;  %v9173_v28 = vld [vmem:[%s9763_s18 + $0x50] sm:$0xff] }
  0x34   : > { %v971_v0 = vsel %vm810_vm3, %v9853_v59, %v970_v61  ;;  %v988_v41 = vor.u32 %v987_v38, %v984_v37  ;;  %v2516_v56 = vsel %vm690_vm0, %v8727_v55, 0 }
  0x35   : > { %v1215_v13 = vor.u32 %v1214_v5, %v1213_v4  ;;  %v1221_v53 = vrot.slane %v883_v43, 3  ;;  %v1222_v54 = vrot.slane %v886_v44, 4  ;;  %2525 = vmatpush.bf16.msrb.mxu1 %v2516_v56 }
  0x37   : > { %v1223_v63 = vor.u32 %v1222_v54, %v1221_v53 }
  0x39   : > { %8637 = vmatmul.msk.bf16.gmra.mxu3 %vm626_vm2, %v623_v2  ;;  %v867_v2 = vrot.slane %v865_v62, 2  ;;  %v994_v62 = vshll.u32 %v9817_v19, 16 }
  0x3b   : > { %v871_v7 = vor.u32 %v870_v3, %v867_v2  ;;  %v996_v2 = vrot.slane %v994_v62, 3  ;;  %v9172_v3 = vld [vmem:[%s9763_s18 + $0x48] sm:$0xff]  ;;  %v1254_v62 = vrot.slane %v958_v48, 4 }
  0x3d   : > { %8621 = vmatmul.msk.bf16.gmra.mxu0 %vm626_vm2, %v591_v12  ;;  %v976_v12 = vshll.u32 %v9784_v42, 16  ;;  %v872_v16 = vsel %vm810_vm3, %v862_v46, %v871_v7  ;;  %v600_v46 = vrot.slane %v9171_v39, 3 }
  0x3f   : > { %v601_v57 = vsel %vm584_vm1, %v598_v26, %v600_v46 }
  0x41   : > { %8664 = vmatmul.msk.bf16.gmra.mxu2 %vm626_vm2, %v1204_v21  ;;  %v1216_v21 = vsel %vm1184_vm4, %v1211_v51, %v1215_v13  ;;  %v885_v51 = vrot.slane %v883_v43, 2 }
  0x42   : > { %8642 = vmatmul.msk.bf16.gmra.mxu1 %vm626_vm2, %v845_v18  ;;  %v978_v18 = vrot.slane %v976_v12, 3 }
  0x49   : > { %8638 = vmatmul.msk.bf16.gmra.mxu3 %vm626_vm2, %v625_v25 }
  0x4d   : > { %8622 = vmatmul.msk.bf16.gmra.mxu0 %vm626_vm2, %v593_v31  ;;  %v599_v31 = vsel %vm584_vm1, %v596_v1, %v598_v26 }
  0x51   : > { %8665 = vmatmul.msk.bf16.gmra.mxu2 %vm626_vm2, %v1208_v36  ;;  %v881_v36 = vsel %vm810_vm3, %v871_v7, %v880_v32  ;;  %v895_v7 = vshll.u32 %v9172_v3, 16 }
  0x52   : > { %8643 = vmatmul.msk.bf16.gmra.mxu1 %vm626_vm2, %v854_v35  ;;  %v1219_v35 = vor.u32 %v1218_v30, %v1217_v29 }
  0x53   : > { %v1226_v20 = vrot.slane %v895_v7, 4 }
  0x54   : > { %v1220_v40 = vsel %vm1184_vm4, %v1215_v13, %v1219_v35  ;;  %v1224_v4 = vsel %vm1184_vm4, %v1219_v35, %v1223_v63  ;;  %v602_v13 = vrot.slane %v9172_v3, 3  ;;  %v904_v35 = vshll.u32 %v9173_v28, 16 }
  0x56   : > { %v906_v43 = vrot.slane %v904_v35, 3 }
  0x59   : > { %8639 = vmatmul.msk.bf16.gmra.mxu3 %vm626_vm2, %v624_v22  ;;  %v979_v22 = vor.u32 %v978_v18, %v975_v17  ;;  %v897_v17 = vrot.slane %v895_v7, 3 }
  0x5b   : > { %v980_v25 = vsel %vm810_vm3, %v970_v61, %v979_v22  ;;  %v991_v61 = vshrl.u32 %v9817_v19, 16 }
  0x5d   : > { %8623 = vmatmul.msk.bf16.gmra.mxu0 %vm626_vm2, %v595_v45  ;;  %v989_v45 = vsel %vm810_vm3, %v979_v22, %v988_v41  ;;  %v993_v1 = vrot.slane %v991_v61, 2  ;;  %v603_v22 = vsel %vm584_vm1, %v600_v46, %v602_v13  ;;  %v1253_v61 = vrot.slane %v955_v47, 3 }
  0x5f   : > { %v997_v5 = vor.u32 %v996_v2, %v993_v1  ;;  %v9939_v47 = vor.u32 %v1254_v62, %v1253_v61 }
  0x61   : > { %8666 = vmatmul.msk.bf16.gmra.mxu2 %vm626_vm2, %v1212_v58  ;;  %v998_v19 = vsel %vm810_vm3, %v988_v41, %v997_v5 }
  0x62   : > { %8644 = vmatmul.msk.bf16.gmra.mxu1 %vm626_vm2, %v863_v52  ;;  %v888_v52 = vrot.slane %v886_v44, 3  ;;  %v8683_v44 = vld [vmem:[%s13382_s2 + $0xc] sm:$0xf] }
  0x64   : > { %v889_v58 = vor.u32 %v888_v52, %v885_v51  ;;  %v1230_v51 = vrot.slane %v904_v35, 4  ;;  %v1899_v52 = vsel %vm690_vm0, %v8683_v44, 0  ;;  %v1262_v35 = vrot.slane %v976_v12, 4 }
  0x69   : > { %8656 = vmatmul.msk.bf16.vlgmr.msrb.gmra.mxu3 %vm626_vm2, %v971_v0  ;;  %v890_v0 = vsel %vm810_vm3, %v880_v32, %v889_v58  ;;  %v901_v32 = vshrl.u32 %v9173_v28, 16 }
  0x6a   : > { %1908 = vmatpush.bf16.msrb.mxu3 %v1899_v52 }
  0x6b   : > { %v903_v41 = vrot.slane %v901_v32, 2  ;;  %v1229_v46 = vrot.slane %v901_v32, 3  ;;  %v1261_v32 = vrot.slane %v973_v11, 3 }
  0x6d   : > { %8624 = vmatmul.msk.bf16.gmra.mxu0 %vm626_vm2, %v597_v6  ;;  %v892_v6 = vshrl.u32 %v9172_v3, 16  ;;  %v907_v55 = vor.u32 %v906_v43, %v903_v41  ;;  %v1231_v56 = vor.u32 %v1230_v51, %v1229_v46  ;;  %v9175_v43 = vld [vmem:[%s9763_s18 + $0x60] sm:$0xff] }
  0x6e   : > { %v919_v51 = vshrl.u32 %v9175_v43, 16  ;;  %v922_v11 = vshll.u32 %v9175_v43, 16 }
  0x6f   : > { %v1225_v18 = vrot.slane %v892_v6, 3 }
  0x70   : > { %v924_v61 = vrot.slane %v922_v11, 3  ;;  %v1237_v62 = vrot.slane %v919_v51, 3 }
  0x71   : > { %8667 = vmatmul.msk.bf16.gmra.mxu2 %vm626_vm2, %v1216_v21  ;;  %v1227_v24 = vor.u32 %v1226_v20, %v1225_v18 }
  0x72   : > { %8645 = vmatmul.msk.bf16.gmra.mxu1 %vm626_vm2, %v872_v16  ;;  %v894_v16 = vrot.slane %v892_v6, 2 }
  0x73   : > { %v1228_v30 = vsel %vm1184_vm4, %v1223_v63, %v1227_v24  ;;  %v1257_v63 = vrot.slane %v964_v49, 3  ;;  %v1232_v6 = vsel %vm1184_vm4, %v1227_v24, %v1231_v56 }
  0x74   : > { %v898_v23 = vor.u32 %v897_v17, %v894_v16 }
  0x76   : > { %v899_v27 = vsel %vm810_vm3, %v889_v58, %v898_v23  ;;  %v908_v3 = vsel %vm810_vm3, %v898_v23, %v907_v55 }
  0x79   : > { %8657 = vmatmul.msk.bf16.gmra.mxu3 %vm626_vm2, %v980_v25 }
  0x7d   : > { %8625 = vmatmul.msk.bf16.gmra.mxu0 %vm626_vm2, %v599_v31 }
  0x81   : > { %8668 = vmatmul.msk.bf16.gmra.mxu2 %vm626_vm2, %v1220_v40  ;;  %v604_v40 = vrot.slane %v9173_v28, 3 }
  0x82   : > { %8646 = vmatmul.msk.bf16.gmra.mxu1 %vm626_vm2, %v881_v36 }
  0x83   : > { %v605_v54 = vsel %vm584_vm1, %v602_v13, %v604_v40 }
  0x89   : > { %8658 = vmatmul.msk.bf16.gmra.mxu3 %vm626_vm2, %v989_v45 }
  0x8d   : > { %8626 = vmatmul.msk.bf16.gmra.mxu0 %vm626_vm2, %v601_v57 }
  0x91   : > { %8669 = vmatmul.msk.bf16.gmra.mxu2 %vm626_vm2, %v1224_v4  ;;  %v9174_v4 = vld [vmem:[%s9763_s18 + $0x58] sm:$0xff] }
  0x92   : > { %8647 = vmatmul.msk.bf16.gmra.mxu1 %vm626_vm2, %v890_v0  ;;  %v1258_v0 = vrot.slane %v967_v50, 4  ;;  %v910_v7 = vshrl.u32 %v9174_v4, 16  ;;  %v913_v9 = vshll.u32 %v9174_v4, 16  ;;  %v606_v18 = vrot.slane %v9174_v4, 3 }
  0x94   : > { %v1259_v48 = vor.u32 %v1258_v0, %v1257_v63  ;;  %v912_v20 = vrot.slane %v910_v7, 2  ;;  %v1233_v23 = vrot.slane %v910_v7, 3  ;;  %v1234_v24 = vrot.slane %v913_v9, 4 }
  0x95   : > { %v1238_v63 = vrot.slane %v922_v11, 4 }
  0x96   : > { %v1260_v13 = vsel %vm1184_vm4, %v9939_v47, %v1259_v48 }
  0x97   : > { %v1239_v4 = vor.u32 %v1238_v63, %v1237_v62 }
  0x99   : > { %8659 = vmatmul.msk.bf16.gmra.mxu3 %vm626_vm2, %v998_v19 }
  0x9a   : > { %v703_v21 = vpop.f32.mrf.mxu0 }
  0x9c   : > { %v9904_v25 = vpop.f32.mrf.mxu3 }
  0x9d   : > { %8627 = vmatmul.msk.bf16.gmra.mxu0 %vm626_vm2, %v603_v22 }
  0x9f   : > { %v1074_v26 = vpop.f32.mrf.mxu1 }
  0xa0   : > { %v1075_v29 = vadd.f32 %v1074_v26, %v703_v21  ;;  %v915_v21 = vrot.slane %v913_v9, 3 }
  0xa1   : > { %8670 = vmatmul.msk.bf16.gmra.mxu2 %vm626_vm2, %v1228_v30 }
  0xa2   : > { %8648 = vmatmul.msk.bf16.gmra.mxu1 %vm626_vm2, %v899_v27  ;;  %v705_v31 = vpop.f32.mrf.mxu0  ;;  %v607_v27 = vsel %vm584_vm1, %v604_v40, %v606_v18  ;;  %v916_v28 = vor.u32 %v915_v21, %v912_v20 }
  0xa4   : > { %v9912_v36 = vpop.f32.mrf.mxu3  ;;  %v1353_v37 = vpop.f32.mrf.mxu2  ;;  %v917_v41 = vsel %vm810_vm3, %v907_v55, %v916_v28  ;;  %v608_v55 = vrot.slane %v9175_v43, 3 }
  0xa5   : > { %v9914_v38 = vadd.f32 %v1353_v37, %v1075_v29  ;;  %v1235_v29 = vor.u32 %v1234_v24, %v1233_v23 }
  0xa7   : > { %v1076_v39 = vpop.f32.mrf.mxu1  ;;  %v1236_v44 = vsel %vm1184_vm4, %v1231_v56, %v1235_v29  ;;  %v1240_v20 = vsel %vm1184_vm4, %v1235_v29, %v1239_v4 }
  0xa8   : > { %v1077_v45 = vadd.f32 %v1076_v39, %v705_v31 }
  0xa9   : > { %8660 = vmatmul.msk.bf16.gmra.mxu3 %vm626_vm2, %v997_v5 }
  0xaa   : > { %v708_v53 = vpop.f32.mrf.mxu0 }
  0xac   : > { %v9922_v57 = vpop.f32.mrf.mxu3  ;;  %v1355_v58 = vpop.f32.mrf.mxu2 }
  0xad   : > { %8628 = vmatmul.msk.bf16.gmra.mxu0 %vm626_vm2, %v605_v54  ;;  %v9933_v1 = vadd.f32 %v1355_v58, %v1077_v45  ;;  %v1263_v45 = vor.u32 %v1262_v35, %v1261_v32  ;;  %v921_v58 = vrot.slane %v919_v51, 2 }
  0xaf   : > { %v1079_v2 = vpop.f32.mrf.mxu1  ;;  %v1264_v12 = vsel %vm1184_vm4, %v1259_v48, %v1263_v45  ;;  %v1265_v48 = vrot.slane %v982_v33, 3 }
  0xb0   : > { %v1080_v5 = vadd.f32 %v1079_v2, %v708_v53  ;;  %v609_v2 = vsel %vm584_vm1, %v606_v18, %v608_v55 }
  0xb1   : > { %8671 = vmatmul.msk.bf16.gmra.mxu2 %vm626_vm2, %v1232_v6 }
  0xb2   : > { %8649 = vmatmul.msk.bf16.gmra.mxu1 %vm626_vm2, %v908_v3  ;;  %v710_v49 = vpop.f32.mrf.mxu0  ;;  %v925_v3 = vor.u32 %v924_v61, %v921_v58 }
  0xb4   : > { %v9942_v50 = vpop.f32.mrf.mxu3  ;;  %v1358_v19 = vpop.f32.mrf.mxu2 }
  0xb5   : > { %v9946_v16 = vadd.f32 %v1358_v19, %v1080_v5  ;;  %v926_v19 = vsel %vm810_vm3, %v916_v28, %v925_v3 }
  0xb7   : > { %v1081_v17 = vpop.f32.mrf.mxu1 }
  0xb8   : > { %v1082_v22 = vadd.f32 %v1081_v17, %v710_v49  ;;  %v1266_v49 = vrot.slane %v985_v34, 4  ;;  %v1178_v17 = vld [vmem:[%s9763_s18 + $0xa4] sm:$0x3] }
  0xb9   : > { %8678 = vmatmul.msk.bf16.vlgmr.msra.gmra.mxu3 %vm626_vm2, %v1260_v13  ;;  %v9176_v13 = vld [vmem:[%s9763_s18 + $0x68] sm:$0xff] }
  0xba   : > { %v713_v26 = vpop.f32.mrf.mxu0  ;;  %v1267_v21 = vor.u32 %v1266_v49, %v1265_v48  ;;  %v928_v23 = vshrl.u32 %v9176_v13, 16  ;;  %v931_v60 = vshll.u32 %v9176_v13, 16 }
  0xbc   : > { %v9950_v30 = vpop.f32.mrf.mxu3  ;;  %v1360_v31 = vpop.f32.mrf.mxu2  ;;  %v930_v32 = vrot.slane %v928_v23, 2  ;;  %v933_v35 = vrot.slane %v931_v60, 3  ;;  %v1242_v43 = vrot.slane %v931_v60, 4 }
  0xbd   : > { %8629 = vmatmul.msk.bf16.gmra.mxu0 %vm626_vm2, %v607_v27  ;;  %v9957_v37 = vadd.f32 %v1360_v31, %v1082_v22  ;;  %v1182_v22 = vunpack.c.l.b16 %v1178_v17  ;;  %v610_v31 = vrot.slane %v9176_v13, 3 }
  0xbe   : > { %v934_v51 = vor.u32 %v933_v35, %v930_v32 }
  0xbf   : > { %v1084_v39 = vpop.f32.mrf.mxu1  ;;  %v1183_v27 = vpack.c.b16 %v1182_v22, %v561_v14 }
  0xc0   : > { %v1085_v40 = vadd.f32 %v1084_v39, %v713_v26  ;;  %v1268_v26 = vsel %vm1184_vm4, %v1263_v45, %v1267_v21  ;;  %v611_v45 = vsel %vm584_vm1, %v608_v55, %v610_v31  ;;  %v935_v61 = vsel %vm810_vm3, %v925_v3, %v934_v51 }
  0xc1   : > { %8672 = vmatmul.msk.bf16.gmra.mxu2 %vm626_vm2, %v1236_v44  ;;  %v1273_v44 = vshll.u32 %v1183_v27, 16 }
  0xc2   : > { %8650 = vmatmul.msk.bf16.gmra.mxu1 %vm626_vm2, %v917_v41  ;;  %v715_v46 = vpop.f32.mrf.mxu0  ;;  %v1241_v41 = vrot.slane %v928_v23, 3 }
  0xc4   : > { %v9964_v52 = vpop.f32.mrf.mxu3  ;;  %v1363_v42 = vpop.f32.mrf.mxu2  ;;  %v1243_v10 = vor.u32 %v1242_v43, %v1241_v41  ;;  %v10026_v41 = vld [vmem:[%s9763_s18 + $0xc] sm:$0xf] }
  0xc5   : > { %v9967_v53 = vadd.f32 %v1363_v42, %v1085_v40  ;;  %v1270_v40 = vshrl.u32 %v1183_v27, 16  ;;  %v10019_v27 = vld [vmem:[%s9763_s18 + $0x78] sm:$0xff] }
  0xc6   : > { %v1244_v63 = vsel %vm1184_vm4, %v1239_v4, %v1243_v10 }
  0xc7   : > { %v1086_v54 = vpop.f32.mrf.mxu1  ;;  %v1272_v42 = vrot.slane %v1270_v40, 3  ;;  %v946_v40 = vshrl.u32 %v10019_v27, 16 }
  0xc8   : > { %v1087_v56 = vadd.f32 %v1086_v54, %v715_v46 }
  0xc9   : > { %8679 = vmatmul.msk.bf16.gmra.mxu3 %vm626_vm2, %v1264_v12  ;;  %v1275_v12 = vrot.slane %v1273_v44, 4  ;;  %v949_v44 = vshll.u32 %v10019_v27, 16 }
  0xca   : > { %v718_v0 = vpop.f32.mrf.mxu0 }
  0xcb   : > { %v1276_v55 = vor.u32 %v1275_v12, %v1272_v42  ;;  %v948_v12 = vrot.slane %v946_v40, 2 }
  0xcc   : > { %v9971_v5 = vpop.f32.mrf.mxu3  ;;  %v1365_v6 = vpop.f32.mrf.mxu2 }
  0xcd   : > { %8630 = vmatmul.msk.bf16.gmra.mxu0 %vm626_vm2, %v609_v2  ;;  %v9978_v7 = vadd.f32 %v1365_v6, %v1087_v56  ;;  %v10002_v56 = vld [vmem:[%s9763_s18 + $0x70] sm:$0xff] }
  0xce   : > { %v937_v2 = vshrl.u32 %v10002_v56, 16  ;;  %v940_v6 = vshll.u32 %v10002_v56, 16  ;;  %v612_v4 = vrot.slane %v10002_v56, 3 }
  0xcf   : > { %v1089_v9 = vpop.f32.mrf.mxu1 }
  0xd0   : > { %v1090_v18 = vadd.f32 %v1089_v9, %v718_v0  ;;  %v1277_v9 = vsel %vm1184_vm4, %v1267_v21, %v1276_v55  ;;  %v939_v13 = vrot.slane %v937_v2, 2  ;;  %v942_v17 = vrot.slane %v940_v6, 3 }
  0xd1   : > { %8673 = vmatmul.msk.bf16.gmra.mxu2 %vm626_vm2, %v1240_v20  ;;  %v1245_v20 = vrot.slane %v937_v2, 3  ;;  %v1246_v22 = vrot.slane %v940_v6, 4  ;;  %v613_v23 = vsel %vm584_vm1, %v610_v31, %v612_v4  ;;  %v1249_v2 = vrot.slane %v946_v40, 3  ;;  %v8869_v40 = vld [vmem:[%s13382_s2 + $0x20] sm:$0xf] }
  0xd2   : > { %8651 = vmatmul.msk.bf16.gmra.mxu1 %vm626_vm2, %v926_v19  ;;  %v720_v33 = vpop.f32.mrf.mxu0  ;;  %v943_v60 = vor.u32 %v942_v17, %v939_v13  ;;  %v1250_v6 = vrot.slane %v949_v44, 4 }
  0xd3   : > { %v1247_v21 = vor.u32 %v1246_v22, %v1245_v20 }
  0xd4   : > { %v9986_v34 = vpop.f32.mrf.mxu3  ;;  %v1368_v24 = vpop.f32.mrf.mxu2  ;;  %v944_v35 = vsel %vm810_vm3, %v934_v51, %v943_v60 }
  0xd5   : > { %v9991_v28 = vadd.f32 %v1368_v24, %v1090_v18  ;;  %v1248_v31 = vsel %vm1184_vm4, %v1243_v10, %v1247_v21 }
  0xd7   : > { %v1091_v29 = vpop.f32.mrf.mxu1 }
  0xd8   : > { %v1092_v39 = vadd.f32 %v1091_v29, %v720_v33 }
  0xd9   : > { %8680 = vmatmul.msk.bf16.gmra.mxu3 %vm626_vm2, %v1268_v26 }
  0xda   : > { %v723_v46 = vpop.f32.mrf.mxu0 }
  0xdc   : > { %v9995_v14 = vpop.f32.mrf.mxu3  ;;  %v1370_v11 = vpop.f32.mrf.mxu2 }
  0xdd   : > { %8631 = vmatmul.msk.bf16.gmra.mxu0 %vm626_vm2, %v611_v45  ;;  %v9998_v54 = vadd.f32 %v1370_v11, %v1092_v39  ;;  %v1498_v39 = vld [vmem:[%s9763_s18 + $0x8] sm:$0x8]  ;;  %v1585_v45 = vunpack.c.l.b16 %v10026_v41 }
  0xdf   : > { %v1094_v58 = vpop.f32.mrf.mxu1 }
  0xe0   : > { %v1095_v62 = vadd.f32 %v1094_v58, %v723_v46  ;;  %v1584_v46 = vunpack.c.l.b16 %v1498_v39  ;;  %v951_v58 = vrot.slane %v949_v44, 3 }
  0xe1   : > { %8674 = vmatmul.msk.bf16.gmra.mxu2 %vm626_vm2, %v1244_v63  ;;  %v8847_v63 = vld [vmem:[%s13382_s2 + $0x1c] sm:$0xf] }
  0xe2   : > { %8652 = vmatmul.msk.bf16.gmra.mxu1 %vm626_vm2, %v935_v61  ;;  %v725_v0 = vpop.f32.mrf.mxu0  ;;  %v1626_v10 = vpack.c.b16 %v1585_v45, %v1584_v46 }
  0xe4   : > { %v805_v48 = vpop.f32.mrf.mxu3  ;;  %v1373_v49 = vpop.f32.mrf.mxu2  ;;  %v1651_v13 = vshll.u32 %v1626_v10, 16 }
  0xe5   : > { %v10010_v3 = vadd.f32 %v1373_v49, %v1095_v62  ;;  %v614_v62 = vrot.slane %v10019_v27, 3  ;;  %v9288_v48 = vld [vmem:[%s9763_s18 + $0x10] sm:$0xff]   ;;  %v3317_v49 = vsel %vm690_vm0, %v8847_v63, 0 }
  0xe6   : > { %3326 = vmatpush.bf16.msra.mxu3 %v3317_v49  ;;  %v1656_v20 = vshrl.u32 %v9288_v48, 16  ;;  %v1659_v22 = vshll.u32 %v9288_v48, 16  ;;  %v2672_v49 = vld [vmem:[%s9763_s18 + $0x14] sm:$0xff]  }
  0xe7   : > { %v1096_v19 = vpop.f32.mrf.mxu1 }
  0xe8   : > { %v1097_v18 = vadd.f32 %v1096_v19, %v725_v0  ;;  %v1648_v19 = vshrl.u32 %v1626_v10, 16 }
  0xe9   : > { %8681 = vmatmul.msk.bf16.gmra.mxu3 %vm626_vm2, %v1277_v9  ;;  %v952_v9 = vor.u32 %v951_v58, %v948_v12 }
  0xea   : > { %v728_v33 = vpop.f32.mrf.mxu0 }
  0xeb   : > { %v953_v27 = vsel %vm810_vm3, %v943_v60, %v952_v9 }
  0xec   : > { %v10015_v24 = vpop.f32.mrf.mxu3  ;;  %v1375_v26 = vpop.f32.mrf.mxu2 }
  0xed   : > { %8632 = vmatmul.msk.bf16.gmra.mxu0 %vm626_vm2, %v613_v23  ;;  %v10021_v29 = vadd.f32 %v1375_v26, %v1097_v18  ;;  %v615_v18 = vsel %vm584_vm1, %v612_v4, %v614_v62  ;;  %v1658_v4 = vrot.slane %v1656_v20, 3  ;;  %v617_v20 = vsel %vm584_vm1, %v614_v62, %v616_v15 }
  0xef   : > { %v1099_v32 = vpop.f32.mrf.mxu1 }
  0xf0   : > { %v1100_v43 = vadd.f32 %v1099_v32, %v728_v33  ;;  %v1251_v33 = vor.u32 %v1250_v6, %v1249_v2  ;;  %v1650_v32 = vrot.slane %v1648_v19, 3  ;;  %v9289_v2 = vld [vmem:[%s9763_s18 + $0x18] sm:$0xff]  }
  0xf1   : > { %8675 = vmatmul.msk.bf16.gmra.mxu2 %vm626_vm2, %v1248_v31  ;;  %v1661_v31 = vrot.slane %v1659_v22, 4  ;;  %v10073_v19 = vld [vmem:[%s9763_s18 + $0x14] sm:$0xf0]  ;;  %v9214_v22 = vunpack.c.l.b16 %v9288_v48 }
  0xf2   : > { %8653 = vmatmul.msk.bf16.gmra.mxu1 %vm626_vm2, %v944_v35  ;;  %v730_v11 = vpop.f32.mrf.mxu0  ;;  %v1653_v35 = vrot.slane %v1651_v13, 4  ;;  %v1252_v60 = vsel %vm1184_vm4, %v1247_v21, %v1251_v33  ;;  %v1665_v13 = vshrl.u32 %v9289_v2, 16  ;;  %v1256_v62 = vsel %vm1184_vm4, %v1251_v33, %v9939_v47 }
  0xf3   : > { %v1662_v58 = vor.u32 %v1661_v31, %v1658_v4  ;;  %v962_v4 = vsel %vm810_vm3, %v952_v9, %v9853_v59  ;;  %v2057_v8 = vpack.c.b16 %v9214_v22, %v1585_v45  ;;  %v2821_v59 = vshll.u32 %v2672_v49, 16 }
  0xf4   : > { %v10034_v51 = vpop.f32.mrf.mxu3  ;;  %v1378_v42 = vpop.f32.mrf.mxu2  ;;  %v1654_v12 = vor.u32 %v1653_v35, %v1650_v32  ;;  %v1667_v32 = vrot.slane %v1665_v13, 3 }
  0xf5   : > { %v10038_v61 = vadd.f32 %v1378_v42, %v1100_v43  ;;  %v2305_v33 = vshrl.u32 %v2057_v8, 16 }
  0xf6   : > { %v1663_v21 = vsel %vm1184_vm4, %v1654_v12, %v1662_v58 }
  0xf7   : > { %v1101_v56 = vpop.f32.mrf.mxu1 }
  0xf8   : > { %v1102_v0 = vadd.f32 %v1101_v56, %v730_v11  ;;  %v3637_v11 = vsel %vm690_vm0, %v8869_v40, 0  ;;  %v10093_v40 = vld [vmem:[%s9763_s18 + $0x14] sm:$0xff]  }
  0xf9   : > { %8682 = vmatmul.msk.bf16.gmra.mxu3 %vm626_vm2, %v1276_v55  ;;  %v8749_v55 = vld [vmem:[%s13382_s2 + $0x18] sm:$0xf]  ;;  %3646 = vmatpush.bf16.msra.mxu0 %v3637_v11 }
  0xfa   : > { %v733_v17 = vpop.f32.mrf.mxu0  ;;  %v3049_v44 = vsel %vm690_vm0, %v8749_v55, 0 }
  0xfb   : > { %3058 = vmatpush.bf16.msrb.mxu2 %v3049_v44  ;;  %v2307_v44 = vshll.u32 %v2057_v8, 16 }
  0xfc   : > { %v10048_v23 = vpop.f32.mrf.mxu3  ;;  %v1380_v26 = vpop.f32.mrf.mxu2 }
  0xfd   : > { %8633 = vmatmul.msk.bf16.gmra.mxu0 %vm626_vm2, %v615_v18  ;;  %v10055_v39 = vadd.f32 %v1380_v26, %v1102_v0  ;;  %v2309_v11 = vrot.slane %v2307_v44, 1 }
  0xff   : > { %v1104_v43 = vpop.f32.mrf.mxu1  ;;  %v2310_v13 = vor.u32 %v2309_v11, %v2305_v33 }
 0x100   : > { %v1105_v46 = vadd.f32 %v1104_v43, %v733_v17  ;;  %v1668_v17 = vshll.u32 %v9289_v2, 16  ;;  %v9290_v2 = vld [vmem:[%s9763_s18 + $0x20] sm:$0xff]  }
 0x101   : > { %8676 = vmatmul.msk.bf16.gmra.mxu2 %vm626_vm2, %v1252_v60 }
 0x102   : > { %8654 = vmatmul.msk.bf16.gmra.mxu1 %vm626_vm2, %v953_v27  ;;  %v735_v42 = vpop.f32.mrf.mxu0  ;;  %v1670_v35 = vrot.slane %v1668_v17, 4 }
 0x104   : > { %v10065_v10 = vpop.f32.mrf.mxu3  ;;  %v1383_v56 = vpop.f32.mrf.mxu2  ;;  %v1671_v48 = vor.u32 %v1670_v35, %v1667_v32 }
 0x105   : > { %v10067_v63 = vadd.f32 %v1383_v56, %v1105_v46  ;;  %v10096_v46 = vld [vmem:[%s9763_s18 + $0x1c] sm:$0xff]  ;;  %v2819_v56 = vshrl.u32 %v2672_v49, 16 }
 0x106   : > { %v1672_v45 = vsel %vm1184_vm4, %v1662_v58, %v1671_v48  ;;  %v1677_v58 = vshll.u32 %v9290_v2, 16 }
 0x107   : > { %v1106_v0 = vpop.f32.mrf.mxu1 }
 0x108   : > { %v1107_v6 = vadd.f32 %v1106_v0, %v735_v42  ;;  %v2311_v42 = vshll.u32 %v10093_v40, 16  ;;  %v2823_v0 = vrot.slane %v2821_v59, 1 }
 0x109   : > { %8684 = vmatmul.msk.bf16.vlgmr.msrb.gmra.mxu3 %vm626_vm2, %v1663_v21  ;;  %v13392_v21 = vshll.u32 %v10096_v46, 16 }
 0x10a   : > { %v738_v18 = vpop.f32.mrf.mxu0  ;;  %v2313_v17 = vrot.slane %v2311_v42, 1 }
 0x10b   : > { %v2828_v22 = vrot.slane %v13392_v21, 1 }
 0x10c   : > { %v10079_v26 = vpop.f32.mrf.mxu3  ;;  %v1385_v27 = vpop.f32.mrf.mxu2 }
 0x10d   : > { %8634 = vmatmul.msk.bf16.gmra.mxu0 %vm626_vm2, %v617_v20  ;;  %v10082_v55 = vadd.f32 %v1385_v27, %v1107_v6  ;;  %v2824_v20 = vor.u32 %v2823_v0, %v2819_v56 }
 0x10f   : > { %v1109_v43 = vpop.f32.mrf.mxu1 }
 0x110   : > { %v1110_v15 = vadd.f32 %v1109_v43, %v738_v18  ;;  %v1674_v18 = vshrl.u32 %v9290_v2, 16  ;;  %v2314_v43 = vsel %vm2304_vm5, %v2310_v13, %v2313_v17  ;;  %v13389_v2 = vshrl.u32 %v10096_v46, 16  ;;  %v9291_v13 = vld [vmem:[%s9763_s18 + $0x28] sm:$0xff]  }
 0x111   : > { %8677 = vmatmul.msk.bf16.gmra.mxu2 %vm626_vm2, %v1256_v62 }
 0x112   : > { %8655 = vmatmul.msk.bf16.gmra.mxu1 %vm626_vm2, %v962_v4  ;;  %v740_v31 = vpop.f32.mrf.mxu0  ;;  %v1676_v4 = vrot.slane %v1674_v18, 3 }
 0x114   : > { %v10098_v9 = vpop.f32.mrf.mxu3  ;;  %v1388_v41 = vpop.f32.mrf.mxu2 }
 0x115   : > { %v10101_v60 = vadd.f32 %v1388_v41, %v1110_v15  ;;  %v1679_v15 = vrot.slane %v1677_v58, 4  ;;  %v9401_v41 = vld [vmem:[%s9763_s18 + $0x1c] sm:$0xff]  }
 0x116   : > { %v2318_v56 = vshll.u32 %v9401_v41, 16 }
 0x117   : > { %v1111_v47 = vpop.f32.mrf.mxu1  ;;  %v1680_v59 = vor.u32 %v1679_v15, %v1676_v4 }
 0x118   : > { %v1112_v12 = vadd.f32 %v1111_v47, %v740_v31  ;;  %v2829_v31 = vsel %vm2304_vm5, %v2824_v20, %v2828_v22  ;;  %v2320_v20 = vrot.slane %v2318_v56, 1  ;;  %v10147_v56 = vld [vmem:[%s9763_s18 + $0x24] sm:$0xff]  }
 0x119   : > { %8685 = vmatmul.msk.bf16.gmra.mxu3 %vm626_vm2, %v1672_v45  ;;  %v10120_v45 = vld [vmem:[%s9763_s18 + $0x24] sm:$0xff]  ;;  %v1681_v42 = vsel %vm1184_vm4, %v1671_v48, %v1680_v59 }
 0x11a   : > { %v743_v6 = vpop.f32.mrf.mxu0 }
 0x11c   : > { %v10109_v27 = vpop.f32.mrf.mxu3  ;;  %v1390_v49 = vpop.f32.mrf.mxu2 }
 0x11d   : > { %8706 = vmatmul.msk.bf16.vlgmr.msrb.gmra.mxu0 %vm626_vm2, %v2057_v8  ;;  %v10112_v32 = vadd.f32 %v1390_v49, %v1112_v12  ;;  %v2315_v12 = vshrl.u32 %v10093_v40, 16  ;;  %v1683_v49 = vshrl.u32 %v9291_v13, 16 }
 0x11f   : > { %v1114_v35 = vpop.f32.mrf.mxu1  ;;  %v2317_v58 = vor.u32 %v2315_v12, %v2313_v17 }
 0x120   : > { %v1115_v62 = vadd.f32 %v1114_v35, %v743_v6  ;;  %v13388_v6 = vshll.u32 %v10120_v45, 16  ;;  %v1686_v35 = vshll.u32 %v9291_v13, 16 }
 0x121   : > { %8826 = vmatmul.msk.bf16.vlgmr.msrb.gmra.mxu2 %vm626_vm2, %v2829_v31  ;;  %v2321_v31 = vsel %vm2304_vm5, %v2317_v58, %v2320_v20 }
 0x122   : > { %8728 = vmatmul.msk.bf16.vlgmr.msrb.gmra.mxu1 %vm626_vm2, %v2314_v43  ;;  %v745_v44 = vpop.f32.mrf.mxu0  ;;  %v2832_v43 = vor.u32 %v13389_v2, %v2828_v22  ;;  %v2836_v48 = vrot.slane %v13388_v6, 1 }
 0x124   : > { %v10122_v8 = vpop.f32.mrf.mxu3  ;;  %v1393_v47 = vpop.f32.mrf.mxu2  ;;  %v2837_v22 = vsel %vm2304_vm5, %v2832_v43, %v2836_v48 }
 0x125   : > { %v10124_v33 = vadd.f32 %v1393_v47, %v1115_v62  ;;  %v1688_v47 = vrot.slane %v1686_v35, 4  ;;  %v2325_v35 = vshll.u32 %v10147_v56, 16 }
 0x127   : > { %v1116_v11 = vpop.f32.mrf.mxu1 }
 0x128   : > { %v1117_v0 = vadd.f32 %v1116_v11, %v745_v44  ;;  %v1685_v44 = vrot.slane %v1683_v49, 3  ;;  %v2322_v49 = vshrl.u32 %v9401_v41, 16 }
 0x129   : > { %8686 = vmatmul.msk.bf16.gmra.mxu3 %vm626_vm2, %v1681_v42 }
 0x12a   : > { %v748_v18 = vpop.f32.mrf.mxu0  ;;  %v1689_v12 = vor.u32 %v1688_v47, %v1685_v44  ;;  %v9292_v44 = vld [vmem:[%s9763_s18 + $0x30] sm:$0xff]  }
 0x12b   : > { %v1692_v6 = vshrl.u32 %v9292_v44, 16 }
 0x12c   : > { %v10136_v4 = vpop.f32.mrf.mxu3  ;;  %v1395_v15 = vpop.f32.mrf.mxu2 }
 0x12d   : > { %8707 = vmatmul.msk.bf16.gmra.mxu0 %vm626_vm2, %v10093_v40  ;;  %v10140_v62 = vadd.f32 %v1395_v15, %v1117_v0  ;;  %v10150_v40 = vld [vmem:[%s9763_s18 + $0x2c] sm:$0xff] }
 0x12f   : > { %v1119_v17 = vpop.f32.mrf.mxu1 }
 0x130   : > { %v1120_v11 = vadd.f32 %v1119_v17, %v748_v18  ;;  %v1690_v18 = vsel %vm1184_vm4, %v1680_v59, %v1689_v12  ;;  %v13391_v17 = vshrl.u32 %v10120_v45, 16 }
 0x131   : > { %8827 = vmatmul.msk.bf16.gmra.mxu2 %vm626_vm2, %v2837_v22  ;;  %v2324_v22 = vor.u32 %v2322_v49, %v2320_v20 }
 0x132   : > { %8729 = vmatmul.msk.bf16.gmra.mxu1 %vm626_vm2, %v2321_v31  ;;  %v750_v42 = vpop.f32.mrf.mxu0  ;;  %v13390_v31 = vshll.u32 %v10150_v40, 16  ;;  %v2840_v59 = vor.u32 %v13391_v17, %v2836_v48 }
 0x134   : > { %v1176_v0 = vpop.f32.mrf.mxu3  ;;  %v1398_v13 = vpop.f32.mrf.mxu2 }
 0x135   : > { %v10152_v15 = vadd.f32 %v1398_v13, %v1120_v11  ;;  %v2327_v0 = vrot.slane %v2325_v35, 1  ;;  %v1695_v11 = vshll.u32 %v9292_v44, 16  ;;  %v1155_v13 = vadd.f32 %v10015_v24, %v9904_v25 }
 0x136   : > { %v1694_v25 = vrot.slane %v1692_v6, 3 }
 0x137   : > { %v1121_v58 = vpop.f32.mrf.mxu1  ;;  %v2328_v35 = vsel %vm2304_vm5, %v2324_v22, %v2327_v0  ;;  %v1697_v24 = vrot.slane %v1695_v11, 4 }
 0x138   : > { %v1122_v43 = vadd.f32 %v1121_v58, %v750_v42  ;;  %v2844_v42 = vrot.slane %v13390_v31, 1 }
 0x139   : > { %8687 = vmatmul.msk.bf16.gmra.mxu3 %vm626_vm2, %v1690_v18  ;;  %v1698_v17 = vor.u32 %v1697_v24, %v1694_v25  ;;  %v13394_v25 = vshrl.u32 %v10150_v40, 16 }
 0x13a   : > { %v753_v47 = vpop.f32.mrf.mxu0  ;;  %v2845_v48 = vsel %vm2304_vm5, %v2840_v59, %v2844_v42 }
 0x13b   : > { %v1699_v59 = vsel %vm1184_vm4, %v1689_v12, %v1698_v17  ;;  %v1160_v12 = vadd.f32 %v10048_v23, %v9922_v57 }
 0x13c   : > { %v1433_v58 = vpop.f32.mrf.mxu3  ;;  %v1400_v2 = vpop.f32.mrf.mxu2 }
 0x13d   : > { %8708 = vmatmul.msk.bf16.gmra.mxu0 %vm626_vm2, %v9401_v41  ;;  %v10167_v18 = vadd.f32 %v1433_v58, %v1155_v13  ;;  %v10169_v20 = vadd.f32 %v1400_v2, %v1122_v43  ;;  %v10176_v41 = vld [vmem:[%s9763_s18 + $0x2c] sm:$0xff]   ;;  %v1157_v2 = vadd.f32 %v10034_v51, %v9912_v36  ;;  %v10181_v43 = vld [vmem:[%s9763_s18 + $0x34] sm:$0xff]  ;;  %v2329_v58 = vshrl.u32 %v10147_v56, 16 }
 0x13e   : > { %v13393_v36 = vshll.u32 %v10181_v43, 16  ;;  %v9293_v51 = vld [vmem:[%s9763_s18 + $0x38] sm:$0xff]  }
 0x13f   : > { %v1124_v49 = vpop.f32.mrf.mxu1 }
 0x140   : > { %v1125_v44 = vadd.f32 %v1124_v49, %v753_v47  ;;  %v2332_v49 = vshll.u32 %v10176_v41, 16 }
 0x141   : > { %8828 = vmatmul.msk.bf16.gmra.mxu2 %vm626_vm2, %v2845_v48  ;;  %v2331_v48 = vor.u32 %v2329_v58, %v2327_v0 }
 0x142   : > { %8730 = vmatmul.msk.bf16.gmra.mxu1 %vm626_vm2, %v2328_v35  ;;  %v755_v31 = vpop.f32.mrf.mxu0 }
 0x144   : > { %v1435_v22 = vpop.f32.mrf.mxu3  ;;  %v1403_v6 = vpop.f32.mrf.mxu2 }
 0x145   : > { %v10183_v11 = vadd.f32 %v1435_v22, %v1157_v2  ;;  %v10185_v47 = vadd.f32 %v1403_v6, %v1125_v44  ;;  %v2334_v2 = vrot.slane %v2332_v49, 1  ;;  %v1701_v44 = vshrl.u32 %v9293_v51, 16 }
 0x146   : > { %v1704_v22 = vshll.u32 %v9293_v51, 16  ;;  %v2848_v6 = vor.u32 %v13394_v25, %v2844_v42 }
 0x147   : > { %v1126_v13 = vpop.f32.mrf.mxu1  ;;  %v2335_v57 = vsel %vm2304_vm5, %v2331_v48, %v2334_v2  ;;  %v1703_v23 = vrot.slane %v1701_v44, 3 }
 0x148   : > { %v1127_v35 = vadd.f32 %v1126_v13, %v755_v31  ;;  %v2852_v31 = vrot.slane %v13393_v36, 1  ;;  %v1706_v49 = vrot.slane %v1704_v22, 4 }
 0x149   : > { %8688 = vmatmul.msk.bf16.gmra.mxu3 %vm626_vm2, %v1699_v59 }
 0x14a   : > { %v758_v24 = vpop.f32.mrf.mxu0  ;;  %v2853_v51 = vsel %vm2304_vm5, %v2848_v6, %v2852_v31  ;;  %v1707_v25 = vor.u32 %v1706_v49, %v1703_v23  ;;  %v13396_v23 = vshrl.u32 %v10181_v43, 16 }
 0x14c   : > { %v1438_v13 = vpop.f32.mrf.mxu3  ;;  %v1405_v21 = vpop.f32.mrf.mxu2  ;;  %v1708_v6 = vsel %vm1184_vm4, %v1698_v17, %v1707_v25  ;;  %v1165_v17 = vadd.f32 %v10079_v26, %v9950_v30 }
 0x14d   : > { %8709 = vmatmul.msk.bf16.gmra.mxu0 %vm626_vm2, %v10147_v56  ;;  %v10202_v0 = vadd.f32 %v1438_v13, %v1160_v12  ;;  %v10204_v59 = vadd.f32 %v1405_v21, %v1127_v35  ;;  %v10211_v56 = vld [vmem:[%s9763_s18 + $0x34] sm:$0xff]   ;;  %v1162_v21 = vadd.f32 %v10065_v10, %v9942_v50  ;;  %v10216_v35 = vld [vmem:[%s9763_s18 + $0x3c] sm:$0xff]  ;;  %v2336_v13 = vshrl.u32 %v10176_v41, 16 }
 0x14e   : > { %v13395_v50 = vshll.u32 %v10216_v35, 16  ;;  %v9294_v10 = vld [vmem:[%s9763_s18 + $0x40] sm:$0xff]  }
 0x14f   : > { %v1129_v58 = vpop.f32.mrf.mxu1 }
 0x150   : > { %v1130_v42 = vadd.f32 %v1129_v58, %v758_v24  ;;  %v2339_v58 = vshll.u32 %v10211_v56, 16 }
 0x151   : > { %8829 = vmatmul.msk.bf16.gmra.mxu2 %vm626_vm2, %v2853_v51  ;;  %v2338_v51 = vor.u32 %v2336_v13, %v2334_v2 }
 0x152   : > { %8731 = vmatmul.msk.bf16.gmra.mxu1 %vm626_vm2, %v2335_v57  ;;  %v760_v36 = vpop.f32.mrf.mxu0 }
 0x154   : > { %v1440_v48 = vpop.f32.mrf.mxu3  ;;  %v1408_v44 = vpop.f32.mrf.mxu2 }
 0x155   : > { %v10218_v22 = vadd.f32 %v1440_v48, %v1162_v21  ;;  %v10220_v24 = vadd.f32 %v1408_v44, %v1130_v42  ;;  %v2341_v21 = vrot.slane %v2339_v58, 1  ;;  %v1710_v42 = vshrl.u32 %v9294_v10, 16 }
 0x156   : > { %v1713_v48 = vshll.u32 %v9294_v10, 16  ;;  %v2856_v44 = vor.u32 %v13396_v23, %v2852_v31 }
 0x157   : > { %13476 = vst [vmem:[#allocation7_spill] sm:$0xff] %v10218_v22  ;;  %v1131_v12 = vpop.f32.mrf.mxu1  ;;  %v2342_v30 = vsel %vm2304_vm5, %v2338_v51, %v2341_v21  ;;  %v1712_v26 = vrot.slane %v1710_v42, 3 }
 0x158   : > { %v1132_v57 = vadd.f32 %v1131_v12, %v760_v36  ;;  %v2860_v36 = vrot.slane %v13395_v50, 1  ;;  %v1715_v58 = vrot.slane %v1713_v48, 4 }
 0x159   : > { %8689 = vmatmul.msk.bf16.gmra.mxu3 %vm626_vm2, %v1708_v6 }
 0x15a   : > { %v763_v49 = vpop.f32.mrf.mxu0  ;;  %v2861_v10 = vsel %vm2304_vm5, %v2856_v44, %v2860_v36  ;;  %v1716_v23 = vor.u32 %v1715_v58, %v1712_v26  ;;  %v13398_v26 = vshrl.u32 %v10216_v35, 16 }
 0x15c   : > { %v1443_v12 = vpop.f32.mrf.mxu3  ;;  %v1410_v22 = vpop.f32.mrf.mxu2  ;;  %v1717_v44 = vsel %vm1184_vm4, %v1707_v25, %v1716_v23  ;;  %v1170_v25 = vadd.f32 %v10109_v27, %v9971_v5 }
 0x15d   : > { %8710 = vmatmul.msk.bf16.gmra.mxu0 %vm626_vm2, %v10176_v41  ;;  %v10237_v2 = vadd.f32 %v1443_v12, %v1165_v17  ;;  %v10239_v6 = vadd.f32 %v1410_v22, %v1132_v57  ;;  %v10246_v41 = vld [vmem:[%s9763_s18 + $0x3c] sm:$0xff]   ;;  %v1167_v22 = vadd.f32 %v10098_v9, %v9964_v52  ;;  %v10251_v57 = vld [vmem:[%s9763_s18 + $0x44] sm:$0xff]  ;;  %v2343_v12 = vshrl.u32 %v10211_v56, 16 }
 0x15e   : > { %13478 = vst [vmem:[#allocation9_spill] sm:$0xff] %v10251_v57  ;;  %v13397_v52 = vshll.u32 %v10251_v57, 16  ;;  %v9295_v9 = vld [vmem:[%s9763_s18 + $0x48] sm:$0xff]  }
 0x15f   : > { %13477 = vst [vmem:[#allocation8_spill] sm:$0xff] %v10237_v2  ;;  %v1134_v13 = vpop.f32.mrf.mxu1 }
 0x160   : > { %v1135_v31 = vadd.f32 %v1134_v13, %v763_v49  ;;  %v2346_v13 = vshll.u32 %v10246_v41, 16 }
 0x161   : > { %8830 = vmatmul.msk.bf16.gmra.mxu2 %vm626_vm2, %v2861_v10  ;;  %v2345_v10 = vor.u32 %v2343_v12, %v2341_v21 }
 0x162   : > { %8732 = vmatmul.msk.bf16.gmra.mxu1 %vm626_vm2, %v2342_v30  ;;  %v765_v50 = vpop.f32.mrf.mxu0 }
 0x164   : > { %v1445_v51 = vpop.f32.mrf.mxu3  ;;  %v1413_v42 = vpop.f32.mrf.mxu2 }
 0x165   : > { %v10253_v48 = vadd.f32 %v1445_v51, %v1167_v22  ;;  %v10255_v49 = vadd.f32 %v1413_v42, %v1135_v31  ;;  %v2348_v22 = vrot.slane %v2346_v13, 1  ;;  %v1719_v31 = vshrl.u32 %v9295_v9, 16 }
 0x166   : > { %v1722_v51 = vshll.u32 %v9295_v9, 16  ;;  %v2864_v42 = vor.u32 %v13398_v26, %v2860_v36 }
 0x167   : > { %13479 = vst [vmem:[#allocation10_spill] sm:$0xff] %v10253_v48  ;;  %v1136_v17 = vpop.f32.mrf.mxu1  ;;  %v2349_v5 = vsel %vm2304_vm5, %v2345_v10, %v2348_v22  ;;  %v1721_v27 = vrot.slane %v1719_v31, 3 }
 0x168   : > { %v1137_v30 = vadd.f32 %v1136_v17, %v765_v50  ;;  %v2868_v50 = vrot.slane %v13397_v52, 1  ;;  %v1724_v13 = vrot.slane %v1722_v51, 4 }
 0x169   : > { %8690 = vmatmul.msk.bf16.gmra.mxu3 %vm626_vm2, %v1717_v44 }
 0x16a   : > { %v768_v58 = vpop.f32.mrf.mxu0  ;;  %v2869_v9 = vsel %vm2304_vm5, %v2864_v42, %v2868_v50  ;;  %v1725_v26 = vor.u32 %v1724_v13, %v1721_v27  ;;  %v13400_v27 = vshrl.u32 %v10251_v57, 16 }
 0x16c   : > { %v1448_v17 = vpop.f32.mrf.mxu3  ;;  %v1415_v48 = vpop.f32.mrf.mxu2  ;;  %v1726_v42 = vsel %vm1184_vm4, %v1716_v23, %v1725_v26  ;;  %v1175_v23 = vadd.f32 %v10136_v4, %v9995_v14 }
 0x16d   : > { %8711 = vmatmul.msk.bf16.gmra.mxu0 %vm626_vm2, %v10211_v56  ;;  %v10272_v21 = vadd.f32 %v1448_v17, %v1170_v25  ;;  %v10274_v44 = vadd.f32 %v1415_v48, %v1137_v30  ;;  %v10281_v56 = vld [vmem:[%s9763_s18 + $0x44] sm:$0xff]   ;;  %v1172_v48 = vadd.f32 %v10122_v8, %v9986_v34  ;;  %v10286_v30 = vld [vmem:[%s9763_s18 + $0x4c] sm:$0xff]  ;;  %v2350_v17 = vshrl.u32 %v10246_v41, 16 }
 0x16e   : > { %13481 = vst [vmem:[#allocation12_spill] sm:$0xff] %v10286_v30  ;;  %v13399_v34 = vshll.u32 %v10286_v30, 16  ;;  %v9296_v8 = vld [vmem:[%s9763_s18 + $0x50] sm:$0xff]  }
 0x16f   : > { %13480 = vst [vmem:[#allocation11_spill] sm:$0xff] %v10272_v21  ;;  %v1139_v12 = vpop.f32.mrf.mxu1 }
 0x170   : > { %v1140_v36 = vadd.f32 %v1139_v12, %v768_v58  ;;  %v2353_v12 = vshll.u32 %v10281_v56, 16 }
 0x171   : > { %8831 = vmatmul.msk.bf16.gmra.mxu2 %vm626_vm2, %v2869_v9  ;;  %v2352_v9 = vor.u32 %v2350_v17, %v2348_v22 }
 0x172   : > { %8733 = vmatmul.msk.bf16.gmra.mxu1 %vm626_vm2, %v2349_v5  ;;  %v770_v52 = vpop.f32.mrf.mxu0 }
 0x174   : > { %v1450_v10 = vpop.f32.mrf.mxu3  ;;  %v1418_v31 = vpop.f32.mrf.mxu2 }
 0x175   : > { %v10288_v51 = vadd.f32 %v1450_v10, %v1172_v48  ;;  %v10290_v58 = vadd.f32 %v1418_v31, %v1140_v36  ;;  %v2355_v48 = vrot.slane %v2353_v12, 1  ;;  %v1728_v36 = vshrl.u32 %v9296_v8, 16 }
 0x176   : > { %v1731_v10 = vshll.u32 %v9296_v8, 16  ;;  %v2872_v31 = vor.u32 %v13400_v27, %v2868_v50 }
 0x177   : > { %13482 = vst [vmem:[#allocation13_spill] sm:$0xff] %v10288_v51  ;;  %v1141_v25 = vpop.f32.mrf.mxu1  ;;  %v2356_v14 = vsel %vm2304_vm5, %v2352_v9, %v2355_v48  ;;  %v1730_v4 = vrot.slane %v1728_v36, 3  ;;  %v2357_v36 = vshrl.u32 %v10281_v56, 16 }
 0x178   : > { %v1142_v5 = vadd.f32 %v1141_v25, %v770_v52  ;;  %v2876_v52 = vrot.slane %v13399_v34, 1  ;;  %v1733_v12 = vrot.slane %v1731_v10, 4 }
 0x179   : > { %8691 = vmatmul.msk.bf16.gmra.mxu3 %vm626_vm2, %v1726_v42 }
 0x17a   : > { %v773_v13 = vpop.f32.mrf.mxu0  ;;  %v2877_v8 = vsel %vm2304_vm5, %v2872_v31, %v2876_v52  ;;  %v1734_v27 = vor.u32 %v1733_v12, %v1730_v4  ;;  %v9297_v4 = vld [vmem:[%s9763_s18 + $0x58] sm:$0xff]   ;;  %v9203_v12 = vld [vmem:[%s13383_s3 + $0x8] sm:$0xff] }
 0x17b   : > { %4500 = vmatpush.bf16.msra.mxu1 %v9203_v12 }
 0x17c   : > { %v1453_v25 = vpop.f32.mrf.mxu3  ;;  %v1420_v51 = vpop.f32.mrf.mxu2 }
 0x17d   : > { %8712 = vmatmul.msk.bf16.gmra.mxu0 %vm626_vm2, %v10246_v41  ;;  %v10307_v22 = vadd.f32 %v1453_v25, %v1175_v23  ;;  %v10309_v42 = vadd.f32 %v1420_v51, %v1142_v5  ;;  %v10316_v41 = vld [vmem:[%s9763_s18 + $0x4c] sm:$0xff]   ;;  %v10319_v23 = vld [vmem:[%s9763_s18 + $0x54] sm:$0xff] }
 0x17e   : > { %v2360_v10 = vshll.u32 %v10316_v41, 16 }
 0x17f   : > { %13483 = vst [vmem:[#allocation14_spill] sm:$0xff] %v10307_v22  ;;  %v1144_v17 = vpop.f32.mrf.mxu1 }
 0x180   : > { %v1145_v50 = vadd.f32 %v1144_v17, %v773_v13  ;;  %v1735_v13 = vsel %vm1184_vm4, %v1725_v26, %v1734_v27  ;;  %v13401_v17 = vshrl.u32 %v10286_v30, 16  ;;  %v2362_v26 = vrot.slane %v2360_v10, 1 }
 0x181   : > { %8832 = vmatmul.msk.bf16.gmra.mxu2 %vm626_vm2, %v2877_v8  ;;  %v2359_v8 = vor.u32 %v2357_v36, %v2355_v48 }
 0x182   : > { %8734 = vmatmul.msk.bf16.gmra.mxu1 %vm626_vm2, %v2356_v14  ;;  %v775_v34 = vpop.f32.mrf.mxu0  ;;  %v13402_v14 = vshll.u32 %v10319_v23, 16 }
 0x183   : > { %v2363_v36 = vsel %vm2304_vm5, %v2359_v8, %v2362_v26 }
 0x184   : > { %v1455_v51 = vpop.f32.mrf.mxu3  ;;  %v1423_v5 = vpop.f32.mrf.mxu2 }
 0x185   : > { %v10321_v25 = vadd.f32 %v1423_v5, %v1145_v50  ;;  %v1737_v51 = vshrl.u32 %v9297_v4, 16  ;;  %v1740_v5 = vshll.u32 %v9297_v4, 16 }
 0x187   : > { %v1146_v9 = vpop.f32.mrf.mxu1  ;;  %v1739_v10 = vrot.slane %v1737_v51, 3  ;;  %v1742_v4 = vrot.slane %v1740_v5, 4  ;;  %v2364_v5 = vshrl.u32 %v10316_v41, 16 }
 0x188   : > { %v1147_v31 = vadd.f32 %v1146_v9, %v775_v34  ;;  %v2880_v34 = vor.u32 %v13401_v17, %v2876_v52  ;;  %v2884_v9 = vrot.slane %v13402_v14, 1 }
 0x189   : > { %8692 = vmatmul.msk.bf16.gmra.mxu3 %vm626_vm2, %v1735_v13  ;;  %v1743_v30 = vor.u32 %v1742_v4, %v1739_v10  ;;  %v9298_v10 = vld [vmem:[%s9763_s18 + $0x60] sm:$0xff]   ;;  %v2366_v57 = vor.u32 %v2364_v5, %v2362_v26 }
 0x18a   : > { %v778_v50 = vpop.f32.mrf.mxu0  ;;  %v2885_v17 = vsel %vm2304_vm5, %v2880_v34, %v2884_v9 }
 0x18b   : > { %v1744_v51 = vsel %vm1184_vm4, %v1734_v27, %v1743_v30 }
 0x18c   : > { %v1910_v22 = vpop.f32.mrf.mxu3  ;;  %v1425_v21 = vpop.f32.mrf.mxu2 }
 0x18d   : > { %8713 = vmatmul.msk.bf16.gmra.mxu0 %vm626_vm2, %v10281_v56  ;;  %v2014_v13 = vadd.f32 %v1910_v22, %v9914_v38  ;;  %v10340_v12 = vadd.f32 %v1425_v21, %v1147_v31  ;;  %v10347_v56 = vld [vmem:[%s9763_s18 + $0x54] sm:$0xff]   ;;  %v10350_v38 = vld [vmem:[%s9763_s18 + $0x5c] sm:$0xff] }
 0x18f   : > { %v1149_v48 = vpop.f32.mrf.mxu1 }
 0x190   : > { %v1150_v52 = vadd.f32 %v1149_v48, %v778_v50  ;;  %v13408_v48 = vshrl.u32 %v10319_v23, 16 }
 0x191   : > { %8833 = vmatmul.msk.bf16.gmra.mxu2 %vm626_vm2, %v2885_v17  ;;  %v2367_v17 = vshll.u32 %v10347_v56, 16 }
 0x192   : > { %8735 = vmatmul.msk.bf16.gmra.mxu1 %vm626_vm2, %v2363_v36  ;;  %v780_v14 = vpop.f32.mrf.mxu0  ;;  %v13407_v36 = vshll.u32 %v10350_v38, 16  ;;  %v2888_v27 = vor.u32 %v13408_v48, %v2884_v9 }
 0x194   : > { %v1912_v21 = vpop.f32.mrf.mxu3  ;;  %v1428_v22 = vpop.f32.mrf.mxu2  ;;  %v2892_v2 = vrot.slane %v13407_v36, 1 }
 0x195   : > { %v2015_v31 = vadd.f32 %v1912_v21, %v9933_v1  ;;  %v10353_v8 = vadd.f32 %v1428_v22, %v1150_v52  ;;  %v2369_v1 = vrot.slane %v2367_v17, 1  ;;  %v1746_v52 = vshrl.u32 %v9298_v10, 16 }
 0x196   : > { %v1749_v21 = vshll.u32 %v9298_v10, 16 }
 0x197   : > { %v1151_v50 = vpop.f32.mrf.mxu1  ;;  %v1748_v17 = vrot.slane %v1746_v52, 3 }
 0x198   : > { %v1152_v34 = vadd.f32 %v1151_v50, %v780_v14  ;;  %v1751_v10 = vrot.slane %v1749_v21, 4 }
 0x199   : > { %8693 = vmatmul.msk.bf16.gmra.mxu3 %vm626_vm2, %v1744_v51 }
 0x19a   : > { %v2153_v4 = vpop.f32.mrf.mxu0  ;;  %v1752_v48 = vor.u32 %v1751_v10, %v1748_v17  ;;  %v13410_v17 = vshrl.u32 %v10350_v38, 16 }
 0x19b   : > { %v2257_v22 = vadd.f32 %v2153_v4, %v2014_v13  ;;  %v2370_v13 = vsel %vm2304_vm5, %v2366_v57, %v2369_v1  ;;  %v2893_v4 = vsel %vm2304_vm5, %v2888_v27, %v2892_v2  ;;  %v2371_v27 = vshrl.u32 %v10347_v56, 16 }
 0x19c   : > { %v1915_v14 = vpop.f32.mrf.mxu3  ;;  %v1430_v50 = vpop.f32.mrf.mxu2 }
 0x19d   : > { %8714 = vmatmul.msk.bf16.gmra.mxu0 %vm626_vm2, %v10316_v41  ;;  %v2016_v51 = vadd.f32 %v1915_v14, %v9946_v16  ;;  %v10369_v26 = vadd.f32 %v1430_v50, %v1152_v34  ;;  %v10376_v41 = vld [vmem:[%s9763_s18 + $0x5c] sm:$0xff]   ;;  %v10379_v34 = vld [vmem:[%s9763_s18 + $0x64] sm:$0xff] }
 0x19f   : > { %v2527_v5 = vpop.f32.mrf.mxu1 }
 0x1a0   : > { %v2631_v9 = vadd.f32 %v2527_v5, %v2257_v22  ;;  %v1753_v22 = vsel %vm1184_vm4, %v1743_v30, %v1752_v48  ;;  %v2374_v5 = vshll.u32 %v10376_v41, 16  ;;  %v2896_v30 = vor.u32 %v13410_v17, %v2892_v2 }
 0x1a1   : > { %8834 = vmatmul.msk.bf16.gmra.mxu2 %vm626_vm2, %v2893_v4  ;;  %v2373_v4 = vor.u32 %v2371_v27, %v2369_v1 }
 0x1a2   : > { %8736 = vmatmul.msk.bf16.gmra.mxu1 %vm626_vm2, %v2370_v13  ;;  %v2155_v36 = vpop.f32.mrf.mxu0 }
 0x1a3   : > { %v2258_v16 = vadd.f32 %v2155_v36, %v2015_v31  ;;  %v13409_v31 = vshll.u32 %v10379_v34, 16  ;;  %v9299_v36 = vld [vmem:[%s9763_s18 + $0x68] sm:$0xff]  }
 0x1a4   : > { %v1917_v14 = vpop.f32.mrf.mxu3  ;;  %v3060_v50 = vpop.f32.mrf.mxu2 }
 0x1a5   : > { %v2017_v57 = vadd.f32 %v1917_v14, %v9957_v37  ;;  %v10382_v52 = vadd.f32 %v3060_v50, %v2631_v9  ;;  %v2376_v37 = vrot.slane %v2374_v5, 1  ;;  %v1755_v9 = vshrl.u32 %v9299_v36, 16 }
 0x1a6   : > { %v1758_v14 = vshll.u32 %v9299_v36, 16 }
 0x1a7   : > { %13484 = vst [vmem:[#allocation15_spill] sm:$0xff] %v10382_v52  ;;  %v2529_v21 = vpop.f32.mrf.mxu1  ;;  %v2900_v52 = vrot.slane %v13409_v31, 1  ;;  %v1757_v5 = vrot.slane %v1755_v9, 3 }
 0x1a8   : > { %v2632_v13 = vadd.f32 %v2529_v21, %v2258_v16  ;;  %v1760_v36 = vrot.slane %v1758_v14, 4 }
 0x1a9   : > { %8694 = vmatmul.msk.bf16.gmra.mxu3 %vm626_vm2, %v1753_v22 }
 0x1aa   : > { %v2158_v10 = vpop.f32.mrf.mxu0  ;;  %v1761_v17 = vor.u32 %v1760_v36, %v1757_v5  ;;  %v13412_v5 = vshrl.u32 %v10379_v34, 16 }
 0x1ab   : > { %v2259_v50 = vadd.f32 %v2158_v10, %v2016_v51  ;;  %v2377_v51 = vsel %vm2304_vm5, %v2373_v4, %v2376_v37  ;;  %v2901_v10 = vsel %vm2304_vm5, %v2896_v30, %v2900_v52  ;;  %v2378_v30 = vshrl.u32 %v10376_v41, 16 }
 0x1ac   : > { %v1920_v16 = vpop.f32.mrf.mxu3  ;;  %v3062_v21 = vpop.f32.mrf.mxu2 }
 0x1ad   : > { %8715 = vmatmul.msk.bf16.gmra.mxu0 %vm626_vm2, %v10347_v56  ;;  %v2018_v22 = vadd.f32 %v1920_v16, %v9967_v53  ;;  %v10398_v1 = vadd.f32 %v3062_v21, %v2632_v13  ;;  %v10405_v56 = vld [vmem:[%s9763_s18 + $0x64] sm:$0xff]   ;;  %v10408_v13 = vld [vmem:[%s9763_s18 + $0x6c] sm:$0xff] }
 0x1af   : > { %v2532_v27 = vpop.f32.mrf.mxu1 }
 0x1b0   : > { %v2633_v2 = vadd.f32 %v2532_v27, %v2259_v50  ;;  %v1762_v50 = vsel %vm1184_vm4, %v1752_v48, %v1761_v17  ;;  %v2381_v27 = vshll.u32 %v10405_v56, 16  ;;  %v2904_v48 = vor.u32 %v13412_v5, %v2900_v52 }
 0x1b1   : > { %8835 = vmatmul.msk.bf16.gmra.mxu2 %vm626_vm2, %v2901_v10  ;;  %v2380_v10 = vor.u32 %v2378_v30, %v2376_v37 }
 0x1b2   : > { %8737 = vmatmul.msk.bf16.gmra.mxu1 %vm626_vm2, %v2377_v51  ;;  %v2160_v31 = vpop.f32.mrf.mxu0 }
 0x1b3   : > { %v2260_v53 = vadd.f32 %v2160_v31, %v2017_v57  ;;  %v13411_v57 = vshll.u32 %v10408_v13, 16  ;;  %v9300_v31 = vld [vmem:[%s9763_s18 + $0x70] sm:$0xff]  }
 0x1b4   : > { %v1922_v16 = vpop.f32.mrf.mxu3  ;;  %v3065_v21 = vpop.f32.mrf.mxu2 }
 0x1b5   : > { %v2019_v4 = vadd.f32 %v1922_v16, %v9978_v7  ;;  %v10411_v9 = vadd.f32 %v3065_v21, %v2633_v2  ;;  %v2383_v7 = vrot.slane %v2381_v27, 1  ;;  %v1764_v2 = vshrl.u32 %v9300_v31, 16 }
 0x1b6   : > { %v1767_v16 = vshll.u32 %v9300_v31, 16 }
 0x1b7   : > { %13485 = vst [vmem:[#allocation16_spill] sm:$0xff] %v10411_v9  ;;  %v2534_v14 = vpop.f32.mrf.mxu1  ;;  %v2908_v9 = vrot.slane %v13411_v57, 1  ;;  %v1766_v27 = vrot.slane %v1764_v2, 3 }
 0x1b8   : > { %v2634_v51 = vadd.f32 %v2534_v14, %v2260_v53  ;;  %v1769_v31 = vrot.slane %v1767_v16, 4 }
 0x1b9   : > { %8695 = vmatmul.msk.bf16.gmra.mxu3 %vm626_vm2, %v1762_v50 }
 0x1ba   : > { %v2163_v36 = vpop.f32.mrf.mxu0  ;;  %v1770_v5 = vor.u32 %v1769_v31, %v1766_v27  ;;  %v13414_v27 = vshrl.u32 %v10408_v13, 16 }
 0x1bb   : > { %v2261_v21 = vadd.f32 %v2163_v36, %v2018_v22  ;;  %v2384_v22 = vsel %vm2304_vm5, %v2380_v10, %v2383_v7  ;;  %v2909_v36 = vsel %vm2304_vm5, %v2904_v48, %v2908_v9  ;;  %v2385_v48 = vshrl.u32 %v10405_v56, 16 }
 0x1bc   : > { %v1925_v53 = vpop.f32.mrf.mxu3  ;;  %v3067_v14 = vpop.f32.mrf.mxu2 }
 0x1bd   : > { %8716 = vmatmul.msk.bf16.gmra.mxu0 %vm626_vm2, %v10376_v41  ;;  %v2020_v50 = vadd.f32 %v1925_v53, %v9991_v28  ;;  %v10427_v37 = vadd.f32 %v3067_v14, %v2634_v51  ;;  %v10434_v41 = vld [vmem:[%s9763_s18 + $0x6c] sm:$0xff]   ;;  %v10437_v51 = vld [vmem:[%s9763_s18 + $0x74] sm:$0xff] }
 0x1bf   : > { %v2537_v30 = vpop.f32.mrf.mxu1 }
 0x1c0   : > { %v2635_v52 = vadd.f32 %v2537_v30, %v2261_v21  ;;  %v1771_v21 = vsel %vm1184_vm4, %v1761_v17, %v1770_v5  ;;  %v2388_v30 = vshll.u32 %v10434_v41, 16  ;;  %v2912_v17 = vor.u32 %v13414_v27, %v2908_v9 }
 0x1c1   : > { %8836 = vmatmul.msk.bf16.gmra.mxu2 %vm626_vm2, %v2909_v36  ;;  %v2387_v36 = vor.u32 %v2385_v48, %v2383_v7 }
 0x1c2   : > { %8738 = vmatmul.msk.bf16.gmra.mxu1 %vm626_vm2, %v2384_v22  ;;  %v2165_v57 = vpop.f32.mrf.mxu0 }
 0x1c3   : > { %v2262_v28 = vadd.f32 %v2165_v57, %v2019_v4  ;;  %v13413_v4 = vshll.u32 %v10437_v51, 16  ;;  %v9301_v57 = vld [vmem:[%s9763_s18 + $0x78] sm:$0xff]  }
 0x1c4   : > { %v1927_v53 = vpop.f32.mrf.mxu3  ;;  %v3070_v14 = vpop.f32.mrf.mxu2 }
 0x1c5   : > { %v2021_v10 = vadd.f32 %v1927_v53, %v9998_v54  ;;  %v10440_v2 = vadd.f32 %v3070_v14, %v2635_v52  ;;  %v2390_v54 = vrot.slane %v2388_v30, 1  ;;  %v1773_v52 = vshrl.u32 %v9301_v57, 16 }
 0x1c6   : > { %v1776_v53 = vshll.u32 %v9301_v57, 16 }
 0x1c7   : > { %13486 = vst [vmem:[#allocation17_spill] sm:$0xff] %v10440_v2  ;;  %v2539_v16 = vpop.f32.mrf.mxu1  ;;  %v2916_v2 = vrot.slane %v13413_v4, 1  ;;  %v1775_v30 = vrot.slane %v1773_v52, 3 }
 0x1c8   : > { %v2636_v22 = vadd.f32 %v2539_v16, %v2262_v28  ;;  %v1778_v57 = vrot.slane %v1776_v53, 4 }
 0x1c9   : > { %8696 = vmatmul.msk.bf16.gmra.mxu3 %vm626_vm2, %v1771_v21 }
 0x1ca   : > { %v2168_v31 = vpop.f32.mrf.mxu0  ;;  %v1779_v27 = vor.u32 %v1778_v57, %v1775_v30  ;;  %v13416_v30 = vshrl.u32 %v10437_v51, 16 }
 0x1cb   : > { %v2263_v14 = vadd.f32 %v2168_v31, %v2020_v50  ;;  %v2391_v50 = vsel %vm2304_vm5, %v2387_v36, %v2390_v54  ;;  %v2917_v31 = vsel %vm2304_vm5, %v2912_v17, %v2916_v2  ;;  %v2392_v17 = vshrl.u32 %v10434_v41, 16 }
 0x1cc   : > { %v1930_v28 = vpop.f32.mrf.mxu3  ;;  %v3072_v16 = vpop.f32.mrf.mxu2 }
 0x1cd   : > { %8717 = vmatmul.msk.bf16.gmra.mxu0 %vm626_vm2, %v10405_v56  ;;  %v2022_v21 = vadd.f32 %v1930_v28, %v10010_v3  ;;  %v10456_v7 = vadd.f32 %v3072_v16, %v2636_v22  ;;  %v10463_v56 = vld [vmem:[%s9763_s18 + $0x74] sm:$0xff]   ;;  %v10466_v22 = vld [vmem:[%s9763_s18 + $0x7c] sm:$0xff] }
 0x1ce   : > { %13487 = vst [vmem:[#allocation18_spill] sm:$0xff] %v10466_v22 }
 0x1cf   : > { %v2542_v48 = vpop.f32.mrf.mxu1 }
 0x1d0   : > { %v2637_v9 = vadd.f32 %v2542_v48, %v2263_v14  ;;  %v1780_v14 = vsel %vm1184_vm4, %v1770_v5, %v1779_v27  ;;  %v2395_v48 = vshll.u32 %v10463_v56, 16  ;;  %v2920_v5 = vor.u32 %v13416_v30, %v2916_v2 }
 0x1d1   : > { %8837 = vmatmul.msk.bf16.gmra.mxu2 %vm626_vm2, %v2917_v31  ;;  %v2394_v31 = vor.u32 %v2392_v17, %v2390_v54 }
 0x1d2   : > { %8739 = vmatmul.msk.bf16.gmra.mxu1 %vm626_vm2, %v2391_v50  ;;  %v2170_v4 = vpop.f32.mrf.mxu0 }
 0x1d3   : > { %v2264_v3 = vadd.f32 %v2170_v4, %v2021_v10  ;;  %v13415_v10 = vshll.u32 %v10466_v22, 16  ;;  %v9302_v4 = vld [vmem:[%s9763_s18 + $0x80] sm:$0xff]  }
 0x1d4   : > { %v1932_v28 = vpop.f32.mrf.mxu3  ;;  %v3075_v16 = vpop.f32.mrf.mxu2 }
 0x1d5   : > { %v2023_v36 = vadd.f32 %v1932_v28, %v10021_v29  ;;  %v10469_v52 = vadd.f32 %v3075_v16, %v2637_v9  ;;  %v2397_v29 = vrot.slane %v2395_v48, 1  ;;  %v1782_v9 = vshrl.u32 %v9302_v4, 16 }
 0x1d6   : > { %v1785_v28 = vshll.u32 %v9302_v4, 16 }
 0x1d7   : > { %13488 = vst [vmem:[#allocation19_spill] sm:$0xff] %v10469_v52  ;;  %v2544_v53 = vpop.f32.mrf.mxu1  ;;  %v2924_v52 = vrot.slane %v13415_v10, 1  ;;  %v1784_v48 = vrot.slane %v1782_v9, 3 }
 0x1d8   : > { %v2638_v50 = vadd.f32 %v2544_v53, %v2264_v3  ;;  %v1787_v4 = vrot.slane %v1785_v28, 4 }
 0x1d9   : > { %8697 = vmatmul.msk.bf16.gmra.mxu3 %vm626_vm2, %v1780_v14 }
 0x1da   : > { %v2173_v57 = vpop.f32.mrf.mxu0  ;;  %v1788_v30 = vor.u32 %v1787_v4, %v1784_v48  ;;  %v13418_v48 = vshrl.u32 %v10466_v22, 16 }
 0x1db   : > { %v2265_v16 = vadd.f32 %v2173_v57, %v2022_v21  ;;  %v2398_v21 = vsel %vm2304_vm5, %v2394_v31, %v2397_v29  ;;  %v2925_v57 = vsel %vm2304_vm5, %v2920_v5, %v2924_v52  ;;  %v2399_v5 = vshrl.u32 %v10463_v56, 16 }
 0x1dc   : > { %v1935_v3 = vpop.f32.mrf.mxu3  ;;  %v3077_v53 = vpop.f32.mrf.mxu2 }
 0x1dd   : > { %8718 = vmatmul.msk.bf16.gmra.mxu0 %vm626_vm2, %v10434_v41  ;;  %v2024_v14 = vadd.f32 %v1935_v3, %v10038_v61  ;;  %v10485_v54 = vadd.f32 %v3077_v53, %v2638_v50  ;;  %v10492_v41 = vld [vmem:[%s9763_s18 + $0x7c] sm:$0xff]   ;;  %v10495_v50 = vld [vmem:[%s9763_s18 + $0x84] sm:$0xff] }
 0x1df   : > { %v2547_v17 = vpop.f32.mrf.mxu1 }
 0x1e0   : > { %v2639_v2 = vadd.f32 %v2547_v17, %v2265_v16  ;;  %v1789_v16 = vsel %vm1184_vm4, %v1779_v27, %v1788_v30  ;;  %v2402_v17 = vshll.u32 %v10492_v41, 16  ;;  %v2928_v27 = vor.u32 %v13418_v48, %v2924_v52 }
 0x1e1   : > { %8838 = vmatmul.msk.bf16.gmra.mxu2 %vm626_vm2, %v2925_v57  ;;  %v2401_v57 = vor.u32 %v2399_v5, %v2397_v29 }
 0x1e2   : > { %8740 = vmatmul.msk.bf16.gmra.mxu1 %vm626_vm2, %v2398_v21  ;;  %v2175_v10 = vpop.f32.mrf.mxu0 }
 0x1e3   : > { %v2266_v61 = vadd.f32 %v2175_v10, %v2023_v36  ;;  %v13417_v36 = vshll.u32 %v10495_v50, 16  ;;  %v9303_v10 = vld [vmem:[%s9763_s18 + $0x88] sm:$0xff]  }
 0x1e4   : > { %v1937_v3 = vpop.f32.mrf.mxu3  ;;  %v3080_v53 = vpop.f32.mrf.mxu2 }
 0x1e5   : > { %v2025_v31 = vadd.f32 %v1937_v3, %v10055_v39  ;;  %v10498_v9 = vadd.f32 %v3080_v53, %v2639_v2  ;;  %v2404_v39 = vrot.slane %v2402_v17, 1  ;;  %v1791_v2 = vshrl.u32 %v9303_v10, 16 }
 0x1e6   : > { %v1794_v3 = vshll.u32 %v9303_v10, 16 }
 0x1e7   : > { %13489 = vst [vmem:[#allocation20_spill] sm:$0xff] %v10498_v9  ;;  %v2549_v28 = vpop.f32.mrf.mxu1  ;;  %v2932_v9 = vrot.slane %v13417_v36, 1  ;;  %v1793_v17 = vrot.slane %v1791_v2, 3 }
 0x1e8   : > { %v2640_v21 = vadd.f32 %v2549_v28, %v2266_v61  ;;  %v1796_v10 = vrot.slane %v1794_v3, 4 }
 0x1e9   : > { %8698 = vmatmul.msk.bf16.gmra.mxu3 %vm626_vm2, %v1789_v16 }
 0x1ea   : > { %v2178_v4 = vpop.f32.mrf.mxu0  ;;  %v1797_v48 = vor.u32 %v1796_v10, %v1793_v17  ;;  %v13422_v17 = vshrl.u32 %v10495_v50, 16  ;;  %v296_v10 = vld [vmem:[%s13386_s6] sm:$0xff] }
 0x1eb   : > { %v2267_v53 = vadd.f32 %v2178_v4, %v2024_v14  ;;  %v2405_v14 = vsel %vm2304_vm5, %v2401_v57, %v2404_v39  ;;  %v2933_v4 = vsel %vm2304_vm5, %v2928_v27, %v2932_v9  ;;  %v2406_v27 = vshrl.u32 %v10492_v41, 16 }
 0x1ec   : > { %v1940_v61 = vpop.f32.mrf.mxu3  ;;  %v3082_v28 = vpop.f32.mrf.mxu2 }
 0x1ed   : > { %8719 = vmatmul.msk.bf16.gmra.mxu0 %vm626_vm2, %v10463_v56  ;;  %v2026_v16 = vadd.f32 %v1940_v61, %v10067_v63  ;;  %v10514_v29 = vadd.f32 %v3082_v28, %v2640_v21  ;;  %v10521_v56 = vld [vmem:[%s9763_s18 + $0x84] sm:$0xff]   ;;  %v10524_v21 = vld [vmem:[%s9763_s18 + $0x8c] sm:$0xff] }
 0x1ef   : > { %13490 = vst [vmem:[#allocation21_spill] sm:$0xff] %v10514_v29  ;;  %v2552_v5 = vpop.f32.mrf.mxu1 }
 0x1f0   : > { %v2641_v52 = vadd.f32 %v2552_v5, %v2267_v53  ;;  %v1798_v53 = vsel %vm1184_vm4, %v1788_v30, %v1797_v48  ;;  %v2409_v5 = vshll.u32 %v10521_v56, 16 }
 0x1f1   : > { %8839 = vmatmul.msk.bf16.gmra.mxu2 %vm626_vm2, %v2933_v4 }
 0x1f2   : > { %8741 = vmatmul.msk.bf16.gmra.mxu1 %vm626_vm2, %v2405_v14  ;;  %v2180_v36 = vpop.f32.mrf.mxu0  ;;  %v2411_v4 = vrot.slane %v2409_v5, 1 }
 0x1f3   : > { %v2268_v63 = vadd.f32 %v2180_v36, %v2025_v31  ;;  %v13421_v31 = vshll.u32 %v10524_v21, 16  ;;  %v9304_v36 = vld [vmem:[%s9763_s18 + $0x90] sm:$0xff]  }
 0x1f4   : > { %v1942_v61 = vpop.f32.mrf.mxu3  ;;  %v3085_v28 = vpop.f32.mrf.mxu2 }
 0x1f5   : > { %v2027_v57 = vadd.f32 %v1942_v61, %v10082_v55  ;;  %v10527_v2 = vadd.f32 %v3085_v28, %v2641_v52  ;;  %v9688_v55 = vmov 0   ;;  %v2408_v52 = vor.u32 %v2406_v27, %v2404_v39 }
 0x1f6   : > { %9459 = vset.pattern.permute.xlu0 %v9688_v55  ;;  %9460 = vset.pattern.permute.xlu1 %v9688_v55  ;;  %v1800_v61 = vshrl.u32 %v9304_v36, 16 }
 0x1f7   : > { %13491 = vst [vmem:[#allocation22_spill] sm:$0xff] %v10527_v2  ;;  %v2554_v3 = vpop.f32.mrf.mxu1  ;;  %4010 = vperm.xlu0 %9459, %v296_v10   ;;  %9461 = vset.pattern.permute.xlu2 %v9688_v55  ;;  %v2940_v2 = vrot.slane %v13421_v31, 1  ;;  %v297_v55 = vld [vmem:[%s13386_s6 + $0x8] sm:$0xff] }
 0x1f8   : > { %v2642_v14 = vadd.f32 %v2554_v3, %v2268_v63  ;;  %v1803_v63 = vshll.u32 %v9304_v36, 16  ;;  %v2936_v3 = vor.u32 %v13422_v17, %v2932_v9  ;;  %v1802_v5 = vrot.slane %v1800_v61, 3 }
 0x1f9   : > { %8699 = vmatmul.msk.bf16.gmra.mxu3 %vm626_vm2, %v1798_v53 }
 0x1fa   : > { %v2183_v30 = vpop.f32.mrf.mxu0  ;;  %v1805_v36 = vrot.slane %v1803_v63, 4  ;;  %v2941_v10 = vsel %vm2304_vm5, %v2936_v3, %v2940_v2 }
 0x1fb   : > { %v2269_v28 = vadd.f32 %v2183_v30, %v2026_v16  ;;  %v2412_v16 = vsel %vm2304_vm5, %v2408_v52, %v2411_v4 }
 0x1fc   : > { %v1945_v29 = vpop.f32.mrf.mxu3  ;;  %v3087_v22 = vpop.f32.mrf.mxu2 }
 0x1fd   : > { %8720 = vmatmul.msk.bf16.gmra.mxu0 %vm626_vm2, %v10492_v41  ;;  %v2028_v53 = vadd.f32 %v1945_v29, %v10101_v60  ;;  %v10546_v39 = vadd.f32 %v3087_v22, %v2642_v14  ;;  %v1806_v22 = vor.u32 %v1805_v36, %v1802_v5  ;;  %v10556_v41 = vld [vmem:[%s9763_s18 + $0x8c] sm:$0xff]   ;;  %v10559_v14 = vld [vmem:[%s9763_s18 + $0x94] sm:$0xff]  ;;  %v13424_v5 = vshrl.u32 %v10524_v21, 16 }
 0x1fe   : > { %13492 = vst [vmem:[#allocation23_spill] sm:$0xff] %v10559_v14  ;;  %v9305_v36 = vld [vmem:[%s9763_s18 + $0x98] sm:$0xff]  }
 0x1ff   : > { %v2557_v27 = vpop.f32.mrf.mxu1  ;;  %4015 = vperm.xlu0 %9459, %v297_v55   ;;  %v1807_v3 = vsel %vm1184_vm4, %v1797_v48, %v1806_v22  ;;  %v298_v55 = vld [vmem:[%s13386_s6 + $0x10] sm:$0xff] }
 0x200   : > { %v2643_v9 = vadd.f32 %v2557_v27, %v2269_v28  ;;  %v2413_v27 = vshrl.u32 %v10521_v56, 16  ;;  %4020 = vperm.xlu1 %9460, %v298_v55  }
 0x201   : > { %8840 = vmatmul.msk.bf16.gmra.mxu2 %vm626_vm2, %v2941_v10 }
 0x202   : > { %8742 = vmatmul.msk.bf16.gmra.mxu1 %vm626_vm2, %v2412_v16  ;;  %v2185_v60 = vpop.f32.mrf.mxu0  ;;  %v2416_v16 = vshll.u32 %v10556_v41, 16 }
 0x203   : > { %v2270_v29 = vadd.f32 %v2185_v60, %v2027_v57  ;;  %v13423_v57 = vshll.u32 %v10559_v14, 16 }
 0x204   : > { %v1947_v30 = vpop.f32.mrf.mxu3  ;;  %v3090_v52 = vpop.f32.mrf.mxu2  ;;  %v2418_v60 = vrot.slane %v2416_v16, 1 }
 0x205   : > { %v2029_v61 = vadd.f32 %v1947_v30, %v10112_v32  ;;  %v10562_v63 = vadd.f32 %v3090_v52, %v2643_v9  ;;  %v302_v32 = vld [vmem:[%s13386_s6 + $0x30] sm:$0xff]  ;;  %v2415_v9 = vor.u32 %v2413_v27, %v2411_v4  ;;  %v1812_v30 = vshll.u32 %v9305_v36, 16 }
 0x206   : > { %v2948_v31 = vrot.slane %v13423_v57, 1 }
 0x207   : > { %13493 = vst [vmem:[#allocation24_spill] sm:$0xff] %v10562_v63  ;;  %v2559_v28 = vpop.f32.mrf.mxu1  ;;  %4040 = vperm.xlu0 %9459, %v302_v32   ;;  %v1814_v16 = vrot.slane %v1812_v30, 4  ;;  %v299_v32 = vld [vmem:[%s13386_s6 + $0x18] sm:$0xff] }
 0x208   : > { %v2644_v10 = vadd.f32 %v2559_v28, %v2270_v29  ;;  %v1809_v29 = vshrl.u32 %v9305_v36, 16  ;;  %v2944_v28 = vor.u32 %v13424_v5, %v2940_v2  ;;  %4025 = vperm.xlu1 %9460, %v299_v32   ;;  %v10614_v32 = vld [vmem:[%s9763_s18 + $0xa0] sm:$0xff]  }
 0x209   : > { %8700 = vmatmul.msk.bf16.gmra.mxu3 %vm626_vm2, %v1807_v3 }
 0x20a   : > { %v2188_v48 = vpop.f32.mrf.mxu0  ;;  %v1811_v27 = vrot.slane %v1809_v29, 3  ;;  %v2949_v36 = vsel %vm2304_vm5, %v2944_v28, %v2948_v31 }
 0x20b   : > { %v2271_v52 = vadd.f32 %v2188_v48, %v2028_v53  ;;  %v2419_v53 = vsel %vm2304_vm5, %v2415_v9, %v2418_v60  ;;  %v10602_v48 = vld [vmem:[%s9763_s18 + $0x9c] sm:$0xff] }
 0x20c   : > { %v1950_v17 = vpop.f32.mrf.mxu3  ;;  %v3092_v63 = vpop.f32.mrf.mxu2 }
 0x20d   : > { %8721 = vmatmul.msk.bf16.gmra.mxu0 %vm626_vm2, %v10521_v56  ;;  %v2030_v3 = vadd.f32 %v1950_v17, %v10124_v33  ;;  %v10584_v55 = vadd.f32 %v3092_v63, %v2644_v10  ;;  %v305_v33 = vld [vmem:[%s13386_s6 + $0x48] sm:$0xff]  ;;  %v10596_v17 = vor.u32 %v1814_v16, %v1811_v27  ;;  %v10599_v63 = vld [vmem:[%s9763_s18 + $0x94] sm:$0xff]  }
 0x20e   : > { %v2423_v27 = vshll.u32 %v10599_v63, 16 }
 0x20f   : > { %13494 = vst [vmem:[#allocation25_spill] sm:$0xff] %v10584_v55  ;;  %v2562_v4 = vpop.f32.mrf.mxu1  ;;  %4055 = vperm.xlu0 %9459, %v305_v33  }
 0x210   : > { %v2645_v2 = vadd.f32 %v2562_v4, %v2271_v52  ;;  %v1816_v4 = vsel %vm1184_vm4, %v1806_v22, %v10596_v17 }
 0x211   : > { %8841 = vmatmul.msk.bf16.gmra.mxu2 %vm626_vm2, %v2949_v36  ;;  %v13426_v36 = vshrl.u32 %v10559_v14, 16 }
 0x212   : > { %8743 = vmatmul.msk.bf16.gmra.mxu1 %vm626_vm2, %v2419_v53  ;;  %v2190_v56 = vpop.f32.mrf.mxu0  ;;  %v2420_v53 = vshrl.u32 %v10556_v41, 16 }
 0x213   : > { %v2272_v10 = vadd.f32 %v2190_v56, %v2029_v61  ;;  %v13425_v61 = vshll.u32 %v10602_v48, 16  ;;  %v2425_v56 = vrot.slane %v2423_v27, 1 }
 0x214   : > { %v1952_v9 = vpop.f32.mrf.mxu3  ;;  %v3095_v29 = vpop.f32.mrf.mxu2  ;;  %v2422_v33 = vor.u32 %v2420_v53, %v2418_v60 }
 0x215   : > { %v2031_v30 = vadd.f32 %v1952_v9, %v10140_v62  ;;  %v10605_v52 = vadd.f32 %v3095_v29, %v2645_v2  ;;  %v303_v62 = vld [vmem:[%s13386_s6 + $0x38] sm:$0xff]  ;;  %v308_v2 = vld [vmem:[%s13386_s6 + $0x60] sm:$0xff]  ;;  %v1821_v9 = vshll.u32 %v10614_v32, 16  ;;  %v2956_v57 = vrot.slane %v13425_v61, 1 }
 0x216   : > { %4045 = vperm.xlu1 %9460, %v303_v62   ;;  %v2426_v27 = vsel %vm2304_vm5, %v2422_v33, %v2425_v56 }
 0x217   : > { %13495 = vst [vmem:[#allocation26_spill] sm:$0xff] %v10605_v52  ;;  %v2564_v28 = vpop.f32.mrf.mxu1  ;;  %4070 = vperm.xlu0 %9459, %v308_v2   ;;  %v1823_v2 = vrot.slane %v1821_v9, 4 }
 0x218   : > { %v2646_v16 = vadd.f32 %v2564_v28, %v2272_v10  ;;  %v1818_v10 = vshrl.u32 %v10614_v32, 16  ;;  %v2952_v28 = vor.u32 %v13426_v36, %v2948_v31  ;;  %v1539_v36 = vld [vmem:[%s9763_s18 + $0xac] sm:$0x3] }
 0x219   : > { %8701 = vmatmul.msk.bf16.gmra.mxu3 %vm626_vm2, %v1816_v4  ;;  %v10652_v9 = vunpack.c.l.b16 %v1539_v36 }
 0x21a   : > { %v2193_v22 = vpop.f32.mrf.mxu0  ;;  %v2957_v61 = vsel %vm2304_vm5, %v2952_v28, %v2956_v57  ;;  %v10655_v28 = vld [vmem:[%s9763_s18 + $0xa4] sm:$0xff] }
 0x21b   : > { %v2273_v29 = vadd.f32 %v2193_v22, %v2030_v3  ;;  %v1820_v3 = vrot.slane %v1818_v10, 3  ;;  %v10636_v22 = vld [vmem:[%s9763_s18 + $0xa8] sm:$0xf] }
 0x21c   : > { %v1955_v62 = vpop.f32.mrf.mxu3  ;;  %v3097_v5 = vpop.f32.mrf.mxu2  ;;  %v1624_v10 = vunpack.c.l.b16 %v10636_v22 }
 0x21d   : > { %8722 = vmatmul.msk.bf16.gmra.mxu0 %vm626_vm2, %v10556_v41  ;;  %v2032_v60 = vadd.f32 %v1955_v62, %v10152_v15  ;;  %v10632_v4 = vadd.f32 %v3097_v5, %v2646_v16  ;;  %v306_v41 = vld [vmem:[%s13386_s6 + $0x50] sm:$0xff]  ;;  %v311_v15 = vld [vmem:[%s13386_s6 + $0x78] sm:$0xff]  ;;  %v1824_v33 = vor.u32 %v1823_v2, %v1820_v3  ;;  %v9202_v62 = vld [vmem:[%s13383_s3] sm:$0xff] }
 0x21e   : > { %4060 = vperm.xlu1 %9460, %v306_v41   ;;  %v10648_v5 = vld [vmem:[%s9763_s18 + $0x9c] sm:$0xff]   ;;  %4682 = vmatpush.bf16.msra.mxu2 %v9202_v62  ;;  %v1646_v2 = vpack.c.b16 %v10652_v9, %v1624_v10 }
 0x21f   : > { %13496 = vst [vmem:[#allocation27_spill] sm:$0xff] %v10632_v4  ;;  %v2567_v53 = vpop.f32.mrf.mxu1  ;;  %4085 = vperm.xlu0 %9459, %v311_v15   ;;  %v2427_v15 = vshrl.u32 %v10599_v63, 16 }
 0x220   : > { %v2647_v31 = vadd.f32 %v2567_v53, %v2273_v29 }
 0x221   : > { %8842 = vmatmul.msk.bf16.gmra.mxu2 %vm626_vm2, %v2957_v61  ;;  %v2430_v61 = vshll.u32 %v10648_v5, 16  ;;  %v2429_v62 = vor.u32 %v2427_v15, %v2425_v56 }
 0x222   : > { %8744 = vmatmul.msk.bf16.gmra.mxu1 %vm626_vm2, %v2426_v27  ;;  %v2195_v16 = vpop.f32.mrf.mxu0 }
 0x223   : > { %v2274_v29 = vadd.f32 %v2195_v16, %v2031_v30  ;;  %v1825_v30 = vsel %vm1184_vm4, %v10596_v17, %v1824_v33  ;;  %v13429_v16 = vshrl.u32 %v10602_v48, 16  ;;  %v2432_v17 = vrot.slane %v2430_v61, 1 }
 0x224   : > { %v1957_v53 = vpop.f32.mrf.mxu3  ;;  %v3100_v27 = vpop.f32.mrf.mxu2 }
 0x225   : > { %v2033_v41 = vadd.f32 %v1957_v53, %v10169_v20  ;;  %v10663_v3 = vadd.f32 %v3100_v27, %v2647_v31  ;;  %v309_v20 = vld [vmem:[%s13386_s6 + $0x68] sm:$0xff]  ;;  %v314_v31 = vld [vmem:[%s13386_s6 + $0x90] sm:$0xff]  ;;  %v1830_v27 = vshll.u32 %v1646_v2, 16  ;;  %v2960_v4 = vor.u32 %v13429_v16, %v2956_v57 }
 0x226   : > { %4075 = vperm.xlu1 %9460, %v309_v20   ;;  %v2433_v56 = vsel %vm2304_vm5, %v2429_v62, %v2432_v17  ;;  %v9287_v57 = vunpack.c.h.b16 %v10614_v32 }
 0x227   : > { %13497 = vst [vmem:[#allocation28_spill] sm:$0xff] %v10663_v3  ;;  %v2569_v36 = vpop.f32.mrf.mxu1  ;;  %4100 = vperm.xlu0 %9459, %v314_v31   ;;  %v13498_v3 = vshll.u32 %v10655_v28, 16  ;;  %v312_v31 = vld [vmem:[%s13386_s6 + $0x80] sm:$0xff] }
 0x228   : > { %v2648_v22 = vadd.f32 %v2569_v36, %v2274_v29  ;;  %v1827_v29 = vshrl.u32 %v1646_v2, 16  ;;  %v1832_v2 = vrot.slane %v1830_v27, 4 }
 0x229   : > { %8702 = vmatmul.msk.bf16.gmra.mxu3 %vm626_vm2, %v1825_v30  ;;  %v2964_v52 = vrot.slane %v13498_v3, 1 }
 0x22a   : > { %v2198_v53 = vpop.f32.mrf.mxu0 }
 0x22b   : > { %v2275_v36 = vadd.f32 %v2198_v53, %v2032_v60  ;;  %v1829_v60 = vrot.slane %v1827_v29, 3  ;;  %v2965_v3 = vsel %vm2304_vm5, %v2960_v4, %v2964_v52  ;;  %v10704_v4 = vld [vmem:[%s9763_s18 + $0xac] sm:$0xff] }
 0x22c   : > { %v1960_v14 = vpop.f32.mrf.mxu3  ;;  %v3102_v55 = vpop.f32.mrf.mxu2 }
 0x22d   : > { %8723 = vmatmul.msk.bf16.gmra.mxu0 %vm626_vm2, %v10599_v63  ;;  %v2034_v30 = vadd.f32 %v1960_v14, %v10185_v47  ;;  %v10685_v15 = vadd.f32 %v3102_v55, %v2648_v22  ;;  %v317_v47 = vld [vmem:[%s13386_s6 + $0xa8] sm:$0xff]  ;;  %v10697_v55 = vor.u32 %v1832_v2, %v1829_v60  ;;  %v10699_v63 = vpack.c.b16 %v1624_v10, %v9287_v57  ;;  %v315_v60 = vld [vmem:[%s13386_s6 + $0x98] sm:$0xff] }
 0x22e   : > { %4090 = vperm.xlu1 %9460, %v312_v31  }
 0x22f   : > { %v2572_v61 = vpop.f32.mrf.mxu1  ;;  %4115 = vperm.xlu0 %9459, %v317_v47   ;;  %v2437_v10 = vshll.u32 %v10699_v63, 16 }
 0x230   : > { %v2649_v20 = vadd.f32 %v2572_v61, %v2275_v36  ;;  %v1834_v36 = vsel %vm1184_vm4, %v1824_v33, %v10697_v55  ;;  %v13430_v61 = vshll.u32 %v10704_v4, 16  ;;  %v320_v33 = vld [vmem:[%s13386_s6 + $0xc0] sm:$0xff] }
 0x231   : > { %8843 = vmatmul.msk.bf16.gmra.mxu2 %vm626_vm2, %v2965_v3 }
 0x232   : > { %8745 = vmatmul.msk.bf16.gmra.mxu1 %vm626_vm2, %v2433_v56  ;;  %v2200_v14 = vpop.f32.mrf.mxu0  ;;  %v2434_v56 = vshrl.u32 %v10648_v5, 16  ;;  %v2972_v47 = vrot.slane %v13430_v61, 1 }
 0x233   : > { %v10701_v32 = vadd.f32 %v2200_v14, %v2033_v41  ;;  %v13431_v41 = vshrl.u32 %v10655_v28, 16  ;;  %v2298_v14 = vld [vmem:[%s9763_s18 + $0xac] sm:$0x7] }
 0x234   : > { %v1962_v22 = vpop.f32.mrf.mxu3  ;;  %v3105_v62 = vpop.f32.mrf.mxu2  ;;  %v2436_v57 = vor.u32 %v2434_v56, %v2432_v17 }
 0x235   : > { %v2035_v53 = vadd.f32 %v1962_v22, %v10204_v59  ;;  %v10707_v29 = vadd.f32 %v3105_v62, %v2649_v20  ;;  %v300_v59 = vld [vmem:[%s13386_s6 + $0x20] sm:$0xff]  ;;  %v2439_v20 = vrot.slane %v2437_v10, 1  ;;  %v2968_v31 = vor.u32 %v13431_v41, %v2964_v52  ;;  %v2712_v62 = vld [vmem:[%s9763_s18 + $0xb4] sm:$0x7] }
 0x236   : > { %4030 = vperm.xlu2 %9461, %v300_v59   ;;  %4105 = vperm.xlu1 %9460, %v315_v60   ;;  %v2796_v10 = vunpack.c.l.b16 %v2712_v62  ;;  %v301_v60 = vld [vmem:[%s13386_s6 + $0x28] sm:$0xff]  ;;  %v13500_v62 = vshll.u32 %v10096_v46, 16 }
 0x237   : > { %v10709_v27 = vpop.f32.mrf.mxu1  ;;  %4130 = vperm.xlu0 %9459, %v320_v33   ;;  %v2440_v17 = vsel %vm2304_vm5, %v2436_v57, %v2439_v20  ;;  %v2973_v52 = vsel %vm2304_vm5, %v2968_v31, %v2972_v47  ;;  %v318_v33 = vld [vmem:[%s13386_s6 + $0xb0] sm:$0xff] }
 0x239   : > { %8703 = vmatmul.msk.bf16.gmra.mxu3 %vm626_vm2, %v1834_v36 }
 0x23a   : > { %v2203_v2 = vpop.f32.mrf.mxu0 }
 0x23b   : > { %v2277_v3 = vadd.f32 %v2203_v2, %v2034_v30  ;;  %v2302_v30 = vunpack.c.l.b16 %v2298_v14 }
 0x23c   : > { %v1965_v22 = vpop.f32.mrf.mxu3  ;;  %v10733_v16 = vpop.f32.mrf.mxu2 }
 0x23d   : > { %8724 = vmatmul.msk.bf16.gmra.mxu0 %vm626_vm2, %v10648_v5  ;;  %v2036_v36 = vadd.f32 %v1965_v22, %v10220_v24  ;;  %v323_v24 = vld [vmem:[%s13386_s6 + $0xd8] sm:$0xff]  ;;  %v10751_v2 = vpack.c.b16 %v2302_v30, %v2302_v30 }
 0x23e   : > { %4035 = vperm.xlu2 %9461, %v301_v60   ;;  %4120 = vperm.xlu1 %9460, %v318_v33   ;;  %v9658_v33 = vld [vmem:[%s9763_s18 + $0x14] sm:$0xe] }
 0x23f   : > { %v2577_v59 = vpop.f32.mrf.mxu1  ;;  %4145 = vperm.xlu0 %9459, %v323_v24   ;;  %v2445_v30 = vshll.u32 %v10751_v2, 16  ;;  %v13432_v24 = vshrl.u32 %v10704_v4, 16 }
 0x240   : > { %v2651_v56 = vadd.f32 %v2577_v59, %v2277_v3  ;;  %v10755_v3 = vpack.c.b16 %v2796_v10, %v2796_v10  ;;  %v3489_v59 = vrot.slane %v13500_v62, 2 }
 0x241   : > { %8844 = vmatmul.msk.bf16.gmra.mxu2 %vm626_vm2, %v2973_v52  ;;  %v2441_v52 = vshrl.u32 %v10699_v63, 16  ;;  %v2447_v62 = vrot.slane %v2445_v30, 1  ;;  %v2976_v61 = vor.u32 %v13432_v24, %v2972_v47  ;;  %v324_v30 = vld [vmem:[%s13386_s6 + $0xe0] sm:$0xff]  ;;  %v13514_v24 = vld [vmem:[#allocation7_spill] sm:$0xff] }
 0x242   : > { %8746 = vmatmul.msk.bf16.gmra.mxu1 %vm626_vm2, %v2440_v17  ;;  %v2205_v5 = vpop.f32.mrf.mxu0 }
 0x243   : > { %v10753_v57 = vadd.f32 %v2205_v5, %v2035_v53  ;;  %v13503_v53 = vshrl.u32 %v10096_v46, 16  ;;  %v2978_v5 = vshll.u32 %v10755_v3, 16 }
 0x244   : > { %v1967_v31 = vpop.f32.mrf.mxu3  ;;  %v3110_v14 = vpop.f32.mrf.mxu2 }
 0x245   : > { %13499 = vst [vmem:[#allocation29_spill] sm:$0xff] %v10753_v57  ;;  %v2037_v22 = vadd.f32 %v1967_v31, %v10239_v6  ;;  %v10760_v60 = vadd.f32 %v3110_v14, %v2651_v56  ;;  %v3488_v10 = vrot.slane %v13503_v53, 1  ;;  %v304_v6 = vld [vmem:[%s13386_s6 + $0x40] sm:$0xff]  ;;  %v321_v56 = vld [vmem:[%s13386_s6 + $0xc8] sm:$0xff]  ;;  %v326_v31 = vld [vmem:[%s13386_s6 + $0xf0] sm:$0xff]  ;;  %v2443_v14 = vor.u32 %v2441_v52, %v2439_v20 }
 0x246   : > { %4050 = vperm.xlu2 %9461, %v304_v6   ;;  %4135 = vperm.xlu1 %9460, %v321_v56   ;;  %v2980_v41 = vrot.slane %v2978_v5, 1 }
 0x247   : > { %13501 = vst [vmem:[#allocation30_spill] sm:$0xff] %v10760_v60  ;;  %v10762_v17 = vpop.f32.mrf.mxu1  ;;  %4160 = vperm.xlu0 %9459, %v326_v31   ;;  %v2448_v20 = vsel %vm2304_vm5, %v2443_v14, %v2447_v62 }
 0x248   : > { %13502 = vst [vmem:[#allocation31_spill] sm:$0xff] %v10762_v17  ;;  %v10784_v17 = vor.u32 %v3489_v59, %v3488_v10  ;;  %v2981_v47 = vsel %vm2304_vm5, %v2976_v61, %v2980_v41  ;;  %v307_v59 = vld [vmem:[%s13386_s6 + $0x58] sm:$0xff] }
 0x249   : > { %8704 = vmatmul.msk.bf16.gmra.mxu3 %vm626_vm2, %v10697_v55  ;;  %v9632_v61 = vld [vmem:[%s9763_s18 + $0x1c] sm:$0xff] }
 0x24a   : > { %v2208_v46 = vpop.f32.mrf.mxu0 }
 0x24b   : > { %v2279_v53 = vadd.f32 %v2208_v46, %v2036_v36  ;;  %v9659_v36 = vor.u32 %v9658_v33, %v10073_v19 }
 0x24c   : > { %v1970_v57 = vpop.f32.mrf.mxu3  ;;  %v10786_v60 = vpop.f32.mrf.mxu2 }
 0x24d   : > { %8725 = vmatmul.msk.bf16.gmra.mxu0 %vm626_vm2, %v10699_v63  ;;  %v2038_v6 = vadd.f32 %v1970_v57, %v10255_v49  ;;  %v329_v49 = vld [vmem:[%s13386_s6 + $0x108] sm:$0xff]  ;;  %v3212_v63 = vrot.slane %v9659_v36, 1  ;;  %v3213_v57 = vrot.slane %v9632_v61, 1 }
 0x24e   : > { %4065 = vperm.xlu2 %9461, %v307_v59   ;;  %4150 = vperm.xlu1 %9460, %v324_v30  }
 0x24f   : > { %v2582_v55 = vpop.f32.mrf.mxu1  ;;  %4175 = vperm.xlu0 %9459, %v329_v49   ;;  %v3214_v14 = vsel %vm3211_vm6, %v3212_v63, %v3213_v57 }
 0x250   : > { %v2653_v52 = vadd.f32 %v2582_v55, %v2279_v53  ;;  %v310_v53 = vld [vmem:[%s13386_s6 + $0x70] sm:$0xff]  ;;  %v332_v55 = vld [vmem:[%s13386_s6 + $0x120] sm:$0xff] }
 0x251   : > { %8845 = vmatmul.msk.bf16.gmra.mxu2 %vm626_vm2, %v2981_v47  ;;  %v2982_v47 = vshrl.u32 %v10755_v3, 16 }
 0x252   : > { %8747 = vmatmul.msk.bf16.gmra.mxu1 %vm626_vm2, %v2448_v20  ;;  %v2210_v19 = vpop.f32.mrf.mxu0  ;;  %v2449_v20 = vshrl.u32 %v10751_v2, 16  ;;  %v313_v2 = vld [vmem:[%s13386_s6 + $0x88] sm:$0xff] }
 0x253   : > { %v10806_v33 = vadd.f32 %v2210_v19, %v2037_v22  ;;  %v327_v22 = vld [vmem:[%s13386_s6 + $0xf8] sm:$0xff] }
 0x254   : > { %v1972_v10 = vpop.f32.mrf.mxu3  ;;  %v3115_v5 = vpop.f32.mrf.mxu2  ;;  %v2451_v63 = vor.u32 %v2449_v20, %v2447_v62 }
 0x255   : > { %v2039_v56 = vadd.f32 %v1972_v10, %v10274_v44  ;;  %v10809_v31 = vadd.f32 %v3115_v5, %v2653_v52  ;;  %v2077_v44 = vpack.c.b16 %v10652_v9, %v10652_v9  ;;  %v2984_v10 = vor.u32 %v2982_v47, %v2980_v41  ;;  %v9633_v41 = vld [vmem:[%s9763_s18 + $0x24] sm:$0xff] }
 0x256   : > { %4080 = vperm.xlu2 %9461, %v310_v53   ;;  %4165 = vperm.xlu1 %9460, %v327_v22   ;;  %v3481_v5 = vshrl.u32 %v9659_v36, 16  ;;  %v3484_v9 = vshll.u32 %v9659_v36, 16  ;;  %v335_v53 = vld [vmem:[%s13386_s6 + $0x138] sm:$0xff]  ;;  %v3215_v62 = vrot.slane %v9633_v41, 1  ;;  %v9634_v41 = vld [vmem:[%s9763_s18 + $0x2c] sm:$0xff] }
 0x257   : > { %v10811_v46 = vpop.f32.mrf.mxu1  ;;  %4190 = vperm.xlu0 %9459, %v332_v55  }
 0x258   : > { %v3483_v36 = vrot.slane %v3481_v5, 1  ;;  %v3486_v22 = vrot.slane %v3484_v9, 2 }
 0x259   : > { %8848 = vmatmul.msk.bf16.vlgmr.msra.gmra.mxu3 %vm626_vm2, %v3214_v14 }
 0x25a   : > { %v2213_v52 = vpop.f32.mrf.mxu0 }
 0x25b   : > { %v2281_v59 = vadd.f32 %v2213_v52, %v2038_v6  ;;  %v330_v6 = vld [vmem:[%s13386_s6 + $0x110] sm:$0xff] }
 0x25c   : > { %v1975_v30 = vpop.f32.mrf.mxu3  ;;  %v10828_v49 = vpop.f32.mrf.mxu2 }
 0x25d   : > { %8726 = vmatmul.msk.bf16.gmra.mxu0 %vm626_vm2, %v2077_v44  ;;  %v2040_v19 = vadd.f32 %v1975_v30, %v10290_v58  ;;  %v3216_v30 = vsel %vm3211_vm6, %v3213_v57, %v3215_v62 }
 0x25e   : > { %4095 = vperm.xlu2 %9461, %v313_v2   ;;  %4180 = vperm.xlu1 %9460, %v330_v6  }
 0x25f   : > { %v2587_v61 = vpop.f32.mrf.mxu1  ;;  %4205 = vperm.xlu0 %9459, %v335_v53   ;;  %v319_v53 = vld [vmem:[%s13386_s6 + $0xb8] sm:$0xff] }
 0x260   : > { %v2655_v14 = vadd.f32 %v2587_v61, %v2281_v59  ;;  %v316_v61 = vld [vmem:[%s13386_s6 + $0xa0] sm:$0xff] }
 0x261   : > { %8846 = vmatmul.msk.bf16.gmra.mxu2 %vm626_vm2, %v2984_v10 }
 0x262   : > { %8748 = vmatmul.msk.bf16.gmra.mxu1 %vm626_vm2, %v2451_v63  ;;  %v2215_v58 = vpop.f32.mrf.mxu0  ;;  %v3487_v63 = vor.u32 %v3486_v22, %v3483_v36  ;;  %v3217_v36 = vrot.slane %v9634_v41, 1  ;;  %v13504_v22 = vshrl.u32 %v10120_v45, 16  ;;  %v325_v41 = vld [vmem:[%s13386_s6 + $0xe8] sm:$0xff] }
 0x263   : > { %v10844_v55 = vadd.f32 %v2215_v58, %v2039_v56  ;;  %v333_v56 = vld [vmem:[%s13386_s6 + $0x128] sm:$0xff]  ;;  %v336_v58 = vld [vmem:[%s13386_s6 + $0x140] sm:$0xf] }
 0x264   : > { %v1977_v44 = vpop.f32.mrf.mxu3  ;;  %v3120_v20 = vpop.f32.mrf.mxu2  ;;  %v3491_v10 = vsel %vm3479_vm7, %v3487_v63, %v10784_v17 }
 0x265   : > { %v2041_v52 = vadd.f32 %v1977_v44, %v10309_v42  ;;  %v10847_v47 = vadd.f32 %v3120_v20, %v2655_v14  ;;  %v3492_v44 = vrot.slane %v13504_v22, 1 }
 0x266   : > { %4110 = vperm.xlu2 %9461, %v316_v61   ;;  %4195 = vperm.xlu1 %9460, %v333_v56  }
 0x267   : > { %v10849_v59 = vpop.f32.mrf.mxu1 }
 0x269   : > { %8849 = vmatmul.msk.bf16.gmra.mxu3 %vm626_vm2, %v3216_v30 }
 0x26a   : > { %v2218_v42 = vpop.f32.mrf.mxu0 }
 0x26b   : > { %v2283_v57 = vadd.f32 %v2218_v42, %v2040_v19 }
 0x26c   : > { %v1980_v5 = vpop.f32.mrf.mxu3  ;;  %v10861_v9 = vpop.f32.mrf.mxu2 }
 0x26d   : > { %8870 = vmatmul.msk.bf16.vlgmr.msra.gmra.mxu0 %vm626_vm2, %v3491_v10  ;;  %v2042_v14 = vadd.f32 %v1980_v5, %v10321_v25  ;;  %v13505_v25 = vshll.u32 %v10120_v45, 16 }
 0x26e   : > { %4125 = vperm.xlu2 %9461, %v319_v53   ;;  %4210 = vperm.xlu1 %9460, %v336_v58  }
 0x26f   : > { %v2592_v2 = vpop.f32.mrf.mxu1  ;;  %v3493_v20 = vrot.slane %v13505_v25, 2 }
 0x270   : > { %v2657_v6 = vadd.f32 %v2592_v2, %v2283_v57  ;;  %v3218_v57 = vsel %vm3211_vm6, %v3215_v62, %v3217_v36  ;;  %v322_v2 = vld [vmem:[%s13386_s6 + $0xd0] sm:$0xff] }
 0x271   : > { %v3494_v5 = vor.u32 %v3493_v20, %v3492_v44  ;;  %v9635_v44 = vld [vmem:[%s9763_s18 + $0x34] sm:$0xff]  ;;  %v13507_v20 = vshll.u32 %v10150_v40, 16 }
 0x272   : > { %v2220_v19 = vpop.f32.mrf.mxu0  ;;  %v3219_v25 = vrot.slane %v9635_v44, 1 }
 0x273   : > { %v10876_v30 = vadd.f32 %v2220_v19, %v2041_v52  ;;  %v3495_v52 = vsel %vm3479_vm7, %v10784_v17, %v3494_v5  ;;  %v13506_v17 = vshrl.u32 %v10150_v40, 16 }
 0x274   : > { %v1982_v63 = vpop.f32.mrf.mxu3  ;;  %v3125_v61 = vpop.f32.mrf.mxu2 }
 0x275   : > { %v2043_v56 = vadd.f32 %v1982_v63, %v10340_v12  ;;  %v10879_v42 = vadd.f32 %v3125_v61, %v2657_v6  ;;  %v3497_v63 = vrot.slane %v13507_v20, 2  ;;  %v9636_v20 = vld [vmem:[%s9763_s18 + $0x3c] sm:$0xff] }
 0x276   : > { %4140 = vperm.xlu2 %9461, %v322_v2  }
 0x277   : > { %v10881_v10 = vpop.f32.mrf.mxu1 }
 0x279   : > { %8850 = vmatmul.msk.bf16.gmra.mxu3 %vm626_vm2, %v3218_v57 }
 0x27a   : > { %v2223_v45 = vpop.f32.mrf.mxu0 }
 0x27b   : > { %v2285_v12 = vadd.f32 %v2223_v45, %v2042_v14  ;;  %v3496_v14 = vrot.slane %v13506_v17, 1  ;;  %v331_v17 = vld [vmem:[%s13386_s6 + $0x118] sm:$0xff] }
 0x27c   : > { %v1985_v6 = vpop.f32.mrf.mxu3  ;;  %v10890_v53 = vpop.f32.mrf.mxu2 }
 0x27d   : > { %8871 = vmatmul.msk.bf16.gmra.mxu0 %vm626_vm2, %v3495_v52  ;;  %v2044_v62 = vadd.f32 %v1985_v6, %v10353_v8  ;;  %v3498_v6 = vor.u32 %v3497_v63, %v3496_v14  ;;  %v3221_v63 = vrot.slane %v9636_v20, 1 }
 0x27e   : > { %4155 = vperm.xlu2 %9461, %v325_v41  }
 0x27f   : > { %v2597_v58 = vpop.f32.mrf.mxu1 }
 0x280   : > { %v2659_v19 = vadd.f32 %v2597_v58, %v2285_v12  ;;  %v3220_v12 = vsel %vm3211_vm6, %v3217_v36, %v3219_v25  ;;  %v328_v58 = vld [vmem:[%s13386_s6 + $0x100] sm:$0xff] }
 0x282   : > { %v2225_v22 = vpop.f32.mrf.mxu0 }
 0x283   : > { %v10902_v61 = vadd.f32 %v2225_v22, %v2043_v56  ;;  %v3499_v56 = vsel %vm3479_vm7, %v3494_v5, %v3498_v6  ;;  %v13508_v5 = vshrl.u32 %v10181_v43, 16 }
 0x284   : > { %v1987_v57 = vpop.f32.mrf.mxu3  ;;  %v3130_v8 = vpop.f32.mrf.mxu2 }
 0x285   : > { %v2045_v2 = vadd.f32 %v1987_v57, %v10369_v26  ;;  %v10905_v45 = vadd.f32 %v3130_v8, %v2659_v19  ;;  %v13509_v57 = vshll.u32 %v10181_v43, 16 }
 0x286   : > { %4170 = vperm.xlu2 %9461, %v328_v58  }
 0x287   : > { %v10907_v52 = vpop.f32.mrf.mxu1  ;;  %v3501_v8 = vrot.slane %v13509_v57, 2  ;;  %v9637_v57 = vld [vmem:[%s9763_s18 + $0x44] sm:$0xff] }
 0x289   : > { %8851 = vmatmul.msk.bf16.gmra.mxu3 %vm626_vm2, %v3220_v12 }
 0x28a   : > { %v2228_v40 = vpop.f32.mrf.mxu0 }
 0x28b   : > { %v2287_v41 = vadd.f32 %v2228_v40, %v2044_v62  ;;  %v3500_v62 = vrot.slane %v13508_v5, 1 }
 0x28c   : > { %v1990_v26 = vpop.f32.mrf.mxu3  ;;  %v10915_v19 = vpop.f32.mrf.mxu2 }
 0x28d   : > { %8872 = vmatmul.msk.bf16.gmra.mxu0 %vm626_vm2, %v3499_v56  ;;  %v2046_v36 = vadd.f32 %v1990_v26, %v10167_v18  ;;  %v3222_v26 = vsel %vm3211_vm6, %v3219_v25, %v3221_v63 }
 0x28e   : > { %4185 = vperm.xlu2 %9461, %v331_v17   ;;  %v334_v17 = vld [vmem:[%s13386_s6 + $0x130] sm:$0xff] }
 0x28f   : > { %v2602_v22 = vpop.f32.mrf.mxu1 }
 0x290   : > { %v2661_v44 = vadd.f32 %v2602_v22, %v2287_v41  ;;  %v3502_v22 = vor.u32 %v3501_v8, %v3500_v62  ;;  %v3223_v8 = vrot.slane %v9637_v57, 1 }
 0x292   : > { %v2230_v14 = vpop.f32.mrf.mxu0 }
 0x293   : > { %v10927_v12 = vadd.f32 %v2230_v14, %v2045_v2  ;;  %v3503_v2 = vsel %vm3479_vm7, %v3498_v6, %v3502_v22 }
 0x294   : > { %v1992_v58 = vpop.f32.mrf.mxu3  ;;  %v3135_v18 = vpop.f32.mrf.mxu2 }
 0x295   : > { %v2047_v40 = vadd.f32 %v1992_v58, %v10183_v11  ;;  %v10930_v56 = vadd.f32 %v3135_v18, %v2661_v44  ;;  %v13511_v58 = vshrl.u32 %v10216_v35, 16 }
 0x296   : > { %4200 = vperm.xlu2 %9461, %v334_v17  }
 0x297   : > { %v10932_v41 = vpop.f32.mrf.mxu1  ;;  %v3504_v18 = vrot.slane %v13511_v58, 1 }
 0x299   : > { %8852 = vmatmul.msk.bf16.gmra.mxu3 %vm626_vm2, %v3222_v26  ;;  %v13512_v26 = vshll.u32 %v10216_v35, 16 }
 0x29a   : > { %v2233_v43 = vpop.f32.mrf.mxu0 }
 0x29b   : > { %v2289_v14 = vadd.f32 %v2233_v43, %v2046_v36  ;;  %v3505_v17 = vrot.slane %v13512_v26, 2 }
 0x29c   : > { %v1995_v11 = vpop.f32.mrf.mxu3  ;;  %v10940_v44 = vpop.f32.mrf.mxu2 }
 0x29d   : > { %13510 = vst [vmem:[#allocation32_spill] sm:$0xff] %v10940_v44  ;;  %8873 = vmatmul.msk.bf16.gmra.mxu0 %vm626_vm2, %v3503_v2  ;;  %v2048_v20 = vadd.f32 %v1995_v11, %v10202_v0  ;;  %v3506_v11 = vor.u32 %v3505_v17, %v3504_v18 }
 0x29f   : > { %v2607_v25 = vpop.f32.mrf.mxu1  ;;  %v3507_v35 = vsel %vm3479_vm7, %v3502_v22, %v3506_v11 }
 0x2a0   : > { %v2663_v5 = vadd.f32 %v2607_v25, %v2289_v14  ;;  %v3224_v14 = vsel %vm3211_vm6, %v3221_v63, %v3223_v8  ;;  %v13519_v63 = vld [vmem:[#allocation9_spill] sm:$0xff] }
 0x2a1   : > { %v13520_v18 = vshrl.u32 %v13519_v63, 16 }
 0x2a2   : > { %v2235_v62 = vpop.f32.mrf.mxu0 }
 0x2a3   : > { %v10949_v6 = vadd.f32 %v2235_v62, %v2047_v40  ;;  %v3508_v17 = vrot.slane %v13520_v18, 1 }
 0x2a4   : > { %v1997_v36 = vpop.f32.mrf.mxu3  ;;  %v3140_v43 = vpop.f32.mrf.mxu2 }
 0x2a5   : > { %13513 = vst [vmem:[#allocation33_spill] sm:$0xff] %v10949_v6  ;;  %v2049_v44 = vadd.f32 %v1997_v36, %v13514_v24  ;;  %v10952_v2 = vadd.f32 %v3140_v43, %v2663_v5  ;;  %v13518_v24 = vld [vmem:[#allocation8_spill] sm:$0xff]  ;;  %v9638_v43 = vld [vmem:[%s9763_s18 + $0x4c] sm:$0xff] }
 0x2a7   : > { %13515 = vst [vmem:[#allocation7_spill] sm:$0xff] %v10952_v2  ;;  %v10954_v0 = vpop.f32.mrf.mxu1 }
 0x2a8   : > { %13516 = vst [vmem:[#allocation34_spill] sm:$0xff] %v10954_v0  ;;  %v3225_v0 = vrot.slane %v9638_v43, 1 }
 0x2a9   : > { %8853 = vmatmul.msk.bf16.gmra.mxu3 %vm626_vm2, %v3224_v14  ;;  %v13521_v14 = vshll.u32 %v13519_v63, 16 }
 0x2aa   : > { %v2238_v25 = vpop.f32.mrf.mxu0 }
 0x2ab   : > { %v2291_v57 = vadd.f32 %v2238_v25, %v2048_v20  ;;  %v3509_v6 = vrot.slane %v13521_v14, 2 }
 0x2ac   : > { %v2000_v40 = vpop.f32.mrf.mxu3  ;;  %v10959_v62 = vpop.f32.mrf.mxu2 }
 0x2ad   : > { %13517 = vst [vmem:[#allocation35_spill] sm:$0xff] %v10959_v62  ;;  %8874 = vmatmul.msk.bf16.gmra.mxu0 %vm626_vm2, %v3507_v35  ;;  %v2050_v58 = vadd.f32 %v2000_v40, %v13518_v24  ;;  %v13523_v62 = vld [vmem:[#allocation10_spill] sm:$0xff]  ;;  %v3510_v24 = vor.u32 %v3509_v6, %v3508_v17  ;;  %v9639_v6 = vld [vmem:[%s9763_s18 + $0x54] sm:$0xff] }
 0x2ae   : > { %v3227_v17 = vrot.slane %v9639_v6, 1 }
 0x2af   : > { %v2612_v5 = vpop.f32.mrf.mxu1  ;;  %v3511_v43 = vsel %vm3479_vm7, %v3506_v11, %v3510_v24 }
 0x2b0   : > { %v2665_v26 = vadd.f32 %v2612_v5, %v2291_v57  ;;  %v3226_v57 = vsel %vm3211_vm6, %v3223_v8, %v3225_v0 }
 0x2b2   : > { %v2240_v36 = vpop.f32.mrf.mxu0 }
 0x2b3   : > { %v10968_v22 = vadd.f32 %v2240_v36, %v2049_v44 }
 0x2b4   : > { %v2002_v20 = vpop.f32.mrf.mxu3  ;;  %v3145_v25 = vpop.f32.mrf.mxu2 }
 0x2b5   : > { %13522 = vst [vmem:[#allocation8_spill] sm:$0xff] %v10968_v22  ;;  %v2051_v2 = vadd.f32 %v2002_v20, %v13523_v62  ;;  %v10971_v35 = vadd.f32 %v3145_v25, %v2665_v26  ;;  %v13527_v62 = vld [vmem:[#allocation11_spill] sm:$0xff]  ;;  %v9689_v20 = vmov 0.0   ;;  %v13528_v25 = vld [vmem:[#allocation12_spill] sm:$0xff] }
 0x2b6   : > { %341 = vst.msk [vmem:[#allocation2 + $0x18] sm:$0xff] %vm337_vm8, %v9689_v20  ;;  %v13529_v11 = vshrl.u32 %v13528_v25, 16 }
 0x2b7   : > { %13524 = vst [vmem:[#allocation9_spill] sm:$0xff] %v10971_v35  ;;  %v10973_v40 = vpop.f32.mrf.mxu1 }
 0x2b8   : > { %13525 = vst [vmem:[#allocation10_spill] sm:$0xff] %v10973_v40  ;;  %v13557_v40 = vshll.u32 %v10437_v51, 16 }
 0x2b9   : > { %8854 = vmatmul.msk.bf16.gmra.mxu3 %vm626_vm2, %v3226_v57  ;;  %v13530_v57 = vshll.u32 %v13528_v25, 16  ;;  %338 = vst.msk [vmem:[#allocation2] sm:$0xff] %vm337_vm8, %v9689_v20 }
 0x2ba   : > { %v2243_v5 = vpop.f32.mrf.mxu0  ;;  %339 = vst.msk [vmem:[#allocation2 + $0x8] sm:$0xff] %vm337_vm8, %v9689_v20  ;;  %v3533_v22 = vrot.slane %v13557_v40, 2 }
 0x2bb   : > { %v2293_v63 = vadd.f32 %v2243_v5, %v2050_v58  ;;  %v3512_v58 = vrot.slane %v13529_v11, 1  ;;  %v3513_v5 = vrot.slane %v13530_v57, 2  ;;  %340 = vst.msk [vmem:[#allocation2 + $0x10] sm:$0xff] %vm337_vm8, %v9689_v20 }
 0x2bc   : > { %v2005_v44 = vpop.f32.mrf.mxu3  ;;  %v10978_v36 = vpop.f32.mrf.mxu2  ;;  %342 = vst.msk [vmem:[#allocation2 + $0x20] sm:$0xff] %vm337_vm8, %v9689_v20 }
 0x2bd   : > { %13526 = vst [vmem:[#allocation36_spill] sm:$0xff] %v10978_v36  ;;  %8875 = vmatmul.msk.bf16.gmra.mxu0 %vm626_vm2, %v3511_v43  ;;  %v2052_v26 = vadd.f32 %v2005_v44, %v13527_v62  ;;  %v13532_v62 = vld [vmem:[#allocation13_spill] sm:$0xff] }
 0x2be   : > { %343 = vst.msk [vmem:[#allocation2 + $0x28] sm:$0xff] %vm337_vm8, %v9689_v20 }
 0x2bf   : > { %v2617_v18 = vpop.f32.mrf.mxu1  ;;  %344 = vst.msk [vmem:[#allocation2 + $0x30] sm:$0xff] %vm337_vm8, %v9689_v20 }
 0x2c0   : > { %v2667_v14 = vadd.f32 %v2617_v18, %v2293_v63  ;;  %345 = vst.msk [vmem:[#allocation2 + $0x38] sm:$0xff] %vm337_vm8, %v9689_v20 }
 0x2c1   : > { %346 = vst.msk [vmem:[#allocation2 + $0x40] sm:$0xff] %vm337_vm8, %v9689_v20 }
 0x2c2   : > { %v2245_v8 = vpop.f32.mrf.mxu0  ;;  %347 = vst.msk [vmem:[#allocation2 + $0x48] sm:$0xff] %vm337_vm8, %v9689_v20  ;;  %v4296_v57 = vld [vmem:[#allocation2 + $0xd] sm:$0xff] }
 0x2c3   : > { %v10991_v43 = vadd.f32 %v2245_v8, %v2051_v2  ;;  %v3228_v2 = vsel %vm3211_vm6, %v3225_v0, %v3227_v17  ;;  %v3514_v8 = vor.u32 %v3513_v5, %v3512_v58  ;;  %v4295_v0 = vld [vmem:[#allocation2 + $0x5] sm:$0xff]  ;;  %348 = vst.msk [vmem:[#allocation2 + $0x50] sm:$0xff] %vm337_vm8, %v9689_v20 }
 0x2c4   : > { %v2007_v63 = vpop.f32.mrf.mxu3  ;;  %v3150_v44 = vpop.f32.mrf.mxu2  ;;  %349 = vst.msk [vmem:[#allocation2 + $0x58] sm:$0xff] %vm337_vm8, %v9689_v20 }
 0x2c5   : > { %13531 = vst [vmem:[#allocation11_spill] sm:$0xff] %v10991_v43  ;;  %v2053_v18 = vadd.f32 %v2007_v63, %v13532_v62  ;;  %v11000_v6 = vadd.f32 %v3150_v44, %v2667_v14  ;;  %v3515_v11 = vsel %vm3479_vm7, %v3510_v24, %v3514_v8  ;;  %v4336_v63 = vpack.c.bf16 %v4296_v57, %v4295_v0  ;;  %v13536_v24 = vld [vmem:[#allocation14_spill] sm:$0xff]  ;;  %v9640_v57 = vld [vmem:[%s9763_s18 + $0x5c] sm:$0xff] }
 0x2c6   : > { %350 = vst.msk [vmem:[#allocation2 + $0x60] sm:$0xff] %vm337_vm8, %v9689_v20 }
 0x2c7   : > { %13533 = vst [vmem:[#allocation12_spill] sm:$0xff] %v11000_v6  ;;  %v11002_v25 = vpop.f32.mrf.mxu1  ;;  %8923 = vmatmul.msk.bf16.vlgmr.msra.gmra.mxu2 %vm337_vm8, %v4336_v63  ;;  %v13537_v63 = vshrl.u32 %v10319_v23, 16  ;;  %v13551_v6 = vshrl.u32 %v10408_v13, 16 }
 0x2c8   : > { %13534 = vst [vmem:[#allocation13_spill] sm:$0xff] %v11002_v25 }
 0x2c9   : > { %8855 = vmatmul.msk.bf16.gmra.mxu3 %vm626_vm2, %v3228_v2  ;;  %351 = vst.msk [vmem:[#allocation2 + $0x68] sm:$0xff] %vm337_vm8, %v9689_v20  ;;  %v4359_v2 = vld [vmem:[#allocation2 + $0x6] sm:$0xff]  ;;  %v3528_v36 = vrot.slane %v13551_v6, 1 }
 0x2ca   : > { %v2248_v14 = vpop.f32.mrf.mxu0  ;;  %352 = vst.msk [vmem:[#allocation2 + $0x70] sm:$0xff] %vm337_vm8, %v9689_v20 }
 0x2cb   : > { %v2295_v58 = vadd.f32 %v2248_v14, %v2052_v26  ;;  %v4360_v14 = vld [vmem:[#allocation2 + $0xe] sm:$0xff]  ;;  %353 = vst.msk [vmem:[#allocation2 + $0x78] sm:$0xff] %vm337_vm8, %v9689_v20 }
 0x2cc   : > { %v2010_v5 = vpop.f32.mrf.mxu3  ;;  %v11021_v44 = vpop.f32.mrf.mxu2  ;;  %v4400_v0 = vpack.c.bf16 %v4360_v14, %v4359_v2  ;;  %354 = vst.msk [vmem:[#allocation2 + $0x80] sm:$0xff] %vm337_vm8, %v9689_v20 }
 0x2cd   : > { %13535 = vst [vmem:[#allocation37_spill] sm:$0xff] %v11021_v44  ;;  %8876 = vmatmul.msk.bf16.gmra.mxu0 %vm626_vm2, %v3515_v11  ;;  %v2054_v62 = vadd.f32 %v2010_v5, %v13536_v24  ;;  %v3229_v5 = vrot.slane %v9640_v57, 1  ;;  %v3516_v24 = vrot.slane %v13537_v63, 1  ;;  %v11210_v44 = vld [vmem:[%s9763_s18 + $0x74] sm:$0xff] }
 0x2ce   : > { %8898 = vmatmul.msk.bf16.vlgmr.msra.gmra.mxu1 %vm337_vm8, %v4400_v0  ;;  %355 = vst.msk [vmem:[#allocation2 + $0x88] sm:$0xff] %vm337_vm8, %v9689_v20  ;;  %v13434_v43 = vrot.slane %v11210_v44, 1 }
 0x2cf   : > { %v2622_v26 = vpop.f32.mrf.mxu1  ;;  %356 = vst.msk [vmem:[#allocation2 + $0x90] sm:$0xff] %vm337_vm8, %v9689_v20  ;;  %v3230_v63 = vsel %vm3211_vm6, %v3227_v17, %v3229_v5 }
 0x2d0   : > { %v2669_v25 = vadd.f32 %v2622_v26, %v2295_v58  ;;  %v13538_v58 = vshll.u32 %v10319_v23, 16  ;;  %357 = vst.msk [vmem:[#allocation2 + $0x98] sm:$0xff] %vm337_vm8, %v9689_v20 }
 0x2d1   : > { %358 = vst.msk [vmem:[#allocation2 + $0xa0] sm:$0xff] %vm337_vm8, %v9689_v20 }
 0x2d2   : > { %v2250_v11 = vpop.f32.mrf.mxu0  ;;  %v3517_v26 = vrot.slane %v13538_v58, 2  ;;  %359 = vst.msk [vmem:[#allocation2 + $0xa8] sm:$0xff] %vm337_vm8, %v9689_v20 }
 0x2d3   : > { %v11044_v2 = vadd.f32 %v2250_v11, %v2053_v18  ;;  %360 = vst.msk [vmem:[#allocation2 + $0xb0] sm:$0xff] %vm337_vm8, %v9689_v20 }
 0x2d4   : > { %v2012_v14 = vpop.f32.mrf.mxu3  ;;  %v3155_v0 = vpop.f32.mrf.mxu2  ;;  %v3518_v58 = vor.u32 %v3517_v26, %v3516_v24  ;;  %361 = vst.msk [vmem:[#allocation2 + $0xb8] sm:$0xff] %vm337_vm8, %v9689_v20 }
 0x2d5   : > { %13539 = vst [vmem:[#allocation14_spill] sm:$0xff] %v11044_v2  ;;  %v11052_v57 = vadd.f32 %v3155_v0, %v2669_v25  ;;  %v9641_v14 = vld [vmem:[%s9763_s18 + $0x64] sm:$0xff] }
 0x2d6   : > { %362 = vst.msk [vmem:[#allocation2 + $0xc0] sm:$0xff] %vm337_vm8, %v9689_v20  ;;  %v3519_v25 = vsel %vm3479_vm7, %v3514_v8, %v3518_v58  ;;  %v3231_v0 = vrot.slane %v9641_v14, 1 }
 0x2d7   : > { %13540 = vst [vmem:[#allocation38_spill] sm:$0xff] %v11052_v57  ;;  %v11054_v23 = vpop.f32.mrf.mxu1 }
 0x2d8   : > { %13541 = vst [vmem:[#allocation39_spill] sm:$0xff] %v11054_v23 }
 0x2d9   : > { %8856 = vmatmul.msk.bf16.gmra.mxu3 %vm626_vm2, %v3230_v63  ;;  %363 = vst.msk [vmem:[#allocation2 + $0xc8] sm:$0xff] %vm337_vm8, %v9689_v20  ;;  %v13543_v63 = vshrl.u32 %v10350_v38, 16 }
 0x2da   : > { %v2253_v18 = vpop.f32.mrf.mxu0  ;;  %364 = vst.msk [vmem:[#allocation2 + $0xd0] sm:$0xff] %vm337_vm8, %v9689_v20 }
 0x2db   : > { %v2297_v17 = vadd.f32 %v2253_v18, %v2054_v62  ;;  %365 = vst.msk [vmem:[#allocation2 + $0xd8] sm:$0xff] %vm337_vm8, %v9689_v20  ;;  %v3520_v18 = vrot.slane %v13543_v63, 1 }
 0x2dc   : > { %v3328_v11 = vpop.f32.mrf.mxu3  ;;  %v11073_v24 = vpop.f32.mrf.mxu2  ;;  %366 = vst.msk [vmem:[#allocation2 + $0xe0] sm:$0xff] %vm337_vm8, %v9689_v20 }
 0x2dd   : > { %13542 = vst [vmem:[#allocation40_spill] sm:$0xff] %v11073_v24  ;;  %8877 = vmatmul.msk.bf16.gmra.mxu0 %vm626_vm2, %v3519_v25  ;;  %v13544_v25 = vshll.u32 %v10350_v38, 16  ;;  %v3232_v38 = vsel %vm3211_vm6, %v3229_v5, %v3231_v0 }
 0x2de   : > { %367 = vst.msk [vmem:[#allocation2 + $0xe8] sm:$0xff] %vm337_vm8, %v9689_v20 }
 0x2df   : > { %v2627_v8 = vpop.f32.mrf.mxu1  ;;  %368 = vst.msk [vmem:[#allocation2 + $0xf0] sm:$0xff] %vm337_vm8, %v9689_v20 }
 0x2e0   : > { %v2671_v26 = vadd.f32 %v2627_v8, %v2297_v17  ;;  %369 = vst.msk [vmem:[#allocation2 + $0xf8] sm:$0xff] %vm337_vm8, %v9689_v20  ;;  %v3521_v17 = vrot.slane %v13544_v25, 2  ;;  %v13546_v25 = vld [vmem:[#allocation15_spill] sm:$0xff] }
 0x2e1   : > { %370 = vst.msk [vmem:[#allocation2 + $0x100] sm:$0xff] %vm337_vm8, %v9689_v20  ;;  %v3432_v23 = vadd.f32 %v3328_v11, %v13546_v25  ;;  %v11125_v11 = vld [vmem:[%s13385_s5 + $0x1] ss:$0 sm:$0xff] }
 0x2e2   : > { %v2255_v62 = vpop.f32.mrf.mxu0  ;;  %371 = vst.msk [vmem:[#allocation2 + $0x108] sm:$0xff] %vm337_vm8, %v9689_v20  ;;  %v3522_v14 = vor.u32 %v3521_v17, %v3520_v18 }
 0x2e3   : > { %372 = vst.msk [vmem:[#allocation2 + $0x110] sm:$0xff] %vm337_vm8, %v9689_v20 }
 0x2e4   : > { %v11095_v8 = vpop.f32.mrf.mxu3  ;;  %373 = vst.msk [vmem:[#allocation2 + $0x118] sm:$0xff] %vm337_vm8, %v9689_v20  ;;  %v3160_v62 = vpop.f32.mrf.mxu2  ;;  %v3523_v18 = vsel %vm3479_vm7, %v3518_v58, %v3522_v14  ;;  %v11135_v58 = vstv %s294_s14  ;;  %s9437_s14 = smul.u32 328, %s13702_s25 }
 0x2e5   : > { %374 = vst.msk [vmem:[#allocation2 + $0x120] sm:$0xff] %vm337_vm8, %v9689_v20  ;;  %v11101_v24 = vadd.f32 %v3160_v62, %v2671_v26  ;;  %v11114_v26 = vld [vmem:[%s13385_s5] ss:$0 sm:$0xff] }
 0x2e6   : > { %375 = vst.msk [vmem:[#allocation2 + $0x128] sm:$0xff] %vm337_vm8, %v9689_v20  ;;  %s13066_s16 = scalar_lea.vmem %s13387_s7, %s9437_s14 }
 0x2e7   : > { %13545 = vst [vmem:[#allocation41_spill] sm:$0xff] %v11101_v24  ;;  %v2629_v63 = vpop.f32.mrf.mxu1 }
 0x2e8   : > { %376 = vst.msk [vmem:[#allocation2 + $0x130] sm:$0xff] %vm337_vm8, %v9689_v20 }
 0x2e9   : > { %377 = vst.msk [vmem:[#allocation2 + $0x138] sm:$0xff] %vm337_vm8, %v9689_v20  ;;  %8857 = vmatmul.msk.bf16.gmra.mxu3 %vm626_vm2, %v3232_v38 }
 0x2ea   : > { %378 = vst.msk [vmem:[#allocation2 + $0x140] sm:$0xff] %vm337_vm8, %v9689_v20  ;;  %v3648_v5 = vpop.f32.mrf.mxu0 }
 0x2eb   : > { %379 = vst.msk [vmem:[#allocation2 + $0x148] sm:$0xff] %vm337_vm8, %v9689_v20  ;;  %v3752_v17 = vadd.f32 %v3648_v5, %v3432_v23 }
 0x2ec   : > { %380 = vst.msk [vmem:[#allocation2 + $0x150] sm:$0xff] %vm337_vm8, %v9689_v20  ;;  %v3333_v62 = vpop.f32.mrf.mxu3  ;;  %v3162_v23 = vpop.f32.mrf.mxu2 }
 0x2ed   : > { %381 = vst.msk [vmem:[#allocation2 + $0x158] sm:$0xff] %vm337_vm8, %v9689_v20  ;;  %v3797_v38 = vmul.f32 %v11114_v26, %v3752_v17  ;;  %8878 = vmatmul.msk.bf16.gmra.mxu0 %vm626_vm2, %v3523_v18  ;;  %v11143_v17 = vpop.permute.xlu0 %4010  ;;  %v9642_v23 = vld [vmem:[%s9763_s18 + $0x6c] sm:$0xff] }
 0x2ee   : > { %382 = vst.msk [vmem:[#allocation2 + $0x160] sm:$0xff] %vm337_vm8, %v9689_v20  ;;  %v3233_v2 = vrot.slane %v9642_v23, 1 }
 0x2ef   : > { %383 = vst.msk [vmem:[#allocation2 + $0x168] sm:$0xff] %vm337_vm8, %v9689_v20  ;;  %v3843_v63 = vadd.f32 %v11125_v11, %v3797_v38 }
 0x2f0   : > { %389 = vst.msk [vmem:[#allocation3 + $0x18] sm:$0xff] %vm337_vm8, %v9689_v20  ;;  %v3234_v57 = vsel %vm3211_vm6, %v3231_v0, %v3233_v2  ;;  %v9204_v0 = vld [vmem:[%s13383_s3 + $0x10] sm:$0xff] }
 0x2f1   : > { %vm3884_vm9 = vcmp.ge.f32.partialorder %v3843_v63, 0.0  ;;  %v3926_v25 = vmul.f32 %v11135_v58, %v3843_v63  ;;  %13547 = vst [vmem:[#allocation15_spill] sm:$0xff] %v11143_v17  ;;  %4929 = vmatpush.bf16.msrb.mxu3 %v9204_v0 }
 0x2f2   : > { %v3650_v5 = vpop.f32.mrf.mxu0  ;;  %390 = vst.msk [vmem:[#allocation3 + $0x20] sm:$0xff] %vm337_vm8, %v9689_v20 }
 0x2f3   : > { %v3967_v24 = vsel %vm3884_vm9, %v3843_v63, %v3926_v25  ;;  %391 = vst.msk [vmem:[#allocation3 + $0x28] sm:$0xff] %vm337_vm8, %v9689_v20  ;;  %v13548_v63 = vshrl.u32 %v10379_v34, 16  ;;  %v13549_v25 = vshll.u32 %v10379_v34, 16 }
 0x2f4   : > { %v4213_v18 = vmul.f32 %v11143_v17, %v3967_v24  ;;  %392 = vst.msk [vmem:[#allocation3 + $0x30] sm:$0xff] %vm337_vm8, %v9689_v20  ;;  %v3335_v38 = vpop.f32.mrf.mxu3 }
 0x2f5   : > { %393 = vst.msk [vmem:[#allocation3 + $0x38] sm:$0xff] %vm337_vm8, %v9689_v20  ;;  %v3524_v24 = vrot.slane %v13548_v63, 1  ;;  %v3525_v17 = vrot.slane %v13549_v25, 2  ;;  %v11288_v35 = vpop.permute.xlu0 %4015 }
 0x2f6   : > { %4254 = vst.msk [vmem:[#allocation2 + $0x18] sm:$0xff] %vm337_vm8, %v4213_v18 }
 0x2f7   : > { %394 = vst.msk [vmem:[#allocation3 + $0x40] sm:$0xff] %vm337_vm8, %v9689_v20  ;;  %v3526_v23 = vor.u32 %v3525_v17, %v3524_v24  ;;  %v3433_v24 = vadd.f32 %v11095_v8, %v10398_v1 }
 0x2f8   : > { %395 = vst.msk [vmem:[#allocation3 + $0x48] sm:$0xff] %vm337_vm8, %v9689_v20 }
 0x2f9   : > { %396 = vst.msk [vmem:[#allocation3 + $0x50] sm:$0xff] %vm337_vm8, %v9689_v20  ;;  %8858 = vmatmul.msk.bf16.gmra.mxu3 %vm626_vm2, %v3234_v57  ;;  %v3527_v34 = vsel %vm3479_vm7, %v3522_v14, %v3526_v23  ;;  %v9205_v57 = vld [vmem:[%s13383_s3 + $0x18] sm:$0xff]  ;;  %v9206_v14 = vld [vmem:[%s13383_s3 + $0x20] sm:$0xff] }
 0x2fa   : > { %v3653_v18 = vpop.f32.mrf.mxu0  ;;  %397 = vst.msk [vmem:[#allocation3 + $0x58] sm:$0xff] %vm337_vm8, %v9689_v20  ;;  %5217 = vmatpush.bf16.msrb.mxu0 %v9205_v57  ;;  %5505 = vmatpush.bf16.msrb.mxu1 %v9206_v14  ;;  %v3435_v57 = vadd.f32 %v3335_v38, %v10427_v37  ;;  %v3753_v14 = vadd.f32 %v3650_v5, %v3433_v24  ;;  %v13553_v37 = vld [vmem:[#allocation17_spill] sm:$0xff] }
 0x2fb   : > { %398 = vst.msk [vmem:[#allocation3 + $0x60] sm:$0xff] %vm337_vm8, %v9689_v20  ;;  %v3236_v38 = vsel %vm3211_vm6, %v3233_v2, %v13434_v43 }
 0x2fc   : > { %399 = vst.msk [vmem:[#allocation3 + $0x68] sm:$0xff] %vm337_vm8, %v9689_v20  ;;  %v3338_v63 = vpop.f32.mrf.mxu3 }
 0x2fd   : > { %8879 = vmatmul.msk.bf16.gmra.mxu0 %vm626_vm2, %v3527_v34  ;;  %400 = vst.msk [vmem:[#allocation3 + $0x70] sm:$0xff] %vm337_vm8, %v9689_v20  ;;  %v13550_v34 = vld [vmem:[#allocation16_spill] sm:$0xff]  ;;  %v3436_v5 = vadd.f32 %v3338_v63, %v13553_v37  ;;  %v11260_v37 = vpop.permute.xlu2 %4030 }
 0x2fe   : > { %401 = vst.msk [vmem:[#allocation3 + $0x78] sm:$0xff] %vm337_vm8, %v9689_v20  ;;  %v3434_v0 = vadd.f32 %v3333_v62, %v13550_v34  ;;  %v13552_v62 = vshll.u32 %v10408_v13, 16  ;;  %v3798_v13 = vmul.f32 %v11114_v26, %v3753_v14 }
 0x2ff   : > { %402 = vst.msk [vmem:[#allocation3 + $0x80] sm:$0xff] %vm337_vm8, %v9689_v20 }
 0x300   : > { %403 = vst.msk [vmem:[#allocation3 + $0x88] sm:$0xff] %vm337_vm8, %v9689_v20  ;;  %v3754_v1 = vadd.f32 %v3653_v18, %v3434_v0  ;;  %v3529_v34 = vrot.slane %v13552_v62, 2 }
 0x301   : > { %404 = vst.msk [vmem:[#allocation3 + $0x90] sm:$0xff] %vm337_vm8, %v9689_v20 }
 0x302   : > { %v3655_v17 = vpop.f32.mrf.mxu0  ;;  %405 = vst.msk [vmem:[#allocation3 + $0x98] sm:$0xff] %vm337_vm8, %v9689_v20  ;;  %v3799_v63 = vmul.f32 %v11114_v26, %v3754_v1  ;;  %v11252_v1 = vpop.permute.xlu1 %4020 }
 0x303   : > { %406 = vst.msk [vmem:[#allocation3 + $0xa0] sm:$0xff] %vm337_vm8, %v9689_v20  ;;  %v3755_v8 = vadd.f32 %v3655_v17, %v3435_v57  ;;  %v11228_v17 = vor.u32 %v3529_v34, %v3528_v36  ;;  %v3844_v57 = vadd.f32 %v11125_v11, %v3798_v13 }
 0x304   : > { %407 = vst.msk [vmem:[#allocation3 + $0xa8] sm:$0xff] %vm337_vm8, %v9689_v20  ;;  %v3340_v25 = vpop.f32.mrf.mxu3 }
 0x305   : > { %408 = vst.msk [vmem:[#allocation3 + $0xb0] sm:$0xff] %vm337_vm8, %v9689_v20  ;;  %v3800_v2 = vmul.f32 %v11114_v26, %v3755_v8  ;;  %v3531_v24 = vsel %vm3479_vm7, %v3526_v23, %v11228_v17  ;;  %v3845_v23 = vadd.f32 %v11125_v11, %v3799_v63  ;;  %v3437_v8 = vadd.f32 %v3340_v25, %v10456_v7 }
 0x306   : > { %409 = vst.msk [vmem:[#allocation3 + $0xb8] sm:$0xff] %vm337_vm8, %v9689_v20  ;;  %vm3885_vm10 = vcmp.ge.f32.partialorder %v3844_v57, 0.0 }
 0x307   : > { %410 = vst.msk [vmem:[#allocation3 + $0xc0] sm:$0xff] %vm337_vm8, %v9689_v20  ;;  %v3846_v14 = vadd.f32 %v11125_v11, %v3800_v2  ;;  %v3928_v7 = vmul.f32 %v11135_v58, %v3845_v23  ;;  %vm3886_vm11 = vcmp.ge.f32.partialorder %v3845_v23, 0.0 }
 0x308   : > { %411 = vst.msk [vmem:[#allocation3 + $0xc8] sm:$0xff] %vm337_vm8, %v9689_v20 }
 0x309   : > { %412 = vst.msk [vmem:[#allocation3 + $0xd0] sm:$0xff] %vm337_vm8, %v9689_v20  ;;  %8859 = vmatmul.msk.bf16.gmra.mxu3 %vm626_vm2, %v3236_v38  ;;  %v3929_v25 = vmul.f32 %v11135_v58, %v3846_v14  ;;  %vm3887_vm12 = vcmp.ge.f32.partialorder %v3846_v14, 0.0 }
 0x30a   : > { %v3658_v18 = vpop.f32.mrf.mxu0  ;;  %413 = vst.msk [vmem:[#allocation3 + $0xd8] sm:$0xff] %vm337_vm8, %v9689_v20 }
 0x30b   : > { %v3756_v6 = vadd.f32 %v3658_v18, %v3436_v5  ;;  %414 = vst.msk [vmem:[#allocation3 + $0xe0] sm:$0xff] %vm337_vm8, %v9689_v20  ;;  %v3927_v5 = vmul.f32 %v11135_v58, %v3844_v57 }
 0x30c   : > { %415 = vst.msk [vmem:[#allocation3 + $0xe8] sm:$0xff] %vm337_vm8, %v9689_v20  ;;  %v3343_v36 = vpop.f32.mrf.mxu3 }
 0x30d   : > { %8880 = vmatmul.msk.bf16.gmra.mxu0 %vm626_vm2, %v3531_v24  ;;  %416 = vst.msk [vmem:[#allocation3 + $0xf0] sm:$0xff] %vm337_vm8, %v9689_v20  ;;  %v3801_v0 = vmul.f32 %v11114_v26, %v3756_v6  ;;  %v3968_v63 = vsel %vm3885_vm10, %v3844_v57, %v3927_v5  ;;  %v11279_v24 = vld [vmem:[%s9763_s18 + $0x7c] sm:$0xff]  ;;  %v13559_v57 = vld [vmem:[#allocation19_spill] sm:$0xff] }
 0x30e   : > { %417 = vst.msk [vmem:[#allocation3 + $0xf8] sm:$0xff] %vm337_vm8, %v9689_v20  ;;  %v3438_v5 = vadd.f32 %v3343_v36, %v13559_v57 }
 0x30f   : > { %418 = vst.msk [vmem:[#allocation3 + $0x100] sm:$0xff] %vm337_vm8, %v9689_v20  ;;  %v3847_v62 = vadd.f32 %v11125_v11, %v3801_v0  ;;  %v13435_v0 = vrot.slane %v11279_v24, 1 }
 0x310   : > { %13554 = vst [vmem:[#allocation16_spill] sm:$0xff] %v11252_v1 }
 0x311   : > { %419 = vst.msk [vmem:[#allocation3 + $0x108] sm:$0xff] %vm337_vm8, %v9689_v20  ;;  %v3930_v6 = vmul.f32 %v11135_v58, %v3847_v62  ;;  %vm3888_vm13 = vcmp.ge.f32.partialorder %v3847_v62, 0.0 }
 0x312   : > { %420 = vst.msk [vmem:[#allocation3 + $0x110] sm:$0xff] %vm337_vm8, %v9689_v20  ;;  %v3660_v34 = vpop.f32.mrf.mxu0 }
 0x313   : > { %13555 = vst [vmem:[#allocation17_spill] sm:$0xff] %v11260_v37  ;;  %v3757_v38 = vadd.f32 %v3660_v34, %v3437_v8  ;;  %v3969_v8 = vsel %vm3886_vm11, %v3845_v23, %v3928_v7  ;;  %v3970_v34 = vsel %vm3887_vm12, %v3846_v14, %v3929_v25  ;;  %v13560_v23 = vrot.slane %v11210_v44, 1  ;;  %v11304_v25 = vpop.permute.xlu1 %4025 }
 0x314   : > { %421 = vst.msk [vmem:[#allocation3 + $0x118] sm:$0xff] %vm337_vm8, %v9689_v20  ;;  %v3345_v13 = vpop.f32.mrf.mxu3  ;;  %v3971_v40 = vsel %vm3888_vm13, %v3847_v62, %v3930_v6  ;;  %v4215_v44 = vmul.f32 %v11252_v1, %v3969_v8 }
 0x315   : > { %422 = vst.msk [vmem:[#allocation3 + $0x120] sm:$0xff] %vm337_vm8, %v9689_v20  ;;  %v3802_v18 = vmul.f32 %v11114_v26, %v3757_v38  ;;  %v13556_v38 = vshrl.u32 %v10437_v51, 16  ;;  %v3238_v14 = vsel %vm3211_vm6, %v13560_v23, %v13435_v0  ;;  %v4214_v51 = vmul.f32 %v11288_v35, %v3968_v63  ;;  %v11312_v0 = vpop.permute.xlu2 %4035 }
 0x316   : > { %423 = vst.msk [vmem:[#allocation3 + $0x128] sm:$0xff] %vm337_vm8, %v9689_v20  ;;  %v4216_v23 = vmul.f32 %v11304_v25, %v3970_v34  ;;  %v4217_v62 = vmul.f32 %v11260_v37, %v3971_v40  ;;  %v11326_v34 = vpop.permute.xlu0 %4040 }
 0x317   : > { %424 = vst.msk [vmem:[#allocation3 + $0x130] sm:$0xff] %vm337_vm8, %v9689_v20  ;;  %v3848_v2 = vadd.f32 %v11125_v11, %v3802_v18  ;;  %v3532_v43 = vrot.slane %v13556_v38, 1 }
 0x318   : > { %425 = vst.msk [vmem:[#allocation3 + $0x138] sm:$0xff] %vm337_vm8, %v9689_v20 }
 0x319   : > { %426 = vst.msk [vmem:[#allocation3 + $0x140] sm:$0xff] %vm337_vm8, %v9689_v20  ;;  %vm3889_vm14 = vcmp.ge.f32.partialorder %v3848_v2, 0.0  ;;  %v3931_v18 = vmul.f32 %v11135_v58, %v3848_v2  ;;  %8860 = vmatmul.msk.bf16.gmra.mxu3 %vm626_vm2, %v3238_v14  ;;  %v3534_v36 = vor.u32 %v3533_v22, %v3532_v43  ;;  %v4361_v14 = vld [vmem:[#allocation2 + $0x16] sm:$0xff] }
 0x31a   : > { %13558 = vst [vmem:[#allocation42_spill] sm:$0xff] %v11288_v35  ;;  %v3663_v7 = vpop.f32.mrf.mxu0 }
 0x31b   : > { %427 = vst.msk [vmem:[#allocation3 + $0x148] sm:$0xff] %vm337_vm8, %v9689_v20  ;;  %v3972_v38 = vsel %vm3889_vm14, %v3848_v2, %v3931_v18  ;;  %v3758_v57 = vadd.f32 %v3663_v7, %v3438_v5  ;;  %v3535_v63 = vsel %vm3479_vm7, %v11228_v17, %v3534_v36  ;;  %v3439_v17 = vadd.f32 %v3345_v13, %v10485_v54  ;;  %v4297_v7 = vld [vmem:[#allocation2 + $0x15] sm:$0xff] }
 0x31c   : > { %428 = vst.msk [vmem:[#allocation3 + $0x150] sm:$0xff] %vm337_vm8, %v9689_v20  ;;  %v3348_v43 = vpop.f32.mrf.mxu3 }
 0x31d   : > { %13561 = vst [vmem:[#allocation19_spill] sm:$0xff] %v11304_v25  ;;  %v3803_v22 = vmul.f32 %v11114_v26, %v3758_v57  ;;  %8881 = vmatmul.msk.bf16.gmra.mxu0 %vm626_vm2, %v3535_v63  ;;  %v9645_v63 = vld [vmem:[%s9763_s18 + $0x84] sm:$0xff] }
 0x31e   : > { %429 = vst.msk [vmem:[#allocation3 + $0x158] sm:$0xff] %vm337_vm8, %v9689_v20  ;;  %v4218_v20 = vmul.f32 %v11312_v0, %v3972_v38 }
 0x31f   : > { %13562 = vst [vmem:[#allocation43_spill] sm:$0xff] %v11312_v0  ;;  %v3849_v6 = vadd.f32 %v11125_v11, %v3803_v22  ;;  %v13564_v22 = vld [vmem:[#allocation18_spill] sm:$0xff] }
 0x320   : > { %4255 = vst.msk [vmem:[#allocation2 + $0x20] sm:$0xff] %vm337_vm8, %v4214_v51 }
 0x321   : > { %4256 = vst.msk [vmem:[#allocation2 + $0x28] sm:$0xff] %vm337_vm8, %v4215_v44  ;;  %vm3890_vm15 = vcmp.ge.f32.partialorder %v3849_v6, 0.0  ;;  %v3932_v2 = vmul.f32 %v11135_v58, %v3849_v6 }
 0x322   : > { %4257 = vst.msk [vmem:[#allocation2 + $0x30] sm:$0xff] %vm337_vm8, %v4216_v23  ;;  %v3665_v8 = vpop.f32.mrf.mxu0 }
 0x323   : > { %4258 = vst.msk [vmem:[#allocation2 + $0x38] sm:$0xff] %vm337_vm8, %v4217_v62  ;;  %v3973_v5 = vsel %vm3890_vm15, %v3849_v6, %v3932_v2  ;;  %v3759_v18 = vadd.f32 %v3665_v8, %v3439_v17  ;;  %v3239_v62 = vrot.slane %v9645_v63, 1  ;;  %v13566_v17 = vshll.u32 %v13564_v22, 16  ;;  %v13567_v8 = vld [vmem:[#allocation20_spill] sm:$0xff] }
 0x324   : > { %4259 = vst.msk [vmem:[#allocation2 + $0x40] sm:$0xff] %vm337_vm8, %v4218_v20  ;;  %v4219_v51 = vmul.f32 %v11326_v34, %v3973_v5  ;;  %v3350_v54 = vpop.f32.mrf.mxu3  ;;  %v13565_v20 = vshrl.u32 %v13564_v22, 16  ;;  %v3440_v5 = vadd.f32 %v3348_v43, %v13567_v8 }
 0x325   : > { %13563 = vst [vmem:[#allocation44_spill] sm:$0xff] %v11326_v34  ;;  %v3804_v38 = vmul.f32 %v11114_v26, %v3759_v18  ;;  %v3537_v2 = vrot.slane %v13566_v17, 2 }
 0x326   : > { %4260 = vst.msk [vmem:[#allocation2 + $0x48] sm:$0xff] %vm337_vm8, %v4219_v51  ;;  %v3536_v6 = vrot.slane %v13565_v20, 1 }
 0x327   : > { %v4362_v40 = vld [vmem:[#allocation2 + $0x1e] sm:$0xff]  ;;  %v3850_v23 = vadd.f32 %v11125_v11, %v3804_v38 }
 0x328   : > { %v4298_v44 = vld [vmem:[#allocation2 + $0x1d] sm:$0xff]  ;;  %v4401_v13 = vpack.c.bf16 %v4362_v40, %v4361_v14  ;;  %v13568_v14 = vrot.slane %v11279_v24, 1 }
 0x329   : > { %v4337_v57 = vpack.c.bf16 %v4298_v44, %v4297_v7  ;;  %vm3891_vm0 = vcmp.ge.f32.partialorder %v3850_v23, 0.0  ;;  %v3933_v18 = vmul.f32 %v11135_v58, %v3850_v23  ;;  %v3538_v7 = vor.u32 %v3537_v2, %v3536_v6  ;;  %v11345_v44 = vpop.permute.xlu1 %4045  ;;  %v4364_v20 = vld [vmem:[#allocation2 + $0x2e] sm:$0xff]  ;;  %v13570_v6 = vld [vmem:[#allocation21_spill] sm:$0xff] }
 0x32a   : > { %8899 = vmatmul.msk.bf16.gmra.mxu1 %vm337_vm8, %v4401_v13  ;;  %v3240_v51 = vsel %vm3211_vm6, %v13568_v14, %v3239_v62  ;;  %v3668_v40 = vpop.f32.mrf.mxu0  ;;  %13569 = vst [vmem:[#allocation18_spill] sm:$0xff] %v11345_v44  ;;  %v4300_v17 = vld [vmem:[#allocation2 + $0x2d] sm:$0xff]  ;;  %v3441_v2 = vadd.f32 %v3350_v54, %v13570_v6 }
 0x32b   : > { %8924 = vmatmul.msk.bf16.gmra.mxu2 %vm337_vm8, %v4337_v57  ;;  %8861 = vmatmul.msk.bf16.gmra.mxu3 %vm626_vm2, %v3240_v51  ;;  %v3974_v38 = vsel %vm3891_vm0, %v3850_v23, %v3933_v18  ;;  %v3760_v13 = vadd.f32 %v3668_v40, %v3440_v5  ;;  %v3539_v63 = vsel %vm3479_vm7, %v3534_v36, %v3538_v7  ;;  %v11355_v5 = vpop.permute.xlu2 %4050  ;;  %v4363_v36 = vld [vmem:[#allocation2 + $0x26] sm:$0xff] }
 0x32c   : > { %v4220_v57 = vmul.f32 %v11345_v44, %v3974_v38  ;;  %v3353_v22 = vpop.f32.mrf.mxu3  ;;  %13571 = vst [vmem:[#allocation20_spill] sm:$0xff] %v11355_v5  ;;  %v4299_v18 = vld [vmem:[#allocation2 + $0x25] sm:$0xff]  ;;  %v4402_v40 = vpack.c.bf16 %v4364_v20, %v4363_v36  ;;  %v13573_v20 = vshll.u32 %v10495_v50, 16 }
 0x32d   : > { %v3805_v43 = vmul.f32 %v11114_v26, %v3760_v13  ;;  %8882 = vmatmul.msk.bf16.gmra.mxu0 %vm626_vm2, %v3539_v63  ;;  %v4338_v38 = vpack.c.bf16 %v4300_v17, %v4299_v18 }
 0x32e   : > { %4261 = vst.msk [vmem:[#allocation2 + $0x50] sm:$0xff] %vm337_vm8, %v4220_v57  ;;  %v3541_v17 = vrot.slane %v13573_v20, 2  ;;  %v4302_v20 = vld [vmem:[#allocation2 + $0x3d] sm:$0xff] }
 0x32f   : > { %v3851_v24 = vadd.f32 %v11125_v11, %v3805_v43  ;;  %v9646_v43 = vld [vmem:[%s9763_s18 + $0x8c] sm:$0xff] }
 0x330   : > { %v3241_v6 = vrot.slane %v9646_v43, 1 }
 0x331   : > { %vm3892_vm1 = vcmp.ge.f32.partialorder %v3851_v24, 0.0  ;;  %v3934_v23 = vmul.f32 %v11135_v58, %v3851_v24 }
 0x332   : > { %v3670_v8 = vpop.f32.mrf.mxu0  ;;  %v3242_v18 = vsel %vm3211_vm6, %v3239_v62, %v3241_v6 }
 0x333   : > { %v3975_v14 = vsel %vm3892_vm1, %v3851_v24, %v3934_v23  ;;  %v3761_v51 = vadd.f32 %v3670_v8, %v3441_v2  ;;  %v13572_v24 = vshrl.u32 %v10495_v50, 16  ;;  %v13574_v23 = vld [vmem:[#allocation22_spill] sm:$0xff] }
 0x334   : > { %v4221_v13 = vmul.f32 %v11355_v5, %v3975_v14  ;;  %v3355_v63 = vpop.f32.mrf.mxu3  ;;  %v3442_v8 = vadd.f32 %v3353_v22, %v13574_v23  ;;  %v11382_v23 = vpop.permute.xlu1 %4060 }
 0x335   : > { %v3806_v57 = vmul.f32 %v11114_v26, %v3761_v51  ;;  %v3540_v2 = vrot.slane %v13572_v24, 1  ;;  %v4366_v24 = vld [vmem:[#allocation2 + $0x3e] sm:$0xff]  ;;  %13576 = vst [vmem:[#allocation22_spill] sm:$0xff] %v11382_v23 }
 0x336   : > { %4262 = vst.msk [vmem:[#allocation2 + $0x58] sm:$0xff] %vm337_vm8, %v4221_v13 }
 0x337   : > { %v3852_v54 = vadd.f32 %v11125_v11, %v3806_v57  ;;  %v3542_v51 = vor.u32 %v3541_v17, %v3540_v2  ;;  %v3443_v2 = vadd.f32 %v3355_v63, %v10546_v39  ;;  %v9647_v63 = vld [vmem:[%s9763_s18 + $0x94] sm:$0xff] }
 0x339   : > { %vm3893_vm3 = vcmp.ge.f32.partialorder %v3852_v54, 0.0  ;;  %v3935_v36 = vmul.f32 %v11135_v58, %v3852_v54  ;;  %v3543_v50 = vsel %vm3479_vm7, %v3538_v7, %v3542_v51  ;;  %v4365_v7 = vld [vmem:[#allocation2 + $0x36] sm:$0xff] }
 0x33a   : > { %8900 = vmatmul.msk.bf16.gmra.mxu1 %vm337_vm8, %v4402_v40  ;;  %v3673_v14 = vpop.f32.mrf.mxu0  ;;  %v11372_v40 = vpop.permute.xlu0 %4055 }
 0x33b   : > { %8925 = vmatmul.msk.bf16.gmra.mxu2 %vm337_vm8, %v4338_v38  ;;  %8862 = vmatmul.msk.bf16.gmra.mxu3 %vm626_vm2, %v3242_v18  ;;  %13575 = vst [vmem:[#allocation21_spill] sm:$0xff] %v11372_v40  ;;  %v3976_v38 = vsel %vm3893_vm3, %v3852_v54, %v3935_v36  ;;  %v3762_v13 = vadd.f32 %v3673_v14, %v3442_v8  ;;  %v4301_v8 = vld [vmem:[#allocation2 + $0x35] sm:$0xff] }
 0x33c   : > { %v4222_v57 = vmul.f32 %v11372_v40, %v3976_v38  ;;  %v3358_v22 = vpop.f32.mrf.mxu3  ;;  %v4403_v14 = vpack.c.bf16 %v4366_v24, %v4365_v7  ;;  %v4339_v38 = vpack.c.bf16 %v4302_v20, %v4301_v8  ;;  %v13578_v24 = vshll.u32 %v10524_v21, 16 }
 0x33d   : > { %v3807_v43 = vmul.f32 %v11114_v26, %v3762_v13  ;;  %8883 = vmatmul.msk.bf16.gmra.mxu0 %vm626_vm2, %v3543_v50 }
 0x33e   : > { %4263 = vst.msk [vmem:[#allocation2 + $0x60] sm:$0xff] %vm337_vm8, %v4222_v57  ;;  %v3545_v20 = vrot.slane %v13578_v24, 2  ;;  %v4304_v24 = vld [vmem:[#allocation2 + $0x4d] sm:$0xff] }
 0x33f   : > { %v3853_v62 = vadd.f32 %v11125_v11, %v3807_v43  ;;  %v3243_v43 = vrot.slane %v9647_v63, 1 }
 0x341   : > { %vm3894_vm4 = vcmp.ge.f32.partialorder %v3853_v62, 0.0  ;;  %v3936_v54 = vmul.f32 %v11135_v58, %v3853_v62  ;;  %v3244_v8 = vsel %vm3211_vm6, %v3241_v6, %v3243_v43 }
 0x342   : > { %v3675_v17 = vpop.f32.mrf.mxu0 }
 0x343   : > { %v3977_v36 = vsel %vm3894_vm4, %v3853_v62, %v3936_v54  ;;  %v3763_v18 = vadd.f32 %v3675_v17, %v3443_v2  ;;  %v13577_v62 = vshrl.u32 %v10524_v21, 16  ;;  %v13579_v54 = vld [vmem:[#allocation24_spill] sm:$0xff] }
 0x344   : > { %v4223_v13 = vmul.f32 %v11382_v23, %v3977_v36  ;;  %v3360_v50 = vpop.f32.mrf.mxu3  ;;  %v3444_v17 = vadd.f32 %v3358_v22, %v13579_v54  ;;  %v13583_v23 = vld [vmem:[#allocation23_spill] sm:$0xff] }
 0x345   : > { %v3808_v57 = vmul.f32 %v11114_v26, %v3763_v18  ;;  %v3544_v2 = vrot.slane %v13577_v62, 1  ;;  %v4368_v62 = vld [vmem:[#allocation2 + $0x4e] sm:$0xff] }
 0x346   : > { %4264 = vst.msk [vmem:[#allocation2 + $0x68] sm:$0xff] %vm337_vm8, %v4223_v13 }
 0x347   : > { %v3854_v39 = vadd.f32 %v11125_v11, %v3808_v57  ;;  %v3546_v18 = vor.u32 %v3545_v20, %v3544_v2  ;;  %v13581_v2 = vld [vmem:[#allocation25_spill] sm:$0xff] }
 0x348   : > { %v3445_v20 = vadd.f32 %v3360_v50, %v13581_v2  ;;  %v9648_v2 = vld [vmem:[%s9763_s18 + $0x9c] sm:$0xff] }
 0x349   : > { %vm3895_vm5 = vcmp.ge.f32.partialorder %v3854_v39, 0.0  ;;  %v3937_v7 = vmul.f32 %v11135_v58, %v3854_v39  ;;  %v3547_v21 = vsel %vm3479_vm7, %v3542_v51, %v3546_v18  ;;  %v4367_v51 = vld [vmem:[#allocation2 + $0x46] sm:$0xff] }
 0x34a   : > { %8901 = vmatmul.msk.bf16.gmra.mxu1 %vm337_vm8, %v4403_v14  ;;  %v3678_v36 = vpop.f32.mrf.mxu0  ;;  %v11399_v14 = vpop.permute.xlu2 %4065 }
 0x34b   : > { %8926 = vmatmul.msk.bf16.gmra.mxu2 %vm337_vm8, %v4339_v38  ;;  %8863 = vmatmul.msk.bf16.gmra.mxu3 %vm626_vm2, %v3244_v8  ;;  %13580 = vst [vmem:[#allocation24_spill] sm:$0xff] %v11399_v14  ;;  %v3978_v38 = vsel %vm3895_vm5, %v3854_v39, %v3937_v7  ;;  %v3764_v13 = vadd.f32 %v3678_v36, %v3444_v17  ;;  %v11409_v17 = vpop.permute.xlu0 %4070  ;;  %v4303_v7 = vld [vmem:[#allocation2 + $0x45] sm:$0xff] }
 0x34c   : > { %v4224_v57 = vmul.f32 %v11399_v14, %v3978_v38  ;;  %v3363_v22 = vpop.f32.mrf.mxu3  ;;  %13582 = vst [vmem:[#allocation25_spill] sm:$0xff] %v11409_v17  ;;  %v4404_v38 = vpack.c.bf16 %v4368_v62, %v4367_v51  ;;  %v3245_v14 = vrot.slane %v9648_v2, 1  ;;  %v13585_v62 = vshll.u32 %v13583_v23, 16 }
 0x34d   : > { %v3809_v63 = vmul.f32 %v11114_v26, %v3764_v13  ;;  %8884 = vmatmul.msk.bf16.gmra.mxu0 %vm626_vm2, %v3547_v21  ;;  %v4340_v13 = vpack.c.bf16 %v4304_v24, %v4303_v7 }
 0x34e   : > { %4265 = vst.msk [vmem:[#allocation2 + $0x70] sm:$0xff] %vm337_vm8, %v4224_v57  ;;  %v3549_v24 = vrot.slane %v13585_v62, 2  ;;  %v3246_v7 = vsel %vm3211_vm6, %v3243_v43, %v3245_v14  ;;  %v4306_v62 = vld [vmem:[#allocation2 + $0x5d] sm:$0xff] }
 0x34f   : > { %v3855_v6 = vadd.f32 %v11125_v11, %v3809_v63 }
 0x351   : > { %vm3896_vm9 = vcmp.ge.f32.partialorder %v3855_v6, 0.0  ;;  %v3938_v39 = vmul.f32 %v11135_v58, %v3855_v6 }
 0x352   : > { %v3680_v54 = vpop.f32.mrf.mxu0 }
 0x353   : > { %v3979_v8 = vsel %vm3896_vm9, %v3855_v6, %v3938_v39  ;;  %v3765_v36 = vadd.f32 %v3680_v54, %v3445_v20  ;;  %v13584_v6 = vshrl.u32 %v13583_v23, 16  ;;  %v13586_v39 = vld [vmem:[#allocation26_spill] sm:$0xff] }
 0x354   : > { %v4225_v57 = vmul.f32 %v11409_v17, %v3979_v8  ;;  %v3365_v63 = vpop.f32.mrf.mxu3  ;;  %v3446_v54 = vadd.f32 %v3363_v22, %v13586_v39  ;;  %v13590_v17 = vld [vmem:[#allocation28_spill] sm:$0xff] }
 0x355   : > { %v3810_v21 = vmul.f32 %v11114_v26, %v3765_v36  ;;  %v3548_v20 = vrot.slane %v13584_v6, 1  ;;  %v4370_v6 = vld [vmem:[#allocation2 + $0x5e] sm:$0xff] }
 0x356   : > { %4266 = vst.msk [vmem:[#allocation2 + $0x78] sm:$0xff] %vm337_vm8, %v4225_v57 }
 0x357   : > { %v3856_v50 = vadd.f32 %v11125_v11, %v3810_v21  ;;  %v3550_v36 = vor.u32 %v3549_v24, %v3548_v20  ;;  %v13588_v20 = vld [vmem:[#allocation27_spill] sm:$0xff] }
 0x358   : > { %v3447_v24 = vadd.f32 %v3365_v63, %v13588_v20  ;;  %v9649_v20 = vld [vmem:[%s9763_s18 + $0xa4] sm:$0xff] }
 0x359   : > { %vm3897_vm10 = vcmp.ge.f32.partialorder %v3856_v50, 0.0  ;;  %v3939_v51 = vmul.f32 %v11135_v58, %v3856_v50  ;;  %v3551_v23 = vsel %vm3479_vm7, %v3546_v18, %v3550_v36  ;;  %v4369_v18 = vld [vmem:[#allocation2 + $0x56] sm:$0xff] }
 0x35a   : > { %8902 = vmatmul.msk.bf16.gmra.mxu1 %vm337_vm8, %v4404_v38  ;;  %v3683_v8 = vpop.f32.mrf.mxu0  ;;  %v11426_v38 = vpop.permute.xlu1 %4075 }
 0x35b   : > { %8927 = vmatmul.msk.bf16.gmra.mxu2 %vm337_vm8, %v4340_v13  ;;  %8864 = vmatmul.msk.bf16.gmra.mxu3 %vm626_vm2, %v3246_v7  ;;  %13587 = vst [vmem:[#allocation23_spill] sm:$0xff] %v11426_v38  ;;  %v3980_v13 = vsel %vm3897_vm10, %v3856_v50, %v3939_v51  ;;  %v3766_v57 = vadd.f32 %v3683_v8, %v3446_v54  ;;  %v11436_v54 = vpop.permute.xlu2 %4080  ;;  %v4305_v51 = vld [vmem:[#allocation2 + $0x55] sm:$0xff] }
 0x35c   : > { %v4226_v21 = vmul.f32 %v11426_v38, %v3980_v13  ;;  %v3368_v22 = vpop.f32.mrf.mxu3  ;;  %13589 = vst [vmem:[#allocation26_spill] sm:$0xff] %v11436_v54  ;;  %v4405_v13 = vpack.c.bf16 %v4370_v6, %v4369_v18  ;;  %v3247_v38 = vrot.slane %v9649_v20, 1  ;;  %v13591_v6 = vshrl.u32 %v10602_v48, 16  ;;  %v4684_v18 = vpop.f32.mrf.mxu2 }
 0x35d   : > { %v3811_v2 = vmul.f32 %v11114_v26, %v3766_v57  ;;  %8885 = vmatmul.msk.bf16.gmra.mxu0 %vm626_vm2, %v3551_v23  ;;  %v4341_v57 = vpack.c.bf16 %v4306_v62, %v4305_v51  ;;  %v5376_v44 = vld [vmem:[#allocation2 + $0x78] sm:$0xff] }
 0x35e   : > { %4267 = vst.msk [vmem:[#allocation2 + $0x80] sm:$0xff] %vm337_vm8, %v4226_v21  ;;  %v3552_v62 = vrot.slane %v13591_v6, 1 }
 0x35f   : > { %v3857_v43 = vadd.f32 %v11125_v11, %v3811_v2 }
 0x361   : > { %vm3898_vm11 = vcmp.ge.f32.partialorder %v3857_v43, 0.0  ;;  %v3940_v50 = vmul.f32 %v11135_v58, %v3857_v43 }
 0x362   : > { %v3685_v39 = vpop.f32.mrf.mxu0 }
 0x363   : > { %v3981_v7 = vsel %vm3898_vm11, %v3857_v43, %v3940_v50  ;;  %v3767_v8 = vadd.f32 %v3685_v39, %v3447_v24  ;;  %v3448_v43 = vadd.f32 %v3368_v22, %v13590_v17  ;;  %v13592_v24 = vshll.u32 %v10602_v48, 16  ;;  %v4502_v39 = vpop.f32.mrf.mxu1  ;;  %v11455_v17 = vpop.permute.xlu0 %4085 }
 0x364   : > { %v4227_v21 = vmul.f32 %v11436_v54, %v3981_v7  ;;  %v3370_v2 = vpop.f32.mrf.mxu3  ;;  %v3248_v7 = vsel %vm3211_vm6, %v3245_v14, %v3247_v38  ;;  %13593 = vst [vmem:[#allocation27_spill] sm:$0xff] %v11455_v17  ;;  %v5374_v54 = vld [vmem:[#allocation2 + $0x68] sm:$0xff] }
 0x365   : > { %v3812_v23 = vmul.f32 %v11114_v26, %v3767_v8  ;;  %v3553_v50 = vrot.slane %v13592_v24, 2  ;;  %v11452_v8 = vadd.f32 %v4684_v18, %v4502_v39  ;;  %v4372_v24 = vld [vmem:[#allocation2 + $0x6e] sm:$0xff]  ;;  %v4307_v18 = vld [vmem:[#allocation2 + $0x65] sm:$0xff] }
 0x366   : > { %4268 = vst.msk [vmem:[#allocation2 + $0x88] sm:$0xff] %vm337_vm8, %v4227_v21  ;;  %v4308_v39 = vld [vmem:[#allocation2 + $0x6d] sm:$0xff] }
 0x367   : > { %v3858_v63 = vadd.f32 %v11125_v11, %v3812_v23 }
 0x369   : > { %vm3899_vm12 = vcmp.ge.f32.partialorder %v3858_v63, 0.0  ;;  %v3941_v51 = vmul.f32 %v11135_v58, %v3858_v63 }
 0x36a   : > { %8903 = vmatmul.msk.bf16.gmra.mxu1 %vm337_vm8, %v4405_v13  ;;  %v3688_v13 = vpop.f32.mrf.mxu0 }
 0x36b   : > { %8928 = vmatmul.msk.bf16.gmra.mxu2 %vm337_vm8, %v4341_v57  ;;  %8865 = vmatmul.msk.bf16.gmra.mxu3 %vm626_vm2, %v3248_v7  ;;  %v3554_v57 = vor.u32 %v3553_v50, %v3552_v62  ;;  %v3982_v22 = vsel %vm3899_vm12, %v3858_v63, %v3941_v51  ;;  %v3768_v21 = vadd.f32 %v3688_v13, %v3448_v43  ;;  %v11465_v50 = vpop.permute.xlu1 %4090 }
 0x36c   : > { %v4228_v48 = vmul.f32 %v11455_v17, %v3982_v22  ;;  %v3373_v6 = vpop.f32.mrf.mxu3  ;;  %v3449_v62 = vadd.f32 %v3370_v2, %v10685_v15  ;;  %13594 = vst [vmem:[#allocation28_spill] sm:$0xff] %v11465_v50  ;;  %v4342_v22 = vpack.c.bf16 %v4308_v39, %v4307_v18  ;;  %v9650_v2 = vld [vmem:[%s9763_s18 + $0xac] sm:$0xff] }
 0x36d   : > { %v3555_v23 = vsel %vm3479_vm7, %v3550_v36, %v3554_v57  ;;  %v3813_v20 = vmul.f32 %v11114_v26, %v3768_v21  ;;  %v4371_v36 = vld [vmem:[#allocation2 + $0x66] sm:$0xff] }
 0x36e   : > { %8886 = vmatmul.msk.bf16.gmra.mxu0 %vm626_vm2, %v3555_v23  ;;  %4269 = vst.msk [vmem:[#allocation2 + $0x90] sm:$0xff] %vm337_vm8, %v4228_v48  ;;  %v4406_v13 = vpack.c.bf16 %v4372_v24, %v4371_v36  ;;  %v13596_v24 = vshll.u32 %v10655_v28, 16  ;;  %v5378_v37 = vld [vmem:[#allocation2 + $0x88] sm:$0xff] }
 0x36f   : > { %v3859_v14 = vadd.f32 %v11125_v11, %v3813_v20  ;;  %v3249_v20 = vrot.slane %v9650_v2, 1 }
 0x370   : > { %v3557_v39 = vrot.slane %v13596_v24, 2 }
 0x371   : > { %vm3900_vm13 = vcmp.ge.f32.partialorder %v3859_v14, 0.0  ;;  %v3942_v63 = vmul.f32 %v11135_v58, %v3859_v14  ;;  %v3250_v36 = vsel %vm3211_vm6, %v3247_v38, %v3249_v20 }
 0x372   : > { %v3690_v43 = vpop.f32.mrf.mxu0 }
 0x373   : > { %v3983_v51 = vsel %vm3900_vm13, %v3859_v14, %v3942_v63  ;;  %v3769_v7 = vadd.f32 %v3690_v43, %v3449_v62  ;;  %v13595_v14 = vshrl.u32 %v10655_v28, 16  ;;  %v3450_v63 = vadd.f32 %v3373_v6, %v10707_v29 }
 0x374   : > { %v4229_v21 = vmul.f32 %v11465_v50, %v3983_v51  ;;  %v3375_v23 = vpop.f32.mrf.mxu3  ;;  %v2650_v29 = vadd.f32 %v10709_v27, %v10701_v32  ;;  %v4373_v32 = vld [vmem:[#allocation2 + $0x76] sm:$0xff] }
 0x375   : > { %v3814_v48 = vmul.f32 %v11114_v26, %v3769_v7  ;;  %v3556_v62 = vrot.slane %v13595_v14, 1  ;;  %v11482_v7 = vpop.permute.xlu2 %4095  ;;  %v4310_v14 = vld [vmem:[#allocation2 + $0x7d] sm:$0xff]  ;;  %v4309_v27 = vld [vmem:[#allocation2 + $0x75] sm:$0xff] }
 0x376   : > { %4270 = vst.msk [vmem:[#allocation2 + $0x98] sm:$0xff] %vm337_vm8, %v4229_v21 }
 0x377   : > { %v3860_v15 = vadd.f32 %v11125_v11, %v3814_v48  ;;  %v3558_v51 = vor.u32 %v3557_v39, %v3556_v62  ;;  %13597 = vst [vmem:[#allocation45_spill] sm:$0xff] %v11482_v7  ;;  %v3183_v48 = vadd.f32 %v10733_v16, %v2650_v29  ;;  %v11494_v39 = vpop.permute.xlu0 %4100 }
 0x378   : > { %13598 = vst [vmem:[#allocation46_spill] sm:$0xff] %v11494_v39 }
 0x379   : > { %vm3901_vm14 = vcmp.ge.f32.partialorder %v3860_v15, 0.0  ;;  %v3943_v43 = vmul.f32 %v11135_v58, %v3860_v15  ;;  %v3559_v28 = vsel %vm3479_vm7, %v3554_v57, %v3558_v51  ;;  %v3451_v62 = vadd.f32 %v3375_v23, %v3183_v48 }
 0x37a   : > { %8904 = vmatmul.msk.bf16.gmra.mxu1 %vm337_vm8, %v4406_v13  ;;  %v3693_v18 = vpop.f32.mrf.mxu0 }
 0x37b   : > { %8929 = vmatmul.msk.bf16.gmra.mxu2 %vm337_vm8, %v4342_v22  ;;  %8866 = vmatmul.msk.bf16.gmra.mxu3 %vm626_vm2, %v3250_v36  ;;  %v3984_v13 = vsel %vm3901_vm14, %v3860_v15, %v3943_v43  ;;  %v3770_v22 = vadd.f32 %v3693_v18, %v3450_v63  ;;  %v4374_v15 = vld [vmem:[#allocation2 + $0x7e] sm:$0xff]  ;;  %v4343_v18 = vpack.c.bf16 %v4310_v14, %v4309_v27 }
 0x37c   : > { %v4230_v21 = vmul.f32 %v11482_v7, %v3984_v13  ;;  %v3378_v38 = vpop.f32.mrf.mxu3  ;;  %v4407_v36 = vpack.c.bf16 %v4374_v15, %v4373_v32  ;;  %v5372_v7 = vld [vmem:[#allocation2 + $0x58] sm:$0xff] }
 0x37d   : > { %v3815_v6 = vmul.f32 %v11114_v26, %v3770_v22 }
 0x37e   : > { %8887 = vmatmul.msk.bf16.gmra.mxu0 %vm626_vm2, %v3559_v28  ;;  %4271 = vst.msk [vmem:[#allocation2 + $0xa0] sm:$0xff] %vm337_vm8, %v4230_v21  ;;  %v3251_v21 = vrot.slane %v10755_v3, 1  ;;  %v13599_v28 = vshrl.u32 %v10704_v4, 16 }
 0x37f   : > { %v3861_v2 = vadd.f32 %v11125_v11, %v3815_v6  ;;  %v13600_v6 = vshll.u32 %v10704_v4, 16 }
 0x380   : > { %v3560_v29 = vrot.slane %v13599_v28, 1  ;;  %v4312_v28 = vld [vmem:[#allocation2 + $0x8d] sm:$0xff] }
 0x381   : > { %vm3902_vm15 = vcmp.ge.f32.partialorder %v3861_v2, 0.0  ;;  %v3944_v57 = vmul.f32 %v11135_v58, %v3861_v2  ;;  %v3561_v48 = vrot.slane %v13600_v6, 2  ;;  %v3473_v6 = vld [vmem:[%s9763_s18 + $0xb4] sm:$0xf] }
 0x382   : > { %v3695_v24 = vpop.f32.mrf.mxu0 }
 0x383   : > { %v3985_v63 = vsel %vm3902_vm15, %v3861_v2, %v3944_v57  ;;  %v3771_v43 = vadd.f32 %v3695_v24, %v3451_v62  ;;  %v13601_v2 = vld [vmem:[#allocation30_spill] sm:$0xff]  ;;  %v3252_v62 = vsel %vm3211_vm6, %v3249_v20, %v3251_v21  ;;  %v3562_v3 = vor.u32 %v3561_v48, %v3560_v29  ;;  %v11511_v24 = vpop.permute.xlu1 %4105 }
 0x384   : > { %v4231_v13 = vmul.f32 %v11494_v39, %v3985_v63  ;;  %v3380_v22 = vpop.f32.mrf.mxu3  ;;  %v3452_v15 = vadd.f32 %v3378_v38, %v13601_v2  ;;  %13602 = vst [vmem:[#allocation30_spill] sm:$0xff] %v11511_v24  ;;  %v13604_v38 = vld [vmem:[#allocation31_spill] sm:$0xff]  ;;  %v3477_v2 = vunpack.c.l.b16 %v3473_v6  ;;  %v11538_v6 = vpop.permute.xlu0 %4115 }
 0x385   : > { %v3816_v16 = vmul.f32 %v11114_v26, %v3771_v43  ;;  %v3563_v4 = vsel %vm3479_vm7, %v3558_v51, %v3562_v3  ;;  %v13603_v43 = vld [vmem:[#allocation29_spill] sm:$0xff]  ;;  %13606 = vst [vmem:[#allocation31_spill] sm:$0xff] %v11538_v6 }
 0x386   : > { %4272 = vst.msk [vmem:[#allocation2 + $0xa8] sm:$0xff] %vm337_vm8, %v4231_v13 }
 0x387   : > { %v3862_v23 = vadd.f32 %v11125_v11, %v3816_v16 }
 0x389   : > { %vm3903_vm0 = vcmp.ge.f32.partialorder %v3862_v23, 0.0  ;;  %v3945_v14 = vmul.f32 %v11135_v58, %v3862_v23 }
 0x38a   : > { %8905 = vmatmul.msk.bf16.gmra.mxu1 %vm337_vm8, %v4407_v36  ;;  %v3698_v57 = vpop.f32.mrf.mxu0  ;;  %v2652_v36 = vadd.f32 %v13604_v38, %v13603_v43 }
 0x38b   : > { %8930 = vmatmul.msk.bf16.gmra.mxu2 %vm337_vm8, %v4343_v18  ;;  %8867 = vmatmul.msk.bf16.gmra.mxu3 %vm626_vm2, %v3252_v62  ;;  %v3986_v32 = vsel %vm3903_vm0, %v3862_v23, %v3945_v14  ;;  %v3772_v27 = vadd.f32 %v3698_v57, %v3452_v15  ;;  %v4376_v23 = vld [vmem:[#allocation2 + $0x8e] sm:$0xff]  ;;  %v11524_v15 = vpop.permute.xlu2 %4110  ;;  %v4375_v14 = vld [vmem:[#allocation2 + $0x86] sm:$0xff] }
 0x38c   : > { %v4232_v63 = vmul.f32 %v11511_v24, %v3986_v32  ;;  %v3383_v20 = vpop.f32.mrf.mxu3  ;;  %v3185_v13 = vadd.f32 %v10786_v60, %v2652_v36  ;;  %13605 = vst [vmem:[#allocation29_spill] sm:$0xff] %v11524_v15  ;;  %v4311_v62 = vld [vmem:[#allocation2 + $0x85] sm:$0xff] }
 0x38d   : > { %v3817_v18 = vmul.f32 %v11114_v26, %v3772_v27  ;;  %v4408_v27 = vpack.c.bf16 %v4376_v23, %v4375_v14  ;;  %v3454_v23 = vadd.f32 %v3383_v20, %v10809_v31 }
 0x38e   : > { %8888 = vmatmul.msk.bf16.gmra.mxu0 %vm626_vm2, %v3563_v4  ;;  %4273 = vst.msk [vmem:[#allocation2 + $0xb0] sm:$0xff] %vm337_vm8, %v4232_v63  ;;  %v3453_v29 = vadd.f32 %v3380_v22, %v3185_v13  ;;  %v4344_v63 = vpack.c.bf16 %v4312_v28, %v4311_v62  ;;  %v9207_v22 = vld [vmem:[%s13383_s3 + $0x28] sm:$0xff]  ;;  %v3478_v4 = vpack.c.b16 %v3477_v2, %v3477_v2 }
 0x38f   : > { %v3863_v16 = vadd.f32 %v11125_v11, %v3817_v18  ;;  %5793 = vmatpush.bf16.msrb.mxu2 %v9207_v22  ;;  %v4314_v22 = vld [vmem:[#allocation2 + $0x9d] sm:$0xff] }
 0x390   : > { %v3565_v36 = vshrl.u32 %v3478_v4, 16  ;;  %v3568_v13 = vshll.u32 %v3478_v4, 16 }
 0x391   : > { %vm3904_vm6 = vcmp.ge.f32.partialorder %v3863_v16, 0.0  ;;  %v3946_v51 = vmul.f32 %v11135_v58, %v3863_v16 }
 0x392   : > { %v3700_v48 = vpop.f32.mrf.mxu0 }
 0x393   : > { %v3987_v57 = vsel %vm3904_vm6, %v3863_v16, %v3946_v51  ;;  %v3773_v32 = vadd.f32 %v3700_v48, %v3453_v29  ;;  %v3567_v16 = vrot.slane %v3565_v36, 1  ;;  %v3570_v29 = vrot.slane %v3568_v13, 2  ;;  %v4313_v36 = vld [vmem:[#allocation2 + $0x95] sm:$0xff] }
 0x394   : > { %v4233_v60 = vmul.f32 %v11524_v15, %v3987_v57  ;;  %v3385_v38 = vpop.f32.mrf.mxu3  ;;  %v2654_v57 = vadd.f32 %v10811_v46, %v10806_v33  ;;  %v5370_v15 = vld [vmem:[#allocation2 + $0x48] sm:$0xff] }
 0x395   : > { %v3818_v43 = vmul.f32 %v11114_v26, %v3773_v32  ;;  %v3571_v14 = vor.u32 %v3570_v29, %v3567_v16  ;;  %v11543_v32 = vpop.f32.mrf.mxu1 }
 0x396   : > { %4274 = vst.msk [vmem:[#allocation2 + $0xb8] sm:$0xff] %vm337_vm8, %v4233_v60  ;;  %v4378_v60 = vld [vmem:[#allocation2 + $0x9e] sm:$0xff] }
 0x397   : > { %v3864_v18 = vadd.f32 %v11125_v11, %v3818_v43  ;;  %v3572_v20 = vsel %vm3479_vm7, %v3562_v3, %v3571_v14  ;;  %v11552_v43 = vpop.permute.xlu1 %4120  ;;  %v4377_v3 = vld [vmem:[#allocation2 + $0x96] sm:$0xff] }
 0x398   : > { %13607 = vst [vmem:[#allocation47_spill] sm:$0xff] %v11552_v43  ;;  %v4409_v16 = vpack.c.bf16 %v4378_v60, %v4377_v3  ;;  %v2656_v3 = vadd.f32 %v10849_v59, %v10844_v55  ;;  %v11588_v55 = vpop.permute.xlu0 %4130 }
 0x399   : > { %vm3905_vm1 = vcmp.ge.f32.partialorder %v3864_v18, 0.0  ;;  %v3947_v28 = vmul.f32 %v11135_v58, %v3864_v18  ;;  %13609 = vst [vmem:[#allocation49_spill] sm:$0xff] %v11588_v55 }
 0x39a   : > { %8906 = vmatmul.msk.bf16.gmra.mxu1 %vm337_vm8, %v4408_v27  ;;  %v3703_v51 = vpop.f32.mrf.mxu0 }
 0x39b   : > { %8931 = vmatmul.msk.bf16.gmra.mxu2 %vm337_vm8, %v4344_v63  ;;  %8868 = vmatmul.msk.bf16.gmra.mxu3 %vm626_vm2, %v3251_v21  ;;  %v3988_v48 = vsel %vm3905_vm1, %v3864_v18, %v3947_v28  ;;  %v3774_v2 = vadd.f32 %v3703_v51, %v3454_v23  ;;  %v3187_v21 = vadd.f32 %v10828_v49, %v2654_v57  ;;  %v11567_v51 = vld [vmem:[%s13385_s5 + $0x1] ss:$0 sm:$0xff] }
 0x39c   : > { %v4234_v62 = vmul.f32 %v11538_v6, %v3988_v48  ;;  %v3388_v27 = vpop.f32.mrf.mxu3  ;;  %v4345_v23 = vpack.c.bf16 %v4314_v22, %v4313_v36 }
 0x39d   : > { %v3819_v31 = vmul.f32 %v11114_v26, %v3774_v2  ;;  %v3455_v4 = vadd.f32 %v3385_v38, %v3187_v21  ;;  %v11554_v26 = vpop.f32.mrf.mxu2  ;;  %v11560_v38 = vld [vmem:[%s13385_s5] ss:$0 sm:$0xff]  ;;  %v4788_v2 = vld [vmem:[#allocation2 + $0x7] sm:$0xff] }
 0x39e   : > { %4275 = vst.msk [vmem:[#allocation2 + $0xc0] sm:$0xff] %vm337_vm8, %v4234_v62  ;;  %8889 = vmatmul.msk.bf16.gmra.mxu0 %vm626_vm2, %v3572_v20  ;;  %v4789_v62 = vld [vmem:[#allocation2 + $0xf] sm:$0xff] }
 0x39f   : > { %v3865_v63 = vadd.f32 %v11125_v11, %v3819_v31  ;;  %v4829_v57 = vpack.c.bf16 %v4789_v62, %v4788_v2  ;;  %v3456_v31 = vadd.f32 %v3388_v27, %v10847_v47  ;;  %v4315_v2 = vld [vmem:[#allocation2 + $0xa5] sm:$0xff] }
 0x3a1   : > { %vm3906_vm3 = vcmp.ge.f32.partialorder %v3865_v63, 0.0  ;;  %v3948_v33 = vmul.f32 %v11135_v58, %v3865_v63 }
 0x3a2   : > { %v3705_v46 = vpop.f32.mrf.mxu0 }
 0x3a3   : > { %v3989_v18 = vsel %vm3906_vm3, %v3865_v63, %v3948_v33  ;;  %v3775_v13 = vadd.f32 %v3705_v46, %v3455_v4  ;;  %v11575_v63 = vpop.permute.xlu2 %4125 }
 0x3a4   : > { %v4235_v49 = vmul.f32 %v11552_v43, %v3989_v18  ;;  %v3390_v29 = vpop.f32.mrf.mxu3  ;;  %13608 = vst [vmem:[#allocation48_spill] sm:$0xff] %v11575_v63  ;;  %v3189_v18 = vadd.f32 %v10861_v9, %v2656_v3 }
 0x3a5   : > { %v3820_v28 = vmul.f32 %v11560_v38, %v3775_v13 }
 0x3a6   : > { %4276 = vst.msk [vmem:[#allocation2 + $0xc8] sm:$0xff] %vm337_vm8, %v4235_v49  ;;  %v3457_v49 = vadd.f32 %v3390_v29, %v3189_v18 }
 0x3a7   : > { %v4507_v11 = vpop.f32.mrf.mxu1  ;;  %v3866_v48 = vadd.f32 %v11567_v51, %v3820_v28 }
 0x3a9   : > { %vm3907_vm7 = vcmp.ge.f32.partialorder %v3866_v48, 0.0  ;;  %v3949_v20 = vmul.f32 %v11135_v58, %v3866_v48 }
 0x3aa   : > { %8907 = vmatmul.msk.bf16.gmra.mxu1 %vm337_vm8, %v4409_v16  ;;  %v3708_v21 = vpop.f32.mrf.mxu0  ;;  %v4380_v16 = vld [vmem:[#allocation2 + $0xae] sm:$0xff] }
 0x3ab   : > { %8932 = vmatmul.msk.bf16.gmra.mxu2 %vm337_vm8, %v4345_v23  ;;  %8950 = vmatmul.msk.bf16.vlgmr.msrb.gmra.mxu3 %vm337_vm8, %v4829_v57  ;;  %v3990_v22 = vsel %vm3907_vm7, %v3866_v48, %v3949_v20  ;;  %v3776_v4 = vadd.f32 %v3708_v21, %v3456_v31  ;;  %v4316_v23 = vld [vmem:[#allocation2 + $0xad] sm:$0xff] }
 0x3ac   : > { %v4236_v46 = vmul.f32 %v11575_v63, %v3990_v22  ;;  %v4379_v48 = vld [vmem:[#allocation2 + $0xa6] sm:$0xff]  ;;  %v4346_v9 = vpack.c.bf16 %v4316_v23, %v4315_v2  ;;  %v5368_v63 = vld [vmem:[#allocation2 + $0x38] sm:$0xff] }
 0x3ad   : > { %v3821_v47 = vmul.f32 %v11560_v38, %v3776_v4  ;;  %v4791_v22 = vld [vmem:[#allocation2 + $0x1f] sm:$0xff] }
 0x3ae   : > { %v4689_v60 = vpop.f32.mrf.mxu2  ;;  %v3393_v27 = vpop.f32.mrf.mxu3  ;;  %4277 = vst.msk [vmem:[#allocation2 + $0xd0] sm:$0xff] %vm337_vm8, %v4236_v46  ;;  %8890 = vmatmul.msk.bf16.gmra.mxu0 %vm626_vm2, %v3571_v14  ;;  %v4410_v14 = vpack.c.bf16 %v4380_v16, %v4379_v48  ;;  %v4790_v46 = vld [vmem:[#allocation2 + $0x17] sm:$0xff] }
 0x3af   : > { %v11577_v33 = vadd.f32 %v4689_v60, %v4507_v11  ;;  %v4509_v36 = vpop.f32.mrf.mxu1  ;;  %v3867_v13 = vadd.f32 %v11567_v51, %v3821_v47  ;;  %v4830_v3 = vpack.c.bf16 %v4791_v22, %v4790_v46  ;;  %v4317_v22 = vld [vmem:[#allocation2 + $0xb5] sm:$0xff] }
 0x3b1   : > { %vm3908_vm4 = vcmp.ge.f32.partialorder %v3867_v13, 0.0  ;;  %v3950_v11 = vmul.f32 %v11135_v58, %v3867_v13 }
 0x3b2   : > { %v3710_v28 = vpop.f32.mrf.mxu0 }
 0x3b3   : > { %v3991_v62 = vsel %vm3908_vm4, %v3867_v13, %v3950_v11  ;;  %v3777_v57 = vadd.f32 %v3710_v28, %v3457_v49  ;;  %v11601_v13 = vpop.permute.xlu1 %4135  ;;  %vm384_vm4 = vcmask 125952  }
 0x3b4   : > { %v4237_v20 = vmul.f32 %v11588_v55, %v3991_v62  ;;  %13610 = vst [vmem:[#allocation50_spill] sm:$0xff] %v11601_v13 }
 0x3b5   : > { %v3822_v29 = vmul.f32 %v11560_v38, %v3777_v57  ;;  %v4382_v57 = vld [vmem:[#allocation2 + $0xbe] sm:$0xff] }
 0x3b6   : > { %v4691_v59 = vpop.f32.mrf.mxu2  ;;  %v3395_v60 = vpop.f32.mrf.mxu3  ;;  %4278 = vst.msk [vmem:[#allocation2 + $0xd8] sm:$0xff] %vm337_vm8, %v4237_v20 }
 0x3b7   : > { %v11590_v31 = vadd.f32 %v4691_v59, %v4509_v36  ;;  %v4512_v21 = vpop.f32.mrf.mxu1  ;;  %v3868_v4 = vadd.f32 %v11567_v51, %v3822_v29  ;;  %v3458_v36 = vadd.f32 %v3393_v27, %v10879_v42  ;;  %v2658_v59 = vadd.f32 %v10881_v10, %v10876_v30  ;;  %v11614_v30 = vpop.permute.xlu2 %4140  ;;  %v4381_v29 = vld [vmem:[#allocation2 + $0xb6] sm:$0xff] }
 0x3b8   : > { %13611 = vst [vmem:[#allocation51_spill] sm:$0xff] %v11614_v30 }
 0x3b9   : > { %vm3909_vm2 = vcmp.ge.f32.partialorder %v3868_v4, 0.0  ;;  %v3951_v47 = vmul.f32 %v11135_v58, %v3868_v4  ;;  %v3191_v2 = vadd.f32 %v10890_v53, %v2658_v59 }
 0x3ba   : > { %8908 = vmatmul.msk.bf16.gmra.mxu1 %vm337_vm8, %v4410_v14  ;;  %v3713_v18 = vpop.f32.mrf.mxu0  ;;  %v4318_v14 = vld [vmem:[#allocation2 + $0xbd] sm:$0xff] }
 0x3bb   : > { %8933 = vmatmul.msk.bf16.gmra.mxu2 %vm337_vm8, %v4346_v9  ;;  %8951 = vmatmul.msk.bf16.gmra.mxu3 %vm337_vm8, %v4830_v3  ;;  %v3992_v23 = vsel %vm3909_vm2, %v3868_v4, %v3951_v47  ;;  %v3778_v49 = vadd.f32 %v3713_v18, %v3458_v36  ;;  %v3459_v9 = vadd.f32 %v3395_v60, %v3191_v2 }
 0x3bc   : > { %v4238_v28 = vmul.f32 %v11601_v13, %v3992_v23  ;;  %v4347_v53 = vpack.c.bf16 %v4318_v14, %v4317_v22  ;;  %v4793_v23 = vld [vmem:[#allocation2 + $0x2f] sm:$0xff] }
 0x3bd   : > { %v3823_v42 = vmul.f32 %v11560_v38, %v3778_v49  ;;  %v4805_v13 = vld [vmem:[#allocation2 + $0x8f] sm:$0xff]  ;;  %v4814_v55 = vld [vmem:[#allocation2 + $0xd7] sm:$0xff] }
 0x3be   : > { %v4694_v16 = vpop.f32.mrf.mxu2  ;;  %v3398_v27 = vpop.f32.mrf.mxu3  ;;  %4279 = vst.msk [vmem:[#allocation2 + $0xe0] sm:$0xff] %vm337_vm8, %v4238_v28  ;;  %8977 = vmatmul.msk.bf16.vlgmr.msrb.gmra.mxu0 %vm337_vm8, %v4830_v3  ;;  %v4411_v3 = vpack.c.bf16 %v4382_v57, %v4381_v29  ;;  %v4792_v28 = vld [vmem:[#allocation2 + $0x27] sm:$0xff] }
 0x3bf   : > { %v11603_v11 = vadd.f32 %v4694_v16, %v4512_v21  ;;  %v4514_v48 = vpop.f32.mrf.mxu1  ;;  %v3869_v62 = vadd.f32 %v11567_v51, %v3823_v42  ;;  %v4831_v59 = vpack.c.bf16 %v4793_v23, %v4792_v28  ;;  %v4319_v23 = vld [vmem:[#allocation2 + $0xc5] sm:$0xff] }
 0x3c1   : > { %vm3910_vm5 = vcmp.ge.f32.partialorder %v3869_v62, 0.0  ;;  %v3952_v20 = vmul.f32 %v11135_v58, %v3869_v62 }
 0x3c2   : > { %v3715_v21 = vpop.f32.mrf.mxu0 }
 0x3c3   : > { %v3993_v4 = vsel %vm3910_vm5, %v3869_v62, %v3952_v20  ;;  %v3779_v46 = vadd.f32 %v3715_v21, %v3459_v9  ;;  %v11627_v62 = vpop.permute.xlu0 %4145 }
 0x3c4   : > { %v4239_v47 = vmul.f32 %v11614_v30, %v3993_v4  ;;  %13612 = vst [vmem:[#allocation52_spill] sm:$0xff] %v11627_v62  ;;  %v4802_v30 = vld [vmem:[#allocation2 + $0x77] sm:$0xff] }
 0x3c5   : > { %v3824_v60 = vmul.f32 %v11560_v38, %v3779_v46  ;;  %v4384_v46 = vld [vmem:[#allocation2 + $0xce] sm:$0xff] }
 0x3c6   : > { %v4696_v10 = vpop.f32.mrf.mxu2  ;;  %v3400_v16 = vpop.f32.mrf.mxu3  ;;  %4280 = vst.msk [vmem:[#allocation2 + $0xe8] sm:$0xff] %vm337_vm8, %v4239_v47 }
 0x3c7   : > { %v11616_v36 = vadd.f32 %v4696_v10, %v4514_v48  ;;  %v4517_v18 = vpop.f32.mrf.mxu1  ;;  %v3870_v49 = vadd.f32 %v11567_v51, %v3824_v60  ;;  %v3460_v48 = vadd.f32 %v3398_v27, %v10905_v45  ;;  %v2660_v10 = vadd.f32 %v10907_v52, %v10902_v61  ;;  %v11640_v61 = vpop.permute.xlu1 %4150  ;;  %v4383_v60 = vld [vmem:[#allocation2 + $0xc6] sm:$0xff] }
 0x3c8   : > { %13613 = vst [vmem:[#allocation53_spill] sm:$0xff] %v11640_v61 }
 0x3c9   : > { %vm3911_vm9 = vcmp.ge.f32.partialorder %v3870_v49, 0.0  ;;  %v3953_v42 = vmul.f32 %v11135_v58, %v3870_v49  ;;  %v3193_v22 = vadd.f32 %v10915_v19, %v2660_v10 }
 0x3ca   : > { %8909 = vmatmul.msk.bf16.gmra.mxu1 %vm337_vm8, %v4411_v3  ;;  %v3718_v2 = vpop.f32.mrf.mxu0  ;;  %v4320_v3 = vld [vmem:[#allocation2 + $0xcd] sm:$0xff] }
 0x3cb   : > { %8934 = vmatmul.msk.bf16.gmra.mxu2 %vm337_vm8, %v4347_v53  ;;  %8952 = vmatmul.msk.bf16.gmra.mxu3 %vm337_vm8, %v4831_v59  ;;  %v3994_v14 = vsel %vm3911_vm9, %v3870_v49, %v3953_v42  ;;  %v3780_v9 = vadd.f32 %v3718_v2, %v3460_v48  ;;  %v3461_v53 = vadd.f32 %v3400_v16, %v3193_v22 }
 0x3cc   : > { %v4240_v21 = vmul.f32 %v11627_v62, %v3994_v14  ;;  %v4348_v19 = vpack.c.bf16 %v4320_v3, %v4319_v23  ;;  %v4795_v14 = vld [vmem:[#allocation2 + $0x3f] sm:$0xff] }
 0x3cd   : > { %v3825_v45 = vmul.f32 %v11560_v38, %v3780_v9  ;;  %v13615_v23 = vld [vmem:[#allocation32_spill] sm:$0xff]  ;;  %v4816_v6 = vld [vmem:[#allocation2 + $0xe7] sm:$0xff] }
 0x3ce   : > { %v4699_v57 = vpop.f32.mrf.mxu2  ;;  %v3403_v27 = vpop.f32.mrf.mxu3  ;;  %4281 = vst.msk [vmem:[#allocation2 + $0xf0] sm:$0xff] %vm337_vm8, %v4240_v21  ;;  %8978 = vmatmul.msk.bf16.gmra.mxu0 %vm337_vm8, %v4831_v59  ;;  %v4412_v59 = vpack.c.bf16 %v4384_v46, %v4383_v60  ;;  %v4794_v21 = vld [vmem:[#allocation2 + $0x37] sm:$0xff] }
 0x3cf   : > { %v11629_v20 = vadd.f32 %v4699_v57, %v4517_v18  ;;  %v4519_v29 = vpop.f32.mrf.mxu1  ;;  %v3871_v4 = vadd.f32 %v11567_v51, %v3825_v45  ;;  %v4832_v10 = vpack.c.bf16 %v4795_v14, %v4794_v21  ;;  %v4385_v14 = vld [vmem:[#allocation2 + $0xd6] sm:$0xff] }
 0x3d1   : > { %vm3912_vm10 = vcmp.ge.f32.partialorder %v3871_v4, 0.0  ;;  %v3954_v47 = vmul.f32 %v11135_v58, %v3871_v4 }
 0x3d2   : > { %v3720_v18 = vpop.f32.mrf.mxu0 }
 0x3d3   : > { %v3995_v49 = vsel %vm3912_vm10, %v3871_v4, %v3954_v47  ;;  %v3781_v28 = vadd.f32 %v3720_v18, %v3461_v53  ;;  %v11653_v4 = vpop.permute.xlu2 %4155 }
 0x3d4   : > { %v4241_v42 = vmul.f32 %v11640_v61, %v3995_v49  ;;  %13614 = vst [vmem:[#allocation54_spill] sm:$0xff] %v11653_v4  ;;  %v4800_v61 = vld [vmem:[#allocation2 + $0x67] sm:$0xff] }
 0x3d5   : > { %v3826_v16 = vmul.f32 %v11560_v38, %v3781_v28 }
 0x3d6   : > { %v4701_v52 = vpop.f32.mrf.mxu2  ;;  %v3405_v57 = vpop.f32.mrf.mxu3  ;;  %4282 = vst.msk [vmem:[#allocation2 + $0xf8] sm:$0xff] %vm337_vm8, %v4241_v42 }
 0x3d7   : > { %v11642_v48 = vadd.f32 %v4701_v52, %v4519_v29  ;;  %v4522_v2 = vpop.f32.mrf.mxu1  ;;  %v3872_v9 = vadd.f32 %v11567_v51, %v3826_v16  ;;  %v3462_v29 = vadd.f32 %v3403_v27, %v10930_v56  ;;  %v2662_v52 = vadd.f32 %v10932_v41, %v10927_v12  ;;  %v11666_v12 = vpop.permute.xlu0 %4160 }
 0x3d8   : > { %13616 = vst [vmem:[#allocation32_spill] sm:$0xff] %v11666_v12 }
 0x3d9   : > { %vm3913_vm11 = vcmp.ge.f32.partialorder %v3872_v9, 0.0  ;;  %v3955_v45 = vmul.f32 %v11135_v58, %v3872_v9  ;;  %v3195_v49 = vadd.f32 %v13615_v23, %v2662_v52  ;;  %v13617_v23 = vld [vmem:[#allocation7_spill] sm:$0xff] }
 0x3da   : > { %8910 = vmatmul.msk.bf16.gmra.mxu1 %vm337_vm8, %v4412_v59  ;;  %v3723_v22 = vpop.f32.mrf.mxu0  ;;  %v4386_v59 = vld [vmem:[#allocation2 + $0xde] sm:$0xff] }
 0x3db   : > { %8935 = vmatmul.msk.bf16.gmra.mxu2 %vm337_vm8, %v4348_v19  ;;  %8953 = vmatmul.msk.bf16.gmra.mxu3 %vm337_vm8, %v4832_v10  ;;  %v3996_v3 = vsel %vm3913_vm11, %v3872_v9, %v3955_v45  ;;  %v3782_v53 = vadd.f32 %v3723_v22, %v3462_v29  ;;  %v4322_v19 = vld [vmem:[#allocation2 + $0xdd] sm:$0xff]  ;;  %v3463_v42 = vadd.f32 %v3405_v57, %v3195_v49  ;;  %v4321_v9 = vld [vmem:[#allocation2 + $0xd5] sm:$0xff] }
 0x3dc   : > { %v4242_v18 = vmul.f32 %v11653_v4, %v3996_v3  ;;  %v4349_v22 = vpack.c.bf16 %v4322_v19, %v4321_v9  ;;  %v11679_v19 = vpop.permute.xlu1 %4165  ;;  %v13619_v9 = vld [vmem:[#allocation33_spill] sm:$0xff] }
 0x3dd   : > { %v3827_v56 = vmul.f32 %v11560_v38, %v3782_v53  ;;  %13618 = vst [vmem:[#allocation7_spill] sm:$0xff] %v11679_v19  ;;  %v4818_v39 = vld [vmem:[#allocation2 + $0xf7] sm:$0xff] }
 0x3de   : > { %v4704_v46 = vpop.f32.mrf.mxu2  ;;  %v3408_v27 = vpop.f32.mrf.mxu3  ;;  %4283 = vst.msk [vmem:[#allocation2 + $0x100] sm:$0xff] %vm337_vm8, %v4242_v18  ;;  %8979 = vmatmul.msk.bf16.gmra.mxu0 %vm337_vm8, %v4832_v10  ;;  %v4413_v10 = vpack.c.bf16 %v4386_v59, %v4385_v14  ;;  %v4797_v18 = vld [vmem:[#allocation2 + $0x4f] sm:$0xff] }
 0x3df   : > { %v11655_v47 = vadd.f32 %v4704_v46, %v4522_v2  ;;  %v4524_v60 = vpop.f32.mrf.mxu1  ;;  %v3873_v28 = vadd.f32 %v11567_v51, %v3827_v56  ;;  %v4796_v56 = vld [vmem:[#allocation2 + $0x47] sm:$0xff]  ;;  %v3464_v49 = vadd.f32 %v3408_v27, %v13617_v23 }
 0x3e1   : > { %vm3914_vm12 = vcmp.ge.f32.partialorder %v3873_v28, 0.0  ;;  %v3956_v2 = vmul.f32 %v11135_v58, %v3873_v28 }
 0x3e2   : > { %v3725_v16 = vpop.f32.mrf.mxu0 }
 0x3e3   : > { %v3997_v21 = vsel %vm3914_vm12, %v3873_v28, %v3956_v2  ;;  %v3783_v29 = vadd.f32 %v3725_v16, %v3463_v42 }
 0x3e4   : > { %v4243_v46 = vmul.f32 %v11666_v12, %v3997_v21  ;;  %v13620_v21 = vld [vmem:[#allocation34_spill] sm:$0xff]  ;;  %v4798_v12 = vld [vmem:[#allocation2 + $0x57] sm:$0xff] }
 0x3e5   : > { %v3828_v57 = vmul.f32 %v11560_v38, %v3783_v29  ;;  %v2664_v29 = vadd.f32 %v13620_v21, %v13619_v9 }
 0x3e6   : > { %v4706_v41 = vpop.f32.mrf.mxu2  ;;  %v3410_v53 = vpop.f32.mrf.mxu3  ;;  %4284 = vst.msk [vmem:[#allocation2 + $0x108] sm:$0xff] %vm337_vm8, %v4243_v46  ;;  %v13621_v46 = vld [vmem:[#allocation35_spill] sm:$0xff] }
 0x3e7   : > { %v11668_v45 = vadd.f32 %v4706_v41, %v4524_v60  ;;  %v4527_v3 = vpop.f32.mrf.mxu1  ;;  %v3874_v52 = vadd.f32 %v11567_v51, %v3828_v57  ;;  %v4833_v60 = vpack.c.bf16 %v4797_v18, %v4796_v56  ;;  %v3197_v57 = vadd.f32 %v13621_v46, %v2664_v29 }
 0x3e9   : > { %vm3915_vm13 = vcmp.ge.f32.partialorder %v3874_v52, 0.0  ;;  %v3957_v28 = vmul.f32 %v11135_v58, %v3874_v52  ;;  %v3465_v56 = vadd.f32 %v3410_v53, %v3197_v57  ;;  %v4799_v57 = vld [vmem:[#allocation2 + $0x5f] sm:$0xff] }
 0x3ea   : > { %8911 = vmatmul.msk.bf16.gmra.mxu1 %vm337_vm8, %v4413_v10 }
 0x3eb   : > { %8936 = vmatmul.msk.bf16.gmra.mxu2 %vm337_vm8, %v4349_v22  ;;  %v3728_v59 = vpop.f32.mrf.mxu0  ;;  %8954 = vmatmul.msk.bf16.gmra.mxu3 %vm337_vm8, %v4833_v60  ;;  %v3998_v2 = vsel %vm3915_vm13, %v3874_v52, %v3957_v28  ;;  %v4388_v52 = vld [vmem:[#allocation2 + $0xee] sm:$0xff]  ;;  %v11692_v28 = vpop.permute.xlu2 %4170 }
 0x3ec   : > { %v3784_v16 = vadd.f32 %v3728_v59, %v3464_v49  ;;  %v4244_v14 = vmul.f32 %v11679_v19, %v3998_v2  ;;  %13622 = vst [vmem:[#allocation33_spill] sm:$0xff] %v11692_v28  ;;  %v4323_v2 = vld [vmem:[#allocation2 + $0xe5] sm:$0xff] }
 0x3ed   : > { %v4820_v17 = vld [vmem:[#allocation2 + $0x107] sm:$0xff] }
 0x3ee   : > { %v4709_v42 = vpop.f32.mrf.mxu2  ;;  %v3829_v27 = vmul.f32 %v11560_v38, %v3784_v16  ;;  %v3413_v22 = vpop.f32.mrf.mxu3  ;;  %4285 = vst.msk [vmem:[#allocation2 + $0x110] sm:$0xff] %vm337_vm8, %v4244_v14  ;;  %8980 = vmatmul.msk.bf16.gmra.mxu0 %vm337_vm8, %v4833_v60 }
 0x3ef   : > { %v11681_v41 = vadd.f32 %v4709_v42, %v4527_v3  ;;  %v4529_v10 = vpop.f32.mrf.mxu1  ;;  %v4324_v3 = vld [vmem:[#allocation2 + $0xed] sm:$0xff] }
 0x3f0   : > { %v3875_v18 = vadd.f32 %v11567_v51, %v3829_v27  ;;  %v4387_v42 = vld [vmem:[#allocation2 + $0xe6] sm:$0xff]  ;;  %v4350_v21 = vpack.c.bf16 %v4324_v3, %v4323_v2 }
 0x3f1   : > { %v4414_v60 = vpack.c.bf16 %v4388_v52, %v4387_v42 }
 0x3f2   : > { %vm3916_vm14 = vcmp.ge.f32.partialorder %v3875_v18, 0.0  ;;  %v3958_v23 = vmul.f32 %v11135_v58, %v3875_v18 }
 0x3f3   : > { %v3730_v49 = vpop.f32.mrf.mxu0 }
 0x3f4   : > { %v3999_v16 = vsel %vm3916_vm14, %v3875_v18, %v3958_v23  ;;  %v3785_v14 = vadd.f32 %v3730_v49, %v3465_v56  ;;  %v13623_v18 = vld [vmem:[#allocation9_spill] sm:$0xff]  ;;  %v11705_v23 = vpop.permute.xlu0 %4175 }
 0x3f5   : > { %v4245_v29 = vmul.f32 %v11692_v28, %v3999_v16  ;;  %v3466_v52 = vadd.f32 %v3413_v22, %v13623_v18  ;;  %13624 = vst [vmem:[#allocation34_spill] sm:$0xff] %v11705_v23  ;;  %v4390_v18 = vld [vmem:[#allocation2 + $0xfe] sm:$0xff]  ;;  %v4801_v28 = vld [vmem:[#allocation2 + $0x6f] sm:$0xff] }
 0x3f6   : > { %v4711_v59 = vpop.f32.mrf.mxu2  ;;  %v3830_v53 = vmul.f32 %v11560_v38, %v3785_v14  ;;  %v3415_v46 = vpop.f32.mrf.mxu3  ;;  %v13625_v14 = vld [vmem:[#allocation8_spill] sm:$0xff] }
 0x3f7   : > { %v11694_v9 = vadd.f32 %v4711_v59, %v4529_v10  ;;  %v4532_v27 = vpop.f32.mrf.mxu1  ;;  %4286 = vst.msk [vmem:[#allocation2 + $0x118] sm:$0xff] %vm337_vm8, %v4245_v29  ;;  %v4834_v10 = vpack.c.bf16 %v4799_v57, %v4798_v12 }
 0x3f8   : > { %v3876_v19 = vadd.f32 %v11567_v51, %v3830_v53  ;;  %v13627_v53 = vld [vmem:[#allocation36_spill] sm:$0xff] }
 0x3fa   : > { %8912 = vmatmul.msk.bf16.gmra.mxu1 %vm337_vm8, %v4414_v60  ;;  %vm3917_vm15 = vcmp.ge.f32.partialorder %v3876_v19, 0.0  ;;  %v3959_v3 = vmul.f32 %v11135_v58, %v3876_v19  ;;  %v13626_v60 = vld [vmem:[#allocation10_spill] sm:$0xff] }
 0x3fb   : > { %8937 = vmatmul.msk.bf16.gmra.mxu2 %vm337_vm8, %v4350_v21  ;;  %v3733_v56 = vpop.f32.mrf.mxu0  ;;  %8955 = vmatmul.msk.bf16.gmra.mxu3 %vm337_vm8, %v4834_v10  ;;  %v2666_v12 = vadd.f32 %v13626_v60, %v13625_v14  ;;  %v4325_v14 = vld [vmem:[#allocation2 + $0xf5] sm:$0xff] }
 0x3fc   : > { %v4000_v59 = vsel %vm3917_vm15, %v3876_v19, %v3959_v3  ;;  %v3786_v42 = vadd.f32 %v3733_v56, %v3466_v52 }
 0x3fd   : > { %v4246_v16 = vmul.f32 %v11705_v23, %v4000_v59  ;;  %v3199_v57 = vadd.f32 %v13627_v53, %v2666_v12 }
 0x3fe   : > { %v4714_v49 = vpop.f32.mrf.mxu2  ;;  %v3831_v22 = vmul.f32 %v11560_v38, %v3786_v42  ;;  %v3418_v29 = vpop.f32.mrf.mxu3  ;;  %8981 = vmatmul.msk.bf16.gmra.mxu0 %vm337_vm8, %v4834_v10  ;;  %v4389_v42 = vld [vmem:[#allocation2 + $0xf6] sm:$0xff] }
 0x3ff   : > { %v11707_v2 = vadd.f32 %v4714_v49, %v4532_v27  ;;  %v4534_v21 = vpop.f32.mrf.mxu1  ;;  %4287 = vst.msk [vmem:[#allocation2 + $0x120] sm:$0xff] %vm337_vm8, %v4246_v16  ;;  %v4326_v27 = vld [vmem:[#allocation2 + $0xfd] sm:$0xff]  ;;  %v3467_v52 = vadd.f32 %v3415_v46, %v3199_v57  ;;  %v11718_v49 = vpop.permute.xlu1 %4180  ;;  %v4415_v10 = vpack.c.bf16 %v4390_v18, %v4389_v42 }
 0x400   : > { %v3877_v19 = vadd.f32 %v11567_v51, %v3831_v22  ;;  %13628 = vst [vmem:[#allocation35_spill] sm:$0xff] %v11718_v49  ;;  %v4351_v12 = vpack.c.bf16 %v4326_v27, %v4325_v14  ;;  %v4822_v5 = vld [vmem:[#allocation2 + $0x117] sm:$0xff] }
 0x402   : > { %vm3918_vm0 = vcmp.ge.f32.partialorder %v3877_v19, 0.0  ;;  %v3960_v3 = vmul.f32 %v11135_v58, %v3877_v19 }
 0x403   : > { %v3735_v56 = vpop.f32.mrf.mxu0 }
 0x404   : > { %v4001_v60 = vsel %vm3918_vm0, %v3877_v19, %v3960_v3  ;;  %v3787_v16 = vadd.f32 %v3735_v56, %v3467_v52  ;;  %v13629_v19 = vld [vmem:[#allocation12_spill] sm:$0xff]  ;;  %v11731_v3 = vpop.permute.xlu2 %4185 }
 0x405   : > { %v4247_v22 = vmul.f32 %v11718_v49, %v4001_v60  ;;  %v3468_v18 = vadd.f32 %v3418_v29, %v13629_v19  ;;  %13630 = vst [vmem:[#allocation9_spill] sm:$0xff] %v11731_v3  ;;  %v4392_v19 = vld [vmem:[#allocation2 + $0x10e] sm:$0xff]  ;;  %v4803_v49 = vld [vmem:[#allocation2 + $0x7f] sm:$0xff] }
 0x406   : > { %v4716_v59 = vpop.f32.mrf.mxu2  ;;  %v3832_v46 = vmul.f32 %v11560_v38, %v3787_v16  ;;  %v3420_v57 = vpop.f32.mrf.mxu3  ;;  %v13631_v16 = vld [vmem:[#allocation11_spill] sm:$0xff] }
 0x407   : > { %v11720_v23 = vadd.f32 %v4716_v59, %v4534_v21  ;;  %v4537_v53 = vpop.f32.mrf.mxu1  ;;  %4288 = vst.msk [vmem:[#allocation2 + $0x128] sm:$0xff] %vm337_vm8, %v4247_v22  ;;  %v4835_v21 = vpack.c.bf16 %v4801_v28, %v4800_v61  ;;  %v13633_v22 = vld [vmem:[#allocation37_spill] sm:$0xff] }
 0x408   : > { %v3878_v4 = vadd.f32 %v11567_v51, %v3832_v46 }
 0x40a   : > { %8913 = vmatmul.msk.bf16.gmra.mxu1 %vm337_vm8, %v4415_v10  ;;  %vm3919_vm6 = vcmp.ge.f32.partialorder %v3878_v4, 0.0  ;;  %v3961_v27 = vmul.f32 %v11135_v58, %v3878_v4  ;;  %v13632_v10 = vld [vmem:[#allocation13_spill] sm:$0xff] }
 0x40b   : > { %8938 = vmatmul.msk.bf16.gmra.mxu2 %vm337_vm8, %v4351_v12  ;;  %v3738_v52 = vpop.f32.mrf.mxu0  ;;  %8956 = vmatmul.msk.bf16.gmra.mxu3 %vm337_vm8, %v4835_v21  ;;  %v2668_v61 = vadd.f32 %v13632_v10, %v13631_v16  ;;  %v4327_v16 = vld [vmem:[#allocation2 + $0x105] sm:$0xff] }
 0x40c   : > { %v4002_v59 = vsel %vm3919_vm6, %v3878_v4, %v3961_v27  ;;  %v3788_v42 = vadd.f32 %v3738_v52, %v3468_v18 }
 0x40d   : > { %v4248_v60 = vmul.f32 %v11731_v3, %v4002_v59  ;;  %v3201_v46 = vadd.f32 %v13633_v22, %v2668_v61 }
 0x40e   : > { %v4719_v56 = vpop.f32.mrf.mxu2  ;;  %v3833_v29 = vmul.f32 %v11560_v38, %v3788_v42  ;;  %v3423_v12 = vpop.f32.mrf.mxu3  ;;  %8982 = vmatmul.msk.bf16.gmra.mxu0 %vm337_vm8, %v4835_v21  ;;  %v4391_v42 = vld [vmem:[#allocation2 + $0x106] sm:$0xff] }
 0x40f   : > { %v11733_v14 = vadd.f32 %v4719_v56, %v4537_v53  ;;  %v4539_v28 = vpop.f32.mrf.mxu1  ;;  %4289 = vst.msk [vmem:[#allocation2 + $0x130] sm:$0xff] %vm337_vm8, %v4248_v60  ;;  %v4328_v53 = vld [vmem:[#allocation2 + $0x10d] sm:$0xff]  ;;  %v3469_v18 = vadd.f32 %v3420_v57, %v3201_v46  ;;  %v11744_v56 = vpop.permute.xlu0 %4190  ;;  %v4416_v21 = vpack.c.bf16 %v4392_v19, %v4391_v42 }
 0x410   : > { %v3879_v4 = vadd.f32 %v11567_v51, %v3833_v29  ;;  %13634 = vst [vmem:[#allocation8_spill] sm:$0xff] %v11744_v56  ;;  %v4352_v61 = vpack.c.bf16 %v4328_v53, %v4327_v16  ;;  %v11755_v19 = vpop.permute.xlu1 %4195  ;;  %v13636_v53 = vld [vmem:[#allocation38_spill] sm:$0xff] }
 0x411   : > { %13635 = vst [vmem:[#allocation10_spill] sm:$0xff] %v11755_v19  ;;  %v4824_v0 = vld [vmem:[#allocation2 + $0x127] sm:$0xff] }
 0x412   : > { %vm3920_vm1 = vcmp.ge.f32.partialorder %v3879_v4, 0.0  ;;  %v3962_v27 = vmul.f32 %v11135_v58, %v3879_v4 }
 0x413   : > { %v3740_v52 = vpop.f32.mrf.mxu0 }
 0x414   : > { %v4003_v10 = vsel %vm3920_vm1, %v3879_v4, %v3962_v27  ;;  %v3789_v60 = vadd.f32 %v3740_v52, %v3469_v18  ;;  %v3470_v18 = vadd.f32 %v3423_v12, %v13636_v53  ;;  %v13639_v12 = vld [vmem:[#allocation40_spill] sm:$0xff] }
 0x415   : > { %v4249_v29 = vmul.f32 %v11744_v56, %v4003_v10  ;;  %v4393_v53 = vld [vmem:[#allocation2 + $0x116] sm:$0xff] }
 0x416   : > { %v4721_v59 = vpop.f32.mrf.mxu2  ;;  %v3834_v57 = vmul.f32 %v11560_v38, %v3789_v60  ;;  %v3425_v46 = vpop.f32.mrf.mxu3 }
 0x417   : > { %v11746_v3 = vadd.f32 %v4721_v59, %v4539_v28  ;;  %v4542_v22 = vpop.f32.mrf.mxu1  ;;  %4290 = vst.msk [vmem:[#allocation2 + $0x138] sm:$0xff] %vm337_vm8, %v4249_v29  ;;  %v4836_v28 = vpack.c.bf16 %v4803_v49, %v4802_v30  ;;  %v13637_v30 = vld [vmem:[#allocation14_spill] sm:$0xff]  ;;  %v13638_v49 = vld [vmem:[#allocation39_spill] sm:$0xff] }
 0x418   : > { %v3880_v62 = vadd.f32 %v11567_v51, %v3834_v57 }
 0x41a   : > { %8914 = vmatmul.msk.bf16.gmra.mxu1 %vm337_vm8, %v4416_v21  ;;  %vm3921_vm3 = vcmp.ge.f32.partialorder %v3880_v62, 0.0  ;;  %v3963_v4 = vmul.f32 %v11135_v58, %v3880_v62 }
 0x41b   : > { %8939 = vmatmul.msk.bf16.gmra.mxu2 %vm337_vm8, %v4352_v61  ;;  %8957 = vmatmul.msk.bf16.gmra.mxu3 %vm337_vm8, %v4836_v28  ;;  %v3743_v59 = vpop.f32.mrf.mxu0  ;;  %v2670_v61 = vadd.f32 %v13638_v49, %v13637_v30  ;;  %v4329_v30 = vld [vmem:[#allocation2 + $0x115] sm:$0xff] }
 0x41c   : > { %v4004_v52 = vsel %vm3921_vm3, %v3880_v62, %v3963_v4  ;;  %v3790_v10 = vadd.f32 %v3743_v59, %v3470_v18  ;;  %v4394_v62 = vld [vmem:[#allocation2 + $0x11e] sm:$0xff] }
 0x41d   : > { %v4250_v16 = vmul.f32 %v11755_v19, %v4004_v52  ;;  %v3203_v57 = vadd.f32 %v13639_v12, %v2670_v61  ;;  %v4330_v4 = vld [vmem:[#allocation2 + $0x11d] sm:$0xff]  ;;  %v4417_v59 = vpack.c.bf16 %v4394_v62, %v4393_v53 }
 0x41e   : > { %v4724_v27 = vpop.f32.mrf.mxu2  ;;  %v3428_v21 = vpop.f32.mrf.mxu3  ;;  %v3835_v29 = vmul.f32 %v11560_v38, %v3790_v10  ;;  %8983 = vmatmul.msk.bf16.gmra.mxu0 %vm337_vm8, %v4836_v28  ;;  %v4353_v28 = vpack.c.bf16 %v4330_v4, %v4329_v30  ;;  %v4826_v1 = vld [vmem:[#allocation2 + $0x137] sm:$0xff] }
 0x41f   : > { %v11759_v42 = vadd.f32 %v4724_v27, %v4542_v22  ;;  %v4544_v60 = vpop.f32.mrf.mxu1  ;;  %4291 = vst.msk [vmem:[#allocation2 + $0x140] sm:$0xff] %vm337_vm8, %v4250_v16  ;;  %v3471_v27 = vadd.f32 %v3425_v46, %v3203_v57  ;;  %v11770_v16 = vpop.permute.xlu2 %4200  ;;  %v4804_v57 = vld [vmem:[#allocation2 + $0x87] sm:$0xff] }
 0x420   : > { %v3881_v22 = vadd.f32 %v11567_v51, %v3835_v29  ;;  %13640 = vst [vmem:[#allocation36_spill] sm:$0xff] %v11770_v16  ;;  %v4837_v62 = vpack.c.bf16 %v4805_v13, %v4804_v57 }
 0x422   : > { %vm3922_vm7 = vcmp.ge.f32.partialorder %v3881_v22, 0.0  ;;  %v3964_v18 = vmul.f32 %v11135_v58, %v3881_v22 }
 0x423   : > { %v3745_v49 = vpop.f32.mrf.mxu0 }
 0x424   : > { %v4005_v19 = vsel %vm3922_vm7, %v3881_v22, %v3964_v18  ;;  %v3791_v61 = vadd.f32 %v3745_v49, %v3471_v27  ;;  %v13641_v22 = vld [vmem:[#allocation41_spill] sm:$0xff]  ;;  %v11783_v27 = vpop.permute.xlu0 %4205 }
 0x425   : > { %v4251_v29 = vmul.f32 %v11770_v16, %v4005_v19  ;;  %v3472_v4 = vadd.f32 %v3428_v21, %v13641_v22  ;;  %13642 = vst [vmem:[#allocation12_spill] sm:$0xff] %v11783_v27  ;;  %v4331_v22 = vld [vmem:[#allocation2 + $0x125] sm:$0xff] }
 0x426   : > { %v4726_v52 = vpop.f32.mrf.mxu2  ;;  %v3430_v56 = vpop.f32.mrf.mxu3  ;;  %v3836_v46 = vmul.f32 %v11560_v38, %v3791_v61 }
 0x427   : > { %v11772_v10 = vadd.f32 %v4726_v52, %v4544_v60  ;;  %v4547_v12 = vpop.f32.mrf.mxu1  ;;  %4292 = vst.msk [vmem:[#allocation2 + $0x148] sm:$0xff] %vm337_vm8, %v4251_v29  ;;  %v4396_v29 = vld [vmem:[#allocation2 + $0x12e] sm:$0xff] }
 0x428   : > { %v3882_v60 = vadd.f32 %v11567_v51, %v3836_v46  ;;  %v4332_v46 = vld [vmem:[#allocation2 + $0x12d] sm:$0xff] }
 0x42a   : > { %8915 = vmatmul.msk.bf16.gmra.mxu1 %vm337_vm8, %v4417_v59  ;;  %vm3923_vm2 = vcmp.ge.f32.partialorder %v3882_v60, 0.0  ;;  %v3965_v19 = vmul.f32 %v11135_v58, %v3882_v60 }
 0x42b   : > { %8940 = vmatmul.msk.bf16.gmra.mxu2 %vm337_vm8, %v4353_v28  ;;  %8958 = vmatmul.msk.bf16.gmra.mxu3 %vm337_vm8, %v4837_v62  ;;  %v3748_v53 = vpop.f32.mrf.mxu0 }
 0x42c   : > { %v4006_v52 = vsel %vm3923_vm2, %v3882_v60, %v3965_v19  ;;  %v3792_v59 = vadd.f32 %v3748_v53, %v3472_v4  ;;  %v4395_v60 = vld [vmem:[#allocation2 + $0x126] sm:$0xff]  ;;  %v11794_v19 = vpop.permute.xlu1 %4210 }
 0x42d   : > { %v4252_v49 = vmul.f32 %v11783_v27, %v4006_v52  ;;  %13643 = vst [vmem:[#allocation11_spill] sm:$0xff] %v11794_v19 }
 0x42e   : > { %v4729_v56 = vpop.f32.mrf.mxu2  ;;  %v4931_v28 = vpop.f32.mrf.mxu3  ;;  %v3837_v13 = vmul.f32 %v11560_v38, %v3792_v59  ;;  %8984 = vmatmul.msk.bf16.gmra.mxu0 %vm337_vm8, %v4837_v62  ;;  %v4418_v62 = vpack.c.bf16 %v4396_v29, %v4395_v60  ;;  %v4807_v59 = vld [vmem:[#allocation2 + $0x9f] sm:$0xff]  ;;  %v4687_v60 = vadd.f32 %v11554_v26, %v11543_v32  ;;  %v4809_v32 = vld [vmem:[#allocation2 + $0xaf] sm:$0xff] }
 0x42f   : > { %v11785_v18 = vadd.f32 %v4729_v56, %v4547_v12  ;;  %v4549_v30 = vpop.f32.mrf.mxu1  ;;  %v5035_v21 = vadd.f32 %v4931_v28, %v11452_v8  ;;  %4293 = vst.msk [vmem:[#allocation2 + $0x150] sm:$0xff] %vm337_vm8, %v4252_v49  ;;  %v4354_v56 = vpack.c.bf16 %v4332_v46, %v4331_v22  ;;  %v4806_v49 = vld [vmem:[#allocation2 + $0x97] sm:$0xff] }
 0x430   : > { %v3883_v61 = vadd.f32 %v11567_v51, %v3837_v13  ;;  %v4398_v22 = vld [vmem:[#allocation2 + $0x13e] sm:$0xff] }
 0x432   : > { %vm3924_vm5 = vcmp.ge.f32.partialorder %v3883_v61, 0.0  ;;  %v3966_v12 = vmul.f32 %v11135_v58, %v3883_v61  ;;  %v4838_v58 = vpack.c.bf16 %v4807_v59, %v4806_v49 }
 0x433   : > { %v3750_v4 = vpop.f32.mrf.mxu0 }
 0x434   : > { %v4007_v8 = vsel %vm3924_vm5, %v3883_v61, %v3966_v12  ;;  %v9208_v12 = vld [vmem:[%s13383_s3 + $0x30] sm:$0xff]  ;;  %v4334_v4 = vld [vmem:[#allocation2 + $0x13d] sm:$0xff] }
 0x435   : > { %v4253_v52 = vmul.f32 %v11794_v19, %v4007_v8  ;;  %6081 = vmatpush.bf16.msra.mxu3 %v9208_v12  ;;  %v4333_v8 = vld [vmem:[#allocation2 + $0x135] sm:$0xff] }
 0x436   : > { %v4731_v57 = vpop.f32.mrf.mxu2  ;;  %v4933_v51 = vpop.f32.mrf.mxu3  ;;  %v4355_v49 = vpack.c.bf16 %v4334_v4, %v4333_v8  ;;  %v4399_v8 = vld [vmem:[#allocation2 + $0x146] sm:$0xf] }
 0x437   : > { %v11796_v38 = vadd.f32 %v4731_v57, %v4549_v30  ;;  %v4552_v53 = vpop.f32.mrf.mxu1  ;;  %4294 = vst.msk [vmem:[#allocation2 + $0x158] sm:$0xf] %vm384_vm4, %v4253_v52 }
 0x43a   : > { %8916 = vmatmul.msk.bf16.gmra.mxu1 %vm337_vm8, %v4418_v62  ;;  %v5036_v62 = vadd.f32 %v4933_v51, %v4687_v60  ;;  %v4808_v51 = vld [vmem:[#allocation2 + $0xa7] sm:$0xff] }
 0x43b   : > { %8941 = vmatmul.msk.bf16.gmra.mxu2 %vm337_vm8, %v4354_v56  ;;  %8959 = vmatmul.msk.bf16.gmra.mxu3 %vm337_vm8, %v4838_v58  ;;  %v5219_v28 = vpop.f32.mrf.mxu0 }
 0x43c   : > { %v11805_v61 = vadd.f32 %v5219_v28, %v5035_v21  ;;  %v4397_v21 = vld [vmem:[#allocation2 + $0x136] sm:$0xff] }
 0x43d   : > { %v4419_v59 = vpack.c.bf16 %v4398_v22, %v4397_v21 }
 0x43e   : > { %v4734_v30 = vpop.f32.mrf.mxu2  ;;  %v4936_v46 = vpop.f32.mrf.mxu3  ;;  %8985 = vmatmul.msk.bf16.gmra.mxu0 %vm337_vm8, %v4838_v58 }
 0x43f   : > { %v11803_v13 = vadd.f32 %v4734_v30, %v4552_v53  ;;  %v4554_v29 = vpop.f32.mrf.mxu1  ;;  %v5037_v57 = vadd.f32 %v4936_v46, %v11577_v33  ;;  %v9209_v33 = vld [vmem:[%s13383_s3 + $0x38] sm:$0xff]  ;;  %v4839_v46 = vpack.c.bf16 %v4809_v32, %v4808_v51  ;;  %v4420_v51 = vpack.c.bf16 %v4399_v8, %v4399_v8 }
 0x440   : > { %6369 = vmatpush.bf16.msra.mxu0 %v9209_v33 }
 0x443   : > { %v5221_v53 = vpop.f32.mrf.mxu0 }
 0x444   : > { %v11816_v30 = vadd.f32 %v5221_v53, %v5036_v62  ;;  %v4335_v53 = vld [vmem:[#allocation2 + $0x145] sm:$0xf] }
 0x446   : > { %v4736_v56 = vpop.f32.mrf.mxu2  ;;  %v4938_v28 = vpop.f32.mrf.mxu3 }
 0x447   : > { %v11814_v52 = vadd.f32 %v4736_v56, %v4554_v29  ;;  %v4557_v58 = vpop.f32.mrf.mxu1  ;;  %v5038_v26 = vadd.f32 %v4938_v28, %v11590_v31  ;;  %v9210_v29 = vld [vmem:[%s13383_s3 + $0x40] sm:$0xff] }
 0x448   : > { %6657 = vmatpush.bf16.msra.mxu1 %v9210_v29 }
 0x44a   : > { %8917 = vmatmul.msk.bf16.gmra.mxu1 %vm337_vm8, %v4419_v59 }
 0x44b   : > { %8942 = vmatmul.msk.bf16.gmra.mxu2 %vm337_vm8, %v4355_v49  ;;  %8960 = vmatmul.msk.bf16.gmra.mxu3 %vm337_vm8, %v4839_v46  ;;  %v5224_v60 = vpop.f32.mrf.mxu0 }
 0x44c   : > { %v11830_v4 = vadd.f32 %v5224_v60, %v5037_v57  ;;  %v4356_v57 = vpack.c.bf16 %v4335_v53, %v4335_v53  ;;  %v5365_v53 = vld [vmem:[#allocation2 + $0x20] sm:$0xff] }
 0x44e   : > { %v4739_v12 = vpop.f32.mrf.mxu2  ;;  %v4941_v62 = vpop.f32.mrf.mxu3  ;;  %8986 = vmatmul.msk.bf16.gmra.mxu0 %vm337_vm8, %v4839_v46 }
 0x44f   : > { %v11828_v22 = vadd.f32 %v4739_v12, %v4557_v58  ;;  %v4559_v31 = vpop.f32.mrf.mxu1  ;;  %v5039_v56 = vadd.f32 %v4941_v62, %v11603_v11  ;;  %v4811_v58 = vld [vmem:[#allocation2 + $0xbf] sm:$0xff]  ;;  %v4810_v12 = vld [vmem:[#allocation2 + $0xb7] sm:$0xff] }
 0x450   : > { %v4840_v11 = vpack.c.bf16 %v4811_v58, %v4810_v12  ;;  %v5364_v12 = vld [vmem:[#allocation2 + $0x18] sm:$0xff] }
 0x453   : > { %v5226_v59 = vpop.f32.mrf.mxu0 }
 0x454   : > { %v11836_v28 = vadd.f32 %v5226_v59, %v5038_v26  ;;  %v5653_v59 = vld [vmem:[#allocation2 + $0x21] sm:$0xff] }
 0x456   : > { %v4741_v21 = vpop.f32.mrf.mxu2  ;;  %v4943_v32 = vpop.f32.mrf.mxu3 }
 0x457   : > { %v11834_v49 = vadd.f32 %v4741_v21, %v4559_v31  ;;  %v4562_v33 = vpop.f32.mrf.mxu1  ;;  %v5040_v29 = vadd.f32 %v4943_v32, %v11616_v36 }
 0x45a   : > { %8918 = vmatmul.msk.bf16.gmra.mxu1 %vm337_vm8, %v4420_v51 }
 0x45b   : > { %8943 = vmatmul.msk.bf16.gmra.mxu2 %vm337_vm8, %v4356_v57  ;;  %8961 = vmatmul.msk.bf16.gmra.mxu3 %vm337_vm8, %v4840_v11  ;;  %v5229_v60 = vpop.f32.mrf.mxu0 }
 0x45c   : > { %v11844_v26 = vadd.f32 %v5229_v60, %v5039_v56  ;;  %v4813_v56 = vld [vmem:[#allocation2 + $0xcf] sm:$0xff]  ;;  %v5405_v60 = vpack.c.bf16 %v5365_v53, %v5364_v12 }
 0x45d   : > { %v5655_v12 = vld [vmem:[#allocation2 + $0x31] sm:$0xff] }
 0x45e   : > { %v4744_v46 = vpop.f32.mrf.mxu2  ;;  %v4946_v21 = vpop.f32.mrf.mxu3  ;;  %8987 = vmatmul.msk.bf16.gmra.mxu0 %vm337_vm8, %v4840_v11  ;;  %v4812_v11 = vld [vmem:[#allocation2 + $0xc7] sm:$0xff] }
 0x45f   : > { %v11842_v31 = vadd.f32 %v4744_v46, %v4562_v33  ;;  %v4564_v62 = vpop.f32.mrf.mxu1  ;;  %v5041_v36 = vadd.f32 %v4946_v21, %v11629_v20  ;;  %v5652_v33 = vld [vmem:[#allocation2 + $0x19] sm:$0xff]  ;;  %v4841_v20 = vpack.c.bf16 %v4813_v56, %v4812_v11 }
 0x460   : > { %v5693_v19 = vpack.c.bf16 %v5653_v59, %v5652_v33  ;;  %v5367_v59 = vld [vmem:[#allocation2 + $0x30] sm:$0xff] }
 0x463   : > { %v5231_v32 = vpop.f32.mrf.mxu0 }
 0x464   : > { %v11850_v58 = vadd.f32 %v5231_v32, %v5040_v29 }
 0x466   : > { %v4746_v8 = vpop.f32.mrf.mxu2  ;;  %v4948_v46 = vpop.f32.mrf.mxu3 }
 0x467   : > { %v11848_v51 = vadd.f32 %v4746_v8, %v4564_v62  ;;  %v4567_v57 = vpop.f32.mrf.mxu1  ;;  %v5042_v27 = vadd.f32 %v4948_v46, %v11642_v48 }
 0x46a   : > { %9004 = vmatmul.msk.bf16.vlgmr.msrb.gmra.mxu1 %vm337_vm8, %v5405_v60  ;;  %v5366_v60 = vld [vmem:[#allocation2 + $0x28] sm:$0xff] }
 0x46b   : > { %9031 = vmatmul.msk.bf16.vlgmr.msrb.gmra.mxu2 %vm337_vm8, %v5693_v19  ;;  %8962 = vmatmul.msk.bf16.gmra.mxu3 %vm337_vm8, %v4841_v20  ;;  %v5234_v29 = vpop.f32.mrf.mxu0 }
 0x46c   : > { %v11858_v8 = vadd.f32 %v5234_v29, %v5041_v36  ;;  %v4815_v36 = vld [vmem:[#allocation2 + $0xdf] sm:$0xff] }
 0x46e   : > { %v4749_v62 = vpop.f32.mrf.mxu2  ;;  %v4951_v16 = vpop.f32.mrf.mxu3  ;;  %8988 = vmatmul.msk.bf16.gmra.mxu0 %vm337_vm8, %v4841_v20 }
 0x46f   : > { %v11856_v21 = vadd.f32 %v4749_v62, %v4567_v57  ;;  %v4569_v32 = vpop.f32.mrf.mxu1  ;;  %v5043_v48 = vadd.f32 %v4951_v16, %v11655_v47  ;;  %v5654_v57 = vld [vmem:[#allocation2 + $0x29] sm:$0xff]  ;;  %v5406_v62 = vpack.c.bf16 %v5367_v59, %v5366_v60  ;;  %v4842_v47 = vpack.c.bf16 %v4815_v36, %v4814_v55  ;;  %v5369_v60 = vld [vmem:[#allocation2 + $0x40] sm:$0xff] }
 0x470   : > { %v11866_v29 = vpack.c.bf16 %v5655_v12, %v5654_v57  ;;  %v5657_v57 = vld [vmem:[#allocation2 + $0x41] sm:$0xff] }
 0x473   : > { %v5236_v33 = vpop.f32.mrf.mxu0 }
 0x474   : > { %v11864_v46 = vadd.f32 %v5236_v33, %v5042_v27 }
 0x476   : > { %v4751_v53 = vpop.f32.mrf.mxu2  ;;  %v4953_v11 = vpop.f32.mrf.mxu3 }
 0x477   : > { %v11862_v19 = vadd.f32 %v4751_v53, %v4569_v32  ;;  %v4572_v56 = vpop.f32.mrf.mxu1  ;;  %v5044_v20 = vadd.f32 %v4953_v11, %v11668_v45 }
 0x47a   : > { %9005 = vmatmul.msk.bf16.gmra.mxu1 %vm337_vm8, %v5406_v62 }
 0x47b   : > { %9032 = vmatmul.msk.bf16.gmra.mxu2 %vm337_vm8, %v11866_v29  ;;  %8963 = vmatmul.msk.bf16.gmra.mxu3 %vm337_vm8, %v4842_v47  ;;  %v5239_v27 = vpop.f32.mrf.mxu0 }
 0x47c   : > { %v11875_v53 = vadd.f32 %v5239_v27, %v5043_v48  ;;  %v4817_v48 = vld [vmem:[#allocation2 + $0xef] sm:$0xff]  ;;  %v5407_v27 = vpack.c.bf16 %v5369_v60, %v5368_v63 }
 0x47e   : > { %v4754_v16 = vpop.f32.mrf.mxu2  ;;  %v4956_v12 = vpop.f32.mrf.mxu3  ;;  %8989 = vmatmul.msk.bf16.gmra.mxu0 %vm337_vm8, %v4842_v47 }
 0x47f   : > { %v11873_v32 = vadd.f32 %v4754_v16, %v4572_v56  ;;  %v4574_v59 = vpop.f32.mrf.mxu1  ;;  %v5045_v45 = vadd.f32 %v4956_v12, %v11681_v41  ;;  %v5656_v56 = vld [vmem:[#allocation2 + $0x39] sm:$0xff]  ;;  %v4843_v41 = vpack.c.bf16 %v4817_v48, %v4816_v6 }
 0x480   : > { %v11883_v43 = vpack.c.bf16 %v5657_v57, %v5656_v56  ;;  %v5659_v56 = vld [vmem:[#allocation2 + $0x51] sm:$0xff] }
 0x483   : > { %v5241_v11 = vpop.f32.mrf.mxu0 }
 0x484   : > { %v11881_v55 = vadd.f32 %v5241_v11, %v5044_v20  ;;  %v5371_v11 = vld [vmem:[#allocation2 + $0x50] sm:$0xff] }
 0x486   : > { %v4756_v33 = vpop.f32.mrf.mxu2  ;;  %v4958_v16 = vpop.f32.mrf.mxu3 }
 0x487   : > { %v11879_v62 = vadd.f32 %v4756_v33, %v4574_v59  ;;  %v4577_v36 = vpop.f32.mrf.mxu1  ;;  %v5046_v47 = vadd.f32 %v4958_v16, %v11694_v9 }
 0x48a   : > { %9006 = vmatmul.msk.bf16.gmra.mxu1 %vm337_vm8, %v5407_v27 }
 0x48b   : > { %9033 = vmatmul.msk.bf16.gmra.mxu2 %vm337_vm8, %v11883_v43  ;;  %8964 = vmatmul.msk.bf16.gmra.mxu3 %vm337_vm8, %v4843_v41  ;;  %v5244_v59 = vpop.f32.mrf.mxu0 }
 0x48c   : > { %v11892_v33 = vadd.f32 %v5244_v59, %v5045_v45  ;;  %v4819_v45 = vld [vmem:[#allocation2 + $0xff] sm:$0xff]  ;;  %v5408_v59 = vpack.c.bf16 %v5371_v11, %v5370_v15 }
 0x48e   : > { %v4759_v20 = vpop.f32.mrf.mxu2  ;;  %v4961_v60 = vpop.f32.mrf.mxu3  ;;  %8990 = vmatmul.msk.bf16.gmra.mxu0 %vm337_vm8, %v4843_v41 }
 0x48f   : > { %v11890_v12 = vadd.f32 %v4759_v20, %v4577_v36  ;;  %v4579_v63 = vpop.f32.mrf.mxu1  ;;  %v5047_v9 = vadd.f32 %v4961_v60, %v11707_v2  ;;  %v5658_v36 = vld [vmem:[#allocation2 + $0x49] sm:$0xff]  ;;  %v4844_v2 = vpack.c.bf16 %v4819_v45, %v4818_v39 }
 0x490   : > { %v11900_v24 = vpack.c.bf16 %v5659_v56, %v5658_v36  ;;  %v5661_v36 = vld [vmem:[#allocation2 + $0x61] sm:$0xff] }
 0x493   : > { %v5246_v16 = vpop.f32.mrf.mxu0 }
 0x494   : > { %v11898_v6 = vadd.f32 %v5246_v16, %v5046_v47  ;;  %v5373_v16 = vld [vmem:[#allocation2 + $0x60] sm:$0xff] }
 0x496   : > { %v4761_v57 = vpop.f32.mrf.mxu2  ;;  %v4963_v20 = vpop.f32.mrf.mxu3 }
 0x497   : > { %v11896_v27 = vadd.f32 %v4761_v57, %v4579_v63  ;;  %v4582_v48 = vpop.f32.mrf.mxu1  ;;  %v5048_v41 = vadd.f32 %v4963_v20, %v11720_v23 }
 0x49a   : > { %9007 = vmatmul.msk.bf16.gmra.mxu1 %vm337_vm8, %v5408_v59 }
 0x49b   : > { %9034 = vmatmul.msk.bf16.gmra.mxu2 %vm337_vm8, %v11900_v24  ;;  %8965 = vmatmul.msk.bf16.gmra.mxu3 %vm337_vm8, %v4844_v2  ;;  %v5249_v63 = vpop.f32.mrf.mxu0 }
 0x49c   : > { %v11909_v57 = vadd.f32 %v5249_v63, %v5047_v9  ;;  %v4821_v9 = vld [vmem:[#allocation2 + $0x10f] sm:$0xff]  ;;  %v5409_v63 = vpack.c.bf16 %v5373_v16, %v5372_v7 }
 0x49e   : > { %v4764_v47 = vpop.f32.mrf.mxu2  ;;  %v4966_v11 = vpop.f32.mrf.mxu3  ;;  %8991 = vmatmul.msk.bf16.gmra.mxu0 %vm337_vm8, %v4844_v2 }
 0x49f   : > { %v11907_v60 = vadd.f32 %v4764_v47, %v4582_v48  ;;  %v4584_v15 = vpop.f32.mrf.mxu1  ;;  %v5049_v23 = vadd.f32 %v4966_v11, %v11733_v14  ;;  %v5660_v48 = vld [vmem:[#allocation2 + $0x59] sm:$0xff]  ;;  %v4845_v14 = vpack.c.bf16 %v4821_v9, %v4820_v17 }
 0x4a0   : > { %v11917_v50 = vpack.c.bf16 %v5661_v36, %v5660_v48  ;;  %v5663_v48 = vld [vmem:[#allocation2 + $0x71] sm:$0xff] }
 0x4a3   : > { %v5251_v20 = vpop.f32.mrf.mxu0 }
 0x4a4   : > { %v11915_v39 = vadd.f32 %v5251_v20, %v5048_v41  ;;  %v5375_v20 = vld [vmem:[#allocation2 + $0x70] sm:$0xff] }
 0x4a6   : > { %v4766_v56 = vpop.f32.mrf.mxu2  ;;  %v4968_v47 = vpop.f32.mrf.mxu3 }
 0x4a7   : > { %v11913_v59 = vadd.f32 %v4766_v56, %v4584_v15  ;;  %v4587_v45 = vpop.f32.mrf.mxu1  ;;  %v5050_v2 = vadd.f32 %v4968_v47, %v11746_v3 }
 0x4aa   : > { %9008 = vmatmul.msk.bf16.gmra.mxu1 %vm337_vm8, %v5409_v63 }
 0x4ab   : > { %9035 = vmatmul.msk.bf16.gmra.mxu2 %vm337_vm8, %v11917_v50  ;;  %8966 = vmatmul.msk.bf16.gmra.mxu3 %vm337_vm8, %v4845_v14  ;;  %v5254_v15 = vpop.f32.mrf.mxu0 }
 0x4ac   : > { %v11926_v56 = vadd.f32 %v5254_v15, %v5049_v23  ;;  %v4823_v23 = vld [vmem:[#allocation2 + $0x11f] sm:$0xff]  ;;  %v5410_v15 = vpack.c.bf16 %v5375_v20, %v5374_v54 }
 0x4ae   : > { %v4769_v41 = vpop.f32.mrf.mxu2  ;;  %v4971_v16 = vpop.f32.mrf.mxu3  ;;  %8992 = vmatmul.msk.bf16.gmra.mxu0 %vm337_vm8, %v4845_v14 }
 0x4af   : > { %v11924_v11 = vadd.f32 %v4769_v41, %v4587_v45  ;;  %v4589_v7 = vpop.f32.mrf.mxu1  ;;  %v5051_v3 = vadd.f32 %v4971_v16, %v11759_v42  ;;  %v5662_v45 = vld [vmem:[#allocation2 + $0x69] sm:$0xff]  ;;  %v4846_v42 = vpack.c.bf16 %v4823_v23, %v4822_v5 }
 0x4b0   : > { %v11934_v40 = vpack.c.bf16 %v5663_v48, %v5662_v45  ;;  %v5665_v45 = vld [vmem:[#allocation2 + $0x81] sm:$0xff] }
 0x4b3   : > { %v5256_v47 = vpop.f32.mrf.mxu0 }
 0x4b4   : > { %v11932_v17 = vadd.f32 %v5256_v47, %v5050_v2  ;;  %v5377_v47 = vld [vmem:[#allocation2 + $0x80] sm:$0xff] }
 0x4b6   : > { %v4771_v36 = vpop.f32.mrf.mxu2  ;;  %v4973_v41 = vpop.f32.mrf.mxu3 }
 0x4b7   : > { %v11930_v63 = vadd.f32 %v4771_v36, %v4589_v7  ;;  %v4592_v9 = vpop.f32.mrf.mxu1  ;;  %v5052_v14 = vadd.f32 %v4973_v41, %v11772_v10 }
 0x4ba   : > { %9009 = vmatmul.msk.bf16.gmra.mxu1 %vm337_vm8, %v5410_v15 }
 0x4bb   : > { %9036 = vmatmul.msk.bf16.gmra.mxu2 %vm337_vm8, %v11934_v40  ;;  %8967 = vmatmul.msk.bf16.gmra.mxu3 %vm337_vm8, %v4846_v42  ;;  %v5259_v7 = vpop.f32.mrf.mxu0 }
 0x4bc   : > { %v11943_v36 = vadd.f32 %v5259_v7, %v5051_v3  ;;  %v5411_v3 = vpack.c.bf16 %v5377_v47, %v5376_v44 }
 0x4be   : > { %v4774_v2 = vpop.f32.mrf.mxu2  ;;  %v4976_v20 = vpop.f32.mrf.mxu3  ;;  %8993 = vmatmul.msk.bf16.gmra.mxu0 %vm337_vm8, %v4846_v42 }
 0x4bf   : > { %v11941_v16 = vadd.f32 %v4774_v2, %v4592_v9  ;;  %v4594_v54 = vpop.f32.mrf.mxu1  ;;  %v5053_v10 = vadd.f32 %v4976_v20, %v11785_v18  ;;  %v5664_v9 = vld [vmem:[#allocation2 + $0x79] sm:$0xff]  ;;  %v4825_v2 = vld [vmem:[#allocation2 + $0x12f] sm:$0xff] }
 0x4c0   : > { %v11951_v7 = vpack.c.bf16 %v5665_v45, %v5664_v9  ;;  %v4847_v18 = vpack.c.bf16 %v4825_v2, %v4824_v0  ;;  %v5379_v45 = vld [vmem:[#allocation2 + $0x90] sm:$0xff] }
 0x4c3   : > { %v5261_v41 = vpop.f32.mrf.mxu0 }
 0x4c4   : > { %v11949_v5 = vadd.f32 %v5261_v41, %v5052_v14  ;;  %v5667_v41 = vld [vmem:[#allocation2 + $0x91] sm:$0xff] }
 0x4c6   : > { %v4776_v48 = vpop.f32.mrf.mxu2  ;;  %v4978_v34 = vpop.f32.mrf.mxu3 }
 0x4c7   : > { %v11947_v15 = vadd.f32 %v4776_v48, %v4594_v54  ;;  %v4597_v23 = vpop.f32.mrf.mxu1  ;;  %v5054_v42 = vadd.f32 %v4978_v34, %v11796_v38 }
 0x4ca   : > { %9010 = vmatmul.msk.bf16.gmra.mxu1 %vm337_vm8, %v5411_v3 }
 0x4cb   : > { %9037 = vmatmul.msk.bf16.gmra.mxu2 %vm337_vm8, %v11951_v7  ;;  %8968 = vmatmul.msk.bf16.gmra.mxu3 %vm337_vm8, %v4847_v18  ;;  %v5264_v54 = vpop.f32.mrf.mxu0 }
 0x4cc   : > { %v11960_v48 = vadd.f32 %v5264_v54, %v5053_v10  ;;  %v5412_v10 = vpack.c.bf16 %v5379_v45, %v5378_v37 }
 0x4ce   : > { %v4779_v14 = vpop.f32.mrf.mxu2  ;;  %8994 = vmatmul.msk.bf16.gmra.mxu0 %vm337_vm8, %v4847_v18  ;;  %v4981_v47 = vpop.f32.mrf.mxu3 }
 0x4cf   : > { %v11958_v20 = vadd.f32 %v4779_v14, %v4597_v23  ;;  %v4599_v44 = vpop.f32.mrf.mxu1  ;;  %v5055_v34 = vadd.f32 %v4981_v47, %v11803_v13  ;;  %v5666_v23 = vld [vmem:[#allocation2 + $0x89] sm:$0xff]  ;;  %v4827_v14 = vld [vmem:[#allocation2 + $0x13f] sm:$0xff] }
 0x4d0   : > { %v11968_v54 = vpack.c.bf16 %v5667_v41, %v5666_v23  ;;  %v4848_v13 = vpack.c.bf16 %v4827_v14, %v4826_v1  ;;  %v5381_v41 = vld [vmem:[#allocation2 + $0xa0] sm:$0xff]  ;;  %v5380_v14 = vld [vmem:[#allocation2 + $0x98] sm:$0xff] }
 0x4d1   : > { %v9211_v1 = vld [vmem:[%s13384_s4] sm:$0xff] }
 0x4d2   : > { %7242 = vmatpush.bf16.msra.mxu2 %v9211_v1 }
 0x4d3   : > { %v5266_v9 = vpop.f32.mrf.mxu0 }
 0x4d4   : > { %v11966_v0 = vadd.f32 %v5266_v9, %v5054_v42  ;;  %v5669_v9 = vld [vmem:[#allocation2 + $0xa1] sm:$0xff] }
 0x4d6   : > { %v4781_v38 = vpop.f32.mrf.mxu2  ;;  %v4983_v25 = vpop.f32.mrf.mxu3 }
 0x4d7   : > { %v11964_v3 = vadd.f32 %v4781_v38, %v4599_v44  ;;  %v4602_v2 = vpop.f32.mrf.mxu1  ;;  %v5056_v18 = vadd.f32 %v4983_v25, %v11814_v52 }
 0x4da   : > { %9011 = vmatmul.msk.bf16.gmra.mxu1 %vm337_vm8, %v5412_v10 }
 0x4db   : > { %9038 = vmatmul.msk.bf16.gmra.mxu2 %vm337_vm8, %v11968_v54  ;;  %8969 = vmatmul.msk.bf16.gmra.mxu3 %vm337_vm8, %v4848_v13  ;;  %v5269_v44 = vpop.f32.mrf.mxu0 }
 0x4dc   : > { %v11977_v38 = vadd.f32 %v5269_v44, %v5055_v34  ;;  %v5668_v34 = vld [vmem:[#allocation2 + $0x99] sm:$0xff] }
 0x4de   : > { %v4784_v42 = vpop.f32.mrf.mxu2  ;;  %13644 = vst [vmem:[#allocation13_spill] sm:$0xff] %v11977_v38  ;;  %8995 = vmatmul.msk.bf16.gmra.mxu0 %vm337_vm8, %v4848_v13  ;;  %v4986_v45 = vpop.f32.mrf.mxu3  ;;  %v5413_v13 = vpack.c.bf16 %v5381_v41, %v5380_v14 }
 0x4df   : > { %v11975_v47 = vadd.f32 %v4784_v42, %v4602_v2  ;;  %v4604_v37 = vpop.f32.mrf.mxu1  ;;  %v5057_v25 = vadd.f32 %v4986_v45, %v11828_v22  ;;  %v4828_v42 = vld [vmem:[#allocation2 + $0x147] sm:$0xf] }
 0x4e0   : > { %v11987_v37 = vpack.c.bf16 %v5669_v9, %v5668_v34 }
 0x4e3   : > { %v5271_v23 = vpop.f32.mrf.mxu0 }
 0x4e4   : > { %v11981_v10 = vadd.f32 %v5271_v23, %v5056_v18  ;;  %v4849_v18 = vpack.c.bf16 %v4828_v42, %v4828_v42  ;;  %v5383_v42 = vld [vmem:[#allocation2 + $0xb0] sm:$0xff] }
 0x4e6   : > { %v4786_v52 = vpop.f32.mrf.mxu2  ;;  %13645 = vst [vmem:[#allocation37_spill] sm:$0xff] %v11981_v10  ;;  %v4988_v22 = vpop.f32.mrf.mxu3  ;;  %v5114_v10 = vld [vmem:[#allocation2 + $0x147] sm:$0xff] }
 0x4e7   : > { %v5507_v2 = vpop.f32.mrf.mxu1  ;;  %v5058_v45 = vadd.f32 %v4988_v22, %v11834_v49  ;;  %v5115_v52 = vld [vmem:[#allocation2 + $0x14f] sm:$0xff] }
 0x4e8   : > { %v5611_v44 = vadd.f32 %v5507_v2, %v11805_v61  ;;  %v5136_v9 = vpack.c.bf16 %v5115_v52, %v5114_v10 }
 0x4ea   : > { %9012 = vmatmul.msk.bf16.gmra.mxu1 %vm337_vm8, %v5413_v13  ;;  %v5671_v13 = vld [vmem:[#allocation2 + $0xb1] sm:$0xff] }
 0x4eb   : > { %9039 = vmatmul.msk.bf16.gmra.mxu2 %vm337_vm8, %v11987_v37  ;;  %8970 = vmatmul.msk.bf16.gmra.mxu3 %vm337_vm8, %v4849_v18  ;;  %v5274_v35 = vpop.f32.mrf.mxu0 }
 0x4ec   : > { %v11996_v41 = vadd.f32 %v5274_v35, %v5057_v25  ;;  %v5382_v35 = vld [vmem:[#allocation2 + $0xa8] sm:$0xff] }
 0x4ed   : > { %v5670_v25 = vld [vmem:[#allocation2 + $0xa9] sm:$0xff]  ;;  %v5414_v52 = vpack.c.bf16 %v5383_v42, %v5382_v35  ;;  %v5673_v35 = vld [vmem:[#allocation2 + $0xc1] sm:$0xff] }
 0x4ee   : > { %v5795_v23 = vpop.f32.mrf.mxu2  ;;  %8996 = vmatmul.msk.bf16.gmra.mxu0 %vm337_vm8, %v5136_v9  ;;  %v4991_v2 = vpop.f32.mrf.mxu3 }
 0x4ef   : > { %v11994_v61 = vadd.f32 %v5795_v23, %v5611_v44  ;;  %v5509_v1 = vpop.f32.mrf.mxu1  ;;  %v5059_v14 = vadd.f32 %v4991_v2, %v11842_v31  ;;  %v5116_v31 = vld [vmem:[#allocation2 + $0x157] sm:$0xf] }
 0x4f0   : > { %v5612_v49 = vadd.f32 %v5509_v1, %v11816_v30  ;;  %v12006_v30 = vpack.c.bf16 %v5671_v13, %v5670_v25  ;;  %v5137_v2 = vpack.c.bf16 %v5116_v31, %v5116_v31 }
 0x4f3   : > { %v5276_v22 = vpop.f32.mrf.mxu0 }
 0x4f4   : > { %v12003_v38 = vadd.f32 %v5276_v22, %v5058_v45 }
 0x4f6   : > { %v5797_v34 = vpop.f32.mrf.mxu2  ;;  %v4993_v23 = vpop.f32.mrf.mxu3 }
 0x4f7   : > { %v12001_v18 = vadd.f32 %v5797_v34, %v5612_v49  ;;  %v5512_v44 = vpop.f32.mrf.mxu1  ;;  %v5060_v9 = vadd.f32 %v4993_v23, %v11848_v51  ;;  %v5672_v23 = vld [vmem:[#allocation2 + $0xb9] sm:$0xff] }
 0x4f8   : > { %v5613_v10 = vadd.f32 %v5512_v44, %v11830_v4  ;;  %v5385_v44 = vld [vmem:[#allocation2 + $0xc0] sm:$0xff] }
 0x4fa   : > { %9013 = vmatmul.msk.bf16.gmra.mxu1 %vm337_vm8, %v5414_v52 }
 0x4fb   : > { %9040 = vmatmul.msk.bf16.gmra.mxu2 %vm337_vm8, %v12006_v30  ;;  %9058 = vmatmul.msk.bf16.vlgmr.msra.gmra.mxu3 %vm337_vm8, %v11866_v29  ;;  %v5279_v1 = vpop.f32.mrf.mxu0 }
 0x4fc   : > { %v12016_v4 = vadd.f32 %v5279_v1, %v5059_v14  ;;  %v5384_v14 = vld [vmem:[#allocation2 + $0xb8] sm:$0xff] }
 0x4fe   : > { %v5800_v45 = vpop.f32.mrf.mxu2  ;;  %8997 = vmatmul.msk.bf16.gmra.mxu0 %vm337_vm8, %v5137_v2  ;;  %v4996_v51 = vpop.f32.mrf.mxu3 }
 0x4ff   : > { %v12014_v49 = vadd.f32 %v5800_v45, %v5613_v10  ;;  %v5514_v34 = vpop.f32.mrf.mxu1  ;;  %v5061_v13 = vadd.f32 %v4996_v51, %v11856_v21  ;;  %v5415_v45 = vpack.c.bf16 %v5385_v44, %v5384_v14  ;;  %v6229_v21 = vld [vmem:[#allocation2 + $0x32] sm:$0xff] }
 0x500   : > { %v5614_v42 = vadd.f32 %v5514_v34, %v11836_v28  ;;  %v12026_v28 = vpack.c.bf16 %v5673_v35, %v5672_v23  ;;  %v5387_v14 = vld [vmem:[#allocation2 + $0xd0] sm:$0xff] }
 0x501   : > { %v5675_v23 = vld [vmem:[#allocation2 + $0xd1] sm:$0xff] }
 0x503   : > { %v5281_v25 = vpop.f32.mrf.mxu0 }
 0x504   : > { %v12023_v52 = vadd.f32 %v5281_v25, %v5060_v9 }
 0x506   : > { %v5802_v22 = vpop.f32.mrf.mxu2  ;;  %v4998_v1 = vpop.f32.mrf.mxu3 }
 0x507   : > { %v12021_v29 = vadd.f32 %v5802_v22, %v5614_v42  ;;  %v5517_v10 = vpop.f32.mrf.mxu1  ;;  %v5062_v2 = vadd.f32 %v4998_v1, %v11862_v19  ;;  %v6228_v42 = vld [vmem:[#allocation2 + $0x2a] sm:$0xff] }
 0x508   : > { %v5615_v31 = vadd.f32 %v5517_v10, %v11844_v26  ;;  %v6269_v22 = vpack.c.bf16 %v6229_v21, %v6228_v42 }
 0x50a   : > { %9014 = vmatmul.msk.bf16.gmra.mxu1 %vm337_vm8, %v5415_v45 }
 0x50b   : > { %9041 = vmatmul.msk.bf16.gmra.mxu2 %vm337_vm8, %v12026_v28  ;;  %9059 = vmatmul.msk.bf16.gmra.mxu3 %vm337_vm8, %v11883_v43  ;;  %v5284_v34 = vpop.f32.mrf.mxu0 }
 0x50c   : > { %v12036_v26 = vadd.f32 %v5284_v34, %v5061_v13  ;;  %v5386_v13 = vld [vmem:[#allocation2 + $0xc8] sm:$0xff] }
 0x50d   : > { %v5416_v34 = vpack.c.bf16 %v5387_v14, %v5386_v13  ;;  %v5389_v13 = vld [vmem:[#allocation2 + $0xe0] sm:$0xff] }
 0x50e   : > { %v5805_v9 = vpop.f32.mrf.mxu2  ;;  %9085 = vmatmul.msk.bf16.vlgmr.msra.gmra.mxu0 %vm337_vm8, %v6269_v22  ;;  %v5001_v35 = vpop.f32.mrf.mxu3 }
 0x50f   : > { %v12034_v51 = vadd.f32 %v5805_v9, %v5615_v31  ;;  %v5519_v44 = vpop.f32.mrf.mxu1  ;;  %v5063_v25 = vadd.f32 %v5001_v35, %v11873_v32  ;;  %v5674_v9 = vld [vmem:[#allocation2 + $0xc9] sm:$0xff] }
 0x510   : > { %v5616_v19 = vadd.f32 %v5519_v44, %v11850_v58  ;;  %v12046_v58 = vpack.c.bf16 %v5675_v23, %v5674_v9  ;;  %v6231_v32 = vld [vmem:[#allocation2 + $0x42] sm:$0xff] }
 0x511   : > { %v5677_v9 = vld [vmem:[#allocation2 + $0xe1] sm:$0xff] }
 0x513   : > { %v5286_v43 = vpop.f32.mrf.mxu0 }
 0x514   : > { %v12043_v1 = vadd.f32 %v5286_v43, %v5062_v2 }
 0x516   : > { %v5807_v10 = vpop.f32.mrf.mxu2  ;;  %v5003_v42 = vpop.f32.mrf.mxu3 }
 0x517   : > { %v12041_v45 = vadd.f32 %v5807_v10, %v5616_v19  ;;  %v5522_v31 = vpop.f32.mrf.mxu1  ;;  %v5064_v22 = vadd.f32 %v5003_v42, %v11879_v62  ;;  %v6230_v19 = vld [vmem:[#allocation2 + $0x3a] sm:$0xff] }
 0x518   : > { %v5617_v21 = vadd.f32 %v5522_v31, %v11858_v8  ;;  %v6270_v10 = vpack.c.bf16 %v6231_v32, %v6230_v19 }
 0x51a   : > { %9015 = vmatmul.msk.bf16.gmra.mxu1 %vm337_vm8, %v5416_v34 }
 0x51b   : > { %9042 = vmatmul.msk.bf16.gmra.mxu2 %vm337_vm8, %v12046_v58  ;;  %9060 = vmatmul.msk.bf16.gmra.mxu3 %vm337_vm8, %v11900_v24  ;;  %v5289_v44 = vpop.f32.mrf.mxu0 }
 0x51c   : > { %v12056_v8 = vadd.f32 %v5289_v44, %v5063_v25  ;;  %v5388_v25 = vld [vmem:[#allocation2 + $0xd8] sm:$0xff] }
 0x51d   : > { %v5417_v44 = vpack.c.bf16 %v5389_v13, %v5388_v25  ;;  %v5391_v25 = vld [vmem:[#allocation2 + $0xf0] sm:$0xff] }
 0x51e   : > { %v5810_v2 = vpop.f32.mrf.mxu2  ;;  %9086 = vmatmul.msk.bf16.gmra.mxu0 %vm337_vm8, %v6270_v10  ;;  %v5006_v23 = vpop.f32.mrf.mxu3 }
 0x51f   : > { %v12054_v35 = vadd.f32 %v5810_v2, %v5617_v21  ;;  %v5524_v14 = vpop.f32.mrf.mxu1  ;;  %v5065_v43 = vadd.f32 %v5006_v23, %v11890_v12  ;;  %v5676_v2 = vld [vmem:[#allocation2 + $0xd9] sm:$0xff] }
 0x520   : > { %v5618_v62 = vadd.f32 %v5524_v14, %v11864_v46  ;;  %v12066_v46 = vpack.c.bf16 %v5677_v9, %v5676_v2  ;;  %v6233_v12 = vld [vmem:[#allocation2 + $0x52] sm:$0xff] }
 0x521   : > { %v5679_v2 = vld [vmem:[#allocation2 + $0xf1] sm:$0xff] }
 0x523   : > { %v5291_v24 = vpop.f32.mrf.mxu0 }
 0x524   : > { %v12063_v42 = vadd.f32 %v5291_v24, %v5064_v22 }
 0x526   : > { %v5812_v31 = vpop.f32.mrf.mxu2  ;;  %v5008_v19 = vpop.f32.mrf.mxu3 }
 0x527   : > { %v12061_v34 = vadd.f32 %v5812_v31, %v5618_v62  ;;  %v5527_v21 = vpop.f32.mrf.mxu1  ;;  %v5066_v10 = vadd.f32 %v5008_v19, %v11896_v27  ;;  %v6232_v62 = vld [vmem:[#allocation2 + $0x4a] sm:$0xff] }
 0x528   : > { %v5619_v32 = vadd.f32 %v5527_v21, %v11875_v53  ;;  %v6271_v31 = vpack.c.bf16 %v6233_v12, %v6232_v62 }
 0x52a   : > { %9016 = vmatmul.msk.bf16.gmra.mxu1 %vm337_vm8, %v5417_v44 }
 0x52b   : > { %9043 = vmatmul.msk.bf16.gmra.mxu2 %vm337_vm8, %v12066_v46  ;;  %9061 = vmatmul.msk.bf16.gmra.mxu3 %vm337_vm8, %v11917_v50  ;;  %v5294_v14 = vpop.f32.mrf.mxu0 }
 0x52c   : > { %v12076_v53 = vadd.f32 %v5294_v14, %v5065_v43  ;;  %v5390_v43 = vld [vmem:[#allocation2 + $0xe8] sm:$0xff] }
 0x52d   : > { %v5418_v14 = vpack.c.bf16 %v5391_v25, %v5390_v43  ;;  %v5393_v43 = vld [vmem:[#allocation2 + $0x100] sm:$0xff] }
 0x52e   : > { %v5815_v22 = vpop.f32.mrf.mxu2  ;;  %9087 = vmatmul.msk.bf16.gmra.mxu0 %vm337_vm8, %v6271_v31  ;;  %v5011_v9 = vpop.f32.mrf.mxu3 }
 0x52f   : > { %v12074_v23 = vadd.f32 %v5815_v22, %v5619_v32  ;;  %v5529_v13 = vpop.f32.mrf.mxu1  ;;  %v5067_v24 = vadd.f32 %v5011_v9, %v11907_v60  ;;  %v5678_v22 = vld [vmem:[#allocation2 + $0xe9] sm:$0xff] }
 0x530   : > { %v5620_v27 = vadd.f32 %v5529_v13, %v11881_v55  ;;  %v12086_v55 = vpack.c.bf16 %v5679_v2, %v5678_v22  ;;  %v6235_v60 = vld [vmem:[#allocation2 + $0x62] sm:$0xff] }
 0x531   : > { %v5681_v22 = vld [vmem:[#allocation2 + $0x101] sm:$0xff] }
 0x533   : > { %v5296_v50 = vpop.f32.mrf.mxu0 }
 0x534   : > { %v12083_v19 = vadd.f32 %v5296_v50, %v5066_v10 }
 0x536   : > { %v5817_v21 = vpop.f32.mrf.mxu2  ;;  %v5013_v62 = vpop.f32.mrf.mxu3 }
 0x537   : > { %v12081_v44 = vadd.f32 %v5817_v21, %v5620_v27  ;;  %v5532_v32 = vpop.f32.mrf.mxu1  ;;  %v5068_v31 = vadd.f32 %v5013_v62, %v11913_v59  ;;  %v6234_v27 = vld [vmem:[#allocation2 + $0x5a] sm:$0xff] }
 0x538   : > { %v5621_v12 = vadd.f32 %v5532_v32, %v11892_v33  ;;  %v6272_v21 = vpack.c.bf16 %v6235_v60, %v6234_v27 }
 0x53a   : > { %9017 = vmatmul.msk.bf16.gmra.mxu1 %vm337_vm8, %v5418_v14 }
 0x53b   : > { %9044 = vmatmul.msk.bf16.gmra.mxu2 %vm337_vm8, %v12086_v55  ;;  %9062 = vmatmul.msk.bf16.gmra.mxu3 %vm337_vm8, %v11934_v40  ;;  %v5299_v13 = vpop.f32.mrf.mxu0 }
 0x53c   : > { %v12096_v33 = vadd.f32 %v5299_v13, %v5067_v24  ;;  %v5392_v24 = vld [vmem:[#allocation2 + $0xf8] sm:$0xff] }
 0x53d   : > { %v5419_v13 = vpack.c.bf16 %v5393_v43, %v5392_v24  ;;  %v5395_v24 = vld [vmem:[#allocation2 + $0x110] sm:$0xff] }
 0x53e   : > { %v5820_v10 = vpop.f32.mrf.mxu2  ;;  %9088 = vmatmul.msk.bf16.gmra.mxu0 %vm337_vm8, %v6272_v21  ;;  %v5016_v2 = vpop.f32.mrf.mxu3 }
 0x53f   : > { %v12094_v9 = vadd.f32 %v5820_v10, %v5621_v12  ;;  %v5534_v25 = vpop.f32.mrf.mxu1  ;;  %v5069_v50 = vadd.f32 %v5016_v2, %v11924_v11  ;;  %v5680_v10 = vld [vmem:[#allocation2 + $0xf9] sm:$0xff] }
 0x540   : > { %v5622_v59 = vadd.f32 %v5534_v25, %v11898_v6  ;;  %v12106_v6 = vpack.c.bf16 %v5681_v22, %v5680_v10  ;;  %v6237_v11 = vld [vmem:[#allocation2 + $0x72] sm:$0xff] }
 0x541   : > { %v5683_v10 = vld [vmem:[#allocation2 + $0x111] sm:$0xff] }
 0x543   : > { %v5301_v40 = vpop.f32.mrf.mxu0 }
 0x544   : > { %v12103_v62 = vadd.f32 %v5301_v40, %v5068_v31 }
 0x546   : > { %v5822_v32 = vpop.f32.mrf.mxu2  ;;  %v5018_v27 = vpop.f32.mrf.mxu3 }
 0x547   : > { %v12101_v14 = vadd.f32 %v5822_v32, %v5622_v59  ;;  %v5537_v12 = vpop.f32.mrf.mxu1  ;;  %v5070_v21 = vadd.f32 %v5018_v27, %v11930_v63  ;;  %v6236_v59 = vld [vmem:[#allocation2 + $0x6a] sm:$0xff] }
 0x548   : > { %v5623_v60 = vadd.f32 %v5537_v12, %v11909_v57  ;;  %v6273_v32 = vpack.c.bf16 %v6237_v11, %v6236_v59 }
 0x54a   : > { %9018 = vmatmul.msk.bf16.gmra.mxu1 %vm337_vm8, %v5419_v13 }
 0x54b   : > { %9045 = vmatmul.msk.bf16.gmra.mxu2 %vm337_vm8, %v12106_v6  ;;  %9063 = vmatmul.msk.bf16.gmra.mxu3 %vm337_vm8, %v11951_v7  ;;  %v5304_v25 = vpop.f32.mrf.mxu0 }
 0x54c   : > { %v12116_v57 = vadd.f32 %v5304_v25, %v5069_v50  ;;  %v5394_v50 = vld [vmem:[#allocation2 + $0x108] sm:$0xff] }
 0x54d   : > { %v5420_v25 = vpack.c.bf16 %v5395_v24, %v5394_v50  ;;  %v5397_v50 = vld [vmem:[#allocation2 + $0x120] sm:$0xff] }
 0x54e   : > { %v5825_v31 = vpop.f32.mrf.mxu2  ;;  %9089 = vmatmul.msk.bf16.gmra.mxu0 %vm337_vm8, %v6273_v32  ;;  %v5021_v22 = vpop.f32.mrf.mxu3 }
 0x54f   : > { %v12114_v2 = vadd.f32 %v5825_v31, %v5623_v60  ;;  %v5539_v43 = vpop.f32.mrf.mxu1  ;;  %v5071_v40 = vadd.f32 %v5021_v22, %v11941_v16  ;;  %v5682_v31 = vld [vmem:[#allocation2 + $0x109] sm:$0xff] }
 0x550   : > { %v5624_v63 = vadd.f32 %v5539_v43, %v11915_v39  ;;  %v12126_v39 = vpack.c.bf16 %v5683_v10, %v5682_v31  ;;  %v6239_v16 = vld [vmem:[#allocation2 + $0x82] sm:$0xff] }
 0x551   : > { %v5685_v31 = vld [vmem:[#allocation2 + $0x121] sm:$0xff] }
 0x553   : > { %v5306_v7 = vpop.f32.mrf.mxu0 }
 0x554   : > { %v12123_v27 = vadd.f32 %v5306_v7, %v5070_v21 }
 0x556   : > { %v5827_v12 = vpop.f32.mrf.mxu2  ;;  %v5023_v59 = vpop.f32.mrf.mxu3 }
 0x557   : > { %v12121_v13 = vadd.f32 %v5827_v12, %v5624_v63  ;;  %v5542_v60 = vpop.f32.mrf.mxu1  ;;  %v5072_v32 = vadd.f32 %v5023_v59, %v11947_v15  ;;  %v6238_v63 = vld [vmem:[#allocation2 + $0x7a] sm:$0xff] }
 0x558   : > { %v5625_v11 = vadd.f32 %v5542_v60, %v11926_v56  ;;  %v6274_v12 = vpack.c.bf16 %v6239_v16, %v6238_v63 }
 0x55a   : > { %9019 = vmatmul.msk.bf16.gmra.mxu1 %vm337_vm8, %v5420_v25 }
 0x55b   : > { %9046 = vmatmul.msk.bf16.gmra.mxu2 %vm337_vm8, %v12126_v39  ;;  %9064 = vmatmul.msk.bf16.gmra.mxu3 %vm337_vm8, %v11968_v54  ;;  %v5309_v43 = vpop.f32.mrf.mxu0 }
 0x55c   : > { %v12136_v56 = vadd.f32 %v5309_v43, %v5071_v40  ;;  %v5396_v40 = vld [vmem:[#allocation2 + $0x118] sm:$0xff] }
 0x55d   : > { %v5421_v43 = vpack.c.bf16 %v5397_v50, %v5396_v40  ;;  %v5399_v40 = vld [vmem:[#allocation2 + $0x130] sm:$0xff] }
 0x55e   : > { %v5830_v21 = vpop.f32.mrf.mxu2  ;;  %9090 = vmatmul.msk.bf16.gmra.mxu0 %vm337_vm8, %v6274_v12  ;;  %v5026_v10 = vpop.f32.mrf.mxu3 }
 0x55f   : > { %v12134_v22 = vadd.f32 %v5830_v21, %v5625_v11  ;;  %v5544_v24 = vpop.f32.mrf.mxu1  ;;  %v5073_v7 = vadd.f32 %v5026_v10, %v11958_v20  ;;  %v5684_v21 = vld [vmem:[#allocation2 + $0x119] sm:$0xff] }
 0x560   : > { %v5626_v15 = vadd.f32 %v5544_v24, %v11932_v17  ;;  %v12146_v17 = vpack.c.bf16 %v5685_v31, %v5684_v21  ;;  %v6241_v20 = vld [vmem:[#allocation2 + $0x92] sm:$0xff] }
 0x561   : > { %v5687_v21 = vld [vmem:[#allocation2 + $0x131] sm:$0xff] }
 0x563   : > { %v5311_v54 = vpop.f32.mrf.mxu0 }
 0x564   : > { %v12143_v59 = vadd.f32 %v5311_v54, %v5072_v32 }
 0x566   : > { %v5832_v60 = vpop.f32.mrf.mxu2  ;;  %v5028_v63 = vpop.f32.mrf.mxu3 }
 0x567   : > { %v12141_v25 = vadd.f32 %v5832_v60, %v5626_v15  ;;  %v5547_v11 = vpop.f32.mrf.mxu1  ;;  %v5074_v12 = vadd.f32 %v5028_v63, %v11964_v3  ;;  %v6240_v15 = vld [vmem:[#allocation2 + $0x8a] sm:$0xff] }
 0x568   : > { %v5627_v16 = vadd.f32 %v5547_v11, %v11943_v36  ;;  %v6275_v60 = vpack.c.bf16 %v6241_v20, %v6240_v15 }
 0x56a   : > { %9020 = vmatmul.msk.bf16.gmra.mxu1 %vm337_vm8, %v5421_v43 }
 0x56b   : > { %9047 = vmatmul.msk.bf16.gmra.mxu2 %vm337_vm8, %v12146_v17  ;;  %9065 = vmatmul.msk.bf16.gmra.mxu3 %vm337_vm8, %v11987_v37  ;;  %v5314_v24 = vpop.f32.mrf.mxu0 }
 0x56c   : > { %v12156_v36 = vadd.f32 %v5314_v24, %v5073_v7  ;;  %v5398_v7 = vld [vmem:[#allocation2 + $0x128] sm:$0xff] }
 0x56d   : > { %v5422_v24 = vpack.c.bf16 %v5399_v40, %v5398_v7  ;;  %v5689_v7 = vld [vmem:[#allocation2 + $0x141] sm:$0xff] }
 0x56e   : > { %v5835_v32 = vpop.f32.mrf.mxu2  ;;  %9091 = vmatmul.msk.bf16.gmra.mxu0 %vm337_vm8, %v6275_v60  ;;  %v5031_v31 = vpop.f32.mrf.mxu3 }
 0x56f   : > { %v12154_v10 = vadd.f32 %v5835_v32, %v5627_v16  ;;  %v5549_v50 = vpop.f32.mrf.mxu1  ;;  %v5075_v54 = vadd.f32 %v5031_v31, %v11975_v47  ;;  %v5686_v32 = vld [vmem:[#allocation2 + $0x129] sm:$0xff] }
 0x570   : > { %v5628_v3 = vadd.f32 %v5549_v50, %v11949_v5  ;;  %v12166_v5 = vpack.c.bf16 %v5687_v21, %v5686_v32  ;;  %v6243_v47 = vld [vmem:[#allocation2 + $0xa2] sm:$0xff]  ;;  %v6242_v50 = vld [vmem:[#allocation2 + $0x9a] sm:$0xff] }
 0x573   : > { %v5316_v37 = vpop.f32.mrf.mxu0 }
 0x574   : > { %v12163_v63 = vadd.f32 %v5316_v37, %v5074_v12 }
 0x576   : > { %v5837_v11 = vpop.f32.mrf.mxu2  ;;  %13646 = vst [vmem:[#allocation38_spill] sm:$0xff] %v12163_v63  ;;  %v5033_v15 = vpop.f32.mrf.mxu3 }
 0x577   : > { %v12161_v43 = vadd.f32 %v5837_v11, %v5628_v3  ;;  %v5552_v16 = vpop.f32.mrf.mxu1  ;;  %v5688_v15 = vld [vmem:[#allocation2 + $0x139] sm:$0xff] }
 0x578   : > { %v5629_v20 = vadd.f32 %v5552_v16, %v11960_v48  ;;  %v6276_v48 = vpack.c.bf16 %v6243_v47, %v6242_v50 }
 0x57a   : > { %9021 = vmatmul.msk.bf16.gmra.mxu1 %vm337_vm8, %v5422_v24 }
 0x57b   : > { %9048 = vmatmul.msk.bf16.gmra.mxu2 %vm337_vm8, %v12166_v5  ;;  %9066 = vmatmul.msk.bf16.gmra.mxu3 %vm337_vm8, %v12006_v30  ;;  %v5319_v60 = vpop.f32.mrf.mxu0  ;;  %v5401_v30 = vld [vmem:[#allocation2 + $0x140] sm:$0xff] }
 0x57c   : > { %v12175_v31 = vadd.f32 %v5319_v60, %v5075_v54  ;;  %v13648_v54 = vld [vmem:[#allocation13_spill] sm:$0xff]  ;;  %v12185_v60 = vpack.c.bf16 %v5689_v7, %v5688_v15 }
 0x57e   : > { %v5840_v12 = vpop.f32.mrf.mxu2  ;;  %13647 = vst [vmem:[#allocation14_spill] sm:$0xff] %v12175_v31  ;;  %9092 = vmatmul.msk.bf16.gmra.mxu0 %vm337_vm8, %v6276_v48  ;;  %v6083_v21 = vpop.f32.mrf.mxu3 }
 0x57f   : > { %v12173_v3 = vadd.f32 %v5840_v12, %v5629_v20  ;;  %v5554_v11 = vpop.f32.mrf.mxu1  ;;  %v6187_v37 = vadd.f32 %v6083_v21, %v11994_v61  ;;  %v5400_v20 = vld [vmem:[#allocation2 + $0x138] sm:$0xff]  ;;  %v6244_v21 = vld [vmem:[#allocation2 + $0xaa] sm:$0xff] }
 0x580   : > { %v12178_v40 = vadd.f32 %v5554_v11, %v11966_v0  ;;  %v5423_v47 = vpack.c.bf16 %v5401_v30, %v5400_v20  ;;  %v6245_v61 = vld [vmem:[#allocation2 + $0xb2] sm:$0xff]  ;;  %v13649_v20 = vld [vmem:[#allocation37_spill] sm:$0xff] }
 0x581   : > { %v6277_v7 = vpack.c.bf16 %v6245_v61, %v6244_v21 }
 0x583   : > { %v5321_v32 = vpop.f32.mrf.mxu0 }
 0x586   : > { %v12182_v16 = vpop.f32.mrf.mxu2  ;;  %v6085_v0 = vpop.f32.mrf.mxu3 }
 0x587   : > { %v5557_v24 = vpop.f32.mrf.mxu1  ;;  %v6188_v50 = vadd.f32 %v6085_v0, %v12001_v18  ;;  %v5691_v0 = vld [vmem:[#allocation2 + $0x151] sm:$0xff] }
 0x588   : > { %v5631_v12 = vadd.f32 %v5557_v24, %v13648_v54 }
 0x58a   : > { %9022 = vmatmul.msk.bf16.gmra.mxu1 %vm337_vm8, %v5423_v47 }
 0x58b   : > { %9049 = vmatmul.msk.bf16.gmra.mxu2 %vm337_vm8, %v12185_v60  ;;  %9067 = vmatmul.msk.bf16.gmra.mxu3 %vm337_vm8, %v12026_v28  ;;  %v6371_v11 = vpop.f32.mrf.mxu0  ;;  %v5403_v28 = vld [vmem:[#allocation2 + $0x150] sm:$0xff] }
 0x58c   : > { %v12195_v30 = vadd.f32 %v6371_v11, %v6187_v37  ;;  %v5402_v37 = vld [vmem:[#allocation2 + $0x148] sm:$0xff] }
 0x58d   : > { %v5424_v11 = vpack.c.bf16 %v5403_v28, %v5402_v37 }
 0x58e   : > { %v5845_v48 = vpop.f32.mrf.mxu2  ;;  %9093 = vmatmul.msk.bf16.gmra.mxu0 %vm337_vm8, %v6277_v7  ;;  %v6088_v15 = vpop.f32.mrf.mxu3 }
 0x58f   : > { %v12193_v32 = vadd.f32 %v5845_v48, %v5631_v12  ;;  %v5559_v24 = vpop.f32.mrf.mxu1  ;;  %v6189_v54 = vadd.f32 %v6088_v15, %v12014_v49  ;;  %v5690_v48 = vld [vmem:[#allocation2 + $0x149] sm:$0xff] }
 0x590   : > { %v12198_v18 = vadd.f32 %v5559_v24, %v13649_v20  ;;  %v12207_v21 = vpack.c.bf16 %v5691_v0, %v5690_v48  ;;  %v6247_v49 = vld [vmem:[#allocation2 + $0xc2] sm:$0xff]  ;;  %v6246_v20 = vld [vmem:[#allocation2 + $0xba] sm:$0xff] }
 0x591   : > { %v6278_v28 = vpack.c.bf16 %v6247_v49, %v6246_v20 }
 0x593   : > { %v6373_v31 = vpop.f32.mrf.mxu0 }
 0x594   : > { %v12204_v63 = vadd.f32 %v6373_v31, %v6188_v50 }
 0x596   : > { %v12202_v47 = vpop.f32.mrf.mxu2  ;;  %13650 = vst [vmem:[#allocation39_spill] sm:$0xff] %v12204_v63  ;;  %v6090_v24 = vpop.f32.mrf.mxu3 }
 0x597   : > { %v5562_v12 = vpop.f32.mrf.mxu1  ;;  %v6190_v7 = vadd.f32 %v6090_v24, %v12021_v29 }
 0x598   : > { %v5633_v61 = vadd.f32 %v5562_v12, %v11996_v41 }
 0x59a   : > { %9023 = vmatmul.msk.bf16.gmra.mxu1 %vm337_vm8, %v5424_v11  ;;  %v5692_v11 = vld [vmem:[#allocation2 + $0x159] sm:$0xf] }
 0x59b   : > { %9050 = vmatmul.msk.bf16.gmra.mxu2 %vm337_vm8, %v12207_v21  ;;  %9068 = vmatmul.msk.bf16.gmra.mxu3 %vm337_vm8, %v12046_v58  ;;  %v6376_v50 = vpop.f32.mrf.mxu0  ;;  %v5404_v58 = vld [vmem:[#allocation2 + $0x158] sm:$0xf] }
 0x59c   : > { %v12217_v41 = vadd.f32 %v6376_v50, %v6189_v54  ;;  %v5425_v49 = vpack.c.bf16 %v5404_v58, %v5404_v58 }
 0x59e   : > { %v5850_v31 = vpop.f32.mrf.mxu2  ;;  %9094 = vmatmul.msk.bf16.gmra.mxu0 %vm337_vm8, %v6278_v28  ;;  %v6093_v12 = vpop.f32.mrf.mxu3 }
 0x59f   : > { %v12215_v15 = vadd.f32 %v5850_v31, %v5633_v61  ;;  %v5564_v0 = vpop.f32.mrf.mxu1  ;;  %v6191_v37 = vadd.f32 %v6093_v12, %v12034_v51  ;;  %v5713_v31 = vpack.c.bf16 %v5692_v11, %v5692_v11  ;;  %v6249_v51 = vld [vmem:[#allocation2 + $0xd2] sm:$0xff] }
 0x5a0   : > { %v12220_v29 = vadd.f32 %v5564_v0, %v12003_v38 }
 0x5a3   : > { %v6378_v24 = vpop.f32.mrf.mxu0 }
 0x5a4   : > { %v12226_v63 = vadd.f32 %v6378_v24, %v6190_v7  ;;  %v6248_v7 = vld [vmem:[#allocation2 + $0xca] sm:$0xff] }
 0x5a6   : > { %v12224_v48 = vpop.f32.mrf.mxu2  ;;  %v6095_v50 = vpop.f32.mrf.mxu3 }
 0x5a7   : > { %v5567_v61 = vpop.f32.mrf.mxu1  ;;  %v6192_v38 = vadd.f32 %v6095_v50, %v12041_v45  ;;  %v6516_v50 = vld [vmem:[#allocation2 + $0x2b] sm:$0xff] }
 0x5a8   : > { %v5635_v54 = vadd.f32 %v5567_v61, %v12016_v4  ;;  %v6279_v4 = vpack.c.bf16 %v6249_v51, %v6248_v7 }
 0x5aa   : > { %9024 = vmatmul.msk.bf16.gmra.mxu1 %vm337_vm8, %v5425_v49 }
 0x5ab   : > { %9051 = vmatmul.msk.bf16.gmra.mxu2 %vm337_vm8, %v5713_v31  ;;  %9069 = vmatmul.msk.bf16.gmra.mxu3 %vm337_vm8, %v12066_v46  ;;  %v6381_v28 = vpop.f32.mrf.mxu0  ;;  %v6517_v46 = vld [vmem:[#allocation2 + $0x33] sm:$0xff] }
 0x5ac   : > { %v12236_v12 = vadd.f32 %v6381_v28, %v6191_v37  ;;  %v6557_v51 = vpack.c.bf16 %v6517_v46, %v6516_v50  ;;  %v6251_v28 = vld [vmem:[#allocation2 + $0xe2] sm:$0xff] }
 0x5ae   : > { %v5855_v20 = vpop.f32.mrf.mxu2  ;;  %9095 = vmatmul.msk.bf16.gmra.mxu0 %vm337_vm8, %v6279_v4  ;;  %v6098_v45 = vpop.f32.mrf.mxu3  ;;  %v6250_v4 = vld [vmem:[#allocation2 + $0xda] sm:$0xff] }
 0x5af   : > { %v12234_v0 = vadd.f32 %v5855_v20, %v5635_v54  ;;  %v5569_v58 = vpop.f32.mrf.mxu1  ;;  %v6193_v24 = vadd.f32 %v6098_v45, %v12054_v35  ;;  %v6280_v45 = vpack.c.bf16 %v6251_v28, %v6250_v4 }
 0x5b0   : > { %v12239_v11 = vadd.f32 %v5569_v58, %v12023_v52 }
 0x5b3   : > { %v6383_v49 = vpop.f32.mrf.mxu0 }
 0x5b4   : > { %v12245_v31 = vadd.f32 %v6383_v49, %v6192_v38 }
 0x5b6   : > { %v12243_v61 = vpop.f32.mrf.mxu2  ;;  %v6100_v20 = vpop.f32.mrf.mxu3 }
 0x5b7   : > { %v5572_v54 = vpop.f32.mrf.mxu1  ;;  %v6194_v52 = vadd.f32 %v6100_v20, %v12061_v34  ;;  %v6518_v20 = vld [vmem:[#allocation2 + $0x3b] sm:$0xff] }
 0x5b8   : > { %v5637_v37 = vadd.f32 %v5572_v54, %v12036_v26 }
 0x5ba   : > { %9112 = vmatmul.msk.bf16.vlgmr.msra.gmra.mxu1 %vm337_vm8, %v6557_v51 }
 0x5bb   : > { %9070 = vmatmul.msk.bf16.gmra.mxu3 %vm337_vm8, %v12086_v55  ;;  %v6386_v7 = vpop.f32.mrf.mxu0  ;;  %v6519_v55 = vld [vmem:[#allocation2 + $0x43] sm:$0xff] }
 0x5bc   : > { %v12254_v38 = vadd.f32 %v6386_v7, %v6193_v24  ;;  %v6558_v28 = vpack.c.bf16 %v6519_v55, %v6518_v20  ;;  %v6253_v7 = vld [vmem:[#allocation2 + $0xf2] sm:$0xff] }
 0x5be   : > { %v5860_v35 = vpop.f32.mrf.mxu2  ;;  %9096 = vmatmul.msk.bf16.gmra.mxu0 %vm337_vm8, %v6280_v45  ;;  %v6103_v34 = vpop.f32.mrf.mxu3  ;;  %v6252_v45 = vld [vmem:[#allocation2 + $0xea] sm:$0xff] }
 0x5bf   : > { %v12252_v58 = vadd.f32 %v5860_v35, %v5637_v37  ;;  %v5574_v49 = vpop.f32.mrf.mxu1  ;;  %v6195_v46 = vadd.f32 %v6103_v34, %v12074_v23  ;;  %v6281_v34 = vpack.c.bf16 %v6253_v7, %v6252_v45 }
 0x5c0   : > { %v12257_v26 = vadd.f32 %v5574_v49, %v12043_v1 }
 0x5c3   : > { %v6388_v50 = vpop.f32.mrf.mxu0 }
 0x5c4   : > { %v12263_v51 = vadd.f32 %v6388_v50, %v6194_v52 }
 0x5c6   : > { %v12261_v54 = vpop.f32.mrf.mxu2  ;;  %v6105_v35 = vpop.f32.mrf.mxu3 }
 0x5c7   : > { %v5577_v37 = vpop.f32.mrf.mxu1  ;;  %v6196_v1 = vadd.f32 %v6105_v35, %v12081_v44  ;;  %v6520_v35 = vld [vmem:[#allocation2 + $0x4b] sm:$0xff] }
 0x5c8   : > { %v5639_v24 = vadd.f32 %v5577_v37, %v12056_v8 }
 0x5ca   : > { %9113 = vmatmul.msk.bf16.gmra.mxu1 %vm337_vm8, %v6558_v28 }
 0x5cb   : > { %9071 = vmatmul.msk.bf16.gmra.mxu3 %vm337_vm8, %v12106_v6  ;;  %v6391_v4 = vpop.f32.mrf.mxu0  ;;  %v6521_v6 = vld [vmem:[#allocation2 + $0x53] sm:$0xff] }
 0x5cc   : > { %v12272_v52 = vadd.f32 %v6391_v4, %v6195_v46  ;;  %v6559_v7 = vpack.c.bf16 %v6521_v6, %v6520_v35  ;;  %v6255_v4 = vld [vmem:[#allocation2 + $0x102] sm:$0xff] }
 0x5ce   : > { %v5865_v23 = vpop.f32.mrf.mxu2  ;;  %9097 = vmatmul.msk.bf16.gmra.mxu0 %vm337_vm8, %v6281_v34  ;;  %v6108_v44 = vpop.f32.mrf.mxu3  ;;  %v6254_v34 = vld [vmem:[#allocation2 + $0xfa] sm:$0xff] }
 0x5cf   : > { %v12270_v49 = vadd.f32 %v5865_v23, %v5639_v24  ;;  %v5579_v50 = vpop.f32.mrf.mxu1  ;;  %v6197_v55 = vadd.f32 %v6108_v44, %v12094_v9  ;;  %v6282_v44 = vpack.c.bf16 %v6255_v4, %v6254_v34 }
 0x5d0   : > { %v12275_v8 = vadd.f32 %v5579_v50, %v12063_v42 }
 0x5d3   : > { %v6393_v20 = vpop.f32.mrf.mxu0 }
 0x5d4   : > { %v12281_v28 = vadd.f32 %v6393_v20, %v6196_v1 }
 0x5d6   : > { %v12279_v37 = vpop.f32.mrf.mxu2  ;;  %v6110_v23 = vpop.f32.mrf.mxu3 }
 0x5d7   : > { %v5582_v24 = vpop.f32.mrf.mxu1  ;;  %v6198_v42 = vadd.f32 %v6110_v23, %v12101_v14  ;;  %v6522_v23 = vld [vmem:[#allocation2 + $0x5b] sm:$0xff] }
 0x5d8   : > { %v5641_v46 = vadd.f32 %v5582_v24, %v12076_v53 }
 0x5da   : > { %9114 = vmatmul.msk.bf16.gmra.mxu1 %vm337_vm8, %v6559_v7 }
 0x5db   : > { %9072 = vmatmul.msk.bf16.gmra.mxu3 %vm337_vm8, %v12126_v39  ;;  %v6396_v45 = vpop.f32.mrf.mxu0  ;;  %v6523_v39 = vld [vmem:[#allocation2 + $0x63] sm:$0xff] }
 0x5dc   : > { %v12290_v1 = vadd.f32 %v6396_v45, %v6197_v55  ;;  %v6560_v4 = vpack.c.bf16 %v6523_v39, %v6522_v23  ;;  %v6257_v45 = vld [vmem:[#allocation2 + $0x112] sm:$0xff] }
 0x5de   : > { %v5870_v9 = vpop.f32.mrf.mxu2  ;;  %9098 = vmatmul.msk.bf16.gmra.mxu0 %vm337_vm8, %v6282_v44  ;;  %v6113_v14 = vpop.f32.mrf.mxu3  ;;  %v6256_v44 = vld [vmem:[#allocation2 + $0x10a] sm:$0xff] }
 0x5df   : > { %v12288_v50 = vadd.f32 %v5870_v9, %v5641_v46  ;;  %v5584_v20 = vpop.f32.mrf.mxu1  ;;  %v6199_v6 = vadd.f32 %v6113_v14, %v12114_v2  ;;  %v6283_v14 = vpack.c.bf16 %v6257_v45, %v6256_v44 }
 0x5e0   : > { %v12293_v53 = vadd.f32 %v5584_v20, %v12083_v19 }
 0x5e3   : > { %v6398_v35 = vpop.f32.mrf.mxu0 }
 0x5e4   : > { %v12299_v7 = vadd.f32 %v6398_v35, %v6198_v42 }
 0x5e6   : > { %v12297_v24 = vpop.f32.mrf.mxu2  ;;  %v6115_v9 = vpop.f32.mrf.mxu3 }
 0x5e7   : > { %v5587_v46 = vpop.f32.mrf.mxu1  ;;  %v6200_v19 = vadd.f32 %v6115_v9, %v12121_v13  ;;  %v6524_v9 = vld [vmem:[#allocation2 + $0x6b] sm:$0xff] }
 0x5e8   : > { %v5643_v55 = vadd.f32 %v5587_v46, %v12096_v33 }
 0x5ea   : > { %9115 = vmatmul.msk.bf16.gmra.mxu1 %vm337_vm8, %v6560_v4 }
 0x5eb   : > { %9073 = vmatmul.msk.bf16.gmra.mxu3 %vm337_vm8, %v12146_v17  ;;  %v6401_v34 = vpop.f32.mrf.mxu0  ;;  %v6525_v17 = vld [vmem:[#allocation2 + $0x73] sm:$0xff] }
 0x5ec   : > { %v12308_v42 = vadd.f32 %v6401_v34, %v6199_v6  ;;  %v6561_v45 = vpack.c.bf16 %v6525_v17, %v6524_v9  ;;  %v6259_v34 = vld [vmem:[#allocation2 + $0x122] sm:$0xff] }
 0x5ee   : > { %v5875_v2 = vpop.f32.mrf.mxu2  ;;  %9099 = vmatmul.msk.bf16.gmra.mxu0 %vm337_vm8, %v6283_v14  ;;  %v6118_v13 = vpop.f32.mrf.mxu3  ;;  %v6258_v14 = vld [vmem:[#allocation2 + $0x11a] sm:$0xff] }
 0x5ef   : > { %v12306_v20 = vadd.f32 %v5875_v2, %v5643_v55  ;;  %v5589_v35 = vpop.f32.mrf.mxu1  ;;  %v6201_v39 = vadd.f32 %v6118_v13, %v12134_v22  ;;  %v6284_v13 = vpack.c.bf16 %v6259_v34, %v6258_v14 }
 0x5f0   : > { %v12311_v33 = vadd.f32 %v5589_v35, %v12103_v62 }
 0x5f3   : > { %v6403_v23 = vpop.f32.mrf.mxu0 }
 0x5f4   : > { %v12317_v4 = vadd.f32 %v6403_v23, %v6200_v19 }
 0x5f6   : > { %v12315_v46 = vpop.f32.mrf.mxu2  ;;  %v6120_v2 = vpop.f32.mrf.mxu3 }
 0x5f7   : > { %v5592_v55 = vpop.f32.mrf.mxu1  ;;  %v6202_v62 = vadd.f32 %v6120_v2, %v12141_v25  ;;  %v6526_v2 = vld [vmem:[#allocation2 + $0x7b] sm:$0xff] }
 0x5f8   : > { %v5645_v6 = vadd.f32 %v5592_v55, %v12116_v57 }
 0x5fa   : > { %9116 = vmatmul.msk.bf16.gmra.mxu1 %vm337_vm8, %v6561_v45 }
 0x5fb   : > { %9074 = vmatmul.msk.bf16.gmra.mxu3 %vm337_vm8, %v12166_v5  ;;  %v6406_v44 = vpop.f32.mrf.mxu0  ;;  %v6527_v5 = vld [vmem:[#allocation2 + $0x83] sm:$0xff] }
 0x5fc   : > { %v12326_v19 = vadd.f32 %v6406_v44, %v6201_v39  ;;  %v6562_v34 = vpack.c.bf16 %v6527_v5, %v6526_v2  ;;  %v6261_v44 = vld [vmem:[#allocation2 + $0x132] sm:$0xff] }
 0x5fe   : > { %v5880_v22 = vpop.f32.mrf.mxu2  ;;  %9100 = vmatmul.msk.bf16.gmra.mxu0 %vm337_vm8, %v6284_v13  ;;  %v6123_v25 = vpop.f32.mrf.mxu3  ;;  %v6260_v13 = vld [vmem:[#allocation2 + $0x12a] sm:$0xff] }
 0x5ff   : > { %v12324_v35 = vadd.f32 %v5880_v22, %v5645_v6  ;;  %v5594_v23 = vpop.f32.mrf.mxu1  ;;  %v6203_v17 = vadd.f32 %v6123_v25, %v12154_v10  ;;  %v6285_v25 = vpack.c.bf16 %v6261_v44, %v6260_v13 }
 0x600   : > { %v12329_v57 = vadd.f32 %v5594_v23, %v12123_v27 }
 0x603   : > { %v6408_v9 = vpop.f32.mrf.mxu0 }
 0x604   : > { %v12335_v45 = vadd.f32 %v6408_v9, %v6202_v62 }
 0x606   : > { %v12333_v55 = vpop.f32.mrf.mxu2  ;;  %v6125_v22 = vpop.f32.mrf.mxu3 }
 0x607   : > { %v5597_v6 = vpop.f32.mrf.mxu1  ;;  %v6204_v27 = vadd.f32 %v6125_v22, %v12161_v43  ;;  %v6528_v22 = vld [vmem:[#allocation2 + $0x8b] sm:$0xff] }
 0x608   : > { %v5647_v39 = vadd.f32 %v5597_v6, %v12136_v56 }
 0x60a   : > { %9117 = vmatmul.msk.bf16.gmra.mxu1 %vm337_vm8, %v6562_v34 }
 0x60b   : > { %9075 = vmatmul.msk.bf16.gmra.mxu3 %vm337_vm8, %v12185_v60  ;;  %v6411_v14 = vpop.f32.mrf.mxu0  ;;  %v6529_v60 = vld [vmem:[#allocation2 + $0x93] sm:$0xff] }
 0x60c   : > { %v12344_v62 = vadd.f32 %v6411_v14, %v6203_v17  ;;  %v6563_v44 = vpack.c.bf16 %v6529_v60, %v6528_v22  ;;  %v6531_v22 = vld [vmem:[#allocation2 + $0xa3] sm:$0xff] }
 0x60e   : > { %v5885_v10 = vpop.f32.mrf.mxu2  ;;  %9101 = vmatmul.msk.bf16.gmra.mxu0 %vm337_vm8, %v6285_v25  ;;  %v6128_v43 = vpop.f32.mrf.mxu3  ;;  %v6262_v25 = vld [vmem:[#allocation2 + $0x13a] sm:$0xff] }
 0x60f   : > { %v12342_v23 = vadd.f32 %v5885_v10, %v5647_v39  ;;  %v5599_v9 = vpop.f32.mrf.mxu1  ;;  %v6205_v5 = vadd.f32 %v6128_v43, %v12173_v3  ;;  %v6263_v10 = vld [vmem:[#allocation2 + $0x142] sm:$0xff] }
 0x610   : > { %v12347_v56 = vadd.f32 %v5599_v9, %v12143_v59  ;;  %v5918_v59 = vadd.f32 %v12182_v16, %v12178_v40  ;;  %v6286_v9 = vpack.c.bf16 %v6263_v10, %v6262_v25  ;;  %v13655_v10 = vld [vmem:[#allocation14_spill] sm:$0xff] }
 0x613   : > { %v6413_v2 = vpop.f32.mrf.mxu0 }
 0x614   : > { %v12353_v34 = vadd.f32 %v6413_v2, %v6204_v27  ;;  %v13652_v2 = vld [vmem:[#allocation38_spill] sm:$0xff] }
 0x616   : > { %v12351_v6 = vpop.f32.mrf.mxu2  ;;  %13651 = vst [vmem:[#allocation40_spill] sm:$0xff] %v12353_v34  ;;  %v6130_v14 = vpop.f32.mrf.mxu3  ;;  %v6264_v34 = vld [vmem:[#allocation2 + $0x14a] sm:$0xff] }
 0x617   : > { %v5602_v39 = vpop.f32.mrf.mxu1  ;;  %v6206_v13 = vadd.f32 %v6130_v14, %v5918_v59  ;;  %v6530_v59 = vld [vmem:[#allocation2 + $0x9b] sm:$0xff] }
 0x618   : > { %v5649_v17 = vadd.f32 %v5602_v39, %v12156_v36  ;;  %v5979_v14 = vld [vmem:[#allocation2 + $0x161] sm:$0xff]  ;;  %v6564_v25 = vpack.c.bf16 %v6531_v22, %v6530_v59 }
 0x61a   : > { %9118 = vmatmul.msk.bf16.gmra.mxu1 %vm337_vm8, %v6563_v44 }
 0x61b   : > { %9076 = vmatmul.msk.bf16.gmra.mxu3 %vm337_vm8, %v12207_v21  ;;  %v6416_v60 = vpop.f32.mrf.mxu0 }
 0x61c   : > { %v12367_v39 = vadd.f32 %v6416_v60, %v6205_v5  ;;  %v6265_v60 = vld [vmem:[#allocation2 + $0x152] sm:$0xff] }
 0x61e   : > { %v5890_v3 = vpop.f32.mrf.mxu2  ;;  %9102 = vmatmul.msk.bf16.gmra.mxu0 %vm337_vm8, %v6286_v9  ;;  %13653 = vst [vmem:[#allocation41_spill] sm:$0xff] %v12367_v39  ;;  %v6133_v40 = vpop.f32.mrf.mxu3 }
 0x61f   : > { %v12361_v27 = vadd.f32 %v5890_v3, %v5649_v17  ;;  %v5604_v43 = vpop.f32.mrf.mxu1  ;;  %v6207_v21 = vadd.f32 %v6133_v40, %v12193_v32  ;;  %v5978_v17 = vld [vmem:[#allocation2 + $0x159] sm:$0xff] }
 0x620   : > { %v12364_v36 = vadd.f32 %v5604_v43, %v13652_v2  ;;  %v6000_v5 = vpack.c.bf16 %v5979_v14, %v5978_v17  ;;  %v5920_v2 = vadd.f32 %v12202_v47, %v12198_v18  ;;  %v6533_v18 = vld [vmem:[#allocation2 + $0xb3] sm:$0xff] }
 0x623   : > { %v6418_v43 = vpop.f32.mrf.mxu0 }
 0x624   : > { %v12374_v9 = vadd.f32 %v6418_v43, %v6206_v13 }
 0x626   : > { %v12369_v16 = vpop.f32.mrf.mxu2  ;;  %v6135_v39 = vpop.f32.mrf.mxu3 }
 0x627   : > { %13654 = vst [vmem:[#allocation13_spill] sm:$0xff] %v12369_v16  ;;  %v5607_v44 = vpop.f32.mrf.mxu1  ;;  %v6208_v40 = vadd.f32 %v6135_v39, %v5920_v2  ;;  %v12388_v39 = vld [vmem:[%s13385_s5 + $0x2] ss:$0 sm:$0xff]  ;;  %v5922_v2 = vadd.f32 %v12224_v48, %v12220_v29  ;;  %v13657_v29 = vld [vmem:[#allocation15_spill] sm:$0xff] }
 0x628   : > { %v5651_v3 = vadd.f32 %v5607_v44, %v13655_v10  ;;  %v6287_v44 = vpack.c.bf16 %v6265_v60, %v6264_v34  ;;  %v12402_v60 = vstv %s8541_s19 }
 0x62a   : > { %9119 = vmatmul.msk.bf16.gmra.mxu1 %vm337_vm8, %v6564_v25 }
 0x62b   : > { %9077 = vmatmul.msk.bf16.gmra.mxu3 %vm337_vm8, %v6000_v5  ;;  %v6421_v59 = vpop.f32.mrf.mxu0 }
 0x62c   : > { %v12382_v13 = vadd.f32 %v6421_v59, %v6207_v21  ;;  %v12394_v21 = vld [vmem:[%s13385_s5 + $0x3] ss:$0 sm:$0xff] }
 0x62e   : > { %v5895_v32 = vpop.f32.mrf.mxu2  ;;  %9103 = vmatmul.msk.bf16.gmra.mxu0 %vm337_vm8, %v6287_v44  ;;  %v6138_v17 = vpop.f32.mrf.mxu3 }
 0x62f   : > { %v12379_v16 = vadd.f32 %v5895_v32, %v5651_v3  ;;  %v5609_v22 = vpop.f32.mrf.mxu1  ;;  %v6209_v47 = vadd.f32 %v6138_v17, %v12215_v15  ;;  %v6532_v3 = vld [vmem:[#allocation2 + $0xab] sm:$0xff]  ;;  %v6266_v32 = vld [vmem:[#allocation2 + $0x15a] sm:$0xff] }
 0x630   : > { %v6565_v25 = vpack.c.bf16 %v6533_v18, %v6532_v3 }
 0x633   : > { %v6423_v43 = vpop.f32.mrf.mxu0 }
 0x634   : > { %v12398_v15 = vadd.f32 %v6423_v43, %v6208_v40 }
 0x636   : > { %v5897_v14 = vpop.f32.mrf.mxu2  ;;  %v6140_v22 = vpop.f32.mrf.mxu3 }
 0x637   : > { %v6659_v10 = vpop.f32.mrf.mxu1  ;;  %v6210_v59 = vadd.f32 %v6140_v22, %v5922_v2  ;;  %v5980_v14 = vld [vmem:[#allocation2 + $0x169] sm:$0xf] }
 0x638   : > { %v6763_v34 = vadd.f32 %v6659_v10, %v12195_v30  ;;  %v6267_v30 = vld [vmem:[#allocation2 + $0x162] sm:$0xff]  ;;  %v6001_v3 = vpack.c.bf16 %v5980_v14, %v5980_v14 }
 0x639   : > { %v6288_v18 = vpack.c.bf16 %v6267_v30, %v6266_v32  ;;  %v6535_v22 = vld [vmem:[#allocation2 + $0xc3] sm:$0xff] }
 0x63a   : > { %v6809_v5 = vmul.f32 %v12388_v39, %v6763_v34  ;;  %9120 = vmatmul.msk.bf16.gmra.mxu1 %vm337_vm8, %v6565_v25  ;;  %v13656_v34 = vld [vmem:[#allocation39_spill] sm:$0xff] }
 0x63b   : > { %v6426_v43 = vpop.f32.mrf.mxu0  ;;  %9078 = vmatmul.msk.bf16.gmra.mxu3 %vm337_vm8, %v6001_v3 }
 0x63c   : > { %v6855_v44 = vadd.f32 %v12394_v21, %v6809_v5  ;;  %v12411_v2 = vadd.f32 %v6426_v43, %v6209_v47 }
 0x63e   : > { %vm6896_vm9 = vcmp.ge.f32.partialorder %v6855_v44, 0.0  ;;  %v6938_v17 = vmul.f32 %v12402_v60, %v6855_v44  ;;  %9104 = vmatmul.msk.bf16.gmra.mxu0 %vm337_vm8, %v6288_v18  ;;  %v6143_v30 = vpop.f32.mrf.mxu3  ;;  %v6534_v18 = vld [vmem:[#allocation2 + $0xbb] sm:$0xff] }
 0x63f   : > { %v6661_v10 = vpop.f32.mrf.mxu1 }
 0x640   : > { %v6979_v40 = vsel %vm6896_vm9, %v6855_v44, %v6938_v17  ;;  %v6764_v25 = vadd.f32 %v6661_v10, %v13656_v34  ;;  %v6211_v44 = vadd.f32 %v6143_v30, %v12234_v0  ;;  %v13658_v34 = vld [vmem:[#allocation42_spill] sm:$0xff]  ;;  %v5924_v0 = vadd.f32 %v12243_v61, %v12239_v11 }
 0x641   : > { %v7020_v48 = vmul.f32 %v6979_v40, %v13657_v29  ;;  %v6566_v40 = vpack.c.bf16 %v6535_v22, %v6534_v18 }
 0x642   : > { %v6810_v5 = vmul.f32 %v12388_v39, %v6764_v25 }
 0x643   : > { %7061 = vst.msk [vmem:[#allocation3 + $0x18] sm:$0xff] %vm337_vm8, %v7020_v48  ;;  %v6428_v25 = vpop.f32.mrf.mxu0 }
 0x644   : > { %v6856_v32 = vadd.f32 %v12394_v21, %v6810_v5  ;;  %v12421_v48 = vadd.f32 %v6428_v25, %v6210_v59 }
 0x646   : > { %vm6897_vm10 = vcmp.ge.f32.partialorder %v6856_v32, 0.0  ;;  %v6939_v17 = vmul.f32 %v12402_v60, %v6856_v32  ;;  %v6145_v5 = vpop.f32.mrf.mxu3 }
 0x647   : > { %v6664_v14 = vpop.f32.mrf.mxu1 }
 0x648   : > { %v6980_v10 = vsel %vm6897_vm10, %v6856_v32, %v6939_v17  ;;  %v6765_v3 = vadd.f32 %v6664_v14, %v12217_v41  ;;  %v6212_v32 = vadd.f32 %v6145_v5, %v5924_v0  ;;  %v13659_v14 = vld [vmem:[#allocation16_spill] sm:$0xff] }
 0x649   : > { %v7021_v47 = vmul.f32 %v6980_v10, %v13658_v34  ;;  %v6268_v10 = vld [vmem:[#allocation2 + $0x16a] sm:$0xf] }
 0x64a   : > { %v6811_v29 = vmul.f32 %v12388_v39, %v6765_v3  ;;  %9121 = vmatmul.msk.bf16.gmra.mxu1 %vm337_vm8, %v6566_v40  ;;  %v7102_v11 = vld [vmem:[#allocation3 + $0x18] sm:$0xff]  ;;  %v6289_v34 = vpack.c.bf16 %v6268_v10, %v6268_v10 }
 0x64b   : > { %7062 = vst.msk [vmem:[#allocation3 + $0x20] sm:$0xff] %vm337_vm8, %v7021_v47  ;;  %v6431_v59 = vpop.f32.mrf.mxu0 }
 0x64c   : > { %v6857_v43 = vadd.f32 %v12394_v21, %v6811_v29  ;;  %v12431_v40 = vadd.f32 %v6431_v59, %v6211_v44  ;;  %v6536_v44 = vld [vmem:[#allocation2 + $0xcb] sm:$0xff] }
 0x64e   : > { %vm6898_vm11 = vcmp.ge.f32.partialorder %v6857_v43, 0.0  ;;  %v6940_v41 = vmul.f32 %v12402_v60, %v6857_v43  ;;  %9105 = vmatmul.msk.bf16.gmra.mxu0 %vm337_vm8, %v6289_v34  ;;  %v6148_v29 = vpop.f32.mrf.mxu3 }
 0x64f   : > { %v6666_v30 = vpop.f32.mrf.mxu1  ;;  %v6213_v0 = vadd.f32 %v6148_v29, %v12252_v58  ;;  %v5926_v58 = vadd.f32 %v12261_v54, %v12257_v26  ;;  %v13661_v29 = vld [vmem:[#allocation17_spill] sm:$0xff] }
 0x650   : > { %v6981_v22 = vsel %vm6898_vm11, %v6857_v43, %v6940_v41  ;;  %v6766_v17 = vadd.f32 %v6666_v30, %v12226_v63  ;;  %v6537_v63 = vld [vmem:[#allocation2 + $0xd3] sm:$0xff] }
 0x651   : > { %v7022_v18 = vmul.f32 %v6981_v22, %v13659_v14  ;;  %v6567_v22 = vpack.c.bf16 %v6537_v63, %v6536_v44 }
 0x652   : > { %v6812_v3 = vmul.f32 %v12388_v39, %v6766_v17  ;;  %v7103_v61 = vld [vmem:[#allocation3 + $0x20] sm:$0xff]  ;;  %v13660_v17 = vld [vmem:[#allocation19_spill] sm:$0xff] }
 0x653   : > { %7063 = vst.msk [vmem:[#allocation3 + $0x28] sm:$0xff] %vm337_vm8, %v7022_v18  ;;  %v7143_v47 = vpack.c.bf16 %v7103_v61, %v7102_v11  ;;  %v6433_v18 = vpop.f32.mrf.mxu0 }
 0x654   : > { %v6858_v25 = vadd.f32 %v12394_v21, %v6812_v3  ;;  %v12443_v10 = vadd.f32 %v6433_v18, %v6212_v32  ;;  %v6538_v18 = vld [vmem:[#allocation2 + $0xdb] sm:$0xff] }
 0x655   : > { %9139 = vmatmul.msk.bf16.vlgmr.msra.gmra.mxu2 %vm337_vm8, %v7143_v47 }
 0x656   : > { %vm6899_vm12 = vcmp.ge.f32.partialorder %v6858_v25, 0.0  ;;  %v6941_v43 = vmul.f32 %v12402_v60, %v6858_v25  ;;  %v6150_v11 = vpop.f32.mrf.mxu3 }
 0x657   : > { %v6669_v5 = vpop.f32.mrf.mxu1  ;;  %v6214_v61 = vadd.f32 %v6150_v11, %v5926_v58 }
 0x658   : > { %v6982_v41 = vsel %vm6899_vm12, %v6858_v25, %v6941_v43  ;;  %v6767_v30 = vadd.f32 %v6669_v5, %v12236_v12 }
 0x659   : > { %v7023_v14 = vmul.f32 %v6982_v41, %v13660_v17 }
 0x65a   : > { %v6813_v59 = vmul.f32 %v12388_v39, %v6767_v30  ;;  %9122 = vmatmul.msk.bf16.gmra.mxu1 %vm337_vm8, %v6567_v22  ;;  %v7104_v5 = vld [vmem:[#allocation3 + $0x28] sm:$0xff] }
 0x65b   : > { %7064 = vst.msk [vmem:[#allocation3 + $0x30] sm:$0xff] %vm337_vm8, %v7023_v14  ;;  %v6436_v32 = vpop.f32.mrf.mxu0  ;;  %v6539_v22 = vld [vmem:[#allocation2 + $0xe3] sm:$0xff] }
 0x65c   : > { %v6859_v3 = vadd.f32 %v12394_v21, %v6813_v59  ;;  %v12453_v54 = vadd.f32 %v6436_v32, %v6213_v0  ;;  %v6568_v58 = vpack.c.bf16 %v6539_v22, %v6538_v18  ;;  %v6541_v18 = vld [vmem:[#allocation2 + $0xf3] sm:$0xff] }
 0x65e   : > { %vm6900_vm13 = vcmp.ge.f32.partialorder %v6859_v3, 0.0  ;;  %v6942_v12 = vmul.f32 %v12402_v60, %v6859_v3  ;;  %v6153_v30 = vpop.f32.mrf.mxu3 }
 0x65f   : > { %v6671_v34 = vpop.f32.mrf.mxu1 }
 0x660   : > { %v6983_v47 = vsel %vm6900_vm13, %v6859_v3, %v6942_v12  ;;  %v6768_v25 = vadd.f32 %v6671_v34, %v12245_v31  ;;  %v6215_v31 = vadd.f32 %v6153_v30, %v12270_v49  ;;  %v13662_v3 = vld [vmem:[#allocation43_spill] sm:$0xff]  ;;  %v5928_v49 = vadd.f32 %v12279_v37, %v12275_v8 }
 0x661   : > { %v7024_v63 = vmul.f32 %v6983_v47, %v13661_v29 }
 0x662   : > { %v6814_v43 = vmul.f32 %v12388_v39, %v6768_v25  ;;  %v7105_v26 = vld [vmem:[#allocation3 + $0x30] sm:$0xff] }
 0x663   : > { %7065 = vst.msk [vmem:[#allocation3 + $0x38] sm:$0xff] %vm337_vm8, %v7024_v63  ;;  %v7144_v44 = vpack.c.bf16 %v7105_v26, %v7104_v5  ;;  %v6438_v12 = vpop.f32.mrf.mxu0  ;;  %v13663_v26 = vld [vmem:[#allocation44_spill] sm:$0xff] }
 0x664   : > { %v6860_v41 = vadd.f32 %v12394_v21, %v6814_v43  ;;  %v12464_v47 = vadd.f32 %v6438_v12, %v6214_v61  ;;  %v13664_v12 = vld [vmem:[#allocation18_spill] sm:$0xff] }
 0x665   : > { %9140 = vmatmul.msk.bf16.gmra.mxu2 %vm337_vm8, %v7144_v44 }
 0x666   : > { %vm6901_vm14 = vcmp.ge.f32.partialorder %v6860_v41, 0.0  ;;  %v6943_v17 = vmul.f32 %v12402_v60, %v6860_v41  ;;  %v6155_v29 = vpop.f32.mrf.mxu3 }
 0x667   : > { %v6674_v14 = vpop.f32.mrf.mxu1  ;;  %v6216_v63 = vadd.f32 %v6155_v29, %v5928_v49 }
 0x668   : > { %v6984_v59 = vsel %vm6901_vm14, %v6860_v41, %v6943_v17  ;;  %v6769_v0 = vadd.f32 %v6674_v14, %v12254_v38 }
 0x669   : > { %v7025_v11 = vmul.f32 %v6984_v59, %v13662_v3 }
 0x66a   : > { %v6815_v34 = vmul.f32 %v12388_v39, %v6769_v0  ;;  %9123 = vmatmul.msk.bf16.gmra.mxu1 %vm337_vm8, %v6568_v58  ;;  %v7106_v30 = vld [vmem:[#allocation3 + $0x38] sm:$0xff] }
 0x66b   : > { %7066 = vst.msk [vmem:[#allocation3 + $0x40] sm:$0xff] %vm337_vm8, %v7025_v11  ;;  %v6441_v61 = vpop.f32.mrf.mxu0  ;;  %v6540_v58 = vld [vmem:[#allocation2 + $0xeb] sm:$0xff] }
 0x66c   : > { %v6861_v25 = vadd.f32 %v12394_v21, %v6815_v34  ;;  %v12474_v37 = vadd.f32 %v6441_v61, %v6215_v31  ;;  %v6569_v11 = vpack.c.bf16 %v6541_v18, %v6540_v58  ;;  %v13665_v61 = vld [vmem:[#allocation20_spill] sm:$0xff]  ;;  %v6543_v18 = vld [vmem:[#allocation2 + $0x103] sm:$0xff] }
 0x66d   : > { %v6542_v58 = vld [vmem:[#allocation2 + $0xfb] sm:$0xff] }
 0x66e   : > { %vm6902_vm15 = vcmp.ge.f32.partialorder %v6861_v25, 0.0  ;;  %v6944_v38 = vmul.f32 %v12402_v60, %v6861_v25  ;;  %v6158_v14 = vpop.f32.mrf.mxu3 }
 0x66f   : > { %v6676_v32 = vpop.f32.mrf.mxu1 }
 0x670   : > { %v6985_v43 = vsel %vm6902_vm15, %v6861_v25, %v6944_v38  ;;  %v6770_v5 = vadd.f32 %v6676_v32, %v12263_v51  ;;  %v6217_v51 = vadd.f32 %v6158_v14, %v12288_v50  ;;  %v5930_v50 = vadd.f32 %v12297_v24, %v12293_v53 }
 0x671   : > { %v7026_v44 = vmul.f32 %v6985_v43, %v13663_v26 }
 0x672   : > { %v6816_v41 = vmul.f32 %v12388_v39, %v6770_v5  ;;  %v7107_v8 = vld [vmem:[#allocation3 + $0x40] sm:$0xff] }
 0x673   : > { %7067 = vst.msk [vmem:[#allocation3 + $0x48] sm:$0xff] %vm337_vm8, %v7026_v44  ;;  %v7145_v22 = vpack.c.bf16 %v7107_v8, %v7106_v30  ;;  %v6443_v49 = vpop.f32.mrf.mxu0 }
 0x674   : > { %v6862_v17 = vadd.f32 %v12394_v21, %v6816_v41  ;;  %v12485_v29 = vadd.f32 %v6443_v49, %v6216_v63 }
 0x675   : > { %9141 = vmatmul.msk.bf16.gmra.mxu2 %vm337_vm8, %v7145_v22 }
 0x676   : > { %vm6903_vm0 = vcmp.ge.f32.partialorder %v6862_v17, 0.0  ;;  %v6945_v59 = vmul.f32 %v12402_v60, %v6862_v17  ;;  %v6160_v32 = vpop.f32.mrf.mxu3 }
 0x677   : > { %v6679_v0 = vpop.f32.mrf.mxu1  ;;  %v6218_v43 = vadd.f32 %v6160_v32, %v5930_v50 }
 0x678   : > { %v6986_v3 = vsel %vm6903_vm0, %v6862_v17, %v6945_v59  ;;  %v6771_v31 = vadd.f32 %v6679_v0, %v12272_v52 }
 0x679   : > { %v7027_v34 = vmul.f32 %v6986_v3, %v13664_v12 }
 0x67a   : > { %v6817_v25 = vmul.f32 %v12388_v39, %v6771_v31  ;;  %9124 = vmatmul.msk.bf16.gmra.mxu1 %vm337_vm8, %v6569_v11  ;;  %v7108_v8 = vld [vmem:[#allocation3 + $0x48] sm:$0xff]  ;;  %v6570_v31 = vpack.c.bf16 %v6543_v18, %v6542_v58  ;;  %v6544_v18 = vld [vmem:[#allocation2 + $0x10b] sm:$0xff]  ;;  %v13668_v58 = vld [vmem:[#allocation24_spill] sm:$0xff] }
 0x67b   : > { %7068 = vst.msk [vmem:[#allocation3 + $0x50] sm:$0xff] %vm337_vm8, %v7027_v34  ;;  %v6446_v63 = vpop.f32.mrf.mxu0  ;;  %v13666_v11 = vld [vmem:[#allocation21_spill] sm:$0xff] }
 0x67c   : > { %v6863_v38 = vadd.f32 %v12394_v21, %v6817_v25  ;;  %v12495_v24 = vadd.f32 %v6446_v63, %v6217_v51 }
 0x67e   : > { %vm6904_vm6 = vcmp.ge.f32.partialorder %v6863_v38, 0.0  ;;  %v6946_v52 = vmul.f32 %v12402_v60, %v6863_v38  ;;  %v6163_v14 = vpop.f32.mrf.mxu3 }
 0x67f   : > { %v6681_v5 = vpop.f32.mrf.mxu1 }
 0x680   : > { %v6987_v26 = vsel %vm6904_vm6, %v6863_v38, %v6946_v52  ;;  %v6772_v44 = vadd.f32 %v6681_v5, %v12281_v28  ;;  %v6219_v28 = vadd.f32 %v6163_v14, %v12306_v20  ;;  %v5932_v20 = vadd.f32 %v12315_v46, %v12311_v33 }
 0x681   : > { %v7028_v41 = vmul.f32 %v6987_v26, %v13665_v61 }
 0x682   : > { %v6818_v30 = vmul.f32 %v12388_v39, %v6772_v44  ;;  %v7109_v53 = vld [vmem:[#allocation3 + $0x50] sm:$0xff] }
 0x683   : > { %7069 = vst.msk [vmem:[#allocation3 + $0x58] sm:$0xff] %vm337_vm8, %v7028_v41  ;;  %v7146_v22 = vpack.c.bf16 %v7109_v53, %v7108_v8  ;;  %v6448_v34 = vpop.f32.mrf.mxu0  ;;  %v13667_v44 = vld [vmem:[#allocation22_spill] sm:$0xff] }
 0x684   : > { %v6864_v17 = vadd.f32 %v12394_v21, %v6818_v30  ;;  %v12506_v25 = vadd.f32 %v6448_v34, %v6218_v43 }
 0x685   : > { %9142 = vmatmul.msk.bf16.gmra.mxu2 %vm337_vm8, %v7146_v22  ;;  %v6545_v22 = vld [vmem:[#allocation2 + $0x113] sm:$0xff] }
 0x686   : > { %vm6905_vm1 = vcmp.ge.f32.partialorder %v6864_v17, 0.0  ;;  %v6947_v59 = vmul.f32 %v12402_v60, %v6864_v17  ;;  %v6165_v38 = vpop.f32.mrf.mxu3 }
 0x687   : > { %v6684_v0 = vpop.f32.mrf.mxu1  ;;  %v6220_v32 = vadd.f32 %v6165_v38, %v5932_v20 }
 0x688   : > { %v6988_v3 = vsel %vm6905_vm1, %v6864_v17, %v6947_v59  ;;  %v6773_v51 = vadd.f32 %v6684_v0, %v12290_v1  ;;  %v6571_v0 = vpack.c.bf16 %v6545_v22, %v6544_v18 }
 0x689   : > { %v7029_v12 = vmul.f32 %v6988_v3, %v13666_v11 }
 0x68a   : > { %v6819_v49 = vmul.f32 %v12388_v39, %v6773_v51  ;;  %9125 = vmatmul.msk.bf16.gmra.mxu1 %vm337_vm8, %v6570_v31  ;;  %v7110_v63 = vld [vmem:[#allocation3 + $0x58] sm:$0xff] }
 0x68b   : > { %7070 = vst.msk [vmem:[#allocation3 + $0x60] sm:$0xff] %vm337_vm8, %v7029_v12  ;;  %v6451_v43 = vpop.f32.mrf.mxu0 }
 0x68c   : > { %v6865_v50 = vadd.f32 %v12394_v21, %v6819_v49  ;;  %v12516_v46 = vadd.f32 %v6451_v43, %v6219_v28 }
 0x68e   : > { %vm6906_vm3 = vcmp.ge.f32.partialorder %v6865_v50, 0.0  ;;  %v6948_v1 = vmul.f32 %v12402_v60, %v6865_v50  ;;  %v6168_v53 = vpop.f32.mrf.mxu3 }
 0x68f   : > { %v6686_v52 = vpop.f32.mrf.mxu1 }
 0x690   : > { %v6989_v5 = vsel %vm6906_vm3, %v6865_v50, %v6948_v1  ;;  %v6774_v26 = vadd.f32 %v6686_v52, %v12299_v7  ;;  %v6221_v7 = vadd.f32 %v6168_v53, %v12324_v35  ;;  %v5934_v35 = vadd.f32 %v12333_v55, %v12329_v57  ;;  %v13669_v1 = vld [vmem:[#allocation25_spill] sm:$0xff] }
 0x691   : > { %v7030_v61 = vmul.f32 %v6989_v5, %v13667_v44 }
 0x692   : > { %v6820_v41 = vmul.f32 %v12388_v39, %v6774_v26  ;;  %v7111_v33 = vld [vmem:[#allocation3 + $0x60] sm:$0xff] }
 0x693   : > { %7071 = vst.msk [vmem:[#allocation3 + $0x68] sm:$0xff] %vm337_vm8, %v7030_v61  ;;  %v7147_v30 = vpack.c.bf16 %v7111_v33, %v7110_v63  ;;  %v6453_v51 = vpop.f32.mrf.mxu0 }
 0x694   : > { %v6866_v8 = vadd.f32 %v12394_v21, %v6820_v41  ;;  %v12527_v11 = vadd.f32 %v6453_v51, %v6220_v32  ;;  %v6547_v41 = vld [vmem:[#allocation2 + $0x123] sm:$0xff] }
 0x695   : > { %9143 = vmatmul.msk.bf16.gmra.mxu2 %vm337_vm8, %v7147_v30  ;;  %v6546_v30 = vld [vmem:[#allocation2 + $0x11b] sm:$0xff] }
 0x696   : > { %vm6907_vm7 = vcmp.ge.f32.partialorder %v6866_v8, 0.0  ;;  %v6949_v17 = vmul.f32 %v12402_v60, %v6866_v8  ;;  %v6170_v34 = vpop.f32.mrf.mxu3  ;;  %v6572_v22 = vpack.c.bf16 %v6547_v41, %v6546_v30 }
 0x697   : > { %v6689_v14 = vpop.f32.mrf.mxu1  ;;  %v6222_v49 = vadd.f32 %v6170_v34, %v5934_v35  ;;  %v13671_v35 = vld [vmem:[#allocation26_spill] sm:$0xff] }
 0x698   : > { %v6990_v59 = vsel %vm6907_vm7, %v6866_v8, %v6949_v17  ;;  %v6775_v28 = vadd.f32 %v6689_v14, %v12308_v42 }
 0x699   : > { %v7031_v3 = vmul.f32 %v6990_v59, %v13668_v58 }
 0x69a   : > { %v6821_v31 = vmul.f32 %v12388_v39, %v6775_v28  ;;  %9126 = vmatmul.msk.bf16.gmra.mxu1 %vm337_vm8, %v6571_v0  ;;  %v7112_v26 = vld [vmem:[#allocation3 + $0x68] sm:$0xff] }
 0x69b   : > { %7072 = vst.msk [vmem:[#allocation3 + $0x70] sm:$0xff] %vm337_vm8, %v7031_v3  ;;  %v6456_v32 = vpop.f32.mrf.mxu0 }
 0x69c   : > { %v6867_v12 = vadd.f32 %v12394_v21, %v6821_v31  ;;  %v12537_v55 = vadd.f32 %v6456_v32, %v6221_v7  ;;  %v13670_v7 = vld [vmem:[#allocation23_spill] sm:$0xff] }
 0x69e   : > { %vm6908_vm2 = vcmp.ge.f32.partialorder %v6867_v12, 0.0  ;;  %v6950_v42 = vmul.f32 %v12402_v60, %v6867_v12  ;;  %v6173_v43 = vpop.f32.mrf.mxu3 }
 0x69f   : > { %v6691_v20 = vpop.f32.mrf.mxu1 }
 0x6a0   : > { %v6991_v50 = vsel %vm6908_vm2, %v6867_v12, %v6950_v42  ;;  %v6776_v38 = vadd.f32 %v6691_v20, %v12317_v4  ;;  %v6223_v4 = vadd.f32 %v6173_v43, %v12342_v23  ;;  %v5936_v23 = vadd.f32 %v12351_v6, %v12347_v56 }
 0x6a1   : > { %v7032_v52 = vmul.f32 %v6991_v50, %v13669_v1  ;;  %v6549_v1 = vld [vmem:[#allocation2 + $0x133] sm:$0xff] }
 0x6a2   : > { %v6822_v5 = vmul.f32 %v12388_v39, %v6776_v38  ;;  %v7113_v57 = vld [vmem:[#allocation3 + $0x70] sm:$0xff] }
 0x6a3   : > { %7073 = vst.msk [vmem:[#allocation3 + $0x78] sm:$0xff] %vm337_vm8, %v7032_v52  ;;  %v7148_v44 = vpack.c.bf16 %v7113_v57, %v7112_v26  ;;  %v6458_v14 = vpop.f32.mrf.mxu0 }
 0x6a4   : > { %v6868_v61 = vadd.f32 %v12394_v21, %v6822_v5  ;;  %v12548_v59 = vadd.f32 %v6458_v14, %v6222_v49  ;;  %v6548_v5 = vld [vmem:[#allocation2 + $0x12b] sm:$0xff] }
 0x6a5   : > { %9144 = vmatmul.msk.bf16.gmra.mxu2 %vm337_vm8, %v7148_v44  ;;  %v6573_v44 = vpack.c.bf16 %v6549_v1, %v6548_v5  ;;  %v13677_v1 = vld [vmem:[#allocation45_spill] sm:$0xff] }
 0x6a6   : > { %vm6909_vm5 = vcmp.ge.f32.partialorder %v6868_v61, 0.0  ;;  %v6951_v63 = vmul.f32 %v12402_v60, %v6868_v61  ;;  %v6175_v0 = vpop.f32.mrf.mxu3 }
 0x6a7   : > { %v6694_v33 = vpop.f32.mrf.mxu1  ;;  %v6224_v58 = vadd.f32 %v6175_v0, %v5936_v23 }
 0x6a8   : > { %v6992_v8 = vsel %vm6909_vm5, %v6868_v61, %v6951_v63  ;;  %v6777_v53 = vadd.f32 %v6694_v33, %v12326_v19  ;;  %v13672_v61 = vld [vmem:[#allocation27_spill] sm:$0xff] }
 0x6a9   : > { %v7033_v17 = vmul.f32 %v6992_v8, %v13670_v7 }
 0x6aa   : > { %v6823_v18 = vmul.f32 %v12388_v39, %v6777_v53  ;;  %9127 = vmatmul.msk.bf16.gmra.mxu1 %vm337_vm8, %v6572_v22  ;;  %v7114_v42 = vld [vmem:[#allocation3 + $0x78] sm:$0xff] }
 0x6ab   : > { %7074 = vst.msk [vmem:[#allocation3 + $0x80] sm:$0xff] %vm337_vm8, %v7033_v17  ;;  %v6461_v34 = vpop.f32.mrf.mxu0  ;;  %v13674_v17 = vld [vmem:[#allocation40_spill] sm:$0xff] }
 0x6ac   : > { %v6869_v28 = vadd.f32 %v12394_v21, %v6823_v18  ;;  %v12558_v6 = vadd.f32 %v6461_v34, %v6223_v4  ;;  %v13675_v18 = vld [vmem:[#allocation28_spill] sm:$0xff] }
 0x6ae   : > { %vm6910_vm9 = vcmp.ge.f32.partialorder %v6869_v28, 0.0  ;;  %v6952_v19 = vmul.f32 %v12402_v60, %v6869_v28  ;;  %v6178_v38 = vpop.f32.mrf.mxu3 }
 0x6af   : > { %v6696_v3 = vpop.f32.mrf.mxu1 }
 0x6b0   : > { %v6993_v51 = vsel %vm6910_vm9, %v6869_v28, %v6952_v19  ;;  %v6778_v31 = vadd.f32 %v6696_v3, %v12335_v45  ;;  %v6225_v45 = vadd.f32 %v6178_v38, %v12361_v27  ;;  %v13673_v27 = vld [vmem:[#allocation13_spill] sm:$0xff] }
 0x6b1   : > { %v7034_v12 = vmul.f32 %v6993_v51, %v13671_v35  ;;  %v5938_v33 = vadd.f32 %v13673_v27, %v12364_v36  ;;  %v6551_v35 = vld [vmem:[#allocation2 + $0x143] sm:$0xff] }
 0x6b2   : > { %v6824_v49 = vmul.f32 %v12388_v39, %v6778_v31  ;;  %v7115_v56 = vld [vmem:[#allocation3 + $0x80] sm:$0xff] }
 0x6b3   : > { %7075 = vst.msk [vmem:[#allocation3 + $0x88] sm:$0xff] %vm337_vm8, %v7034_v12  ;;  %v7149_v20 = vpack.c.bf16 %v7115_v56, %v7114_v42  ;;  %v6463_v41 = vpop.f32.mrf.mxu0  ;;  %v6550_v42 = vld [vmem:[#allocation2 + $0x13b] sm:$0xff] }
 0x6b4   : > { %v6870_v50 = vadd.f32 %v12394_v21, %v6824_v49  ;;  %v12569_v63 = vadd.f32 %v6463_v41, %v6224_v58  ;;  %v6574_v38 = vpack.c.bf16 %v6551_v35, %v6550_v42  ;;  %v13678_v41 = vld [vmem:[#allocation46_spill] sm:$0xff] }
 0x6b5   : > { %9145 = vmatmul.msk.bf16.gmra.mxu2 %vm337_vm8, %v7149_v20  ;;  %v13676_v20 = vld [vmem:[#allocation41_spill] sm:$0xff] }
 0x6b6   : > { %vm6911_vm10 = vcmp.ge.f32.partialorder %v6870_v50, 0.0  ;;  %v6953_v52 = vmul.f32 %v12402_v60, %v6870_v50  ;;  %v6180_v8 = vpop.f32.mrf.mxu3 }
 0x6b7   : > { %v6699_v32 = vpop.f32.mrf.mxu1  ;;  %v6226_v53 = vadd.f32 %v6180_v8, %v5938_v33 }
 0x6b8   : > { %v6994_v26 = vsel %vm6911_vm10, %v6870_v50, %v6953_v52  ;;  %v6779_v57 = vadd.f32 %v6699_v32, %v12344_v62 }
 0x6b9   : > { %v7035_v43 = vmul.f32 %v6994_v26, %v13672_v61 }
 0x6ba   : > { %v6825_v4 = vmul.f32 %v12388_v39, %v6779_v57  ;;  %9128 = vmatmul.msk.bf16.gmra.mxu1 %vm337_vm8, %v6573_v44  ;;  %v7116_v58 = vld [vmem:[#allocation3 + $0x88] sm:$0xff] }
 0x6bb   : > { %7076 = vst.msk [vmem:[#allocation3 + $0x90] sm:$0xff] %vm337_vm8, %v7035_v43  ;;  %v6466_v28 = vpop.f32.mrf.mxu0 }
 0x6bc   : > { %v6871_v30 = vadd.f32 %v12394_v21, %v6825_v4  ;;  %v12579_v19 = vadd.f32 %v6466_v28, %v6225_v45 }
 0x6be   : > { %vm6912_vm11 = vcmp.ge.f32.partialorder %v6871_v30, 0.0  ;;  %v6954_v62 = vmul.f32 %v12402_v60, %v6871_v30  ;;  %v6183_v31 = vpop.f32.mrf.mxu3 }
 0x6bf   : > { %v6701_v22 = vpop.f32.mrf.mxu1  ;;  %v6227_v12 = vadd.f32 %v6183_v31, %v12379_v16 }
 0x6c0   : > { %v6995_v7 = vsel %vm6912_vm11, %v6871_v30, %v6954_v62  ;;  %v6780_v14 = vadd.f32 %v6701_v22, %v13674_v17 }
 0x6c1   : > { %v7036_v23 = vmul.f32 %v6995_v7, %v13675_v18  ;;  %v6553_v7 = vld [vmem:[#allocation2 + $0x153] sm:$0xff]  ;;  %v6552_v18 = vld [vmem:[#allocation2 + $0x14b] sm:$0xff] }
 0x6c2   : > { %v6826_v0 = vmul.f32 %v12388_v39, %v6780_v14  ;;  %v7117_v36 = vld [vmem:[#allocation3 + $0x90] sm:$0xff] }
 0x6c3   : > { %7077 = vst.msk [vmem:[#allocation3 + $0x98] sm:$0xff] %vm337_vm8, %v7036_v23  ;;  %v7150_v3 = vpack.c.bf16 %v7117_v36, %v7116_v58  ;;  %v6468_v52 = vpop.f32.mrf.mxu0  ;;  %v12612_v23 = vld [vmem:[%s13385_s5 + $0x5] ss:$0 sm:$0xff]  ;;  %v6575_v36 = vpack.c.bf16 %v6553_v7, %v6552_v18 }
 0x6c4   : > { %v6872_v51 = vadd.f32 %v12394_v21, %v6826_v0  ;;  %v12590_v5 = vadd.f32 %v6468_v52, %v6226_v53 }
 0x6c5   : > { %9146 = vmatmul.msk.bf16.gmra.mxu2 %vm337_vm8, %v7150_v3  ;;  %v13679_v3 = vld [vmem:[#allocation30_spill] sm:$0xff] }
 0x6c6   : > { %vm6913_vm12 = vcmp.ge.f32.partialorder %v6872_v51, 0.0  ;;  %v6955_v34 = vmul.f32 %v12402_v60, %v6872_v51  ;;  %v6185_v26 = vpop.f32.mrf.mxu3 }
 0x6c7   : > { %v6704_v49 = vpop.f32.mrf.mxu1 }
 0x6c8   : > { %v6996_v56 = vsel %vm6913_vm12, %v6872_v51, %v6955_v34  ;;  %v6781_v50 = vadd.f32 %v6704_v49, %v13676_v20 }
 0x6c9   : > { %v7037_v45 = vmul.f32 %v6996_v56, %v13677_v1  ;;  %v13680_v1 = vld [vmem:[#allocation29_spill] sm:$0xff] }
 0x6ca   : > { %v6827_v32 = vmul.f32 %v12388_v39, %v6781_v50  ;;  %9129 = vmatmul.msk.bf16.gmra.mxu1 %vm337_vm8, %v6574_v38  ;;  %v7118_v30 = vld [vmem:[#allocation3 + $0x98] sm:$0xff] }
 0x6cb   : > { %7078 = vst.msk [vmem:[#allocation3 + $0xa0] sm:$0xff] %vm337_vm8, %v7037_v45  ;;  %v6471_v27 = vpop.f32.mrf.mxu0 }
 0x6cc   : > { %v6873_v16 = vadd.f32 %v12394_v21, %v6827_v32  ;;  %v12598_v53 = vadd.f32 %v6471_v27, %v6227_v12 }
 0x6ce   : > { %vm6914_vm13 = vcmp.ge.f32.partialorder %v6873_v16, 0.0  ;;  %v6956_v57 = vmul.f32 %v12402_v60, %v6873_v16 }
 0x6cf   : > { %v6706_v44 = vpop.f32.mrf.mxu1 }
 0x6d0   : > { %v6997_v61 = vsel %vm6914_vm13, %v6873_v16, %v6956_v57  ;;  %v6782_v43 = vadd.f32 %v6706_v44, %v12374_v9  ;;  %v12606_v9 = vld [vmem:[%s13385_s5 + $0x4] ss:$0 sm:$0xff] }
 0x6d1   : > { %v7038_v4 = vmul.f32 %v6997_v61, %v13678_v41  ;;  %v6555_v41 = vld [vmem:[#allocation2 + $0x163] sm:$0xff] }
 0x6d2   : > { %v6828_v33 = vmul.f32 %v12388_v39, %v6782_v43  ;;  %v7119_v8 = vld [vmem:[#allocation3 + $0xa0] sm:$0xff] }
 0x6d3   : > { %7079 = vst.msk [vmem:[#allocation3 + $0xa8] sm:$0xff] %vm337_vm8, %v7038_v4  ;;  %v7151_v62 = vpack.c.bf16 %v7119_v8, %v7118_v30  ;;  %v6473_v35 = vpop.f32.mrf.mxu0  ;;  %v6554_v43 = vld [vmem:[#allocation2 + $0x15b] sm:$0xff] }
 0x6d4   : > { %v6874_v22 = vadd.f32 %v12394_v21, %v6828_v33 }
 0x6d5   : > { %9147 = vmatmul.msk.bf16.gmra.mxu2 %vm337_vm8, %v7151_v62  ;;  %v6576_v62 = vpack.c.bf16 %v6555_v41, %v6554_v43 }
 0x6d6   : > { %vm6915_vm14 = vcmp.ge.f32.partialorder %v6874_v22, 0.0  ;;  %v6957_v17 = vmul.f32 %v12402_v60, %v6874_v22 }
 0x6d7   : > { %v6709_v14 = vpop.f32.mrf.mxu1 }
 0x6d8   : > { %v6998_v28 = vsel %vm6915_vm14, %v6874_v22, %v6957_v17  ;;  %v6783_v0 = vadd.f32 %v6709_v14, %v12382_v13  ;;  %v7244_v58 = vpop.f32.mrf.mxu2  ;;  %v13681_v22 = vld [vmem:[#allocation31_spill] sm:$0xff] }
 0x6d9   : > { %v7039_v51 = vmul.f32 %v6998_v28, %v13679_v3  ;;  %v7353_v31 = vmul.f32 %v12606_v9, %v7244_v58 }
 0x6da   : > { %v6829_v12 = vmul.f32 %v12388_v39, %v6783_v0  ;;  %9130 = vmatmul.msk.bf16.gmra.mxu1 %vm337_vm8, %v6575_v36  ;;  %v7120_v16 = vld [vmem:[#allocation3 + $0xa8] sm:$0xff] }
 0x6db   : > { %7080 = vst.msk [vmem:[#allocation3 + $0xb0] sm:$0xff] %vm337_vm8, %v7039_v51  ;;  %v12621_v34 = vadd.f32 %v12612_v23, %v7353_v31  ;;  %v13682_v31 = vld [vmem:[#allocation47_spill] sm:$0xff] }
 0x6dc   : > { %v6875_v49 = vadd.f32 %v12394_v21, %v6829_v12 }
 0x6dd   : > { %v7440_v13 = vsel %vm337_vm8, %v12621_v34, -inf }
 0x6de   : > { %vm6916_vm15 = vcmp.ge.f32.partialorder %v6875_v49, 0.0  ;;  %v6958_v42 = vmul.f32 %v12402_v60, %v6875_v49  ;;  %7441 = vmax.xlane.f32.xlu2 %v7440_v13 }
 0x6df   : > { %v6711_v56 = vpop.f32.mrf.mxu1 }
 0x6e0   : > { %v6999_v20 = vsel %vm6916_vm15, %v6875_v49, %v6958_v42  ;;  %v6784_v50 = vadd.f32 %v6711_v56, %v12398_v15  ;;  %v7246_v38 = vpop.f32.mrf.mxu2 }
 0x6e1   : > { %v7040_v45 = vmul.f32 %v6999_v20, %v13680_v1  ;;  %v7354_v52 = vmul.f32 %v12606_v9, %v7246_v38 }
 0x6e2   : > { %v6830_v32 = vmul.f32 %v12388_v39, %v6784_v50  ;;  %v7121_v26 = vld [vmem:[#allocation3 + $0xb0] sm:$0xff] }
 0x6e3   : > { %7081 = vst.msk [vmem:[#allocation3 + $0xb8] sm:$0xff] %vm337_vm8, %v7040_v45  ;;  %v7152_v57 = vpack.c.bf16 %v7121_v26, %v7120_v16  ;;  %v12633_v44 = vadd.f32 %v12612_v23, %v7354_v52  ;;  %v6556_v50 = vld [vmem:[#allocation2 + $0x16b] sm:$0xf] }
 0x6e4   : > { %v6876_v61 = vadd.f32 %v12394_v21, %v6830_v32  ;;  %v6577_v45 = vpack.c.bf16 %v6556_v50, %v6556_v50 }
 0x6e5   : > { %9148 = vmatmul.msk.bf16.gmra.mxu2 %vm337_vm8, %v7152_v57  ;;  %v7443_v15 = vsel %vm337_vm8, %v12633_v44, -inf  ;;  %v13683_v57 = vld [vmem:[#allocation48_spill] sm:$0xff] }
 0x6e6   : > { %vm6917_vm0 = vcmp.ge.f32.partialorder %v6876_v61, 0.0  ;;  %v6959_v4 = vmul.f32 %v12402_v60, %v6876_v61  ;;  %7444 = vmax.xlane.f32.xlu0 %v7443_v15 }
 0x6e7   : > { %v6714_v27 = vpop.f32.mrf.mxu1 }
 0x6e8   : > { %v7000_v33 = vsel %vm6917_vm0, %v6876_v61, %v6959_v4  ;;  %v6785_v30 = vadd.f32 %v6714_v27, %v12411_v2  ;;  %v7249_v8 = vpop.f32.mrf.mxu2 }
 0x6e9   : > { %v7041_v7 = vmul.f32 %v7000_v33, %v13681_v22  ;;  %v7355_v17 = vmul.f32 %v12606_v9, %v7249_v8  ;;  %v13684_v22 = vld [vmem:[#allocation49_spill] sm:$0xff] }
 0x6ea   : > { %v6831_v14 = vmul.f32 %v12388_v39, %v6785_v30  ;;  %9131 = vmatmul.msk.bf16.gmra.mxu1 %vm337_vm8, %v6576_v62  ;;  %v7122_v13 = vld [vmem:[#allocation3 + $0xb8] sm:$0xff] }
 0x6eb   : > { %7082 = vst.msk [vmem:[#allocation3 + $0xc0] sm:$0xff] %vm337_vm8, %v7041_v7  ;;  %v12647_v18 = vadd.f32 %v12612_v23, %v7355_v17 }
 0x6ec   : > { %v6877_v28 = vadd.f32 %v12394_v21, %v6831_v14 }
 0x6ed   : > { %v7446_v2 = vsel %vm337_vm8, %v12647_v18, -inf }
 0x6ee   : > { %vm6918_vm6 = vcmp.ge.f32.partialorder %v6877_v28, 0.0  ;;  %v6960_v0 = vmul.f32 %v12402_v60, %v6877_v28  ;;  %7447 = vmax.xlane.f32.xlu1 %v7446_v2 }
 0x6ef   : > { %v6716_v58 = vpop.f32.mrf.mxu1 }
 0x6f0   : > { %v7001_v36 = vsel %vm6918_vm6, %v6877_v28, %v6960_v0  ;;  %v6786_v3 = vadd.f32 %v6716_v58, %v12421_v48  ;;  %v7251_v51 = vpop.f32.mrf.mxu2 }
 0x6f1   : > { %v7042_v35 = vmul.f32 %v7001_v36, %v13682_v31  ;;  %v7356_v12 = vmul.f32 %v12606_v9, %v7251_v51 }
 0x6f2   : > { %v6832_v49 = vmul.f32 %v12388_v39, %v6786_v3  ;;  %v7123_v42 = vld [vmem:[#allocation3 + $0xc0] sm:$0xff] }
 0x6f3   : > { %7083 = vst.msk [vmem:[#allocation3 + $0xc8] sm:$0xff] %vm337_vm8, %v7042_v35  ;;  %v7153_v56 = vpack.c.bf16 %v7123_v42, %v7122_v13  ;;  %v12659_v20 = vadd.f32 %v12612_v23, %v7356_v12 }
 0x6f4   : > { %v6878_v38 = vadd.f32 %v12394_v21, %v6832_v49  ;;  %v13685_v49 = vld [vmem:[#allocation50_spill] sm:$0xff] }
 0x6f5   : > { %9149 = vmatmul.msk.bf16.gmra.mxu2 %vm337_vm8, %v7153_v56  ;;  %v7449_v48 = vsel %vm337_vm8, %v12659_v20, -inf }
 0x6f6   : > { %vm6919_vm1 = vcmp.ge.f32.partialorder %v6878_v38, 0.0  ;;  %v6961_v1 = vmul.f32 %v12402_v60, %v6878_v38  ;;  %7450 = vmax.xlane.f32.xlu2 %v7449_v48 }
 0x6f7   : > { %v6719_v52 = vpop.f32.mrf.mxu1 }
 0x6f8   : > { %v7002_v32 = vsel %vm6919_vm1, %v6878_v38, %v6961_v1  ;;  %v6787_v16 = vadd.f32 %v6719_v52, %v12431_v40  ;;  %v7254_v26 = vpop.f32.mrf.mxu2 }
 0x6f9   : > { %v7043_v61 = vmul.f32 %v7002_v32, %v13683_v57  ;;  %v7357_v15 = vmul.f32 %v12606_v9, %v7254_v26 }
 0x6fa   : > { %v6833_v43 = vmul.f32 %v12388_v39, %v6787_v16  ;;  %9132 = vmatmul.msk.bf16.gmra.mxu1 %vm337_vm8, %v6577_v45  ;;  %v7124_v28 = vld [vmem:[#allocation3 + $0xc8] sm:$0xff]  ;;  %v13686_v16 = vld [vmem:[#allocation51_spill] sm:$0xff] }
 0x6fb   : > { %7084 = vst.msk [vmem:[#allocation3 + $0xd0] sm:$0xff] %vm337_vm8, %v7043_v61  ;;  %v12673_v41 = vadd.f32 %v12612_v23, %v7357_v15 }
 0x6fc   : > { %v6879_v4 = vadd.f32 %v12394_v21, %v6833_v43 }
 0x6fd   : > { %v7452_v27 = vsel %vm337_vm8, %v12673_v41, -inf }
 0x6fe   : > { %vm6920_vm3 = vcmp.ge.f32.partialorder %v6879_v4, 0.0  ;;  %v6962_v40 = vmul.f32 %v12402_v60, %v6879_v4  ;;  %7453 = vmax.xlane.f32.xlu2 %v7452_v27 }
 0x6ff   : > { %v6721_v33 = vpop.f32.mrf.mxu1 }
 0x700   : > { %v7003_v30 = vsel %vm6920_vm3, %v6879_v4, %v6962_v40  ;;  %v6788_v8 = vadd.f32 %v6721_v33, %v12443_v10  ;;  %v7256_v62 = vpop.f32.mrf.mxu2 }
 0x701   : > { %v7044_v7 = vmul.f32 %v7003_v30, %v13684_v22  ;;  %v7358_v17 = vmul.f32 %v12606_v9, %v7256_v62 }
 0x702   : > { %v6834_v14 = vmul.f32 %v12388_v39, %v6788_v8  ;;  %v7125_v2 = vld [vmem:[#allocation3 + $0xd0] sm:$0xff] }
 0x703   : > { %7085 = vst.msk [vmem:[#allocation3 + $0xd8] sm:$0xff] %vm337_vm8, %v7044_v7  ;;  %v7154_v0 = vpack.c.bf16 %v7125_v2, %v7124_v28  ;;  %v12685_v58 = vadd.f32 %v12612_v23, %v7358_v17  ;;  %v13687_v7 = vld [vmem:[#allocation52_spill] sm:$0xff] }
 0x704   : > { %v6880_v36 = vadd.f32 %v12394_v21, %v6834_v14 }
 0x705   : > { %9150 = vmatmul.msk.bf16.gmra.mxu2 %vm337_vm8, %v7154_v0  ;;  %v7455_v10 = vsel %vm337_vm8, %v12685_v58, -inf }
 0x706   : > { %vm6921_vm7 = vcmp.ge.f32.partialorder %v6880_v36, 0.0  ;;  %v6963_v3 = vmul.f32 %v12402_v60, %v6880_v36  ;;  %7456 = vmax.xlane.f32.xlu0 %v7455_v10 }
 0x707   : > { %v6724_v51 = vpop.f32.mrf.mxu1 }
 0x708   : > { %v7004_v31 = vsel %vm6921_vm7, %v6880_v36, %v6963_v3  ;;  %v6789_v35 = vadd.f32 %v6724_v51, %v12453_v54  ;;  %v7259_v12 = vpop.f32.mrf.mxu2 }
 0x709   : > { %v7045_v13 = vmul.f32 %v7004_v31, %v13685_v49  ;;  %v7359_v42 = vmul.f32 %v12606_v9, %v7259_v12 }
 0x70a   : > { %v6835_v56 = vmul.f32 %v12388_v39, %v6789_v35  ;;  %v7126_v15 = vld [vmem:[#allocation3 + $0xd8] sm:$0xff] }
 0x70b   : > { %7086 = vst.msk [vmem:[#allocation3 + $0xe0] sm:$0xff] %vm337_vm8, %v7045_v13  ;;  %v12698_v50 = vadd.f32 %v12612_v23, %v7359_v42 }
 0x70c   : > { %v6881_v38 = vadd.f32 %v12394_v21, %v6835_v56 }
 0x70d   : > { %v7458_v48 = vsel %vm337_vm8, %v12698_v50, -inf }
 0x70e   : > { %vm6922_vm2 = vcmp.ge.f32.partialorder %v6881_v38, 0.0  ;;  %v6964_v54 = vmul.f32 %v12402_v60, %v6881_v38  ;;  %7459 = vmax.xlane.f32.xlu1 %v7458_v48 }
 0x70f   : > { %v6726_v1 = vpop.f32.mrf.mxu1 }
 0x710   : > { %v7005_v45 = vsel %vm6922_vm2, %v6881_v38, %v6964_v54  ;;  %v6790_v52 = vadd.f32 %v6726_v1, %v12464_v47  ;;  %v7261_v32 = vpop.f32.mrf.mxu2 }
 0x711   : > { %v7046_v26 = vmul.f32 %v7005_v45, %v13686_v16  ;;  %v7360_v57 = vmul.f32 %v12606_v9, %v7261_v32 }
 0x712   : > { %v6836_v61 = vmul.f32 %v12388_v39, %v6790_v52  ;;  %v7127_v43 = vld [vmem:[#allocation3 + $0xe0] sm:$0xff] }
 0x713   : > { %7087 = vst.msk [vmem:[#allocation3 + $0xe8] sm:$0xff] %vm337_vm8, %v7046_v26  ;;  %v7155_v4 = vpack.c.bf16 %v7127_v43, %v7126_v15  ;;  %v12710_v27 = vadd.f32 %v12612_v23, %v7360_v57  ;;  %v13689_v26 = vld [vmem:[#allocation54_spill] sm:$0xff] }
 0x714   : > { %v6882_v40 = vadd.f32 %v12394_v21, %v6836_v61 }
 0x715   : > { %9151 = vmatmul.msk.bf16.gmra.mxu2 %vm337_vm8, %v7155_v4  ;;  %v7461_v47 = vsel %vm337_vm8, %v12710_v27, -inf }
 0x716   : > { %vm6923_vm5 = vcmp.ge.f32.partialorder %v6882_v40, 0.0  ;;  %v6965_v33 = vmul.f32 %v12402_v60, %v6882_v40  ;;  %7462 = vmax.xlane.f32.xlu2 %v7461_v47 }
 0x717   : > { %v6729_v30 = vpop.f32.mrf.mxu1 }
 0x718   : > { %v7006_v8 = vsel %vm6923_vm5, %v6882_v40, %v6965_v33  ;;  %v6791_v62 = vadd.f32 %v6729_v30, %v12474_v37  ;;  %v7264_v22 = vpop.f32.mrf.mxu2 }
 0x719   : > { %v7047_v17 = vmul.f32 %v7006_v8, %v13687_v7  ;;  %v7361_v14 = vmul.f32 %v12606_v9, %v7264_v22 }
 0x71a   : > { %v6837_v28 = vmul.f32 %v12388_v39, %v6791_v62  ;;  %v13688_v39 = vld [vmem:[#allocation53_spill] sm:$0xff]  ;;  %v13690_v62 = vld [vmem:[#allocation32_spill] sm:$0xff] }
 0x71b   : > { %7088 = vst.msk [vmem:[#allocation3 + $0xf0] sm:$0xff] %vm337_vm8, %v7047_v17  ;;  %v12723_v2 = vadd.f32 %v12612_v23, %v7361_v14  ;;  %v7128_v13 = vld [vmem:[#allocation3 + $0xe8] sm:$0xff] }
 0x71c   : > { %v6883_v0 = vadd.f32 %v12394_v21, %v6837_v28  ;;  %v12735_v21 = vld [vmem:[%s13385_s5 + $0x2] ss:$0 sm:$0xff] }
 0x71d   : > { %v7464_v36 = vsel %vm337_vm8, %v12723_v2, -inf }
 0x71e   : > { %vm6924_vm9 = vcmp.ge.f32.partialorder %v6883_v0, 0.0  ;;  %v6966_v37 = vmul.f32 %v12402_v60, %v6883_v0  ;;  %7465 = vmax.xlane.f32.xlu0 %v7464_v36 }
 0x71f   : > { %v6731_v10 = vpop.f32.mrf.mxu1 }
 0x720   : > { %v7007_v3 = vsel %vm6924_vm9, %v6883_v0, %v6966_v37  ;;  %v6792_v51 = vadd.f32 %v6731_v10, %v12485_v29  ;;  %v7266_v31 = vpop.f32.mrf.mxu2  ;;  %v12745_v29 = vld [vmem:[%s13385_s5 + $0x3] ss:$0 sm:$0xff] }
 0x721   : > { %v7048_v35 = vmul.f32 %v7007_v3, %v13688_v39  ;;  %v7362_v12 = vmul.f32 %v12606_v9, %v7266_v31 }
 0x722   : > { %v6838_v49 = vmul.f32 %v12735_v21, %v6792_v51  ;;  %v7129_v42 = vld [vmem:[#allocation3 + $0xf0] sm:$0xff] }
 0x723   : > { %7089 = vst.msk [vmem:[#allocation3 + $0xf8] sm:$0xff] %vm337_vm8, %v7048_v35  ;;  %v7156_v56 = vpack.c.bf16 %v7129_v42, %v7128_v13  ;;  %v12740_v38 = vadd.f32 %v12612_v23, %v7362_v12  ;;  %v13691_v35 = vld [vmem:[#allocation7_spill] sm:$0xff] }
 0x724   : > { %v6884_v48 = vadd.f32 %v12745_v29, %v6838_v49 }
 0x725   : > { %9152 = vmatmul.msk.bf16.gmra.mxu2 %vm337_vm8, %v7156_v56  ;;  %v7467_v54 = vsel %vm337_vm8, %v12740_v38, -inf }
 0x726   : > { %vm6925_vm10 = vcmp.ge.f32.partialorder %v6884_v48, 0.0  ;;  %v6967_v1 = vmul.f32 %v12402_v60, %v6884_v48  ;;  %7468 = vmax.xlane.f32.xlu1 %v7467_v54 }
 0x727   : > { %v6734_v45 = vpop.f32.mrf.mxu1 }
 0x728   : > { %v7008_v52 = vsel %vm6925_vm10, %v6884_v48, %v6967_v1  ;;  %v6793_v32 = vadd.f32 %v6734_v45, %v12495_v24  ;;  %v7269_v16 = vpop.f32.mrf.mxu2 }
 0x729   : > { %v7049_v57 = vmul.f32 %v7008_v52, %v13689_v26  ;;  %v7363_v61 = vmul.f32 %v12606_v9, %v7269_v16 }
 0x72a   : > { %v6839_v15 = vmul.f32 %v12735_v21, %v6793_v32  ;;  %v7130_v14 = vld [vmem:[#allocation3 + $0xf8] sm:$0xff]  ;;  %v13692_v32 = vld [vmem:[#allocation33_spill] sm:$0xff] }
 0x72b   : > { %7090 = vst.msk [vmem:[#allocation3 + $0x100] sm:$0xff] %vm337_vm8, %v7049_v57  ;;  %v12758_v43 = vadd.f32 %v12612_v23, %v7363_v61 }
 0x72c   : > { %v6885_v4 = vadd.f32 %v12745_v29, %v6839_v15 }
 0x72d   : > { %v7470_v40 = vsel %vm337_vm8, %v12758_v43, -inf }
 0x72e   : > { %vm6926_vm11 = vcmp.ge.f32.partialorder %v6885_v4, 0.0  ;;  %v6968_v24 = vmul.f32 %v12402_v60, %v6885_v4  ;;  %7471 = vmax.xlane.f32.xlu2 %v7470_v40 }
 0x72f   : > { %v6736_v47 = vpop.f32.mrf.mxu1 }
 0x730   : > { %v7009_v33 = vsel %vm6926_vm11, %v6885_v4, %v6968_v24  ;;  %v6794_v30 = vadd.f32 %v6736_v47, %v12506_v25  ;;  %v7271_v8 = vpop.f32.mrf.mxu2 }
 0x731   : > { %v7050_v22 = vmul.f32 %v7009_v33, %v13690_v62  ;;  %v7364_v7 = vmul.f32 %v12606_v9, %v7271_v8 }
 0x732   : > { %v6840_v17 = vmul.f32 %v12735_v21, %v6794_v30  ;;  %v7131_v28 = vld [vmem:[#allocation3 + $0x100] sm:$0xff] }
 0x733   : > { %7091 = vst.msk [vmem:[#allocation3 + $0x108] sm:$0xff] %vm337_vm8, %v7050_v22  ;;  %v7157_v0 = vpack.c.bf16 %v7131_v28, %v7130_v14  ;;  %v12770_v36 = vadd.f32 %v12612_v23, %v7364_v7  ;;  %v13693_v22 = vld [vmem:[#allocation34_spill] sm:$0xff] }
 0x734   : > { %v6886_v37 = vadd.f32 %v12745_v29, %v6840_v17 }
 0x735   : > { %9153 = vmatmul.msk.bf16.gmra.mxu2 %vm337_vm8, %v7157_v0  ;;  %v7473_v25 = vsel %vm337_vm8, %v12770_v36, -inf }
 0x736   : > { %vm6927_vm12 = vcmp.ge.f32.partialorder %v6886_v37, 0.0  ;;  %v6969_v10 = vmul.f32 %v12402_v60, %v6886_v37  ;;  %7474 = vmax.xlane.f32.xlu0 %v7473_v25 }
 0x737   : > { %v6739_v3 = vpop.f32.mrf.mxu1 }
 0x738   : > { %v7010_v51 = vsel %vm6927_vm12, %v6886_v37, %v6969_v10  ;;  %v6795_v31 = vadd.f32 %v6739_v3, %v12516_v46  ;;  %v7274_v39 = vpop.f32.mrf.mxu2 }
 0x739   : > { %v7051_v12 = vmul.f32 %v7010_v51, %v13691_v35  ;;  %v7365_v49 = vmul.f32 %v12606_v9, %v7274_v39 }
 0x73a   : > { %v6841_v13 = vmul.f32 %v12735_v21, %v6795_v31  ;;  %v7132_v61 = vld [vmem:[#allocation3 + $0x108] sm:$0xff]  ;;  %v13694_v31 = vld [vmem:[#allocation35_spill] sm:$0xff] }
 0x73b   : > { %7092 = vst.msk [vmem:[#allocation3 + $0x110] sm:$0xff] %vm337_vm8, %v7051_v12  ;;  %v12783_v42 = vadd.f32 %v12612_v23, %v7365_v49 }
 0x73c   : > { %v6887_v56 = vadd.f32 %v12745_v29, %v6841_v13 }
 0x73d   : > { %v7476_v48 = vsel %vm337_vm8, %v12783_v42, -inf }
 0x73e   : > { %vm6928_vm13 = vcmp.ge.f32.partialorder %v6887_v56, 0.0  ;;  %v6970_v46 = vmul.f32 %v12402_v60, %v6887_v56  ;;  %7477 = vmax.xlane.f32.xlu1 %v7476_v48 }
 0x73f   : > { %v6741_v54 = vpop.f32.mrf.mxu1 }
 0x740   : > { %v7011_v1 = vsel %vm6928_vm13, %v6887_v56, %v6970_v46  ;;  %v6796_v45 = vadd.f32 %v6741_v54, %v12527_v11  ;;  %v7276_v52 = vpop.f32.mrf.mxu2 }
 0x741   : > { %v7052_v16 = vmul.f32 %v7011_v1, %v13692_v32  ;;  %v7366_v26 = vmul.f32 %v12606_v9, %v7276_v52 }
 0x742   : > { %v6842_v57 = vmul.f32 %v12735_v21, %v6796_v45  ;;  %v7133_v15 = vld [vmem:[#allocation3 + $0x110] sm:$0xff] }
 0x743   : > { %7093 = vst.msk [vmem:[#allocation3 + $0x118] sm:$0xff] %vm337_vm8, %v7052_v16  ;;  %v7158_v4 = vpack.c.bf16 %v7133_v15, %v7132_v61  ;;  %v12795_v40 = vadd.f32 %v12612_v23, %v7366_v26 }
 0x744   : > { %v6888_v24 = vadd.f32 %v12745_v29, %v6842_v57  ;;  %v13695_v57 = vld [vmem:[#allocation9_spill] sm:$0xff] }
 0x745   : > { %9154 = vmatmul.msk.bf16.gmra.mxu2 %vm337_vm8, %v7158_v4  ;;  %v7479_v11 = vsel %vm337_vm8, %v12795_v40, -inf }
 0x746   : > { %vm6929_vm14 = vcmp.ge.f32.partialorder %v6888_v24, 0.0  ;;  %v6971_v47 = vmul.f32 %v12402_v60, %v6888_v24  ;;  %7480 = vmax.xlane.f32.xlu2 %v7479_v11 }
 0x747   : > { %v6744_v33 = vpop.f32.mrf.mxu1 }
 0x748   : > { %v7012_v30 = vsel %vm6929_vm14, %v6888_v24, %v6971_v47  ;;  %v6797_v8 = vadd.f32 %v6744_v33, %v12537_v55  ;;  %v7279_v62 = vpop.f32.mrf.mxu2 }
 0x749   : > { %v7053_v7 = vmul.f32 %v7012_v30, %v13693_v22  ;;  %v7367_v17 = vmul.f32 %v12606_v9, %v7279_v62 }
 0x74a   : > { %v6843_v14 = vmul.f32 %v12735_v21, %v6797_v8  ;;  %v7134_v56 = vld [vmem:[#allocation3 + $0x118] sm:$0xff] }
 0x74b   : > { %7094 = vst.msk [vmem:[#allocation3 + $0x120] sm:$0xff] %vm337_vm8, %v7053_v7  ;;  %v12808_v28 = vadd.f32 %v12612_v23, %v7367_v17 }
 0x74c   : > { %v6889_v0 = vadd.f32 %v12745_v29, %v6843_v14 }
 0x74d   : > { %v7482_v37 = vsel %vm337_vm8, %v12808_v28, -inf }
 0x74e   : > { %vm6930_vm15 = vcmp.ge.f32.partialorder %v6889_v0, 0.0  ;;  %v6972_v55 = vmul.f32 %v12402_v60, %v6889_v0  ;;  %7483 = vmax.xlane.f32.xlu0 %v7482_v37 }
 0x74f   : > { %v6746_v25 = vpop.f32.mrf.mxu1 }
 0x750   : > { %v7013_v10 = vsel %vm6930_vm15, %v6889_v0, %v6972_v55  ;;  %v6798_v3 = vadd.f32 %v6746_v25, %v12548_v59  ;;  %v7281_v51 = vpop.f32.mrf.mxu2  ;;  %v13696_v0 = vld [vmem:[#allocation8_spill] sm:$0xff] }
 0x751   : > { %v7054_v39 = vmul.f32 %v7013_v10, %v13694_v31  ;;  %v7368_v35 = vmul.f32 %v12606_v9, %v7281_v51  ;;  %v7442_v12 = vpop.xlane.xlu2 %7441 }
 0x752   : > { %v6844_v49 = vmul.f32 %v12735_v21, %v6798_v3  ;;  %v7563_v13 = vsub.f32 %v12621_v34, %v7442_v12  ;;  %v7135_v48 = vld [vmem:[#allocation3 + $0x120] sm:$0xff] }
 0x753   : > { %7095 = vst.msk [vmem:[#allocation3 + $0x128] sm:$0xff] %vm337_vm8, %v7054_v39  ;;  %v7159_v46 = vpack.c.bf16 %v7135_v48, %v7134_v56  ;;  %v12821_v54 = vadd.f32 %v12612_v23, %v7368_v35 }
 0x754   : > { %v6890_v59 = vadd.f32 %v12745_v29, %v6844_v49  ;;  %v7604_v1 = vmul.f32 1.442695, %v7563_v13 }
 0x755   : > { %9155 = vmatmul.msk.bf16.gmra.mxu2 %vm337_vm8, %v7159_v46  ;;  %v7485_v45 = vsel %vm337_vm8, %v12821_v54, -inf }
 0x756   : > { %vm6931_vm0 = vcmp.ge.f32.partialorder %v6890_v59, 0.0  ;;  %v6973_v52 = vmul.f32 %v12402_v60, %v6890_v59  ;;  %9468 = vpow2.f32 %v7604_v1  ;;  %7486 = vmax.xlane.f32.xlu1 %v7485_v45  ;;  %v13697_v45 = vld [vmem:[#allocation10_spill] sm:$0xff] }
 0x757   : > { %v6749_v34 = vpop.f32.mrf.mxu1 }
 0x758   : > { %v7014_v32 = vsel %vm6931_vm0, %v6890_v59, %v6973_v52  ;;  %v6799_v16 = vadd.f32 %v6749_v34, %v12558_v6  ;;  %v7284_v26 = vpop.f32.mrf.mxu2 }
 0x759   : > { %v7055_v61 = vmul.f32 %v7014_v32, %v13695_v57  ;;  %v7369_v15 = vmul.f32 %v12606_v9, %v7284_v26  ;;  %v7445_v4 = vpop.xlane.xlu0 %7444 }
 0x75a   : > { %v6845_v24 = vmul.f32 %v12735_v21, %v6799_v16  ;;  %v7564_v11 = vsub.f32 %v12633_v44, %v7445_v4  ;;  %v7136_v51 = vld [vmem:[#allocation3 + $0x128] sm:$0xff] }
 0x75b   : > { %7096 = vst.msk [vmem:[#allocation3 + $0x130] sm:$0xff] %vm337_vm8, %v7055_v61  ;;  %v12835_v47 = vadd.f32 %v12612_v23, %v7369_v15 }
 0x75c   : > { %v12837_v33 = vpop.eup %9468  ;;  %v6891_v30 = vadd.f32 %v12745_v29, %v6845_v24  ;;  %v7606_v6 = vmul.f32 1.442695, %v7564_v11 }
 0x75d   : > { %v7686_v8 = vsel %vm337_vm8, %v12837_v33, 0.0  ;;  %v7488_v62 = vsel %vm337_vm8, %v12835_v47, -inf }
 0x75e   : > { %vm6932_vm6 = vcmp.ge.f32.partialorder %v6891_v30, 0.0  ;;  %v6974_v22 = vmul.f32 %v12402_v60, %v6891_v30  ;;  %9470 = vpow2.f32 %v7606_v6  ;;  %7687 = vadd.xlane.f32.xlu0 %v7686_v8  ;;  %7489 = vmax.xlane.f32.xlu2 %v7488_v62  ;;  %v13698_v62 = vld [vmem:[#allocation36_spill] sm:$0xff] }
 0x75f   : > { %v6751_v44 = vpop.f32.mrf.mxu1 }
 0x760   : > { %v7015_v7 = vsel %vm6932_vm6, %v6891_v30, %v6974_v22  ;;  %v6800_v17 = vadd.f32 %v6751_v44, %v12569_v63  ;;  %v7286_v14 = vpop.f32.mrf.mxu2 }
 0x761   : > { %v7056_v37 = vmul.f32 %v7015_v7, %v13696_v0  ;;  %v7370_v55 = vmul.f32 %v12606_v9, %v7286_v14  ;;  %v7448_v25 = vpop.xlane.xlu1 %7447 }
 0x762   : > { %v6846_v10 = vmul.f32 %v12735_v21, %v6800_v17  ;;  %v7565_v3 = vsub.f32 %v12647_v18, %v7448_v25  ;;  %v7137_v31 = vld [vmem:[#allocation3 + $0x130] sm:$0xff] }
 0x763   : > { %7097 = vst.msk [vmem:[#allocation3 + $0x138] sm:$0xff] %vm337_vm8, %v7056_v37  ;;  %v7160_v39 = vpack.c.bf16 %v7137_v31, %v7136_v51  ;;  %v12852_v35 = vadd.f32 %v12612_v23, %v7370_v55 }
 0x764   : > { %v12854_v12 = vpop.eup %9470  ;;  %v6892_v63 = vadd.f32 %v12745_v29, %v6846_v10  ;;  %v7608_v49 = vmul.f32 1.442695, %v7565_v3 }
 0x765   : > { %9156 = vmatmul.msk.bf16.gmra.mxu2 %vm337_vm8, %v7160_v39  ;;  %v7689_v13 = vsel %vm337_vm8, %v12854_v12, 0.0  ;;  %v7491_v18 = vsel %vm337_vm8, %v12852_v35, -inf }
 0x766   : > { %vm6933_vm1 = vcmp.ge.f32.partialorder %v6892_v63, 0.0  ;;  %v6975_v56 = vmul.f32 %v12402_v60, %v6892_v63  ;;  %9472 = vpow2.f32 %v7608_v49  ;;  %7690 = vadd.xlane.f32.xlu1 %v7689_v13  ;;  %7492 = vmax.xlane.f32.xlu0 %v7491_v18  ;;  %v13699_v18 = vld [vmem:[#allocation12_spill] sm:$0xff] }
 0x767   : > { %v6754_v48 = vpop.f32.mrf.mxu1 }
 0x768   : > { %v7016_v46 = vsel %vm6933_vm1, %v6892_v63, %v6975_v56  ;;  %v6801_v59 = vadd.f32 %v6754_v48, %v12579_v19  ;;  %v7289_v1 = vpop.f32.mrf.mxu2 }
 0x769   : > { %v7057_v52 = vmul.f32 %v7016_v46, %v13697_v45  ;;  %v7371_v34 = vmul.f32 %v12606_v9, %v7289_v1  ;;  %v7451_v32 = vpop.xlane.xlu2 %7450 }
 0x76a   : > { %v6847_v16 = vmul.f32 %v12735_v21, %v6801_v59  ;;  %v7566_v26 = vsub.f32 %v12659_v20, %v7451_v32  ;;  %v7138_v0 = vld [vmem:[#allocation3 + $0x138] sm:$0xff] }
 0x76b   : > { %7098 = vst.msk [vmem:[#allocation3 + $0x140] sm:$0xff] %vm337_vm8, %v7057_v52  ;;  %v12870_v57 = vadd.f32 %v12612_v23, %v7371_v34 }
 0x76c   : > { %v12872_v61 = vpop.eup %9472  ;;  %v6893_v15 = vadd.f32 %v12745_v29, %v6847_v16  ;;  %v7610_v19 = vmul.f32 1.442695, %v7566_v26 }
 0x76d   : > { %v7692_v4 = vsel %vm337_vm8, %v12872_v61, 0.0  ;;  %v7494_v24 = vsel %vm337_vm8, %v12870_v57, -inf }
 0x76e   : > { %vm6934_vm3 = vcmp.ge.f32.partialorder %v6893_v15, 0.0  ;;  %v6976_v11 = vmul.f32 %v12402_v60, %v6893_v15  ;;  %9474 = vpow2.f32 %v7610_v19  ;;  %7693 = vadd.xlane.f32.xlu2 %v7692_v4  ;;  %7495 = vmax.xlane.f32.xlu1 %v7494_v24  ;;  %v13700_v19 = vld [vmem:[#allocation11_spill] sm:$0xff] }
 0x76f   : > { %v6756_v20 = vpop.f32.mrf.mxu1 }
 0x770   : > { %v7017_v30 = vsel %vm6934_vm3, %v6893_v15, %v6976_v11  ;;  %v6802_v6 = vadd.f32 %v6756_v20, %v12590_v5  ;;  %v7291_v8 = vpop.f32.mrf.mxu2 }
 0x771   : > { %v7058_v22 = vmul.f32 %v7017_v30, %v13698_v62  ;;  %v7372_v44 = vmul.f32 %v12606_v9, %v7291_v8  ;;  %v7454_v7 = vpop.xlane.xlu2 %7453 }
 0x772   : > { %v6848_v17 = vmul.f32 %v12735_v21, %v6802_v6  ;;  %v7567_v14 = vsub.f32 %v12673_v41, %v7454_v7  ;;  %v7139_v37 = vld [vmem:[#allocation3 + $0x140] sm:$0xff] }
 0x773   : > { %7099 = vst.msk [vmem:[#allocation3 + $0x148] sm:$0xff] %vm337_vm8, %v7058_v22  ;;  %v7161_v55 = vpack.c.bf16 %v7139_v37, %v7138_v0  ;;  %v12887_v25 = vadd.f32 %v12612_v23, %v7372_v44 }
 0x774   : > { %v12889_v10 = vpop.eup %9474  ;;  %v6894_v5 = vadd.f32 %v12745_v29, %v6848_v17  ;;  %v7612_v3 = vmul.f32 1.442695, %v7567_v14 }
 0x775   : > { %9157 = vmatmul.msk.bf16.gmra.mxu2 %vm337_vm8, %v7161_v55  ;;  %v7695_v51 = vsel %vm337_vm8, %v12889_v10, 0.0  ;;  %v7497_v41 = vsel %vm337_vm8, %v12887_v25, -inf }
 0x776   : > { %vm6935_vm7 = vcmp.ge.f32.partialorder %v6894_v5, 0.0  ;;  %v6977_v31 = vmul.f32 %v12402_v60, %v6894_v5  ;;  %9476 = vpow2.f32 %v7612_v3  ;;  %7696 = vadd.xlane.f32.xlu0 %v7695_v51  ;;  %7498 = vmax.xlane.f32.xlu2 %v7497_v41 }
 0x777   : > { %v6759_v39 = vpop.f32.mrf.mxu1 }
 0x778   : > { %v7018_v63 = vsel %vm6935_vm7, %v6894_v5, %v6977_v31  ;;  %v6803_v49 = vadd.f32 %v6759_v39, %v12598_v53  ;;  %v7294_v13 = vpop.f32.mrf.mxu2 }
 0x779   : > { %v7059_v56 = vmul.f32 %v7018_v63, %v13699_v18  ;;  %v7373_v48 = vmul.f32 %v12606_v9, %v7294_v13  ;;  %v7457_v46 = vpop.xlane.xlu0 %7456 }
 0x77a   : > { %v6849_v59 = vmul.f32 %v12735_v21, %v6803_v49  ;;  %v7568_v1 = vsub.f32 %v12685_v58, %v7457_v46  ;;  %v7140_v20 = vld [vmem:[#allocation3 + $0x148] sm:$0xff] }
 0x77b   : > { %7100 = vst.msk [vmem:[#allocation3 + $0x150] sm:$0xff] %vm337_vm8, %v7059_v56  ;;  %v12905_v45 = vadd.f32 %v12612_v23, %v7373_v48 }
 0x77c   : > { %v12907_v52 = vpop.eup %9476  ;;  %v6895_v34 = vadd.f32 %v12745_v29, %v6849_v59  ;;  %v7614_v53 = vmul.f32 1.442695, %v7568_v1 }
 0x77d   : > { %v7698_v32 = vsel %vm337_vm8, %v12907_v52, 0.0  ;;  %v7500_v16 = vsel %vm337_vm8, %v12905_v45, -inf }
 0x77e   : > { %vm6936_vm2 = vcmp.ge.f32.partialorder %v6895_v34, 0.0  ;;  %v6978_v21 = vmul.f32 %v12402_v60, %v6895_v34  ;;  %9478 = vpow2.f32 %v7614_v53  ;;  %7699 = vadd.xlane.f32.xlu1 %v7698_v32  ;;  %7501 = vmax.xlane.f32.xlu0 %v7500_v16 }
 0x77f   : > { %v6761_v58 = vpop.f32.mrf.mxu1 }
 0x780   : > { %v7019_v26 = vsel %vm6936_vm2, %v6895_v34, %v6978_v21  ;;  %v7296_v15 = vpop.f32.mrf.mxu2 }
 0x781   : > { %v7060_v4 = vmul.f32 %v7019_v26, %v13700_v19  ;;  %v7374_v29 = vmul.f32 %v12606_v9, %v7296_v15  ;;  %v7460_v24 = vpop.xlane.xlu1 %7459 }
 0x782   : > { %v7569_v11 = vsub.f32 %v12698_v50, %v7460_v24  ;;  %v7141_v30 = vld [vmem:[#allocation3 + $0x150] sm:$0xff] }
 0x783   : > { %7101 = vst.msk [vmem:[#allocation3 + $0x158] sm:$0xf] %vm384_vm4, %v7060_v4  ;;  %v7162_v6 = vpack.c.bf16 %v7141_v30, %v7140_v20  ;;  %v12920_v60 = vadd.f32 %v12612_v23, %v7374_v29 }
 0x784   : > { %v12922_v8 = vpop.eup %9478  ;;  %v7616_v62 = vmul.f32 1.442695, %v7569_v11 }
 0x785   : > { %9158 = vmatmul.msk.bf16.gmra.mxu2 %vm337_vm8, %v7162_v6  ;;  %v7701_v22 = vsel %vm337_vm8, %v12922_v8, 0.0  ;;  %v7503_v44 = vsel %vm337_vm8, %v12920_v60, -inf }
 0x786   : > { %9480 = vpow2.f32 %v7616_v62  ;;  %7702 = vadd.xlane.f32.xlu2 %v7701_v22  ;;  %7504 = vmax.xlane.f32.xlu1 %v7503_v44 }
 0x788   : > { %v7299_v50 = vpop.f32.mrf.mxu2 }
 0x789   : > { %v7375_v7 = vmul.f32 %v12606_v9, %v7299_v50  ;;  %v7463_v17 = vpop.xlane.xlu2 %7462 }
 0x78a   : > { %v7570_v14 = vsub.f32 %v12710_v27, %v7463_v17  ;;  %v7142_v41 = vld [vmem:[#allocation3 + $0x158] sm:$0xf] }
 0x78b   : > { %v12932_v0 = vadd.f32 %v12612_v23, %v7375_v7  ;;  %v7163_v63 = vpack.c.bf16 %v7142_v41, %v7142_v41 }
 0x78c   : > { %v12934_v37 = vpop.eup %9480  ;;  %v7618_v55 = vmul.f32 1.442695, %v7570_v14 }
 0x78d   : > { %v7704_v5 = vsel %vm337_vm8, %v12934_v37, 0.0  ;;  %v7506_v3 = vsel %vm337_vm8, %v12932_v0, -inf }
 0x78e   : > { %9482 = vpow2.f32 %v7618_v55  ;;  %7705 = vadd.xlane.f32.xlu0 %v7704_v5  ;;  %7507 = vmax.xlane.f32.xlu2 %v7506_v3 }
 0x790   : > { %v7301_v51 = vpop.f32.mrf.mxu2 }
 0x791   : > { %v7376_v31 = vmul.f32 %v12606_v9, %v7301_v51  ;;  %v7466_v27 = vpop.xlane.xlu0 %7465 }
 0x792   : > { %v7571_v39 = vsub.f32 %v12723_v2, %v7466_v27 }
 0x793   : > { %v12943_v49 = vadd.f32 %v12612_v23, %v7376_v31 }
 0x794   : > { %v12945_v13 = vpop.eup %9482  ;;  %v7620_v18 = vmul.f32 1.442695, %v7571_v39 }
 0x795   : > { %9159 = vmatmul.msk.bf16.gmra.mxu2 %vm337_vm8, %v7163_v63  ;;  %v7707_v56 = vsel %vm337_vm8, %v12945_v13, 0.0  ;;  %v7509_v48 = vsel %vm337_vm8, %v12943_v49, -inf }
 0x796   : > { %9484 = vpow2.f32 %v7620_v18  ;;  %7708 = vadd.xlane.f32.xlu1 %v7707_v56  ;;  %7510 = vmax.xlane.f32.xlu0 %v7509_v48 }
 0x798   : > { %v7304_v46 = vpop.f32.mrf.mxu2 }
 0x799   : > { %v7377_v2 = vmul.f32 %v12606_v9, %v7304_v46  ;;  %v7469_v59 = vpop.xlane.xlu1 %7468 }
 0x79a   : > { %v7572_v1 = vsub.f32 %v12740_v38, %v7469_v59 }
 0x79b   : > { %v12955_v34 = vadd.f32 %v12612_v23, %v7377_v2 }
 0x79c   : > { %v12957_v53 = vpop.eup %9484  ;;  %v7622_v32 = vmul.f32 1.442695, %v7572_v1 }
 0x79d   : > { %v7710_v16 = vsel %vm337_vm8, %v12957_v53, 0.0  ;;  %v7512_v21 = vsel %vm337_vm8, %v12955_v34, -inf }
 0x79e   : > { %9486 = vpow2.f32 %v7622_v32  ;;  %7711 = vadd.xlane.f32.xlu2 %v7710_v16  ;;  %7513 = vmax.xlane.f32.xlu1 %v7512_v21 }
 0x7a0   : > { %v7306_v58 = vpop.f32.mrf.mxu2 }
 0x7a1   : > { %v7378_v26 = vmul.f32 %v12606_v9, %v7306_v58  ;;  %v7472_v15 = vpop.xlane.xlu2 %7471 }
 0x7a2   : > { %v7573_v38 = vsub.f32 %v12758_v43, %v7472_v15 }
 0x7a3   : > { %v12966_v19 = vadd.f32 %v12612_v23, %v7378_v26 }
 0x7a4   : > { %v12968_v4 = vpop.eup %9486  ;;  %v7624_v29 = vmul.f32 1.442695, %v7573_v38 }
 0x7a5   : > { %v7713_v24 = vsel %vm337_vm8, %v12968_v4, 0.0  ;;  %v7515_v11 = vsel %vm337_vm8, %v12966_v19, -inf }
 0x7a6   : > { %9488 = vpow2.f32 %v7624_v29  ;;  %7714 = vadd.xlane.f32.xlu0 %v7713_v24  ;;  %7516 = vmax.xlane.f32.xlu2 %v7515_v11 }
 0x7a8   : > { %v7309_v20 = vpop.f32.mrf.mxu2 }
 0x7a9   : > { %v7379_v30 = vmul.f32 %v12606_v9, %v7309_v20  ;;  %v7475_v6 = vpop.xlane.xlu0 %7474 }
 0x7aa   : > { %v7574_v43 = vsub.f32 %v12770_v36, %v7475_v6 }
 0x7ab   : > { %v12977_v62 = vadd.f32 %v12612_v23, %v7379_v30 }
 0x7ac   : > { %v12979_v22 = vpop.eup %9488  ;;  %v7626_v44 = vmul.f32 1.442695, %v7574_v43 }
 0x7ad   : > { %v7716_v50 = vsel %vm337_vm8, %v12979_v22, 0.0  ;;  %v7518_v7 = vsel %vm337_vm8, %v12977_v62, -inf }
 0x7ae   : > { %9490 = vpow2.f32 %v7626_v44  ;;  %7717 = vadd.xlane.f32.xlu1 %v7716_v50  ;;  %7519 = vmax.xlane.f32.xlu0 %v7518_v7 }
 0x7b0   : > { %v7311_v17 = vpop.f32.mrf.mxu2 }
 0x7b1   : > { %v7380_v14 = vmul.f32 %v12606_v9, %v7311_v17  ;;  %v7478_v55 = vpop.xlane.xlu1 %7477  ;;  %v13039_v17 = vld [vmem:[%s13385_s5 + $0x5] ss:$0 sm:$0xff] }
 0x7b2   : > { %v7575_v36 = vsub.f32 %v12783_v42, %v7478_v55 }
 0x7b3   : > { %v12988_v5 = vadd.f32 %v12612_v23, %v7380_v14 }
 0x7b4   : > { %v12990_v3 = vpop.eup %9490  ;;  %v7628_v51 = vmul.f32 1.442695, %v7575_v36 }
 0x7b5   : > { %v7719_v41 = vsel %vm337_vm8, %v12990_v3, 0.0  ;;  %v7521_v31 = vsel %vm337_vm8, %v12988_v5, -inf }
 0x7b6   : > { %9492 = vpow2.f32 %v7628_v51  ;;  %7720 = vadd.xlane.f32.xlu2 %v7719_v41  ;;  %7522 = vmax.xlane.f32.xlu1 %v7521_v31 }
 0x7b8   : > { %v7314_v27 = vpop.f32.mrf.mxu2 }
 0x7b9   : > { %v7381_v39 = vmul.f32 %v12606_v9, %v7314_v27  ;;  %v7481_v63 = vpop.xlane.xlu2 %7480 }
 0x7ba   : > { %v7576_v42 = vsub.f32 %v12795_v40, %v7481_v63 }
 0x7bb   : > { %v12999_v18 = vadd.f32 %v12612_v23, %v7381_v39 }
 0x7bc   : > { %v13001_v56 = vpop.eup %9492  ;;  %v7630_v48 = vmul.f32 1.442695, %v7576_v42 }
 0x7bd   : > { %v7722_v46 = vsel %vm337_vm8, %v13001_v56, 0.0  ;;  %v7524_v2 = vsel %vm337_vm8, %v12999_v18, -inf }
 0x7be   : > { %9494 = vpow2.f32 %v7630_v48  ;;  %7723 = vadd.xlane.f32.xlu0 %v7722_v46  ;;  %7525 = vmax.xlane.f32.xlu2 %v7524_v2 }
 0x7c0   : > { %v7316_v59 = vpop.f32.mrf.mxu2 }
 0x7c1   : > { %v7382_v1 = vmul.f32 %v12606_v9, %v7316_v59  ;;  %v7484_v32 = vpop.xlane.xlu0 %7483 }
 0x7c2   : > { %v7577_v40 = vsub.f32 %v12808_v28, %v7484_v32 }
 0x7c3   : > { %v13010_v16 = vadd.f32 %v12612_v23, %v7382_v1 }
 0x7c4   : > { %v13012_v21 = vpop.eup %9494  ;;  %v7632_v58 = vmul.f32 1.442695, %v7577_v40 }
 0x7c5   : > { %v7725_v26 = vsel %vm337_vm8, %v13012_v21, 0.0  ;;  %v7527_v15 = vsel %vm337_vm8, %v13010_v16, -inf }
 0x7c6   : > { %9496 = vpow2.f32 %v7632_v58  ;;  %7726 = vadd.xlane.f32.xlu1 %v7725_v26  ;;  %7528 = vmax.xlane.f32.xlu0 %v7527_v15 }
 0x7c8   : > { %v7319_v38 = vpop.f32.mrf.mxu2 }
 0x7c9   : > { %v7383_v29 = vmul.f32 %v12606_v9, %v7319_v38  ;;  %v7487_v24 = vpop.xlane.xlu1 %7486  ;;  %v13032_v9 = vld [vmem:[%s13385_s5 + $0x4] ss:$0 sm:$0xff] }
 0x7ca   : > { %v7578_v28 = vsub.f32 %v12821_v54, %v7487_v24 }
 0x7cb   : > { %v13021_v11 = vadd.f32 %v12612_v23, %v7383_v29 }
 0x7cc   : > { %v13023_v20 = vpop.eup %9496  ;;  %v7634_v30 = vmul.f32 1.442695, %v7578_v28 }
 0x7cd   : > { %v7728_v6 = vsel %vm337_vm8, %v13023_v20, 0.0  ;;  %v7530_v43 = vsel %vm337_vm8, %v13021_v11, -inf }
 0x7ce   : > { %9498 = vpow2.f32 %v7634_v30  ;;  %7729 = vadd.xlane.f32.xlu2 %v7728_v6  ;;  %7531 = vmax.xlane.f32.xlu1 %v7530_v43 }
 0x7d0   : > { %v7321_v44 = vpop.f32.mrf.mxu2 }
 0x7d1   : > { %v7384_v23 = vmul.f32 %v13032_v9, %v7321_v44  ;;  %v7688_v54 = vpop.xlane.xlu0 %7687  ;;  %v7490_v50 = vpop.xlane.xlu2 %7489 }
 0x7d2   : > { %9500 = vrcp.f32 %v7688_v54  ;;  %v7579_v7 = vsub.f32 %v12835_v47, %v7490_v50  ;;  %v7818_v59 = vand.u32 2147483647, %v7688_v54  ;;  %v7820_v1 = vand.u32 2147483648, %v7688_v54 }
 0x7d3   : > { %v13042_v14 = vadd.f32 %v13039_v17, %v7384_v23  ;;  %vm7814_vm9 = vweird.f32 %v7688_v54 }
 0x7d4   : > { %v13044_v55 = vpop.eup %9498  ;;  %v7636_v36 = vmul.f32 1.442695, %v7579_v7  ;;  %v7821_v29 = vor.u32 1.1754944e-38, %v7820_v1  ;;  %vm7819_vm11 = vcmp.eq.f32.partialorder %v7818_v59, 8.507059e+37 }
 0x7d5   : > { %v7731_v51 = vsel %vm337_vm8, %v13044_v55, 0.0  ;;  %v7533_v41 = vsel %vm337_vm8, %v13042_v14, -inf }
 0x7d6   : > { %7732 = vadd.xlane.f32.xlu0 %v7731_v51  ;;  %7534 = vmax.xlane.f32.xlu2 %v7533_v41  ;;  %9502 = vpow2.f32 %v7636_v36 }
 0x7d8   : > { %v9501_v47 = vpop.eup %9500  ;;  %v7324_v31 = vpop.f32.mrf.mxu2 }
 0x7d9   : > { %v7810_v27 = vmul.f32 %v9501_v47, %v7688_v54  ;;  %v7385_v39 = vmul.f32 %v13032_v9, %v7324_v31  ;;  %v7691_v63 = vpop.xlane.xlu1 %7690  ;;  %v7493_v42 = vpop.xlane.xlu0 %7492  ;;  %vm7815_vm5 = vweird.f32 %v9501_v47 }
 0x7da   : > { %9504 = vrcp.f32 %v7691_v63  ;;  %v7580_v46 = vsub.f32 %v12852_v35, %v7493_v42  ;;  %vm7816_vm10 = vmor %vm7814_vm9, %vm7815_vm5  ;;  %v7834_v36 = vand.u32 2147483648, %v7691_v63  ;;  %v7832_v31 = vand.u32 2147483647, %v7691_v63 }
 0x7db   : > { %v7811_v48 = vsub.f32 1.0, %v7810_v27  ;;  %v13053_v2 = vadd.f32 %v13039_v17, %v7385_v39  ;;  %vm7828_vm13 = vweird.f32 %v7691_v63 }
 0x7dc   : > { %v13055_v32 = vpop.eup %9502  ;;  %v7638_v58 = vmul.f32 1.442695, %v7580_v46  ;;  %vm7833_vm15 = vcmp.eq.f32.partialorder %v7832_v31, 8.507059e+37 }
 0x7dd   : > { %v7812_v40 = vmul.f32 %v9501_v47, %v7811_v48  ;;  %v7536_v26 = vsel %vm337_vm8, %v13053_v2, -inf  ;;  %v7734_v15 = vsel %vm337_vm8, %v13055_v32, 0.0  ;;  %v7835_v48 = vor.u32 1.1754944e-38, %v7834_v36 }
 0x7de   : > { %7537 = vmax.xlane.f32.xlu0 %v7536_v26  ;;  %9506 = vpow2.f32 %v7638_v58  ;;  %7735 = vadd.xlane.f32.xlu1 %v7734_v15 }
 0x7df   : > { %v7813_v38 = vadd.f32 %v9501_v47, %v7812_v40 }
 0x7e0   : > { %v9505_v35 = vpop.eup %9504  ;;  %v7326_v24 = vpop.f32.mrf.mxu2 }
 0x7e1   : > { %v7817_v28 = vsel %vm7816_vm10, %v9501_v47, %v7813_v38  ;;  %v7824_v30 = vmul.f32 %v9505_v35, %v7691_v63  ;;  %v7386_v6 = vmul.f32 %v13032_v9, %v7326_v24  ;;  %v7694_v43 = vpop.xlane.xlu2 %7693  ;;  %v7496_v44 = vpop.xlane.xlu1 %7495  ;;  %vm7829_vm12 = vweird.f32 %v9505_v35 }
 0x7e2   : > { %v7822_v23 = vsel %vm7819_vm11, %v7821_v29, %v7817_v28  ;;  %9508 = vrcp.f32 %v7694_v43  ;;  %v7581_v7 = vsub.f32 %v12870_v57, %v7496_v44  ;;  %vm7830_vm14 = vmor %vm7828_vm13, %vm7829_vm12  ;;  %v7848_v24 = vand.u32 2147483648, %v7694_v43 }
 0x7e3   : > { %v8383_v54 = vmul.f32 %v12837_v33, %v7822_v23  ;;  %v7825_v50 = vsub.f32 1.0, %v7824_v30  ;;  %v13071_v51 = vadd.f32 %v13039_v17, %v7386_v6  ;;  %v7846_v6 = vand.u32 2147483647, %v7694_v43 }
 0x7e4   : > { %v13073_v41 = vpop.eup %9506  ;;  %v7640_v27 = vmul.f32 1.442695, %v7581_v7  ;;  %vm7842_vm6 = vweird.f32 %v7694_v43 }
 0x7e5   : > { %8424 = vst.msk [vmem:[%s13066_s16] sm:$0xff] %vm337_vm8, %v8383_v54  ;;  %v7826_v47 = vmul.f32 %v9505_v35, %v7825_v50  ;;  %v7737_v39 = vsel %vm337_vm8, %v13073_v41, 0.0  ;;  %v7539_v33 = vsel %vm337_vm8, %v13071_v51, -inf  ;;  %v7849_v50 = vor.u32 1.1754944e-38, %v7848_v24 }
 0x7e6   : > { %9510 = vpow2.f32 %v7640_v27  ;;  %7738 = vadd.xlane.f32.xlu2 %v7737_v39  ;;  %7540 = vmax.xlane.f32.xlu1 %v7539_v33  ;;  %vm7847_vm3 = vcmp.eq.f32.partialorder %v7846_v6, 8.507059e+37 }
 0x7e7   : > { %v7827_v42 = vadd.f32 %v9505_v35, %v7826_v47 }
 0x7e8   : > { %v9509_v57 = vpop.eup %9508  ;;  %v7329_v46 = vpop.f32.mrf.mxu2 }
 0x7e9   : > { %v7831_v59 = vsel %vm7830_vm14, %v9505_v35, %v7827_v42  ;;  %v7838_v1 = vmul.f32 %v9509_v57, %v7694_v43  ;;  %v7387_v40 = vmul.f32 %v13032_v9, %v7329_v46  ;;  %v7697_v58 = vpop.xlane.xlu0 %7696  ;;  %v7499_v26 = vpop.xlane.xlu2 %7498  ;;  %vm7843_vm0 = vweird.f32 %v9509_v57 }
 0x7ea   : > { %v7836_v15 = vsel %vm7833_vm15, %v7835_v48, %v7831_v59  ;;  %9512 = vrcp.f32 %v7697_v58  ;;  %v7582_v29 = vsub.f32 %v12887_v25, %v7499_v26  ;;  %vm7844_vm1 = vmor %vm7842_vm6, %vm7843_vm0  ;;  %v7862_v43 = vand.u32 2147483648, %v7697_v58 }
 0x7eb   : > { %v8384_v38 = vmul.f32 %v12854_v12, %v7836_v15  ;;  %v7839_v63 = vsub.f32 1.0, %v7838_v1  ;;  %v13085_v28 = vadd.f32 %v13039_v17, %v7387_v40  ;;  %vm7856_vm2 = vweird.f32 %v7697_v58 }
 0x7ec   : > { %v13087_v30 = vpop.eup %9510  ;;  %v7642_v44 = vmul.f32 1.442695, %v7582_v29  ;;  %v7863_v15 = vor.u32 1.1754944e-38, %v7862_v43 }
 0x7ed   : > { %8425 = vst.msk [vmem:[%s13066_s16 + $0x8] sm:$0xff] %vm337_vm8, %v8384_v38  ;;  %v7840_v35 = vmul.f32 %v9509_v57, %v7839_v63  ;;  %v7740_v23 = vsel %vm337_vm8, %v13087_v30, 0.0  ;;  %v7542_v12 = vsel %vm337_vm8, %v13085_v28, -inf }
 0x7ee   : > { %9514 = vpow2.f32 %v7642_v44  ;;  %7741 = vadd.xlane.f32.xlu0 %v7740_v23  ;;  %7543 = vmax.xlane.f32.xlu2 %v7542_v12 }
 0x7ef   : > { %v7841_v54 = vadd.f32 %v9509_v57, %v7840_v35 }
 0x7f0   : > { %v9513_v25 = vpop.eup %9512  ;;  %v7331_v7 = vpop.f32.mrf.mxu2 }
 0x7f1   : > { %v7845_v36 = vsel %vm7844_vm1, %v9509_v57, %v7841_v54  ;;  %v7852_v47 = vmul.f32 %v9513_v25, %v7697_v58  ;;  %v7388_v31 = vmul.f32 %v13032_v9, %v7331_v7  ;;  %v7700_v27 = vpop.xlane.xlu1 %7699  ;;  %vm7857_vm7 = vweird.f32 %v9513_v25  ;;  %v13108_v24 = vpop.xlane.xlu0 %7501 }
 0x7f2   : > { %v7850_v39 = vsel %vm7847_vm3, %v7849_v50, %v7845_v36  ;;  %9516 = vrcp.f32 %v7700_v27  ;;  %v7860_v57 = vand.u32 2147483647, %v7697_v58  ;;  %vm7858_vm5 = vmor %vm7856_vm2, %vm7857_vm7  ;;  %v7876_v12 = vand.u32 2147483648, %v7700_v27 }
 0x7f3   : > { %v8385_v33 = vmul.f32 %v12872_v61, %v7850_v39  ;;  %v7853_v42 = vsub.f32 1.0, %v7852_v47  ;;  %v13098_v48 = vadd.f32 %v13039_v17, %v7388_v31  ;;  %vm7870_vm11 = vweird.f32 %v7700_v27 }
 0x7f4   : > { %v13100_v46 = vpop.eup %9514  ;;  %vm7861_vm9 = vcmp.eq.f32.partialorder %v7860_v57, 8.507059e+37 }
 0x7f5   : > { %8426 = vst.msk [vmem:[%s13066_s16 + $0x10] sm:$0xff] %vm337_vm8, %v8385_v33  ;;  %v7854_v59 = vmul.f32 %v9513_v25, %v7853_v42  ;;  %v7743_v1 = vsel %vm337_vm8, %v13100_v46, 0.0  ;;  %v7545_v40 = vsel %vm337_vm8, %v13098_v48, -inf }
 0x7f6   : > { %7744 = vadd.xlane.f32.xlu1 %v7743_v1  ;;  %7546 = vmax.xlane.f32.xlu0 %v7545_v40 }
 0x7f7   : > { %v7855_v26 = vadd.f32 %v9513_v25, %v7854_v59 }
 0x7f8   : > { %v9517_v61 = vpop.eup %9516  ;;  %v7334_v38 = vpop.f32.mrf.mxu2 }
 0x7f9   : > { %v7859_v63 = vsel %vm7858_vm5, %v9513_v25, %v7855_v26  ;;  %v7866_v29 = vmul.f32 %v9517_v61, %v7700_v27  ;;  %v7389_v35 = vmul.f32 %v13032_v9, %v7334_v38  ;;  %v7703_v6 = vpop.xlane.xlu2 %7702  ;;  %vm7871_vm10 = vweird.f32 %v9517_v61  ;;  %v7505_v42 = vpop.xlane.xlu1 %7504 }
 0x7fa   : > { %v7864_v44 = vsel %vm7861_vm9, %v7863_v15, %v7859_v63  ;;  %9518 = vrcp.f32 %v7703_v6  ;;  %v7874_v25 = vand.u32 2147483647, %v7700_v27  ;;  %vm7872_vm12 = vmor %vm7870_vm11, %vm7871_vm10  ;;  %v7888_v26 = vand.u32 2147483647, %v7703_v6 }
 0x7fb   : > { %v8386_v23 = vmul.f32 %v12889_v10, %v7864_v44  ;;  %v7867_v58 = vsub.f32 1.0, %v7866_v29  ;;  %v13113_v54 = vadd.f32 %v13039_v17, %v7389_v35  ;;  %v7877_v10 = vor.u32 1.1754944e-38, %v7876_v12 }
 0x7fc   : > { %vm7875_vm13 = vcmp.eq.f32.partialorder %v7874_v25, 8.507059e+37  ;;  %v7890_v27 = vand.u32 2147483648, %v7703_v6  ;;  %vm7884_vm15 = vweird.f32 %v7703_v6  ;;  %vm7889_vm6 = vcmp.eq.f32.partialorder %v7888_v26, 8.507059e+37 }
 0x7fd   : > { %8427 = vst.msk [vmem:[%s13066_s16 + $0x18] sm:$0xff] %vm337_vm8, %v8386_v23  ;;  %v7868_v50 = vmul.f32 %v9517_v61, %v7867_v58  ;;  %v7548_v7 = vsel %vm337_vm8, %v13113_v54, -inf }
 0x7fe   : > { %7549 = vmax.xlane.f32.xlu1 %v7548_v7 }
 0x7ff   : > { %v7869_v36 = vadd.f32 %v9517_v61, %v7868_v50 }
 0x800   : > { %v9519_v47 = vpop.eup %9518  ;;  %v7336_v31 = vpop.f32.mrf.mxu2 }
 0x801   : > { %v7873_v39 = vsel %vm7872_vm12, %v9517_v61, %v7869_v36  ;;  %v7880_v33 = vmul.f32 %v9519_v47, %v7703_v6  ;;  %v7390_v43 = vmul.f32 %v13032_v9, %v7336_v31  ;;  %v7706_v59 = vpop.xlane.xlu0 %7705  ;;  %vm7885_vm14 = vweird.f32 %v9519_v47  ;;  %v7508_v50 = vpop.xlane.xlu2 %7507 }
 0x802   : > { %v7878_v57 = vsel %vm7875_vm13, %v7877_v10, %v7873_v39  ;;  %9520 = vrcp.f32 %v7706_v59  ;;  %v7584_v61 = vsub.f32 %v12920_v60, %v7505_v42  ;;  %vm7886_vm0 = vmor %vm7884_vm15, %vm7885_vm14  ;;  %v7904_v6 = vand.u32 2147483648, %v7706_v59 }
 0x803   : > { %v8387_v1 = vmul.f32 %v12907_v52, %v7878_v57  ;;  %v7881_v40 = vsub.f32 1.0, %v7880_v33  ;;  %v13122_v15 = vadd.f32 %v13039_v17, %v7390_v43  ;;  %v7891_v52 = vor.u32 1.1754944e-38, %v7890_v27 }
 0x804   : > { %v7646_v58 = vmul.f32 1.442695, %v7584_v61  ;;  %v7585_v31 = vsub.f32 %v12932_v0, %v7508_v50  ;;  %v7902_v33 = vand.u32 2147483647, %v7706_v59  ;;  %vm7898_vm3 = vweird.f32 %v7706_v59 }
 0x805   : > { %8428 = vst.msk [vmem:[%s13066_s16 + $0x20] sm:$0xff] %vm337_vm8, %v8387_v1  ;;  %v7882_v38 = vmul.f32 %v9519_v47, %v7881_v40  ;;  %v7551_v63 = vsel %vm337_vm8, %v13122_v15, -inf  ;;  %v7905_v57 = vor.u32 1.1754944e-38, %v7904_v6 }
 0x806   : > { %7552 = vmax.xlane.f32.xlu2 %v7551_v63  ;;  %v7648_v1 = vmul.f32 1.442695, %v7585_v31  ;;  %vm7903_vm2 = vcmp.eq.f32.partialorder %v7902_v33, 8.507059e+37 }
 0x807   : > { %v7883_v29 = vadd.f32 %v9519_v47, %v7882_v38 }
 0x808   : > { %v9521_v35 = vpop.eup %9520  ;;  %v7339_v44 = vpop.f32.mrf.mxu2 }
 0x809   : > { %v7887_v23 = vsel %vm7886_vm0, %v9519_v47, %v7883_v29  ;;  %v7894_v12 = vmul.f32 %v9521_v35, %v7706_v59  ;;  %v7391_v25 = vmul.f32 %v13032_v9, %v7339_v44  ;;  %v7709_v7 = vpop.xlane.xlu1 %7708  ;;  %vm7899_vm1 = vweird.f32 %v9521_v35  ;;  %v13139_v0 = vpop.xlane.xlu0 %7510 }
 0x80a   : > { %v7892_v60 = vsel %vm7889_vm6, %v7891_v52, %v7887_v23  ;;  %9522 = vrcp.f32 %v7709_v7  ;;  %vm7900_vm7 = vmor %vm7898_vm3, %vm7899_vm1  ;;  %vm7912_vm9 = vweird.f32 %v7709_v7 }
 0x80b   : > { %v8388_v36 = vmul.f32 %v12922_v8, %v7892_v60  ;;  %v7895_v10 = vsub.f32 1.0, %v7894_v12  ;;  %v13133_v39 = vadd.f32 %v13039_v17, %v7391_v25  ;;  %9524 = vpow2.f32 %v7646_v58 }
 0x80c   : > { %v7918_v58 = vand.u32 2147483648, %v7709_v7  ;;  %v7916_v25 = vand.u32 2147483647, %v7709_v7 }
 0x80d   : > { %8429 = vst.msk [vmem:[%s13066_s16 + $0x28] sm:$0xff] %vm337_vm8, %v8388_v36  ;;  %v7896_v47 = vmul.f32 %v9521_v35, %v7895_v10  ;;  %v7554_v42 = vsel %vm337_vm8, %v13133_v39, -inf }
 0x80e   : > { %7555 = vmax.xlane.f32.xlu0 %v7554_v42  ;;  %v7919_v10 = vor.u32 1.1754944e-38, %v7918_v58  ;;  %vm7917_vm11 = vcmp.eq.f32.partialorder %v7916_v25, 8.507059e+37 }
 0x80f   : > { %v7897_v43 = vadd.f32 %v9521_v35, %v7896_v47 }
 0x810   : > { %v9523_v8 = vpop.eup %9522  ;;  %v7341_v40 = vpop.f32.mrf.mxu2 }
 0x811   : > { %v7901_v26 = vsel %vm7900_vm7, %v9521_v35, %v7897_v43  ;;  %v7908_v27 = vmul.f32 %v9523_v8, %v7709_v7  ;;  %v7392_v38 = vmul.f32 %v13032_v9, %v7341_v40  ;;  %v13142_v61 = vpop.xlane.xlu2 %7711  ;;  %v7514_v63 = vpop.xlane.xlu1 %7513  ;;  %v7583_v35 = vsub.f32 %v12905_v45, %v13108_v24 }
 0x812   : > { %v7906_v29 = vsel %vm7903_vm2, %v7905_v57, %v7901_v26  ;;  %9526 = vrcp.f32 %v13142_v61  ;;  %v13145_v59 = vpop.eup %9524  ;;  %v7587_v23 = vsub.f32 %v12955_v34, %v7514_v63  ;;  %vm7913_vm5 = vweird.f32 %v9523_v8 }
 0x813   : > { %v8389_v52 = vmul.f32 %v12934_v37, %v7906_v29  ;;  %v7909_v44 = vsub.f32 1.0, %v7908_v27  ;;  %9528 = vpow2.f32 %v7648_v1  ;;  %v13152_v12 = vadd.f32 %v13039_v17, %v7392_v38  ;;  %vm7914_vm10 = vmor %vm7912_vm9, %vm7913_vm5 }
 0x814   : > { %v7652_v60 = vmul.f32 1.442695, %v7587_v23  ;;  %v7749_v37 = vsel %vm337_vm8, %v13145_v59, 0.0  ;;  %v7644_v24 = vmul.f32 1.442695, %v7583_v35  ;;  %vm7926_vm13 = vweird.f32 %v13142_v61 }
 0x815   : > { %8430 = vst.msk [vmem:[%s13066_s16 + $0x30] sm:$0xff] %vm337_vm8, %v8389_v52  ;;  %v7910_v50 = vmul.f32 %v9523_v8, %v7909_v44  ;;  %v7557_v34 = vsel %vm337_vm8, %v13152_v12, -inf  ;;  %v7930_v63 = vand.u32 2147483647, %v13142_v61 }
 0x816   : > { %9530 = vpow2.f32 %v7652_v60  ;;  %7750 = vadd.xlane.f32.xlu0 %v7749_v37  ;;  %7558 = vmax.xlane.f32.xlu1 %v7557_v34 }
 0x817   : > { %v7911_v36 = vadd.f32 %v9523_v8, %v7910_v50  ;;  %vm7931_vm15 = vcmp.eq.f32.partialorder %v7930_v63, 8.507059e+37 }
 0x818   : > { %v9527_v45 = vpop.eup %9526  ;;  %v7344_v6 = vpop.f32.mrf.mxu2 }
 0x819   : > { %v7915_v31 = vsel %vm7914_vm10, %v9523_v8, %v7911_v36  ;;  %v7922_v47 = vmul.f32 %v9527_v45, %v13142_v61  ;;  %v7393_v33 = vmul.f32 %v13032_v9, %v7344_v6  ;;  %v7715_v42 = vpop.xlane.xlu0 %7714  ;;  %v7517_v43 = vpop.xlane.xlu2 %7516  ;;  %v7932_v8 = vand.u32 2147483648, %v13142_v61 }
 0x81a   : > { %v13162_v57 = vpop.eup %9528  ;;  %v7920_v7 = vsel %vm7917_vm11, %v7919_v10, %v7915_v31  ;;  %9532 = vrcp.f32 %v7715_v42  ;;  %v7588_v26 = vsub.f32 %v12966_v19, %v7517_v43  ;;  %vm7927_vm12 = vweird.f32 %v9527_v45 }
 0x81b   : > { %v8390_v1 = vmul.f32 %v12945_v13, %v7920_v7  ;;  %v7923_v40 = vsub.f32 1.0, %v7922_v47  ;;  %9534 = vpow2.f32 %v7644_v24  ;;  %v13168_v27 = vadd.f32 %v13039_v17, %v7393_v33  ;;  %vm7928_vm14 = vmor %vm7926_vm13, %vm7927_vm12 }
 0x81c   : > { %v13170_v38 = vpop.eup %9530  ;;  %v7654_v29 = vmul.f32 1.442695, %v7588_v26  ;;  %v7586_v13 = vsub.f32 %v12943_v49, %v13139_v0  ;;  %v7752_v52 = vsel %vm337_vm8, %v13162_v57, 0.0  ;;  %v7933_v35 = vor.u32 1.1754944e-38, %v7932_v8 }
 0x81d   : > { %8431 = vst.msk [vmem:[%s13066_s16 + $0x38] sm:$0xff] %vm337_vm8, %v8390_v1  ;;  %v7924_v9 = vmul.f32 %v9527_v45, %v7923_v40  ;;  %v7758_v19 = vsel %vm337_vm8, %v13170_v38, 0.0  ;;  %v7560_v17 = vsel %vm384_vm4, %v13168_v27, -inf  ;;  %v7946_v24 = vand.u32 2147483648, %v7715_v42 }
 0x81e   : > { %9536 = vpow2.f32 %v7654_v29  ;;  %7759 = vadd.xlane.f32.xlu0 %v7758_v19  ;;  %7753 = vadd.xlane.f32.xlu1 %v7752_v52  ;;  %v7650_v60 = vmul.f32 1.442695, %v7586_v13  ;;  %vm7940_vm6 = vweird.f32 %v7715_v42 }
 0x81f   : > { %v7925_v44 = vadd.f32 %v9527_v45, %v7924_v9  ;;  %7561 = vmax.xlane.f32.xlu2 %v7560_v17  ;;  %v7947_v7 = vor.u32 1.1754944e-38, %v7946_v24 }
 0x820   : > { %v9533_v23 = vpop.eup %9532  ;;  %v7346_v49 = vpop.f32.mrf.mxu2 }
 0x821   : > { %v7929_v0 = vsel %vm7928_vm14, %v9527_v45, %v7925_v44  ;;  %v7936_v58 = vmul.f32 %v9533_v23, %v7715_v42  ;;  %v7718_v50 = vpop.xlane.xlu1 %7717  ;;  %v13184_v25 = vpop.eup %9534  ;;  %vm7941_vm0 = vweird.f32 %v9533_v23  ;;  %v7944_v45 = vand.u32 2147483647, %v7715_v42 }
 0x822   : > { %v7934_v37 = vsel %vm7931_vm15, %v7933_v35, %v7929_v0  ;;  %9538 = vrcp.f32 %v7718_v50  ;;  %v7520_v36 = vpop.xlane.xlu0 %7519  ;;  %vm7942_vm1 = vmor %vm7940_vm6, %vm7941_vm0  ;;  %v7960_v19 = vand.u32 2147483648, %v7718_v50  ;;  %v7958_v17 = vand.u32 2147483647, %v7718_v50 }
 0x823   : > { %v8391_v61 = vmul.f32 %v12957_v53, %v7934_v37  ;;  %v7937_v34 = vsub.f32 1.0, %v7936_v58  ;;  %9540 = vpow2.f32 %v7650_v60  ;;  %v7589_v31 = vsub.f32 %v12977_v62, %v7520_v36 }
 0x824   : > { %v13187_v10 = vpop.eup %9536  ;;  %v7746_v53 = vsel %vm337_vm8, %v13184_v25, 0.0  ;;  %vm7945_vm3 = vcmp.eq.f32.partialorder %v7944_v45, 8.507059e+37  ;;  %vm7954_vm2 = vweird.f32 %v7718_v50  ;;  %vm7959_vm9 = vcmp.eq.f32.partialorder %v7958_v17, 8.507059e+37 }
 0x825   : > { %8432 = vst.msk [vmem:[%s13066_s16 + $0x40] sm:$0xff] %vm337_vm8, %v8391_v61  ;;  %v7938_v6 = vmul.f32 %v9533_v23, %v7937_v34  ;;  %v7761_v47 = vsel %vm337_vm8, %v13187_v10, 0.0  ;;  %v7656_v9 = vmul.f32 1.442695, %v7589_v31 }
 0x826   : > { %7762 = vadd.xlane.f32.xlu1 %v7761_v47 }
 0x827   : > { %v7939_v33 = vadd.f32 %v9533_v23, %v7938_v6  ;;  %7747 = vadd.xlane.f32.xlu2 %v7746_v53 }
 0x828   : > { %v9539_v43 = vpop.eup %9538 }
 0x829   : > { %v7943_v1 = vsel %vm7942_vm1, %v9533_v23, %v7939_v33  ;;  %v7950_v40 = vmul.f32 %v9539_v43, %v7718_v50  ;;  %v7721_v26 = vpop.xlane.xlu2 %7720  ;;  %v7523_v8 = vpop.xlane.xlu1 %7522  ;;  %vm7955_vm7 = vweird.f32 %v9539_v43 }
 0x82a   : > { %v7948_v62 = vsel %vm7945_vm3, %v7947_v7, %v7943_v1  ;;  %9542 = vrcp.f32 %v7721_v26  ;;  %v7590_v29 = vsub.f32 %v12988_v5, %v7523_v8  ;;  %v13198_v13 = vpop.eup %9540  ;;  %vm7956_vm5 = vmor %vm7954_vm2, %vm7955_vm7  ;;  %v7961_v5 = vor.u32 1.1754944e-38, %v7960_v19 }
 0x82b   : > { %v8392_v63 = vmul.f32 %v12968_v4, %v7948_v62  ;;  %v7951_v42 = vsub.f32 1.0, %v7950_v40  ;;  %9544 = vpow2.f32 %v7656_v9  ;;  %v7755_v35 = vsel %vm337_vm8, %v13198_v13, 0.0 }
 0x82c   : > { %v7658_v44 = vmul.f32 1.442695, %v7590_v29  ;;  %v7974_v24 = vand.u32 2147483648, %v7721_v26  ;;  %v7972_v31 = vand.u32 2147483647, %v7721_v26  ;;  %vm7968_vm11 = vweird.f32 %v7721_v26 }
 0x82d   : > { %8433 = vst.msk [vmem:[%s13066_s16 + $0x48] sm:$0xff] %vm337_vm8, %v8392_v63  ;;  %v7952_v52 = vmul.f32 %v9539_v43, %v7951_v42 }
 0x82e   : > { %9546 = vpow2.f32 %v7658_v44  ;;  %vm7973_vm13 = vcmp.eq.f32.partialorder %v7972_v31, 8.507059e+37 }
 0x82f   : > { %v7953_v23 = vadd.f32 %v9539_v43, %v7952_v52  ;;  %7756 = vadd.xlane.f32.xlu2 %v7755_v35 }
 0x830   : > { %v9543_v4 = vpop.eup %9542 }
 0x831   : > { %v7957_v49 = vsel %vm7956_vm5, %v9539_v43, %v7953_v23  ;;  %v7964_v0 = vmul.f32 %v9543_v4, %v7721_v26  ;;  %v7724_v58 = vpop.xlane.xlu0 %7723  ;;  %v7526_v60 = vpop.xlane.xlu2 %7525  ;;  %vm7969_vm10 = vweird.f32 %v9543_v4  ;;  %v7975_v43 = vor.u32 1.1754944e-38, %v7974_v24 }
 0x832   : > { %v7962_v37 = vsel %vm7959_vm9, %v7961_v5, %v7957_v49  ;;  %9548 = vrcp.f32 %v7724_v58  ;;  %v7591_v50 = vsub.f32 %v12999_v18, %v7526_v60  ;;  %v13206_v36 = vpop.eup %9544  ;;  %vm7970_vm12 = vmor %vm7968_vm11, %vm7969_vm10  ;;  %v7988_v42 = vand.u32 2147483648, %v7724_v58 }
 0x833   : > { %v8393_v61 = vmul.f32 %v12979_v22, %v7962_v37  ;;  %v7965_v34 = vsub.f32 1.0, %v7964_v0  ;;  %v7764_v22 = vsel %vm337_vm8, %v13206_v36, 0.0  ;;  %v7986_v52 = vand.u32 2147483647, %v7724_v58 }
 0x834   : > { %v13208_v6 = vpop.eup %9546  ;;  %v7660_v47 = vmul.f32 1.442695, %v7591_v50  ;;  %vm7982_vm15 = vweird.f32 %v7724_v58 }
 0x835   : > { %8434 = vst.msk [vmem:[%s13066_s16 + $0x50] sm:$0xff] %vm337_vm8, %v8393_v61  ;;  %v7966_v45 = vmul.f32 %v9543_v4, %v7965_v34  ;;  %v7767_v33 = vsel %vm337_vm8, %v13208_v6, 0.0  ;;  %vm7987_vm6 = vcmp.eq.f32.partialorder %v7986_v52, 8.507059e+37 }
 0x836   : > { %9550 = vpow2.f32 %v7660_v47  ;;  %7768 = vadd.xlane.f32.xlu0 %v7767_v33 }
 0x837   : > { %v7967_v53 = vadd.f32 %v9543_v4, %v7966_v45  ;;  %7765 = vadd.xlane.f32.xlu2 %v7764_v22 }
 0x838   : > { %v9549_v18 = vpop.eup %9548 }
 0x839   : > { %v7971_v7 = vsel %vm7970_vm12, %v9543_v4, %v7967_v53  ;;  %v7978_v1 = vmul.f32 %v9549_v18, %v7724_v58  ;;  %v7727_v40 = vpop.xlane.xlu1 %7726  ;;  %v7529_v8 = vpop.xlane.xlu0 %7528  ;;  %vm7983_vm14 = vweird.f32 %v9549_v18 }
 0x83a   : > { %v7976_v62 = vsel %vm7973_vm13, %v7975_v43, %v7971_v7  ;;  %9552 = vrcp.f32 %v7727_v40  ;;  %v7592_v63 = vsub.f32 %v13010_v16, %v7529_v8  ;;  %vm7984_vm0 = vmor %vm7982_vm15, %vm7983_vm14  ;;  %v7989_v16 = vor.u32 1.1754944e-38, %v7988_v42 }
 0x83b   : > { %v8394_v9 = vmul.f32 %v12990_v3, %v7976_v62  ;;  %v7979_v26 = vsub.f32 1.0, %v7978_v1  ;;  %v8002_v34 = vand.u32 2147483648, %v7727_v40  ;;  %v8000_v24 = vand.u32 2147483647, %v7727_v40 }
 0x83c   : > { %v13218_v29 = vpop.eup %9550  ;;  %v7662_v17 = vmul.f32 1.442695, %v7592_v63  ;;  %vm7996_vm3 = vweird.f32 %v7727_v40 }
 0x83d   : > { %8435 = vst.msk [vmem:[%s13066_s16 + $0x58] sm:$0xff] %vm337_vm8, %v8394_v9  ;;  %v7980_v19 = vmul.f32 %v9549_v18, %v7979_v26  ;;  %v7770_v44 = vsel %vm337_vm8, %v13218_v29, 0.0  ;;  %vm8001_vm2 = vcmp.eq.f32.partialorder %v8000_v24, 8.507059e+37 }
 0x83e   : > { %9554 = vpow2.f32 %v7662_v17  ;;  %7771 = vadd.xlane.f32.xlu1 %v7770_v44 }
 0x83f   : > { %v7981_v23 = vadd.f32 %v9549_v18, %v7980_v19 }
 0x840   : > { %v9553_v3 = vpop.eup %9552 }
 0x841   : > { %v7985_v35 = vsel %vm7984_vm0, %v9549_v18, %v7981_v23  ;;  %v7992_v4 = vmul.f32 %v9553_v3, %v7727_v40  ;;  %v7730_v5 = vpop.xlane.xlu2 %7729  ;;  %v7532_v49 = vpop.xlane.xlu1 %7531  ;;  %vm7997_vm1 = vweird.f32 %v9553_v3 }
 0x842   : > { %v7990_v0 = vsel %vm7987_vm6, %v7989_v16, %v7985_v35  ;;  %9556 = vrcp.f32 %v7730_v5  ;;  %v7593_v61 = vsub.f32 %v13021_v11, %v7532_v49  ;;  %vm7998_vm7 = vmor %vm7996_vm3, %vm7997_vm1  ;;  %v8003_v11 = vor.u32 1.1754944e-38, %v8002_v34 }
 0x843   : > { %v8395_v60 = vmul.f32 %v13001_v56, %v7990_v0  ;;  %v7993_v37 = vsub.f32 1.0, %v7992_v4  ;;  %v8016_v62 = vand.u32 2147483648, %v7730_v5  ;;  %v8014_v26 = vand.u32 2147483647, %v7730_v5 }
 0x844   : > { %v13226_v58 = vpop.eup %9554  ;;  %v7664_v45 = vmul.f32 1.442695, %v7593_v61  ;;  %vm8010_vm9 = vweird.f32 %v7730_v5 }
 0x845   : > { %8436 = vst.msk [vmem:[%s13066_s16 + $0x60] sm:$0xff] %vm337_vm8, %v8395_v60  ;;  %v7994_v50 = vmul.f32 %v9553_v3, %v7993_v37  ;;  %v7773_v31 = vsel %vm337_vm8, %v13226_v58, 0.0  ;;  %vm8015_vm11 = vcmp.eq.f32.partialorder %v8014_v26, 8.507059e+37 }
 0x846   : > { %9558 = vpow2.f32 %v7664_v45  ;;  %7774 = vadd.xlane.f32.xlu2 %v7773_v31 }
 0x847   : > { %v7995_v47 = vadd.f32 %v9553_v3, %v7994_v50 }
 0x848   : > { %v9557_v56 = vpop.eup %9556 }
 0x849   : > { %v7999_v33 = vsel %vm7998_vm7, %v9553_v3, %v7995_v47  ;;  %v8006_v53 = vmul.f32 %v9557_v56, %v7730_v5  ;;  %v7733_v22 = vpop.xlane.xlu0 %7732  ;;  %v7535_v18 = vpop.xlane.xlu2 %7534  ;;  %vm8011_vm5 = vweird.f32 %v9557_v56 }
 0x84a   : > { %v8004_v43 = vsel %vm8001_vm2, %v8003_v11, %v7999_v33  ;;  %9560 = vrcp.f32 %v7733_v22  ;;  %v7594_v8 = vsub.f32 %v13042_v14, %v7535_v18  ;;  %vm8012_vm10 = vmor %vm8010_vm9, %vm8011_vm5  ;;  %v8017_v14 = vor.u32 1.1754944e-38, %v8016_v62 }
 0x84b   : > { %v8396_v7 = vmul.f32 %v13012_v21, %v8004_v43  ;;  %v8007_v1 = vsub.f32 1.0, %v8006_v53  ;;  %v8030_v49 = vand.u32 2147483648, %v7733_v22  ;;  %v8028_v37 = vand.u32 2147483647, %v7733_v22 }
 0x84c   : > { %v13234_v40 = vpop.eup %9558  ;;  %v7666_v63 = vmul.f32 1.442695, %v7594_v8  ;;  %vm8024_vm13 = vweird.f32 %v7733_v22 }
 0x84d   : > { %8437 = vst.msk [vmem:[%s13066_s16 + $0x68] sm:$0xff] %vm337_vm8, %v8396_v7  ;;  %v8008_v9 = vmul.f32 %v9557_v56, %v8007_v1  ;;  %v7776_v42 = vsel %vm337_vm8, %v13234_v40, 0.0  ;;  %vm8029_vm15 = vcmp.eq.f32.partialorder %v8028_v37, 8.507059e+37 }
 0x84e   : > { %9562 = vpow2.f32 %v7666_v63  ;;  %7777 = vadd.xlane.f32.xlu0 %v7776_v42 }
 0x84f   : > { %v8009_v19 = vadd.f32 %v9557_v56, %v8008_v9 }
 0x850   : > { %v9561_v21 = vpop.eup %9560 }
 0x851   : > { %v8013_v52 = vsel %vm8012_vm10, %v9557_v56, %v8009_v19  ;;  %v8020_v17 = vmul.f32 %v9561_v21, %v7733_v22  ;;  %v7538_v44 = vpop.xlane.xlu0 %7537  ;;  %v7736_v3 = vpop.xlane.xlu1 %7735  ;;  %vm8025_vm12 = vweird.f32 %v9561_v21 }
 0x852   : > { %v8018_v23 = vsel %vm8015_vm11, %v8017_v14, %v8013_v52  ;;  %v7595_v16 = vsub.f32 %v13053_v2, %v7538_v44  ;;  %9564 = vrcp.f32 %v7736_v3  ;;  %vm8026_vm14 = vmor %vm8024_vm13, %vm8025_vm12  ;;  %v8044_v22 = vand.u32 2147483648, %v7736_v3 }
 0x853   : > { %v8397_v35 = vmul.f32 %v13023_v20, %v8018_v23  ;;  %v8021_v4 = vsub.f32 1.0, %v8020_v17  ;;  %v8031_v20 = vor.u32 1.1754944e-38, %v8030_v49  ;;  %v8042_v7 = vand.u32 2147483647, %v7736_v3 }
 0x854   : > { %v7668_v5 = vmul.f32 1.442695, %v7595_v16  ;;  %v13242_v0 = vpop.eup %9562  ;;  %vm8038_vm6 = vweird.f32 %v7736_v3  ;;  %v8045_v62 = vor.u32 1.1754944e-38, %v8044_v22 }
 0x855   : > { %8438 = vst.msk [vmem:[%s13066_s16 + $0x70] sm:$0xff] %vm337_vm8, %v8397_v35  ;;  %v8022_v60 = vmul.f32 %v9561_v21, %v8021_v4  ;;  %v7779_v61 = vsel %vm337_vm8, %v13242_v0, 0.0  ;;  %vm8043_vm3 = vcmp.eq.f32.partialorder %v8042_v7, 8.507059e+37 }
 0x856   : > { %9566 = vpow2.f32 %v7668_v5  ;;  %7780 = vadd.xlane.f32.xlu1 %v7779_v61 }
 0x857   : > { %v8023_v34 = vadd.f32 %v9561_v21, %v8022_v60 }
 0x858   : > { %v9565_v2 = vpop.eup %9564 }
 0x859   : > { %v8027_v50 = vsel %vm8026_vm14, %v9561_v21, %v8023_v34  ;;  %v8034_v45 = vmul.f32 %v9565_v2, %v7736_v3  ;;  %v7739_v31 = vpop.xlane.xlu2 %7738  ;;  %v7541_v47 = vpop.xlane.xlu1 %7540  ;;  %vm8039_vm0 = vweird.f32 %v9565_v2 }
 0x85a   : > { %v8032_v24 = vsel %vm8029_vm15, %v8031_v20, %v8027_v50  ;;  %9568 = vrcp.f32 %v7739_v31  ;;  %v7596_v53 = vsub.f32 %v13071_v51, %v7541_v47  ;;  %vm8040_vm1 = vmor %vm8038_vm6, %vm8039_vm0  ;;  %v8058_v52 = vand.u32 2147483648, %v7739_v31 }
 0x85b   : > { %v8398_v56 = vmul.f32 %v13044_v55, %v8032_v24  ;;  %v8035_v33 = vsub.f32 1.0, %v8034_v45  ;;  %v8056_v23 = vand.u32 2147483647, %v7739_v31  ;;  %vm8052_vm2 = vweird.f32 %v7739_v31 }
 0x85c   : > { %v13249_v11 = vpop.eup %9566  ;;  %v7670_v1 = vmul.f32 1.442695, %v7596_v53 }
 0x85d   : > { %8439 = vst.msk [vmem:[%s13066_s16 + $0x78] sm:$0xff] %vm337_vm8, %v8398_v56  ;;  %v7782_v18 = vsel %vm337_vm8, %v13249_v11, 0.0  ;;  %v8036_v43 = vmul.f32 %v9565_v2, %v8035_v33  ;;  %vm8057_vm9 = vcmp.eq.f32.partialorder %v8056_v23, 8.507059e+37 }
 0x85e   : > { %7783 = vadd.xlane.f32.xlu2 %v7782_v18  ;;  %9570 = vpow2.f32 %v7670_v1 }
 0x85f   : > { %v8037_v8 = vadd.f32 %v9565_v2, %v8036_v43 }
 0x860   : > { %v9569_v55 = vpop.eup %9568 }
 0x861   : > { %v8041_v9 = vsel %vm8040_vm1, %v9565_v2, %v8037_v8  ;;  %v8048_v51 = vmul.f32 %v9569_v55, %v7739_v31  ;;  %v7742_v26 = vpop.xlane.xlu0 %7741  ;;  %v7544_v63 = vpop.xlane.xlu2 %7543  ;;  %vm8053_vm7 = vweird.f32 %v9569_v55 }
 0x862   : > { %v8046_v42 = vsel %vm8043_vm3, %v8045_v62, %v8041_v9  ;;  %9572 = vrcp.f32 %v7742_v26  ;;  %v7597_v14 = vsub.f32 %v13085_v28, %v7544_v63  ;;  %vm8054_vm5 = vmor %vm8052_vm2, %vm8053_vm7  ;;  %v8059_v28 = vor.u32 1.1754944e-38, %v8058_v52 }
 0x863   : > { %v8399_v19 = vmul.f32 %v13055_v32, %v8046_v42  ;;  %v8049_v21 = vsub.f32 1.0, %v8048_v51  ;;  %v8072_v2 = vand.u32 2147483648, %v7742_v26  ;;  %v8070_v45 = vand.u32 2147483647, %v7742_v26 }
 0x864   : > { %v13258_v17 = vpop.eup %9570  ;;  %v7672_v3 = vmul.f32 1.442695, %v7597_v14  ;;  %vm8066_vm11 = vweird.f32 %v7742_v26 }
 0x865   : > { %8440 = vst.msk [vmem:[%s13066_s16 + $0x80] sm:$0xff] %vm337_vm8, %v8399_v19  ;;  %v8050_v44 = vmul.f32 %v9569_v55, %v8049_v21  ;;  %v7785_v16 = vsel %vm337_vm8, %v13258_v17, 0.0  ;;  %vm8071_vm13 = vcmp.eq.f32.partialorder %v8070_v45, 8.507059e+37 }
 0x866   : > { %9574 = vpow2.f32 %v7672_v3  ;;  %7786 = vadd.xlane.f32.xlu0 %v7785_v16 }
 0x867   : > { %v8051_v35 = vadd.f32 %v9569_v55, %v8050_v44 }
 0x868   : > { %v9573_v32 = vpop.eup %9572 }
 0x869   : > { %v8055_v4 = vsel %vm8054_vm5, %v9569_v55, %v8051_v35  ;;  %v8062_v49 = vmul.f32 %v9573_v32, %v7742_v26  ;;  %v7745_v5 = vpop.xlane.xlu1 %7744  ;;  %v7547_v60 = vpop.xlane.xlu0 %7546  ;;  %vm8067_vm10 = vweird.f32 %v9573_v32 }
 0x86a   : > { %v8060_v37 = vsel %vm8057_vm9, %v8059_v28, %v8055_v4  ;;  %9576 = vrcp.f32 %v7745_v5  ;;  %v7598_v20 = vsub.f32 %v13098_v48, %v7547_v60  ;;  %vm8068_vm12 = vmor %vm8066_vm11, %vm8067_vm10  ;;  %v8073_v48 = vor.u32 1.1754944e-38, %v8072_v2 }
 0x86b   : > { %v8400_v61 = vmul.f32 %v13073_v41, %v8060_v37  ;;  %v8063_v34 = vsub.f32 1.0, %v8062_v49  ;;  %v8086_v8 = vand.u32 2147483648, %v7745_v5  ;;  %v8084_v51 = vand.u32 2147483647, %v7745_v5 }
 0x86c   : > { %v13266_v50 = vpop.eup %9574  ;;  %v7674_v31 = vmul.f32 1.442695, %v7598_v20  ;;  %vm8080_vm15 = vweird.f32 %v7745_v5 }
 0x86d   : > { %8441 = vst.msk [vmem:[%s13066_s16 + $0x88] sm:$0xff] %vm337_vm8, %v8400_v61  ;;  %v8064_v24 = vmul.f32 %v9573_v32, %v8063_v34  ;;  %v7788_v47 = vsel %vm337_vm8, %v13266_v50, 0.0  ;;  %vm8085_vm6 = vcmp.eq.f32.partialorder %v8084_v51, 8.507059e+37 }
 0x86e   : > { %9578 = vpow2.f32 %v7674_v31  ;;  %7789 = vadd.xlane.f32.xlu1 %v7788_v47 }
 0x86f   : > { %v8065_v56 = vadd.f32 %v9573_v32, %v8064_v24 }
 0x870   : > { %v9577_v41 = vpop.eup %9576 }
 0x871   : > { %v8069_v33 = vsel %vm8068_vm12, %v9573_v32, %v8065_v56  ;;  %v8076_v53 = vmul.f32 %v9577_v41, %v7745_v5  ;;  %v7550_v22 = vpop.xlane.xlu1 %7549  ;;  %vm8081_vm14 = vweird.f32 %v9577_v41 }
 0x872   : > { %v8074_v18 = vsel %vm8071_vm13, %v8073_v48, %v8069_v33  ;;  %v7599_v43 = vsub.f32 %v13113_v54, %v7550_v22  ;;  %vm8082_vm0 = vmor %vm8080_vm15, %vm8081_vm14 }
 0x873   : > { %v8401_v7 = vmul.f32 %v13087_v30, %v8074_v18  ;;  %v8077_v1 = vsub.f32 1.0, %v8076_v53  ;;  %v8087_v30 = vor.u32 1.1754944e-38, %v8086_v8 }
 0x874   : > { %v7676_v55 = vmul.f32 1.442695, %v7599_v43  ;;  %v13274_v62 = vpop.eup %9578 }
 0x875   : > { %8442 = vst.msk [vmem:[%s13066_s16 + $0x90] sm:$0xff] %vm337_vm8, %v8401_v7  ;;  %v8078_v9 = vmul.f32 %v9577_v41, %v8077_v1  ;;  %v7791_v26 = vsel %vm337_vm8, %v13274_v62, 0.0 }
 0x876   : > { %9580 = vpow2.f32 %v7676_v55  ;;  %7792 = vadd.xlane.f32.xlu2 %v7791_v26 }
 0x877   : > { %v8079_v63 = vadd.f32 %v9577_v41, %v8078_v9 }
 0x879   : > { %v8083_v54 = vsel %vm8082_vm0, %v9577_v41, %v8079_v63  ;;  %v7553_v42 = vpop.xlane.xlu2 %7552 }
 0x87a   : > { %v8088_v19 = vsel %vm8085_vm6, %v8087_v30, %v8083_v54  ;;  %v7600_v21 = vsub.f32 %v13122_v15, %v7553_v42 }
 0x87b   : > { %v8402_v14 = vmul.f32 %v13100_v46, %v8088_v19 }
 0x87c   : > { %v13282_v52 = vpop.eup %9580  ;;  %v7678_v44 = vmul.f32 1.442695, %v7600_v21 }
 0x87d   : > { %8443 = vst.msk [vmem:[%s13066_s16 + $0x98] sm:$0xff] %vm337_vm8, %v8402_v14  ;;  %v7794_v23 = vsel %vm337_vm8, %v13282_v52, 0.0 }
 0x87e   : > { %9582 = vpow2.f32 %v7678_v44  ;;  %7795 = vadd.xlane.f32.xlu0 %v7794_v23 }
 0x881   : > { %v7556_v3 = vpop.xlane.xlu0 %7555 }
 0x882   : > { %v7601_v16 = vsub.f32 %v13133_v39, %v7556_v3 }
 0x884   : > { %v13289_v35 = vpop.eup %9582  ;;  %v7680_v32 = vmul.f32 1.442695, %v7601_v16 }
 0x885   : > { %v7797_v15 = vsel %vm337_vm8, %v13289_v35, 0.0 }
 0x886   : > { %9584 = vpow2.f32 %v7680_v32  ;;  %7798 = vadd.xlane.f32.xlu1 %v7797_v15 }
 0x889   : > { %v7751_v46 = vpop.xlane.xlu0 %7750  ;;  %v7559_v28 = vpop.xlane.xlu1 %7558 }
 0x88a   : > { %9586 = vrcp.f32 %v7751_v46  ;;  %v7602_v4 = vsub.f32 %v13152_v12, %v7559_v28  ;;  %v8114_v24 = vand.u32 2147483648, %v7751_v46  ;;  %v8112_v47 = vand.u32 2147483647, %v7751_v46 }
 0x88b   : > { %vm8108_vm3 = vweird.f32 %v7751_v46 }
 0x88c   : > { %v13294_v49 = vpop.eup %9584  ;;  %v7682_v5 = vmul.f32 1.442695, %v7602_v4  ;;  %v8115_v53 = vor.u32 1.1754944e-38, %v8114_v24  ;;  %vm8113_vm2 = vcmp.eq.f32.partialorder %v8112_v47, 8.507059e+37 }
 0x88d   : > { %v7800_v60 = vsel %vm337_vm8, %v13294_v49, 0.0 }
 0x88e   : > { %7801 = vadd.xlane.f32.xlu2 %v7800_v60  ;;  %9588 = vpow2.f32 %v7682_v5 }
 0x890   : > { %v9587_v39 = vpop.eup %9586 }
 0x891   : > { %v8104_v37 = vmul.f32 %v9587_v39, %v7751_v46  ;;  %v7760_v61 = vpop.xlane.xlu0 %7759  ;;  %v7754_v34 = vpop.xlane.xlu1 %7753  ;;  %vm8109_vm1 = vweird.f32 %v9587_v39 }
 0x892   : > { %9590 = vrcp.f32 %v7760_v61  ;;  %v7562_v20 = vpop.xlane.xlu2 %7561  ;;  %vm8110_vm7 = vmor %vm8108_vm3, %vm8109_vm1  ;;  %v8156_v51 = vand.u32 2147483648, %v7760_v61  ;;  %v8154_v30 = vand.u32 2147483647, %v7760_v61  ;;  %v8128_v54 = vand.u32 2147483648, %v7754_v34 }
 0x893   : > { %v8105_v2 = vsub.f32 1.0, %v8104_v37  ;;  %9592 = vrcp.f32 %v7754_v34  ;;  %v7603_v45 = vsub.f32 %v13168_v27, %v7562_v20  ;;  %v8126_v21 = vand.u32 2147483647, %v7754_v34 }
 0x894   : > { %v13299_v12 = vpop.eup %9588  ;;  %vm8150_vm10 = vweird.f32 %v7760_v61  ;;  %v8157_v23 = vor.u32 1.1754944e-38, %v8156_v51  ;;  %vm8122_vm12 = vweird.f32 %v7754_v34  ;;  %vm8155_vm13 = vcmp.eq.f32.partialorder %v8154_v30, 8.507059e+37 }
 0x895   : > { %v8106_v31 = vmul.f32 %v9587_v39, %v8105_v2  ;;  %v7684_v56 = vmul.f32 1.442695, %v7603_v45  ;;  %v7803_v41 = vsel %vm337_vm8, %v13299_v12, 0.0  ;;  %v8129_v32 = vor.u32 1.1754944e-38, %v8128_v54 }
 0x896   : > { %7804 = vadd.xlane.f32.xlu0 %v7803_v41  ;;  %vm8127_vm15 = vcmp.eq.f32.partialorder %v8126_v21, 8.507059e+37 }
 0x897   : > { %v8107_v48 = vadd.f32 %v9587_v39, %v8106_v31  ;;  %9594 = vpow2.f32 %v7684_v56 }
 0x898   : > { %v9591_v33 = vpop.eup %9590 }
 0x899   : > { %v9593_v22 = vpop.eup %9592  ;;  %v8111_v18 = vsel %vm8110_vm7, %v9587_v39, %v8107_v48  ;;  %v8146_v27 = vmul.f32 %v9591_v33, %v7760_v61  ;;  %v7763_v43 = vpop.xlane.xlu1 %7762  ;;  %vm8151_vm5 = vweird.f32 %v9591_v33 }
 0x89a   : > { %v8116_v7 = vsel %vm8113_vm2, %v8115_v53, %v8111_v18  ;;  %v8118_v1 = vmul.f32 %v9593_v22, %v7754_v34  ;;  %9596 = vrcp.f32 %v7763_v43  ;;  %v13303_v8 = vpop.xlane.xlu2 %7747  ;;  %vm8123_vm9 = vweird.f32 %v9593_v22  ;;  %vm8152_vm11 = vmor %vm8150_vm10, %vm8151_vm5 }
 0x89b   : > { %v8404_v55 = vmul.f32 %v13145_v59, %v8116_v7  ;;  %v8147_v9 = vsub.f32 1.0, %v8146_v27  ;;  %9598 = vrcp.f32 %v13303_v8  ;;  %vm8124_vm14 = vmor %vm8122_vm12, %vm8123_vm9  ;;  %v8170_v20 = vand.u32 2147483648, %v7763_v43 }
 0x89c   : > { %v8119_v26 = vsub.f32 1.0, %v8118_v1  ;;  %v8168_v24 = vand.u32 2147483647, %v7763_v43  ;;  %vm8164_vm6 = vweird.f32 %v7763_v43  ;;  %v8100_v31 = vand.u32 2147483648, %v13303_v8 }
 0x89d   : > { %8445 = vst.msk [vmem:[%s13066_s16 + $0xa8] sm:$0xff] %vm337_vm8, %v8404_v55  ;;  %v8148_v63 = vmul.f32 %v9591_v33, %v8147_v9  ;;  %v13309_v42 = vpop.eup %9594  ;;  %v8098_v56 = vand.u32 2147483647, %v13303_v8  ;;  %vm8094_vm2 = vweird.f32 %v13303_v8 }
 0x89e   : > { %v8120_v19 = vmul.f32 %v9593_v22, %v8119_v26  ;;  %v7806_v59 = vsel %vm384_vm4, %v13309_v42, 0.0  ;;  %vm8169_vm7 = vcmp.eq.f32.partialorder %v8168_v24, 8.507059e+37  ;;  %v8101_v18 = vor.u32 1.1754944e-38, %v8100_v31 }
 0x89f   : > { %v8149_v14 = vadd.f32 %v9591_v33, %v8148_v63  ;;  %7807 = vadd.xlane.f32.xlu1 %v7806_v59  ;;  %vm8099_vm9 = vcmp.eq.f32.partialorder %v8098_v56, 8.507059e+37 }
 0x8a0   : > { %v9597_v44 = vpop.eup %9596  ;;  %v8121_v3 = vadd.f32 %v9593_v22, %v8120_v19 }
 0x8a1   : > { %v8153_v16 = vsel %vm8152_vm11, %v9591_v33, %v8149_v14  ;;  %v8160_v15 = vmul.f32 %v9597_v44, %v7763_v43  ;;  %v9599_v46 = vpop.eup %9598  ;;  %vm8165_vm0 = vweird.f32 %v9597_v44 }
 0x8a2   : > { %v8158_v28 = vsel %vm8155_vm13, %v8157_v23, %v8153_v16  ;;  %v8125_v4 = vsel %vm8124_vm14, %v9593_v22, %v8121_v3  ;;  %v7757_v5 = vpop.xlane.xlu2 %7756  ;;  %v8090_v61 = vmul.f32 %v9599_v46, %v13303_v8  ;;  %vm8095_vm1 = vweird.f32 %v9599_v46  ;;  %vm8166_vm3 = vmor %vm8164_vm6, %vm8165_vm0 }
 0x8a3   : > { %v8407_v60 = vmul.f32 %v13170_v38, %v8158_v28  ;;  %v8130_v39 = vsel %vm8127_vm15, %v8129_v32, %v8125_v4  ;;  %v8161_v37 = vsub.f32 1.0, %v8160_v15  ;;  %9600 = vrcp.f32 %v7757_v5  ;;  %vm8096_vm5 = vmor %vm8094_vm2, %vm8095_vm1 }
 0x8a4   : > { %v8405_v34 = vmul.f32 %v13162_v57, %v8130_v39  ;;  %v8091_v45 = vsub.f32 1.0, %v8090_v61  ;;  %v8171_v57 = vor.u32 1.1754944e-38, %v8170_v20  ;;  %v8142_v51 = vand.u32 2147483648, %v7757_v5 }
 0x8a5   : > { %8448 = vst.msk [vmem:[%s13066_s16 + $0xc0] sm:$0xff] %vm337_vm8, %v8407_v60  ;;  %v8162_v2 = vmul.f32 %v9597_v44, %v8161_v37  ;;  %v8140_v63 = vand.u32 2147483647, %v7757_v5  ;;  %vm8136_vm11 = vweird.f32 %v7757_v5 }
 0x8a6   : > { %8446 = vst.msk [vmem:[%s13066_s16 + $0xb0] sm:$0xff] %vm337_vm8, %v8405_v34  ;;  %v8092_v47 = vmul.f32 %v9599_v46, %v8091_v45  ;;  %v8143_v14 = vor.u32 1.1754944e-38, %v8142_v51 }
 0x8a7   : > { %v8163_v38 = vadd.f32 %v9597_v44, %v8162_v2  ;;  %vm8141_vm13 = vcmp.eq.f32.partialorder %v8140_v63, 8.507059e+37 }
 0x8a8   : > { %v8093_v48 = vadd.f32 %v9599_v46, %v8092_v47 }
 0x8a9   : > { %v8167_v41 = vsel %vm8166_vm3, %v9597_v44, %v8163_v38  ;;  %v7769_v33 = vpop.xlane.xlu0 %7768  ;;  %v9601_v53 = vpop.eup %9600 }
 0x8aa   : > { %v8172_v22 = vsel %vm8169_vm7, %v8171_v57, %v8167_v41  ;;  %9602 = vrcp.f32 %v7769_v33  ;;  %v7766_v27 = vpop.xlane.xlu2 %7765  ;;  %v8097_v7 = vsel %vm8096_vm5, %v9599_v46, %v8093_v48  ;;  %v8132_v1 = vmul.f32 %v9601_v53, %v7757_v5 }
 0x8ab   : > { %v8408_v43 = vmul.f32 %v13187_v10, %v8172_v22  ;;  %v8102_v55 = vsel %vm8099_vm9, %v8101_v18, %v8097_v7  ;;  %9604 = vrcp.f32 %v7766_v27  ;;  %vm8137_vm10 = vweird.f32 %v9601_v53 }
 0x8ac   : > { %v8403_v9 = vmul.f32 %v13184_v25, %v8102_v55  ;;  %v8133_v8 = vsub.f32 1.0, %v8132_v1  ;;  %vm8138_vm12 = vmor %vm8136_vm11, %vm8137_vm10  ;;  %v8196_v3 = vand.u32 2147483647, %v7769_v33  ;;  %v8198_v16 = vand.u32 2147483648, %v7769_v33 }
 0x8ad   : > { %8449 = vst.msk [vmem:[%s13066_s16 + $0xc8] sm:$0xff] %vm337_vm8, %v8408_v43  ;;  %vm8192_vm15 = vweird.f32 %v7769_v33  ;;  %v8184_v28 = vand.u32 2147483648, %v7766_v27  ;;  %v8182_v60 = vand.u32 2147483647, %v7766_v27  ;;  %vm8178_vm3 = vweird.f32 %v7766_v27 }
 0x8ae   : > { %8444 = vst.msk [vmem:[%s13066_s16 + $0xa0] sm:$0xff] %vm337_vm8, %v8403_v9  ;;  %v8134_v26 = vmul.f32 %v9601_v53, %v8133_v8  ;;  %vm8197_vm1 = vcmp.eq.f32.partialorder %v8196_v3, 8.507059e+37  ;;  %v8199_v37 = vor.u32 1.1754944e-38, %v8198_v16 }
 0x8af   : > { %v8185_v24 = vor.u32 1.1754944e-38, %v8184_v28  ;;  %vm8183_vm2 = vcmp.eq.f32.partialorder %v8182_v60, 8.507059e+37 }
 0x8b0   : > { %v9603_v30 = vpop.eup %9602  ;;  %v8135_v54 = vadd.f32 %v9601_v53, %v8134_v26 }
 0x8b1   : > { %v8188_v10 = vmul.f32 %v9603_v30, %v7769_v33  ;;  %v7772_v19 = vpop.xlane.xlu1 %7771  ;;  %v9605_v21 = vpop.eup %9604  ;;  %vm8193_vm14 = vweird.f32 %v9603_v30 }
 0x8b2   : > { %9606 = vrcp.f32 %v7772_v19  ;;  %v8139_v59 = vsel %vm8138_vm12, %v9601_v53, %v8135_v54  ;;  %v8174_v44 = vmul.f32 %v9605_v21, %v7766_v27  ;;  %vm8179_vm0 = vweird.f32 %v9605_v21  ;;  %vm8194_vm6 = vmor %vm8192_vm15, %vm8193_vm14 }
 0x8b3   : > { %v8189_v25 = vsub.f32 1.0, %v8188_v10  ;;  %v8144_v23 = vsel %vm8141_vm13, %v8143_v14, %v8139_v59  ;;  %vm8180_vm7 = vmor %vm8178_vm3, %vm8179_vm0  ;;  %v8212_v56 = vand.u32 2147483648, %v7772_v19  ;;  %v8210_v48 = vand.u32 2147483647, %v7772_v19 }
 0x8b4   : > { %v8406_v32 = vmul.f32 %v13198_v13, %v8144_v23  ;;  %v8175_v46 = vsub.f32 1.0, %v8174_v44  ;;  %vm8206_vm9 = vweird.f32 %v7772_v19 }
 0x8b5   : > { %v8190_v15 = vmul.f32 %v9603_v30, %v8189_v25  ;;  %vm8211_vm11 = vcmp.eq.f32.partialorder %v8210_v48, 8.507059e+37 }
 0x8b6   : > { %8447 = vst.msk [vmem:[%s13066_s16 + $0xb8] sm:$0xff] %vm337_vm8, %v8406_v32  ;;  %v8176_v5 = vmul.f32 %v9605_v21, %v8175_v46 }
 0x8b7   : > { %v8191_v4 = vadd.f32 %v9603_v30, %v8190_v15 }
 0x8b8   : > { %v9607_v39 = vpop.eup %9606  ;;  %v8177_v34 = vadd.f32 %v9605_v21, %v8176_v5 }
 0x8b9   : > { %v8195_v61 = vsel %vm8194_vm6, %v9603_v30, %v8191_v4  ;;  %v8202_v13 = vmul.f32 %v9607_v39, %v7772_v19  ;;  %v7775_v20 = vpop.xlane.xlu2 %7774  ;;  %vm8207_vm5 = vweird.f32 %v9607_v39 }
 0x8ba   : > { %v8200_v2 = vsel %vm8197_vm1, %v8199_v37, %v8195_v61  ;;  %9608 = vrcp.f32 %v7775_v20  ;;  %v8181_v31 = vsel %vm8180_vm7, %v9605_v21, %v8177_v34  ;;  %vm8208_vm10 = vmor %vm8206_vm9, %vm8207_vm5  ;;  %v8226_v1 = vand.u32 2147483648, %v7775_v20 }
 0x8bb   : > { %v8410_v45 = vmul.f32 %v13208_v6, %v8200_v2  ;;  %v8203_v38 = vsub.f32 1.0, %v8202_v13  ;;  %v8186_v47 = vsel %vm8183_vm2, %v8185_v24, %v8181_v31  ;;  %v8213_v6 = vor.u32 1.1754944e-38, %v8212_v56 }
 0x8bc   : > { %v8409_v57 = vmul.f32 %v13206_v36, %v8186_v47  ;;  %v8224_v9 = vand.u32 2147483647, %v7775_v20  ;;  %vm8220_vm13 = vweird.f32 %v7775_v20  ;;  %v8227_v26 = vor.u32 1.1754944e-38, %v8226_v1 }
 0x8bd   : > { %8451 = vst.msk [vmem:[%s13066_s16 + $0xd8] sm:$0xff] %vm337_vm8, %v8410_v45  ;;  %v8204_v41 = vmul.f32 %v9607_v39, %v8203_v38 }
 0x8be   : > { %8450 = vst.msk [vmem:[%s13066_s16 + $0xd0] sm:$0xff] %vm337_vm8, %v8409_v57  ;;  %vm8225_vm15 = vcmp.eq.f32.partialorder %v8224_v9, 8.507059e+37 }
 0x8bf   : > { %v8205_v33 = vadd.f32 %v9607_v39, %v8204_v41 }
 0x8c0   : > { %v9609_v53 = vpop.eup %9608 }
 0x8c1   : > { %v8209_v22 = vsel %vm8208_vm10, %v9607_v39, %v8205_v33  ;;  %v8216_v18 = vmul.f32 %v9609_v53, %v7775_v20  ;;  %v7778_v27 = vpop.xlane.xlu0 %7777  ;;  %vm8221_vm12 = vweird.f32 %v9609_v53 }
 0x8c2   : > { %v8214_v43 = vsel %vm8211_vm11, %v8213_v6, %v8209_v22  ;;  %9610 = vrcp.f32 %v7778_v27  ;;  %vm8222_vm14 = vmor %vm8220_vm13, %vm8221_vm12  ;;  %v8240_v21 = vand.u32 2147483648, %v7778_v27  ;;  %v8238_v59 = vand.u32 2147483647, %v7778_v27 }
 0x8c3   : > { %v8411_v7 = vmul.f32 %v13218_v29, %v8214_v43  ;;  %v8217_v36 = vsub.f32 1.0, %v8216_v18  ;;  %vm8234_vm6 = vweird.f32 %v7778_v27 }
 0x8c4   : > { %v8241_v23 = vor.u32 1.1754944e-38, %v8240_v21  ;;  %vm8239_vm3 = vcmp.eq.f32.partialorder %v8238_v59, 8.507059e+37 }
 0x8c5   : > { %8452 = vst.msk [vmem:[%s13066_s16 + $0xe0] sm:$0xff] %vm337_vm8, %v8411_v7  ;;  %v8218_v55 = vmul.f32 %v9609_v53, %v8217_v36 }
 0x8c7   : > { %v8219_v8 = vadd.f32 %v9609_v53, %v8218_v55 }
 0x8c8   : > { %v9611_v51 = vpop.eup %9610 }
 0x8c9   : > { %v8223_v63 = vsel %vm8222_vm14, %v9609_v53, %v8219_v8  ;;  %v8230_v30 = vmul.f32 %v9611_v51, %v7778_v27  ;;  %v7781_v54 = vpop.xlane.xlu1 %7780  ;;  %vm8235_vm0 = vweird.f32 %v9611_v51 }
 0x8ca   : > { %v8228_v10 = vsel %vm8225_vm15, %v8227_v26, %v8223_v63  ;;  %9612 = vrcp.f32 %v7781_v54  ;;  %vm8236_vm1 = vmor %vm8234_vm6, %vm8235_vm0  ;;  %v8254_v28 = vand.u32 2147483648, %v7781_v54  ;;  %v8252_v5 = vand.u32 2147483647, %v7781_v54 }
 0x8cb   : > { %v8412_v29 = vmul.f32 %v13226_v58, %v8228_v10  ;;  %v8231_v19 = vsub.f32 1.0, %v8230_v30  ;;  %vm8248_vm2 = vweird.f32 %v7781_v54 }
 0x8cc   : > { %v8255_v37 = vor.u32 1.1754944e-38, %v8254_v28  ;;  %vm8253_vm9 = vcmp.eq.f32.partialorder %v8252_v5, 8.507059e+37 }
 0x8cd   : > { %8453 = vst.msk [vmem:[%s13066_s16 + $0xe8] sm:$0xff] %vm337_vm8, %v8412_v29  ;;  %v8232_v14 = vmul.f32 %v9611_v51, %v8231_v19 }
 0x8cf   : > { %v8233_v25 = vadd.f32 %v9611_v51, %v8232_v14 }
 0x8d0   : > { %v9613_v44 = vpop.eup %9612 }
 0x8d1   : > { %v7784_v3 = vpop.xlane.xlu2 %7783  ;;  %v8237_v16 = vsel %vm8236_vm1, %v9611_v51, %v8233_v25  ;;  %v8244_v32 = vmul.f32 %v9613_v44, %v7781_v54  ;;  %vm8249_vm7 = vweird.f32 %v9613_v44 }
 0x8d2   : > { %9614 = vrcp.f32 %v7784_v3  ;;  %v8242_v15 = vsel %vm8239_vm3, %v8241_v23, %v8237_v16  ;;  %vm8250_vm5 = vmor %vm8248_vm2, %vm8249_vm7  ;;  %v8268_v24 = vand.u32 2147483648, %v7784_v3  ;;  %v8266_v31 = vand.u32 2147483647, %v7784_v3 }
 0x8d3   : > { %v8413_v58 = vmul.f32 %v13234_v40, %v8242_v15  ;;  %v8245_v46 = vsub.f32 1.0, %v8244_v32  ;;  %vm8262_vm11 = vweird.f32 %v7784_v3 }
 0x8d4   : > { %v8269_v47 = vor.u32 1.1754944e-38, %v8268_v24  ;;  %vm8267_vm13 = vcmp.eq.f32.partialorder %v8266_v31, 8.507059e+37 }
 0x8d5   : > { %8454 = vst.msk [vmem:[%s13066_s16 + $0xf0] sm:$0xff] %vm337_vm8, %v8413_v58  ;;  %v8246_v4 = vmul.f32 %v9613_v44, %v8245_v46 }
 0x8d7   : > { %v8247_v39 = vadd.f32 %v9613_v44, %v8246_v4 }
 0x8d8   : > { %v9615_v60 = vpop.eup %9614 }
 0x8d9   : > { %v8258_v61 = vmul.f32 %v9615_v60, %v7784_v3  ;;  %v8251_v34 = vsel %vm8250_vm5, %v9613_v44, %v8247_v39  ;;  %v7787_v2 = vpop.xlane.xlu0 %7786  ;;  %vm8263_vm10 = vweird.f32 %v9615_v60 }
 0x8da   : > { %v8256_v13 = vsel %vm8253_vm9, %v8255_v37, %v8251_v34  ;;  %9616 = vrcp.f32 %v7787_v2  ;;  %vm8264_vm12 = vmor %vm8262_vm11, %vm8263_vm10  ;;  %v8282_v6 = vand.u32 2147483648, %v7787_v2  ;;  %v8280_v18 = vand.u32 2147483647, %v7787_v2 }
 0x8db   : > { %v8259_v20 = vsub.f32 1.0, %v8258_v61  ;;  %v8414_v40 = vmul.f32 %v13242_v0, %v8256_v13  ;;  %vm8276_vm15 = vweird.f32 %v7787_v2 }
 0x8dc   : > { %v8283_v7 = vor.u32 1.1754944e-38, %v8282_v6  ;;  %vm8281_vm6 = vcmp.eq.f32.partialorder %v8280_v18, 8.507059e+37 }
 0x8dd   : > { %v8260_v45 = vmul.f32 %v9615_v60, %v8259_v20  ;;  %8455 = vst.msk [vmem:[%s13066_s16 + $0xf8] sm:$0xff] %vm337_vm8, %v8414_v40 }
 0x8df   : > { %v8261_v38 = vadd.f32 %v9615_v60, %v8260_v45 }
 0x8e0   : > { %v9617_v57 = vpop.eup %9616 }
 0x8e1   : > { %v8265_v56 = vsel %vm8264_vm12, %v9615_v60, %v8261_v38  ;;  %v8272_v33 = vmul.f32 %v9617_v57, %v7787_v2  ;;  %v7790_v0 = vpop.xlane.xlu1 %7789  ;;  %vm8277_vm14 = vweird.f32 %v9617_v57 }
 0x8e2   : > { %v8270_v41 = vsel %vm8267_vm13, %v8269_v47, %v8265_v56  ;;  %9618 = vrcp.f32 %v7790_v0  ;;  %vm8278_vm0 = vmor %vm8276_vm15, %vm8277_vm14  ;;  %v8296_v51 = vand.u32 2147483648, %v7790_v0  ;;  %v8294_v63 = vand.u32 2147483647, %v7790_v0 }
 0x8e3   : > { %v8415_v48 = vmul.f32 %v13249_v11, %v8270_v41  ;;  %v8273_v53 = vsub.f32 1.0, %v8272_v33  ;;  %vm8290_vm3 = vweird.f32 %v7790_v0 }
 0x8e4   : > { %v8297_v10 = vor.u32 1.1754944e-38, %v8296_v51  ;;  %vm8295_vm2 = vcmp.eq.f32.partialorder %v8294_v63, 8.507059e+37 }
 0x8e5   : > { %8456 = vst.msk [vmem:[%s13066_s16 + $0x100] sm:$0xff] %vm337_vm8, %v8415_v48  ;;  %v8274_v22 = vmul.f32 %v9617_v57, %v8273_v53 }
 0x8e7   : > { %v8275_v27 = vadd.f32 %v9617_v57, %v8274_v22 }
 0x8e8   : > { %v9619_v43 = vpop.eup %9618 }
 0x8e9   : > { %v8279_v36 = vsel %vm8278_vm0, %v9617_v57, %v8275_v27  ;;  %v8286_v1 = vmul.f32 %v9619_v43, %v7790_v0  ;;  %v7793_v11 = vpop.xlane.xlu2 %7792  ;;  %vm8291_vm1 = vweird.f32 %v9619_v43 }
 0x8ea   : > { %v8284_v55 = vsel %vm8281_vm6, %v8283_v7, %v8279_v36  ;;  %9620 = vrcp.f32 %v7793_v11  ;;  %vm8292_vm7 = vmor %vm8290_vm3, %vm8291_vm1  ;;  %v8310_v25 = vand.u32 2147483648, %v7793_v11  ;;  %v8308_v23 = vand.u32 2147483647, %v7793_v11 }
 0x8eb   : > { %v8416_v9 = vmul.f32 %v13258_v17, %v8284_v55  ;;  %v8287_v8 = vsub.f32 1.0, %v8286_v1  ;;  %vm8304_vm9 = vweird.f32 %v7793_v11 }
 0x8ec   : > { %v8311_v32 = vor.u32 1.1754944e-38, %v8310_v25  ;;  %vm8309_vm11 = vcmp.eq.f32.partialorder %v8308_v23, 8.507059e+37 }
 0x8ed   : > { %8457 = vst.msk [vmem:[%s13066_s16 + $0x108] sm:$0xff] %vm337_vm8, %v8416_v9  ;;  %v8288_v26 = vmul.f32 %v9619_v43, %v8287_v8 }
 0x8ef   : > { %v8289_v30 = vadd.f32 %v9619_v43, %v8288_v26 }
 0x8f0   : > { %v9621_v54 = vpop.eup %9620 }
 0x8f1   : > { %v7796_v29 = vpop.xlane.xlu0 %7795  ;;  %v8293_v19 = vsel %vm8292_vm7, %v9619_v43, %v8289_v30  ;;  %v8300_v21 = vmul.f32 %v9621_v54, %v7793_v11  ;;  %vm8305_vm5 = vweird.f32 %v9621_v54 }
 0x8f2   : > { %9622 = vrcp.f32 %v7796_v29  ;;  %v8298_v14 = vsel %vm8295_vm2, %v8297_v10, %v8293_v19  ;;  %vm8306_vm10 = vmor %vm8304_vm9, %vm8305_vm5  ;;  %v8324_v5 = vand.u32 2147483648, %v7796_v29  ;;  %v8322_v39 = vand.u32 2147483647, %v7796_v29 }
 0x8f3   : > { %v8417_v17 = vmul.f32 %v13266_v50, %v8298_v14  ;;  %v8301_v59 = vsub.f32 1.0, %v8300_v21  ;;  %vm8318_vm13 = vweird.f32 %v7796_v29 }
 0x8f4   : > { %v8325_v34 = vor.u32 1.1754944e-38, %v8324_v5  ;;  %vm8323_vm15 = vcmp.eq.f32.partialorder %v8322_v39, 8.507059e+37 }
 0x8f5   : > { %8458 = vst.msk [vmem:[%s13066_s16 + $0x110] sm:$0xff] %vm337_vm8, %v8417_v17  ;;  %v8302_v44 = vmul.f32 %v9621_v54, %v8301_v59 }
 0x8f7   : > { %v8303_v16 = vadd.f32 %v9621_v54, %v8302_v44 }
 0x8f8   : > { %v9623_v3 = vpop.eup %9622 }
 0x8f9   : > { %v8314_v15 = vmul.f32 %v9623_v3, %v7796_v29  ;;  %v7799_v58 = vpop.xlane.xlu1 %7798  ;;  %v8307_v46 = vsel %vm8306_vm10, %v9621_v54, %v8303_v16  ;;  %vm8319_vm12 = vweird.f32 %v9623_v3 }
 0x8fa   : > { %9624 = vrcp.f32 %v7799_v58  ;;  %v8312_v28 = vsel %vm8309_vm11, %v8311_v32, %v8307_v46  ;;  %vm8320_vm14 = vmor %vm8318_vm13, %vm8319_vm12  ;;  %v8338_v45 = vand.u32 2147483648, %v7799_v58  ;;  %v8336_v38 = vand.u32 2147483647, %v7799_v58 }
 0x8fb   : > { %v8315_v50 = vsub.f32 1.0, %v8314_v15  ;;  %v8418_v4 = vmul.f32 %v13274_v62, %v8312_v28  ;;  %vm8332_vm6 = vweird.f32 %v7799_v58 }
 0x8fc   : > { %v8339_v57 = vor.u32 1.1754944e-38, %v8338_v45  ;;  %vm8337_vm3 = vcmp.eq.f32.partialorder %v8336_v38, 8.507059e+37 }
 0x8fd   : > { %v8316_v60 = vmul.f32 %v9623_v3, %v8315_v50  ;;  %8459 = vst.msk [vmem:[%s13066_s16 + $0x118] sm:$0xff] %vm337_vm8, %v8418_v4 }
 0x8ff   : > { %v8317_v37 = vadd.f32 %v9623_v3, %v8316_v60 }
 0x900   : > { %v9625_v61 = vpop.eup %9624 }
 0x901   : > { %v8321_v13 = vsel %vm8320_vm14, %v9623_v3, %v8317_v37  ;;  %v8328_v20 = vmul.f32 %v9625_v61, %v7799_v58  ;;  %v7802_v2 = vpop.xlane.xlu2 %7801  ;;  %vm8333_vm0 = vweird.f32 %v9625_v61 }
 0x902   : > { %v8326_v40 = vsel %vm8323_vm15, %v8325_v34, %v8321_v13  ;;  %9626 = vrcp.f32 %v7802_v2  ;;  %vm8334_vm1 = vmor %vm8332_vm6, %vm8333_vm0  ;;  %v8352_v6 = vand.u32 2147483648, %v7802_v2  ;;  %v8350_v18 = vand.u32 2147483647, %v7802_v2 }
 0x903   : > { %v8419_v62 = vmul.f32 %v13282_v52, %v8326_v40  ;;  %v8329_v24 = vsub.f32 1.0, %v8328_v20  ;;  %vm8346_vm2 = vweird.f32 %v7802_v2 }
 0x904   : > { %v8353_v43 = vor.u32 1.1754944e-38, %v8352_v6  ;;  %vm8351_vm9 = vcmp.eq.f32.partialorder %v8350_v18, 8.507059e+37 }
 0x905   : > { %8460 = vst.msk [vmem:[%s13066_s16 + $0x120] sm:$0xff] %vm337_vm8, %v8419_v62  ;;  %v8330_v31 = vmul.f32 %v9625_v61, %v8329_v24 }
 0x907   : > { %v8331_v47 = vadd.f32 %v9625_v61, %v8330_v31 }
 0x908   : > { %v9627_v56 = vpop.eup %9626 }
 0x909   : > { %v8335_v41 = vsel %vm8334_vm1, %v9625_v61, %v8331_v47  ;;  %v8342_v48 = vmul.f32 %v9627_v56, %v7802_v2  ;;  %v7805_v0 = vpop.xlane.xlu0 %7804  ;;  %vm8347_vm7 = vweird.f32 %v9627_v56 }
 0x90a   : > { %v8340_v33 = vsel %vm8337_vm3, %v8339_v57, %v8335_v41  ;;  %9628 = vrcp.f32 %v7805_v0  ;;  %vm8348_vm5 = vmor %vm8346_vm2, %vm8347_vm7  ;;  %v8366_v8 = vand.u32 2147483648, %v7805_v0  ;;  %v8364_v26 = vand.u32 2147483647, %v7805_v0 }
 0x90b   : > { %v8420_v52 = vmul.f32 %v13289_v35, %v8340_v33  ;;  %v8343_v53 = vsub.f32 1.0, %v8342_v48  ;;  %vm8360_vm11 = vweird.f32 %v7805_v0 }
 0x90c   : > { %v8367_v30 = vor.u32 1.1754944e-38, %v8366_v8  ;;  %vm8365_vm13 = vcmp.eq.f32.partialorder %v8364_v26, 8.507059e+37 }
 0x90d   : > { %8461 = vst.msk [vmem:[%s13066_s16 + $0x128] sm:$0xff] %vm337_vm8, %v8420_v52  ;;  %v8344_v22 = vmul.f32 %v9627_v56, %v8343_v53 }
 0x90f   : > { %v8345_v27 = vadd.f32 %v9627_v56, %v8344_v22 }
 0x910   : > { %v9629_v7 = vpop.eup %9628 }
 0x911   : > { %v8349_v36 = vsel %vm8348_vm5, %v9627_v56, %v8345_v27  ;;  %v8356_v11 = vmul.f32 %v9629_v7, %v7805_v0  ;;  %vm8361_vm10 = vweird.f32 %v9629_v7 }
 0x912   : > { %v8354_v1 = vsel %vm8351_vm9, %v8353_v43, %v8349_v36  ;;  %v7808_v55 = vpop.xlane.xlu1 %7807  ;;  %vm8362_vm12 = vmor %vm8360_vm11, %vm8361_vm10 }
 0x913   : > { %v8421_v35 = vmul.f32 %v13294_v49, %v8354_v1  ;;  %v8357_v9 = vsub.f32 1.0, %v8356_v11  ;;  %9630 = vrcp.f32 %v7808_v55  ;;  %v8380_v14 = vand.u32 2147483648, %v7808_v55 }
 0x914   : > { %v8378_v59 = vand.u32 2147483647, %v7808_v55  ;;  %vm8374_vm15 = vweird.f32 %v7808_v55 }
 0x915   : > { %8462 = vst.msk [vmem:[%s13066_s16 + $0x130] sm:$0xff] %vm337_vm8, %v8421_v35  ;;  %v8358_v51 = vmul.f32 %v9629_v7, %v8357_v9  ;;  %v8381_v44 = vor.u32 1.1754944e-38, %v8380_v14 }
 0x916   : > { %vm8379_vm6 = vcmp.eq.f32.partialorder %v8378_v59, 8.507059e+37 }
 0x917   : > { %v8359_v63 = vadd.f32 %v9629_v7, %v8358_v51 }
 0x919   : > { %v9631_v54 = vpop.eup %9630  ;;  %v8363_v10 = vsel %vm8362_vm12, %v9629_v7, %v8359_v63 }
 0x91a   : > { %v8368_v29 = vsel %vm8365_vm13, %v8367_v30, %v8363_v10  ;;  %v8370_v19 = vmul.f32 %v9631_v54, %v7808_v55  ;;  %vm8375_vm14 = vweird.f32 %v9631_v54 }
 0x91b   : > { %v8422_v49 = vmul.f32 %v13299_v12, %v8368_v29  ;;  %vm8376_vm0 = vmor %vm8374_vm15, %vm8375_vm14 }
 0x91c   : > { %v8371_v21 = vsub.f32 1.0, %v8370_v19 }
 0x91d   : > { %8463 = vst.msk [vmem:[%s13066_s16 + $0x138] sm:$0xff] %vm337_vm8, %v8422_v49 }
 0x91e   : > { %v8372_v17 = vmul.f32 %v9631_v54, %v8371_v21 }
 0x920   : > { %v8373_v25 = vadd.f32 %v9631_v54, %v8372_v17 }
 0x922   : > { %v8377_v23 = vsel %vm8376_vm0, %v9631_v54, %v8373_v25 }
 0x923   : > { %v8382_v3 = vsel %vm8379_vm6, %v8381_v44, %v8377_v23 }
 0x924   : > { %v8423_v16 = vmul.f32 %v13309_v42, %v8382_v3 }
 0x926   : > { %8464 = vst.msk [vmem:[%s13066_s16 + $0x140] sm:$0xf] %vm384_vm4, %v8423_v16 }
 0x927 PF: > { %s18_s24 = sadd.s32 1, %s9685_s24  }
 0x928   : > { %p15_p7 = scmp.ge.s32.totalorder %s18_s24, 4  }
 0x92a   :  { %17 = sbr.rel (!%p15_p7) target bundleno = 1 (0x1), region = 104 }
 0x92f   :  { %8486 = vsyncpa [#allocation5], 1 }
 0x930   :  { %8488 = vsyncpa [#allocation5 + $0x1], 1 }

</bundles_post_ra>
